<compile_context>
chip_gen: v5e
topology: v5e:2x2
jax: 0.10.0
libtpu: 0.0.40
codegen_flags: <defaults>
</compile_context>

<pallas_src>
import jax
import jax.numpy as jnp
from jax.experimental import pallas as pl
from jax.experimental.pallas import tpu as pltpu

_KS = (8, 5, 3)                      # conv kernel sizes inside each residual block
_KMAX = max(_KS)
_PAD_L = (_KMAX - 1) // 2            # PyTorch 'same' left pad for K=8  -> 3
_SC_TAP = (_KS[0] - 1) // 2          # zero-shift tap that carries the fused shortcut
_LANE = 128


def _round_up(n, m):
    return ((n + m - 1) // m) * m


# ---------------------------------------------------------------------------
# Fused whole-network kernel (one batch *tile* per grid step)
# ---------------------------------------------------------------------------
def _fused_resnet_kernel(x_ref, w8_ref, b8_ref, w5_ref, b5_ref, w3_ref, b3_ref,
                         fcw_ref, fcb_ref, o_ref, halo_ref):
    """3 residual blocks + GAP + Linear head for one batch tile.

    x_ref:    (Bt, L, Cp)       bf16  input tile (channels zero-padded to Cp lanes)
    w8_ref:   (3, 8, Cp, 2*Cp)  bf16  conv-8 taps (BN folded); cols [Cp:2Cp] of the
                                      zero-shift tap hold the fused shortcut weight
    b8_ref:   (3, 1, 2*Cp)      f32   [conv-8 BN bias | shortcut BN bias]
    w5_ref:   (3, 5, Cp, Cp)    bf16  conv-5 taps (BN folded)
    b5_ref:   (3, 1, Cp)        f32
    w3_ref:   (3, 3, Cp, Cp)    bf16  conv-3 taps (BN folded)
    b3_ref:   (3, 1, Cp)        f32
    fcw_ref:  (Cp, NCp)         bf16  classifier weight (lane-dense padded classes)
    fcb_ref:  (1, NCp)          f32   classifier bias
    o_ref:    (Bt, NCp)         f32   logits (padded)
    halo_ref: (Bt, Lbuf, Cp)    bf16  VMEM halo buffer for 'same' padding
    """
    Bt, L, Cp = x_ref.shape
    M = Bt * L
    Lbuf = halo_ref.shape[1]

    # Zero the fixed halo pad rows ONCE per grid step.  Every conv's interior
    # write stays inside [_PAD_L, _PAD_L + L), so pad rows never hold stale data.
    halo_ref[:, 0:_PAD_L, :] = jnp.zeros((Bt, _PAD_L, Cp), halo_ref.dtype)
    halo_ref[:, _PAD_L + L:, :] = jnp.zeros((Bt, Lbuf - _PAD_L - L, Cp),
                                            halo_ref.dtype)

    def conv_taps(h3, w_ref, blk, K):
        """'same' conv as K per-tap accumulated MXU matmuls.

        h3: (Bt, L, Cp) activation (any float dtype; cast once into the bf16 halo).
        w_ref[blk, k]: (Cp, cout) bf16.  Returns (Bt*L, cout) f32.
        """
        halo_ref[:, _PAD_L:_PAD_L + L, :] = h3.astype(halo_ref.dtype)
        off = _PAD_L - (K - 1) // 2          # shift window per-K (left pad (K-1)//2)
        cout = w_ref.shape[-1]
        acc = jnp.zeros((M, cout), jnp.float32)
        for k in range(K):
            win = halo_ref[:, off + k:off + k + L, :].reshape(M, Cp)
            acc = acc + jnp.dot(win, w_ref[blk, k],
                                preferred_element_type=jnp.float32)
        return acc

    h3 = x_ref[...]                                          # (Bt, L, Cp) bf16
    for blk in range(3):
        # conv(k=8)+BN with the shortcut fused into the extra Cp output columns of
        # the zero-shift tap: one 2*Cp-wide matmul set yields both branches.
        y = conv_taps(h3, w8_ref, blk, 8) + b8_ref[blk]      # (M, 2Cp) f32
        sc = y[:, Cp:]                                       # shortcut branch
        a = jnp.maximum(y[:, :Cp], 0.0)                      # conv8+BN+ReLU
        a = jnp.maximum(
            conv_taps(a.reshape(Bt, L, Cp), w5_ref, blk, 5) + b5_ref[blk], 0.0)
        h = conv_taps(a.reshape(Bt, L, Cp), w3_ref, blk, 3) + b3_ref[blk]
        h3 = jnp.maximum(h + sc, 0.0).reshape(Bt, L, Cp)     # residual add + ReLU

    # fused global-average-pool + classifier head (single (Bt, Cp)@(Cp, NCp) dot)
    feat = jnp.mean(h3, axis=1)                              # (Bt, Cp) f32
    o_ref[...] = (jnp.dot(feat.astype(fcw_ref.dtype), fcw_ref[...],
                          preferred_element_type=jnp.float32) + fcb_ref[...])


# ---------------------------------------------------------------------------
# Wrapper
# ---------------------------------------------------------------------------
def prototype_resnet_forward(x_ncl, params):
    """x_ncl: (B, n_var, L) float32 (PyTorch NCL layout). Returns (B, num_classes)."""
    meta = params["meta"]
    Cp, NCp, ncls = meta["Cp"], meta["NCp"], meta["num_classes"]
    B, n_var, L = x_ncl.shape

    # One-time layout prep on the *network input* only: NCL -> NLC, zero-pad the
    # channel axis to the lane width, cast the MXU operand to bf16.
    x = jnp.transpose(x_ncl.astype(jnp.float32), (0, 2, 1))
    x = jnp.pad(x, ((0, 0), (0, 0), (0, Cp - n_var))).astype(jnp.bfloat16)

    # Batch tile: fold Bt elements into the matmul M dimension (target M ~ 256),
    # capped so the live (M, 2*Cp) f32 intermediates stay small (v7x 64 MiB VMEM).
    Bt = max(1, min(B, pl.cdiv(256, L)))
    while Bt > 1 and Bt * L > 1024:
        Bt -= 1
    B_pad = _round_up(B, Bt)
    if B_pad != B:
        x = jnp.pad(x, ((0, B_pad - B), (0, 0), (0, 0)))

    lbuf = _round_up(L + _KMAX - 1, 8)

    weight_names = ("w8", "b8", "w5", "b5", "w3", "b3", "fc_w", "fc_b")
    weights = [params[k] for k in weight_names]

    def _const_spec(arr):
        # Full-array block, constant index_map -> fetched once, resident in VMEM.
        nd = arr.ndim
        return pl.BlockSpec(arr.shape, lambda b: (0,) * nd)

    # VMEM budget from actual residency: (double-buffered) weights + I/O blocks,
    # bf16 halo, and a few live (M, 2*Cp) f32 intermediates; capped for v7x.
    wbytes = sum(int(w.size) * w.dtype.itemsize for w in weights)
    resident = (2 * wbytes + 2 * Bt * L * Cp * 2 + 2 * Bt * NCp * 4
                + Bt * lbuf * Cp * 2 + 8 * Bt * L * 2 * Cp * 4)
    vmem_limit = int(min(max(2 * resident, 8 * 2 ** 20), 40 * 2 ** 20))

    out = pl.pallas_call(
        _fused_resnet_kernel,
        out_shape=jax.ShapeDtypeStruct((B_pad, NCp), jnp.float32),
        grid=(B_pad // Bt,),
        in_specs=[pl.BlockSpec((Bt, L, Cp), lambda b: (b, 0, 0))]
                 + [_const_spec(w) for w in weights],
        out_specs=pl.BlockSpec((Bt, NCp), lambda b: (b, 0)),
        scratch_shapes=[pltpu.VMEM((Bt, lbuf, Cp), jnp.bfloat16)],
        compiler_params=pltpu.CompilerParams(
            dimension_semantics=("parallel",),       # batch tiles across TCs (v7x)
            vmem_limit_bytes=vmem_limit),
    )(x, *weights)
    return out[:B, :ncls]


# ---------------------------------------------------------------------------
# Parameter construction (deterministic, eval-mode BN folded into the weights)
# ---------------------------------------------------------------------------
def _fold_bn(gamma, beta, mean, var, eps=1e-5):
    scale = gamma / jnp.sqrt(var + eps)
    return scale, beta - mean * scale


def _conv_w(key, K, cin, cout):
    return jax.random.normal(key, (K, cin, cout), jnp.float32) / jnp.sqrt(
        jnp.asarray(K * cin, jnp.float32))


def _bn_p(key, c):
    k1, k2, k3, k4 = jax.random.split(key, 4)
    gamma = 1.0 + 0.1 * jax.random.normal(k1, (c,), jnp.float32)
    beta = 0.1 * jax.random.normal(k2, (c,), jnp.float32)
    mean = 0.1 * jax.random.normal(k3, (c,), jnp.float32)
    var = jnp.abs(1.0 + 0.1 * jax.random.normal(k4, (c,), jnp.float32))
    return _fold_bn(gamma, beta, mean, var)


def _raw_block(key, cin, cout):
    ks = jax.random.split(key, 8)
    p = {
        "w1": _conv_w(ks[0], 8, cin, cout), "bn1": _bn_p(ks[1], cout),
        "w2": _conv_w(ks[2], 5, cout, cout), "bn2": _bn_p(ks[3], cout),
        "w3": _conv_w(ks[4], 3, cout, cout), "bn3": _bn_p(ks[5], cout),
        "bn_sc": _bn_p(ks[7], cout),
    }
    if cin != cout:
        p["w_sc"] = _conv_w(ks[6], 1, cin, cout)
    return p


def _pack_tap_w(w_kio, scale, Cp):
    """(K, cin, cout) conv weight * BN scale -> lane-padded per-tap (K, Cp, Cp)."""
    w = w_kio * scale[None, None, :]
    K, cin, cout = w.shape
    return jnp.pad(w, ((0, 0), (0, Cp - cin), (0, Cp - cout)))


def _pad_bias(b, Cp):
    return jnp.pad(b, (0, Cp - b.shape[0]))


def _pack_block(p, Cp):
    s1, b1 = p["bn1"]
    s2, b2 = p["bn2"]
    s3, b3 = p["bn3"]
    ssc, bsc = p["bn_sc"]

    # conv-8 weight with BN scale folded in, per tap
    w8 = _pack_tap_w(p["w1"], s1, Cp)                     # (8, Cp, Cp)
    # shortcut: 1x1 conv * BN scale, or plain BN as a diagonal matrix
    if "w_sc" in p:
        wsc = p["w_sc"][0] * ssc[None, :]
    else:
        wsc = jnp.diag(ssc)
    wsc = jnp.pad(wsc, ((0, Cp - wsc.shape[0]), (0, Cp - wsc.shape[1])))
    # fuse the shortcut into the extra Cp output columns of the zero-shift tap
    sc_taps = jnp.zeros((_KS[0], Cp, Cp), jnp.float32).at[_SC_TAP].set(wsc)
    w8f = jnp.concatenate([w8, sc_taps], axis=-1)          # (8, Cp, 2*Cp)
    b8f = jnp.concatenate([_pad_bias(b1, Cp), _pad_bias(bsc, Cp)])   # (2*Cp,)

    return {
        "w8": w8f, "b8": b8f,
        "w5": _pack_tap_w(p["w2"], s2, Cp), "b5": _pad_bias(b2, Cp),
        "w3": _pack_tap_w(p["w3"], s3, Cp), "b3": _pad_bias(b3, Cp),
    }


def init_params(key, n_var, num_prototypes, num_classes):
    """Deterministic eval-mode parameters, pre-folded/packed for the fused kernel."""
    nf = num_prototypes
    k1, k2, k3, k4, k5 = jax.random.split(key, 5)
    raw = [_raw_block(k1, n_var, nf),
           _raw_block(k2, nf, 2 * nf),
           _raw_block(k3, 2 * nf, 2 * nf)]
    fc_w = jax.random.normal(k4, (2 * nf, num_classes), jnp.float32) / jnp.sqrt(
        jnp.asarray(2 * nf, jnp.float32))
    fc_b = 0.1 * jax.random.normal(k5, (num_classes,), jnp.float32)

    Cp = _round_up(max(n_var, 2 * nf), _LANE)      # single lane-dense channel width
    NCp = _round_up(num_classes, _LANE)            # lane-dense logits

    packed = [_pack_block(p, Cp) for p in raw]

    def stack_w(name):
        return jnp.stack([b[name] for b in packed]).astype(jnp.bfloat16)

    def stack_b(name):
        return jnp.stack([b[name] for b in packed])[:, None, :].astype(jnp.float32)

    return {
        "w8": stack_w("w8"), "b8": stack_b("b8"),
        "w5": stack_w("w5"), "b5": stack_b("b5"),
        "w3": stack_w("w3"), "b3": stack_b("b3"),
        "fc_w": jnp.pad(fc_w, ((0, Cp - 2 * nf), (0, NCp - num_classes))
                        ).astype(jnp.bfloat16),
        "fc_b": jnp.pad(fc_b, (0, NCp - num_classes))[None, :].astype(jnp.float32),
        "meta": {"Cp": Cp, "NCp": NCp, "num_classes": num_classes},
    }


# ---------------------------------------------------------------------------
if __name__ == "__main__":
    num_prototypes, n_var, num_classes = 8, 4, 3
    batch, length = 2, 16

    key = jax.random.PRNGKey(0)
    kx, kp = jax.random.split(key)
    x = jax.random.normal(kx, (batch, n_var, length), jnp.float32)
    params = init_params(kp, n_var, num_prototypes, num_classes)

    logits = prototype_resnet_forward(x, params)
    jax.block_until_ready(logits)
    assert logits.shape == (batch, num_classes)
    assert bool(jnp.all(jnp.isfinite(logits)))
    print("KERNEL_OK")
</pallas_src>

<mosaic_0001>
module attributes {stable_mosaic.version = 11 : i64} {
  func.func @_fused_resnet_kernel(%arg0: i32, %arg1: memref<2x16x128xbf16, #tpu.memory_space<vmem>>, %arg2: memref<3x8x128x256xbf16, #tpu.memory_space<vmem>>, %arg3: memref<3x1x256xf32, #tpu.memory_space<vmem>>, %arg4: memref<3x5x128x128xbf16, #tpu.memory_space<vmem>>, %arg5: memref<3x1x128xf32, #tpu.memory_space<vmem>>, %arg6: memref<3x3x128x128xbf16, #tpu.memory_space<vmem>>, %arg7: memref<3x1x128xf32, #tpu.memory_space<vmem>>, %arg8: memref<128x128xbf16, #tpu.memory_space<vmem>>, %arg9: memref<1x128xf32, #tpu.memory_space<vmem>>, %arg10: memref<2x128xf32, #tpu.memory_space<vmem>>, %arg11: memref<2x24x128xbf16, #tpu.memory_space<vmem>>) attributes {dimension_semantics = [#tpu.dimension_semantics<parallel>], iteration_bounds = array<i64: 1>, scalar_prefetch = 0 : i64, scratch_operands = 1 : i64, tpu.core_type = #tpu.core_type<tc>, window_params = [{transform_indices = @transform_0, window_bounds = array<i64: 2, 16, 128>}, {pipeline_mode = #tpu.pipeline_mode<synchronous>, transform_indices = @transform_1, window_bounds = array<i64: 3, 8, 128, 256>}, {pipeline_mode = #tpu.pipeline_mode<synchronous>, transform_indices = @transform_2, window_bounds = array<i64: 3, 1, 256>}, {pipeline_mode = #tpu.pipeline_mode<synchronous>, transform_indices = @transform_3, window_bounds = array<i64: 3, 5, 128, 128>}, {pipeline_mode = #tpu.pipeline_mode<synchronous>, transform_indices = @transform_4, window_bounds = array<i64: 3, 1, 128>}, {pipeline_mode = #tpu.pipeline_mode<synchronous>, transform_indices = @transform_5, window_bounds = array<i64: 3, 3, 128, 128>}, {pipeline_mode = #tpu.pipeline_mode<synchronous>, transform_indices = @transform_6, window_bounds = array<i64: 3, 1, 128>}, {pipeline_mode = #tpu.pipeline_mode<synchronous>, transform_indices = @transform_7, window_bounds = array<i64: 128, 128>}, {pipeline_mode = #tpu.pipeline_mode<synchronous>, transform_indices = @transform_8, window_bounds = array<i64: 1, 128>}, {transform_indices = @transform_9, window_bounds = array<i64: 2, 128>}]} {
    %cst = arith.constant 0.000000e+00 : bf16
    %0 = vector.broadcast %cst : bf16 to vector<2x3x128xbf16>
    %c0 = arith.constant 0 : index
    %c0_0 = arith.constant 0 : index
    %c0_1 = arith.constant 0 : index
    %1 = vector.load %arg11[%c0, %c0_0, %c0_1] : memref<2x24x128xbf16, #tpu.memory_space<vmem>>, vector<2x3x128xbf16>
    tpu.vector_store %arg11[%c0, %c0_0, %c0_1], %0 {strides = array<i32>} : memref<2x24x128xbf16, #tpu.memory_space<vmem>>, vector<2x3x128xbf16>,
    %cst_2 = arith.constant 0.000000e+00 : bf16
    %2 = vector.broadcast %cst_2 : bf16 to vector<2x5x128xbf16>
    %c0_3 = arith.constant 0 : index
    %c19 = arith.constant 19 : index
    %c0_4 = arith.constant 0 : index
    %3 = vector.load %arg11[%c0_3, %c19, %c0_4] : memref<2x24x128xbf16, #tpu.memory_space<vmem>>, vector<2x5x128xbf16>
    tpu.vector_store %arg11[%c0_3, %c19, %c0_4], %2 {strides = array<i32>} : memref<2x24x128xbf16, #tpu.memory_space<vmem>>, vector<2x5x128xbf16>,
    %c0_5 = arith.constant 0 : index
    %c0_6 = arith.constant 0 : index
    %c0_7 = arith.constant 0 : index
    %4 = vector.load %arg1[%c0_5, %c0_6, %c0_7] : memref<2x16x128xbf16, #tpu.memory_space<vmem>>, vector<2x16x128xbf16>
    %c0_8 = arith.constant 0 : index
    %c3 = arith.constant 3 : index
    %c0_9 = arith.constant 0 : index
    %5 = vector.load %arg11[%c0_8, %c3, %c0_9] : memref<2x24x128xbf16, #tpu.memory_space<vmem>>, vector<2x16x128xbf16>
    tpu.vector_store %arg11[%c0_8, %c3, %c0_9], %4 {strides = array<i32>} : memref<2x24x128xbf16, #tpu.memory_space<vmem>>, vector<2x16x128xbf16>,
    %cst_10 = arith.constant 0.000000e+00 : f32
    %6 = vector.broadcast %cst_10 : f32 to vector<32x256xf32>
    %c0_11 = arith.constant 0 : index
    %c0_12 = arith.constant 0 : index
    %c0_13 = arith.constant 0 : index
    %7 = vector.load %arg11[%c0_11, %c0_12, %c0_13] : memref<2x24x128xbf16, #tpu.memory_space<vmem>>, vector<2x16x128xbf16>
    %8 = vector.shape_cast %7 : vector<2x16x128xbf16> to vector<32x128xbf16>
    %c0_14 = arith.constant 0 : index
    %c0_15 = arith.constant 0 : index
    %c0_16 = arith.constant 0 : index
    %c0_17 = arith.constant 0 : index
    %9 = vector.load %arg2[%c0_14, %c0_15, %c0_16, %c0_17] : memref<3x8x128x256xbf16, #tpu.memory_space<vmem>>, vector<1x1x128x256xbf16>
    %10 = vector.shape_cast %9 : vector<1x1x128x256xbf16> to vector<128x256xbf16>
    %cst_18 = arith.constant dense<0.000000e+00> : vector<32x256xf32>
    %11 = tpu.matmul %8, %10, %cst_18 {dimension_numbers = #tpu.dot_dimension_numbers<[1], [0], [0], [1], [0, 0, 1, 1], [], []>} : vector<32x128xbf16>, vector<128x256xbf16>, vector<32x256xf32> -> vector<32x256xf32>
    %12 = arith.addf %6, %11 : vector<32x256xf32>
    %c0_19 = arith.constant 0 : index
    %c1 = arith.constant 1 : index
    %c0_20 = arith.constant 0 : index
    %13 = vector.load %arg11[%c0_19, %c1, %c0_20] : memref<2x24x128xbf16, #tpu.memory_space<vmem>>, vector<2x16x128xbf16>
    %14 = vector.shape_cast %13 : vector<2x16x128xbf16> to vector<32x128xbf16>
    %c0_21 = arith.constant 0 : index
    %c1_22 = arith.constant 1 : index
    %c0_23 = arith.constant 0 : index
    %c0_24 = arith.constant 0 : index
    %15 = vector.load %arg2[%c0_21, %c1_22, %c0_23, %c0_24] : memref<3x8x128x256xbf16, #tpu.memory_space<vmem>>, vector<1x1x128x256xbf16>
    %16 = vector.shape_cast %15 : vector<1x1x128x256xbf16> to vector<128x256xbf16>
    %cst_25 = arith.constant dense<0.000000e+00> : vector<32x256xf32>
    %17 = tpu.matmul %14, %16, %cst_25 {dimension_numbers = #tpu.dot_dimension_numbers<[1], [0], [0], [1], [0, 0, 1, 1], [], []>} : vector<32x128xbf16>, vector<128x256xbf16>, vector<32x256xf32> -> vector<32x256xf32>
    %18 = arith.addf %12, %17 : vector<32x256xf32>
    %c0_26 = arith.constant 0 : index
    %c2 = arith.constant 2 : index
    %c0_27 = arith.constant 0 : index
    %19 = vector.load %arg11[%c0_26, %c2, %c0_27] : memref<2x24x128xbf16, #tpu.memory_space<vmem>>, vector<2x16x128xbf16>
    %20 = vector.shape_cast %19 : vector<2x16x128xbf16> to vector<32x128xbf16>
    %c0_28 = arith.constant 0 : index
    %c2_29 = arith.constant 2 : index
    %c0_30 = arith.constant 0 : index
    %c0_31 = arith.constant 0 : index
    %21 = vector.load %arg2[%c0_28, %c2_29, %c0_30, %c0_31] : memref<3x8x128x256xbf16, #tpu.memory_space<vmem>>, vector<1x1x128x256xbf16>
    %22 = vector.shape_cast %21 : vector<1x1x128x256xbf16> to vector<128x256xbf16>
    %cst_32 = arith.constant dense<0.000000e+00> : vector<32x256xf32>
    %23 = tpu.matmul %20, %22, %cst_32 {dimension_numbers = #tpu.dot_dimension_numbers<[1], [0], [0], [1], [0, 0, 1, 1], [], []>} : vector<32x128xbf16>, vector<128x256xbf16>, vector<32x256xf32> -> vector<32x256xf32>
    %24 = arith.addf %18, %23 : vector<32x256xf32>
    %c0_33 = arith.constant 0 : index
    %c3_34 = arith.constant 3 : index
    %c0_35 = arith.constant 0 : index
    %25 = vector.load %arg11[%c0_33, %c3_34, %c0_35] : memref<2x24x128xbf16, #tpu.memory_space<vmem>>, vector<2x16x128xbf16>
    %26 = vector.shape_cast %25 : vector<2x16x128xbf16> to vector<32x128xbf16>
    %c0_36 = arith.constant 0 : index
    %c3_37 = arith.constant 3 : index
    %c0_38 = arith.constant 0 : index
    %c0_39 = arith.constant 0 : index
    %27 = vector.load %arg2[%c0_36, %c3_37, %c0_38, %c0_39] : memref<3x8x128x256xbf16, #tpu.memory_space<vmem>>, vector<1x1x128x256xbf16>
    %28 = vector.shape_cast %27 : vector<1x1x128x256xbf16> to vector<128x256xbf16>
    %cst_40 = arith.constant dense<0.000000e+00> : vector<32x256xf32>
    %29 = tpu.matmul %26, %28, %cst_40 {dimension_numbers = #tpu.dot_dimension_numbers<[1], [0], [0], [1], [0, 0, 1, 1], [], []>} : vector<32x128xbf16>, vector<128x256xbf16>, vector<32x256xf32> -> vector<32x256xf32>
    %30 = arith.addf %24, %29 : vector<32x256xf32>
    %c0_41 = arith.constant 0 : index
    %c4 = arith.constant 4 : index
    %c0_42 = arith.constant 0 : index
    %31 = vector.load %arg11[%c0_41, %c4, %c0_42] : memref<2x24x128xbf16, #tpu.memory_space<vmem>>, vector<2x16x128xbf16>
    %32 = vector.shape_cast %31 : vector<2x16x128xbf16> to vector<32x128xbf16>
    %c0_43 = arith.constant 0 : index
    %c4_44 = arith.constant 4 : index
    %c0_45 = arith.constant 0 : index
    %c0_46 = arith.constant 0 : index
    %33 = vector.load %arg2[%c0_43, %c4_44, %c0_45, %c0_46] : memref<3x8x128x256xbf16, #tpu.memory_space<vmem>>, vector<1x1x128x256xbf16>
    %34 = vector.shape_cast %33 : vector<1x1x128x256xbf16> to vector<128x256xbf16>
    %cst_47 = arith.constant dense<0.000000e+00> : vector<32x256xf32>
    %35 = tpu.matmul %32, %34, %cst_47 {dimension_numbers = #tpu.dot_dimension_numbers<[1], [0], [0], [1], [0, 0, 1, 1], [], []>} : vector<32x128xbf16>, vector<128x256xbf16>, vector<32x256xf32> -> vector<32x256xf32>
    %36 = arith.addf %30, %35 : vector<32x256xf32>
    %c0_48 = arith.constant 0 : index
    %c5 = arith.constant 5 : index
    %c0_49 = arith.constant 0 : index
    %37 = vector.load %arg11[%c0_48, %c5, %c0_49] : memref<2x24x128xbf16, #tpu.memory_space<vmem>>, vector<2x16x128xbf16>
    %38 = vector.shape_cast %37 : vector<2x16x128xbf16> to vector<32x128xbf16>
    %c0_50 = arith.constant 0 : index
    %c5_51 = arith.constant 5 : index
    %c0_52 = arith.constant 0 : index
    %c0_53 = arith.constant 0 : index
    %39 = vector.load %arg2[%c0_50, %c5_51, %c0_52, %c0_53] : memref<3x8x128x256xbf16, #tpu.memory_space<vmem>>, vector<1x1x128x256xbf16>
    %40 = vector.shape_cast %39 : vector<1x1x128x256xbf16> to vector<128x256xbf16>
    %cst_54 = arith.constant dense<0.000000e+00> : vector<32x256xf32>
    %41 = tpu.matmul %38, %40, %cst_54 {dimension_numbers = #tpu.dot_dimension_numbers<[1], [0], [0], [1], [0, 0, 1, 1], [], []>} : vector<32x128xbf16>, vector<128x256xbf16>, vector<32x256xf32> -> vector<32x256xf32>
    %42 = arith.addf %36, %41 : vector<32x256xf32>
    %c0_55 = arith.constant 0 : index
    %c6 = arith.constant 6 : index
    %c0_56 = arith.constant 0 : index
    %43 = vector.load %arg11[%c0_55, %c6, %c0_56] : memref<2x24x128xbf16, #tpu.memory_space<vmem>>, vector<2x16x128xbf16>
    %44 = vector.shape_cast %43 : vector<2x16x128xbf16> to vector<32x128xbf16>
    %c0_57 = arith.constant 0 : index
    %c6_58 = arith.constant 6 : index
    %c0_59 = arith.constant 0 : index
    %c0_60 = arith.constant 0 : index
    %45 = vector.load %arg2[%c0_57, %c6_58, %c0_59, %c0_60] : memref<3x8x128x256xbf16, #tpu.memory_space<vmem>>, vector<1x1x128x256xbf16>
    %46 = vector.shape_cast %45 : vector<1x1x128x256xbf16> to vector<128x256xbf16>
    %cst_61 = arith.constant dense<0.000000e+00> : vector<32x256xf32>
    %47 = tpu.matmul %44, %46, %cst_61 {dimension_numbers = #tpu.dot_dimension_numbers<[1], [0], [0], [1], [0, 0, 1, 1], [], []>} : vector<32x128xbf16>, vector<128x256xbf16>, vector<32x256xf32> -> vector<32x256xf32>
    %48 = arith.addf %42, %47 : vector<32x256xf32>
    %c0_62 = arith.constant 0 : index
    %c7 = arith.constant 7 : index
    %c0_63 = arith.constant 0 : index
    %49 = vector.load %arg11[%c0_62, %c7, %c0_63] : memref<2x24x128xbf16, #tpu.memory_space<vmem>>, vector<2x16x128xbf16>
    %50 = vector.shape_cast %49 : vector<2x16x128xbf16> to vector<32x128xbf16>
    %c0_64 = arith.constant 0 : index
    %c7_65 = arith.constant 7 : index
    %c0_66 = arith.constant 0 : index
    %c0_67 = arith.constant 0 : index
    %51 = vector.load %arg2[%c0_64, %c7_65, %c0_66, %c0_67] : memref<3x8x128x256xbf16, #tpu.memory_space<vmem>>, vector<1x1x128x256xbf16>
    %52 = vector.shape_cast %51 : vector<1x1x128x256xbf16> to vector<128x256xbf16>
    %cst_68 = arith.constant dense<0.000000e+00> : vector<32x256xf32>
    %53 = tpu.matmul %50, %52, %cst_68 {dimension_numbers = #tpu.dot_dimension_numbers<[1], [0], [0], [1], [0, 0, 1, 1], [], []>} : vector<32x128xbf16>, vector<128x256xbf16>, vector<32x256xf32> -> vector<32x256xf32>
    %54 = arith.addf %48, %53 : vector<32x256xf32>
    %c0_69 = arith.constant 0 : index
    %c0_70 = arith.constant 0 : index
    %c0_71 = arith.constant 0 : index
    %55 = vector.load %arg3[%c0_69, %c0_70, %c0_71] : memref<3x1x256xf32, #tpu.memory_space<vmem>>, vector<1x1x256xf32>
    %56 = vector.shape_cast %55 : vector<1x1x256xf32> to vector<1x256xf32>
    %57 = vector.broadcast %56 : vector<1x256xf32> to vector<32x256xf32>
    %58 = arith.addf %54, %57 : vector<32x256xf32>
    %59 = vector.extract_strided_slice %58 {offsets = [0, 128], sizes = [32, 128], strides = [1, 1]} : vector<32x256xf32> to vector<32x128xf32>
    %60 = vector.extract_strided_slice %58 {offsets = [0, 0], sizes = [32, 128], strides = [1, 1]} : vector<32x256xf32> to vector<32x128xf32>
    %cst_72 = arith.constant 0.000000e+00 : f32
    %61 = vector.broadcast %cst_72 : f32 to vector<32x128xf32>
    %62 = arith.maximumf %60, %61 : vector<32x128xf32>
    %63 = vector.shape_cast %62 : vector<32x128xf32> to vector<2x16x128xf32>
    %64 = arith.truncf %63 : vector<2x16x128xf32> to vector<2x16x128xbf16>
    %c0_73 = arith.constant 0 : index
    %c3_74 = arith.constant 3 : index
    %c0_75 = arith.constant 0 : index
    %65 = vector.load %arg11[%c0_73, %c3_74, %c0_75] : memref<2x24x128xbf16, #tpu.memory_space<vmem>>, vector<2x16x128xbf16>
    tpu.vector_store %arg11[%c0_73, %c3_74, %c0_75], %64 {strides = array<i32>} : memref<2x24x128xbf16, #tpu.memory_space<vmem>>, vector<2x16x128xbf16>,
    %cst_76 = arith.constant 0.000000e+00 : f32
    %66 = vector.broadcast %cst_76 : f32 to vector<32x128xf32>
    %c0_77 = arith.constant 0 : index
    %c1_78 = arith.constant 1 : index
    %c0_79 = arith.constant 0 : index
    %67 = vector.load %arg11[%c0_77, %c1_78, %c0_79] : memref<2x24x128xbf16, #tpu.memory_space<vmem>>, vector<2x16x128xbf16>
    %68 = vector.shape_cast %67 : vector<2x16x128xbf16> to vector<32x128xbf16>
    %c0_80 = arith.constant 0 : index
    %c0_81 = arith.constant 0 : index
    %c0_82 = arith.constant 0 : index
    %c0_83 = arith.constant 0 : index
    %69 = vector.load %arg4[%c0_80, %c0_81, %c0_82, %c0_83] : memref<3x5x128x128xbf16, #tpu.memory_space<vmem>>, vector<1x1x128x128xbf16>
    %70 = vector.shape_cast %69 : vector<1x1x128x128xbf16> to vector<128x128xbf16>
    %cst_84 = arith.constant dense<0.000000e+00> : vector<32x128xf32>
    %71 = tpu.matmul %68, %70, %cst_84 {dimension_numbers = #tpu.dot_dimension_numbers<[1], [0], [0], [1], [0, 0, 1, 1], [], []>} : vector<32x128xbf16>, vector<128x128xbf16>, vector<32x128xf32> -> vector<32x128xf32>
    %72 = arith.addf %66, %71 : vector<32x128xf32>
    %c0_85 = arith.constant 0 : index
    %c2_86 = arith.constant 2 : index
    %c0_87 = arith.constant 0 : index
    %73 = vector.load %arg11[%c0_85, %c2_86, %c0_87] : memref<2x24x128xbf16, #tpu.memory_space<vmem>>, vector<2x16x128xbf16>
    %74 = vector.shape_cast %73 : vector<2x16x128xbf16> to vector<32x128xbf16>
    %c0_88 = arith.constant 0 : index
    %c1_89 = arith.constant 1 : index
    %c0_90 = arith.constant 0 : index
    %c0_91 = arith.constant 0 : index
    %75 = vector.load %arg4[%c0_88, %c1_89, %c0_90, %c0_91] : memref<3x5x128x128xbf16, #tpu.memory_space<vmem>>, vector<1x1x128x128xbf16>
    %76 = vector.shape_cast %75 : vector<1x1x128x128xbf16> to vector<128x128xbf16>
    %cst_92 = arith.constant dense<0.000000e+00> : vector<32x128xf32>
    %77 = tpu.matmul %74, %76, %cst_92 {dimension_numbers = #tpu.dot_dimension_numbers<[1], [0], [0], [1], [0, 0, 1, 1], [], []>} : vector<32x128xbf16>, vector<128x128xbf16>, vector<32x128xf32> -> vector<32x128xf32>
    %78 = arith.addf %72, %77 : vector<32x128xf32>
    %c0_93 = arith.constant 0 : index
    %c3_94 = arith.constant 3 : index
    %c0_95 = arith.constant 0 : index
    %79 = vector.load %arg11[%c0_93, %c3_94, %c0_95] : memref<2x24x128xbf16, #tpu.memory_space<vmem>>, vector<2x16x128xbf16>
    %80 = vector.shape_cast %79 : vector<2x16x128xbf16> to vector<32x128xbf16>
    %c0_96 = arith.constant 0 : index
    %c2_97 = arith.constant 2 : index
    %c0_98 = arith.constant 0 : index
    %c0_99 = arith.constant 0 : index
    %81 = vector.load %arg4[%c0_96, %c2_97, %c0_98, %c0_99] : memref<3x5x128x128xbf16, #tpu.memory_space<vmem>>, vector<1x1x128x128xbf16>
    %82 = vector.shape_cast %81 : vector<1x1x128x128xbf16> to vector<128x128xbf16>
    %cst_100 = arith.constant dense<0.000000e+00> : vector<32x128xf32>
    %83 = tpu.matmul %80, %82, %cst_100 {dimension_numbers = #tpu.dot_dimension_numbers<[1], [0], [0], [1], [0, 0, 1, 1], [], []>} : vector<32x128xbf16>, vector<128x128xbf16>, vector<32x128xf32> -> vector<32x128xf32>
    %84 = arith.addf %78, %83 : vector<32x128xf32>
    %c0_101 = arith.constant 0 : index
    %c4_102 = arith.constant 4 : index
    %c0_103 = arith.constant 0 : index
    %85 = vector.load %arg11[%c0_101, %c4_102, %c0_103] : memref<2x24x128xbf16, #tpu.memory_space<vmem>>, vector<2x16x128xbf16>
    %86 = vector.shape_cast %85 : vector<2x16x128xbf16> to vector<32x128xbf16>
    %c0_104 = arith.constant 0 : index
    %c3_105 = arith.constant 3 : index
    %c0_106 = arith.constant 0 : index
    %c0_107 = arith.constant 0 : index
    %87 = vector.load %arg4[%c0_104, %c3_105, %c0_106, %c0_107] : memref<3x5x128x128xbf16, #tpu.memory_space<vmem>>, vector<1x1x128x128xbf16>
    %88 = vector.shape_cast %87 : vector<1x1x128x128xbf16> to vector<128x128xbf16>
    %cst_108 = arith.constant dense<0.000000e+00> : vector<32x128xf32>
    %89 = tpu.matmul %86, %88, %cst_108 {dimension_numbers = #tpu.dot_dimension_numbers<[1], [0], [0], [1], [0, 0, 1, 1], [], []>} : vector<32x128xbf16>, vector<128x128xbf16>, vector<32x128xf32> -> vector<32x128xf32>
    %90 = arith.addf %84, %89 : vector<32x128xf32>
    %c0_109 = arith.constant 0 : index
    %c5_110 = arith.constant 5 : index
    %c0_111 = arith.constant 0 : index
    %91 = vector.load %arg11[%c0_109, %c5_110, %c0_111] : memref<2x24x128xbf16, #tpu.memory_space<vmem>>, vector<2x16x128xbf16>
    %92 = vector.shape_cast %91 : vector<2x16x128xbf16> to vector<32x128xbf16>
    %c0_112 = arith.constant 0 : index
    %c4_113 = arith.constant 4 : index
    %c0_114 = arith.constant 0 : index
    %c0_115 = arith.constant 0 : index
    %93 = vector.load %arg4[%c0_112, %c4_113, %c0_114, %c0_115] : memref<3x5x128x128xbf16, #tpu.memory_space<vmem>>, vector<1x1x128x128xbf16>
    %94 = vector.shape_cast %93 : vector<1x1x128x128xbf16> to vector<128x128xbf16>
    %cst_116 = arith.constant dense<0.000000e+00> : vector<32x128xf32>
    %95 = tpu.matmul %92, %94, %cst_116 {dimension_numbers = #tpu.dot_dimension_numbers<[1], [0], [0], [1], [0, 0, 1, 1], [], []>} : vector<32x128xbf16>, vector<128x128xbf16>, vector<32x128xf32> -> vector<32x128xf32>
    %96 = arith.addf %90, %95 : vector<32x128xf32>
    %c0_117 = arith.constant 0 : index
    %c0_118 = arith.constant 0 : index
    %c0_119 = arith.constant 0 : index
    %97 = vector.load %arg5[%c0_117, %c0_118, %c0_119] : memref<3x1x128xf32, #tpu.memory_space<vmem>>, vector<1x1x128xf32>
    %98 = vector.shape_cast %97 : vector<1x1x128xf32> to vector<1x128xf32>
    %99 = vector.broadcast %98 : vector<1x128xf32> to vector<32x128xf32>
    %100 = arith.addf %96, %99 : vector<32x128xf32>
    %cst_120 = arith.constant 0.000000e+00 : f32
    %101 = vector.broadcast %cst_120 : f32 to vector<32x128xf32>
    %102 = arith.maximumf %100, %101 : vector<32x128xf32>
    %103 = vector.shape_cast %102 : vector<32x128xf32> to vector<2x16x128xf32>
    %104 = arith.truncf %103 : vector<2x16x128xf32> to vector<2x16x128xbf16>
    %c0_121 = arith.constant 0 : index
    %c3_122 = arith.constant 3 : index
    %c0_123 = arith.constant 0 : index
    %105 = vector.load %arg11[%c0_121, %c3_122, %c0_123] : memref<2x24x128xbf16, #tpu.memory_space<vmem>>, vector<2x16x128xbf16>
    tpu.vector_store %arg11[%c0_121, %c3_122, %c0_123], %104 {strides = array<i32>} : memref<2x24x128xbf16, #tpu.memory_space<vmem>>, vector<2x16x128xbf16>,
    %cst_124 = arith.constant 0.000000e+00 : f32
    %106 = vector.broadcast %cst_124 : f32 to vector<32x128xf32>
    %c0_125 = arith.constant 0 : index
    %c2_126 = arith.constant 2 : index
    %c0_127 = arith.constant 0 : index
    %107 = vector.load %arg11[%c0_125, %c2_126, %c0_127] : memref<2x24x128xbf16, #tpu.memory_space<vmem>>, vector<2x16x128xbf16>
    %108 = vector.shape_cast %107 : vector<2x16x128xbf16> to vector<32x128xbf16>
    %c0_128 = arith.constant 0 : index
    %c0_129 = arith.constant 0 : index
    %c0_130 = arith.constant 0 : index
    %c0_131 = arith.constant 0 : index
    %109 = vector.load %arg6[%c0_128, %c0_129, %c0_130, %c0_131] : memref<3x3x128x128xbf16, #tpu.memory_space<vmem>>, vector<1x1x128x128xbf16>
    %110 = vector.shape_cast %109 : vector<1x1x128x128xbf16> to vector<128x128xbf16>
    %cst_132 = arith.constant dense<0.000000e+00> : vector<32x128xf32>
    %111 = tpu.matmul %108, %110, %cst_132 {dimension_numbers = #tpu.dot_dimension_numbers<[1], [0], [0], [1], [0, 0, 1, 1], [], []>} : vector<32x128xbf16>, vector<128x128xbf16>, vector<32x128xf32> -> vector<32x128xf32>
    %112 = arith.addf %106, %111 : vector<32x128xf32>
    %c0_133 = arith.constant 0 : index
    %c3_134 = arith.constant 3 : index
    %c0_135 = arith.constant 0 : index
    %113 = vector.load %arg11[%c0_133, %c3_134, %c0_135] : memref<2x24x128xbf16, #tpu.memory_space<vmem>>, vector<2x16x128xbf16>
    %114 = vector.shape_cast %113 : vector<2x16x128xbf16> to vector<32x128xbf16>
    %c0_136 = arith.constant 0 : index
    %c1_137 = arith.constant 1 : index
    %c0_138 = arith.constant 0 : index
    %c0_139 = arith.constant 0 : index
    %115 = vector.load %arg6[%c0_136, %c1_137, %c0_138, %c0_139] : memref<3x3x128x128xbf16, #tpu.memory_space<vmem>>, vector<1x1x128x128xbf16>
    %116 = vector.shape_cast %115 : vector<1x1x128x128xbf16> to vector<128x128xbf16>
    %cst_140 = arith.constant dense<0.000000e+00> : vector<32x128xf32>
    %117 = tpu.matmul %114, %116, %cst_140 {dimension_numbers = #tpu.dot_dimension_numbers<[1], [0], [0], [1], [0, 0, 1, 1], [], []>} : vector<32x128xbf16>, vector<128x128xbf16>, vector<32x128xf32> -> vector<32x128xf32>
    %118 = arith.addf %112, %117 : vector<32x128xf32>
    %c0_141 = arith.constant 0 : index
    %c4_142 = arith.constant 4 : index
    %c0_143 = arith.constant 0 : index
    %119 = vector.load %arg11[%c0_141, %c4_142, %c0_143] : memref<2x24x128xbf16, #tpu.memory_space<vmem>>, vector<2x16x128xbf16>
    %120 = vector.shape_cast %119 : vector<2x16x128xbf16> to vector<32x128xbf16>
    %c0_144 = arith.constant 0 : index
    %c2_145 = arith.constant 2 : index
    %c0_146 = arith.constant 0 : index
    %c0_147 = arith.constant 0 : index
    %121 = vector.load %arg6[%c0_144, %c2_145, %c0_146, %c0_147] : memref<3x3x128x128xbf16, #tpu.memory_space<vmem>>, vector<1x1x128x128xbf16>
    %122 = vector.shape_cast %121 : vector<1x1x128x128xbf16> to vector<128x128xbf16>
    %cst_148 = arith.constant dense<0.000000e+00> : vector<32x128xf32>
    %123 = tpu.matmul %120, %122, %cst_148 {dimension_numbers = #tpu.dot_dimension_numbers<[1], [0], [0], [1], [0, 0, 1, 1], [], []>} : vector<32x128xbf16>, vector<128x128xbf16>, vector<32x128xf32> -> vector<32x128xf32>
    %124 = arith.addf %118, %123 : vector<32x128xf32>
    %c0_149 = arith.constant 0 : index
    %c0_150 = arith.constant 0 : index
    %c0_151 = arith.constant 0 : index
    %125 = vector.load %arg7[%c0_149, %c0_150, %c0_151] : memref<3x1x128xf32, #tpu.memory_space<vmem>>, vector<1x1x128xf32>
    %126 = vector.shape_cast %125 : vector<1x1x128xf32> to vector<1x128xf32>
    %127 = vector.broadcast %126 : vector<1x128xf32> to vector<32x128xf32>
    %128 = arith.addf %124, %127 : vector<32x128xf32>
    %129 = arith.addf %128, %59 : vector<32x128xf32>
    %cst_152 = arith.constant 0.000000e+00 : f32
    %130 = vector.broadcast %cst_152 : f32 to vector<32x128xf32>
    %131 = arith.maximumf %129, %130 : vector<32x128xf32>
    %132 = vector.shape_cast %131 : vector<32x128xf32> to vector<2x16x128xf32>
    %133 = arith.truncf %132 : vector<2x16x128xf32> to vector<2x16x128xbf16>
    %c0_153 = arith.constant 0 : index
    %c3_154 = arith.constant 3 : index
    %c0_155 = arith.constant 0 : index
    %134 = vector.load %arg11[%c0_153, %c3_154, %c0_155] : memref<2x24x128xbf16, #tpu.memory_space<vmem>>, vector<2x16x128xbf16>
    tpu.vector_store %arg11[%c0_153, %c3_154, %c0_155], %133 {strides = array<i32>} : memref<2x24x128xbf16, #tpu.memory_space<vmem>>, vector<2x16x128xbf16>,
    %cst_156 = arith.constant 0.000000e+00 : f32
    %135 = vector.broadcast %cst_156 : f32 to vector<32x256xf32>
    %c0_157 = arith.constant 0 : index
    %c0_158 = arith.constant 0 : index
    %c0_159 = arith.constant 0 : index
    %136 = vector.load %arg11[%c0_157, %c0_158, %c0_159] : memref<2x24x128xbf16, #tpu.memory_space<vmem>>, vector<2x16x128xbf16>
    %137 = vector.shape_cast %136 : vector<2x16x128xbf16> to vector<32x128xbf16>
    %c1_160 = arith.constant 1 : index
    %c0_161 = arith.constant 0 : index
    %c0_162 = arith.constant 0 : index
    %c0_163 = arith.constant 0 : index
    %138 = vector.load %arg2[%c1_160, %c0_161, %c0_162, %c0_163] : memref<3x8x128x256xbf16, #tpu.memory_space<vmem>>, vector<1x1x128x256xbf16>
    %139 = vector.shape_cast %138 : vector<1x1x128x256xbf16> to vector<128x256xbf16>
    %cst_164 = arith.constant dense<0.000000e+00> : vector<32x256xf32>
    %140 = tpu.matmul %137, %139, %cst_164 {dimension_numbers = #tpu.dot_dimension_numbers<[1], [0], [0], [1], [0, 0, 1, 1], [], []>} : vector<32x128xbf16>, vector<128x256xbf16>, vector<32x256xf32> -> vector<32x256xf32>
    %141 = arith.addf %135, %140 : vector<32x256xf32>
    %c0_165 = arith.constant 0 : index
    %c1_166 = arith.constant 1 : index
    %c0_167 = arith.constant 0 : index
    %142 = vector.load %arg11[%c0_165, %c1_166, %c0_167] : memref<2x24x128xbf16, #tpu.memory_space<vmem>>, vector<2x16x128xbf16>
    %143 = vector.shape_cast %142 : vector<2x16x128xbf16> to vector<32x128xbf16>
    %c1_168 = arith.constant 1 : index
    %c1_169 = arith.constant 1 : index
    %c0_170 = arith.constant 0 : index
    %c0_171 = arith.constant 0 : index
    %144 = vector.load %arg2[%c1_168, %c1_169, %c0_170, %c0_171] : memref<3x8x128x256xbf16, #tpu.memory_space<vmem>>, vector<1x1x128x256xbf16>
    %145 = vector.shape_cast %144 : vector<1x1x128x256xbf16> to vector<128x256xbf16>
    %cst_172 = arith.constant dense<0.000000e+00> : vector<32x256xf32>
    %146 = tpu.matmul %143, %145, %cst_172 {dimension_numbers = #tpu.dot_dimension_numbers<[1], [0], [0], [1], [0, 0, 1, 1], [], []>} : vector<32x128xbf16>, vector<128x256xbf16>, vector<32x256xf32> -> vector<32x256xf32>
    %147 = arith.addf %141, %146 : vector<32x256xf32>
    %c0_173 = arith.constant 0 : index
    %c2_174 = arith.constant 2 : index
    %c0_175 = arith.constant 0 : index
    %148 = vector.load %arg11[%c0_173, %c2_174, %c0_175] : memref<2x24x128xbf16, #tpu.memory_space<vmem>>, vector<2x16x128xbf16>
    %149 = vector.shape_cast %148 : vector<2x16x128xbf16> to vector<32x128xbf16>
    %c1_176 = arith.constant 1 : index
    %c2_177 = arith.constant 2 : index
    %c0_178 = arith.constant 0 : index
    %c0_179 = arith.constant 0 : index
    %150 = vector.load %arg2[%c1_176, %c2_177, %c0_178, %c0_179] : memref<3x8x128x256xbf16, #tpu.memory_space<vmem>>, vector<1x1x128x256xbf16>
    %151 = vector.shape_cast %150 : vector<1x1x128x256xbf16> to vector<128x256xbf16>
    %cst_180 = arith.constant dense<0.000000e+00> : vector<32x256xf32>
    %152 = tpu.matmul %149, %151, %cst_180 {dimension_numbers = #tpu.dot_dimension_numbers<[1], [0], [0], [1], [0, 0, 1, 1], [], []>} : vector<32x128xbf16>, vector<128x256xbf16>, vector<32x256xf32> -> vector<32x256xf32>
    %153 = arith.addf %147, %152 : vector<32x256xf32>
    %c0_181 = arith.constant 0 : index
    %c3_182 = arith.constant 3 : index
    %c0_183 = arith.constant 0 : index
    %154 = vector.load %arg11[%c0_181, %c3_182, %c0_183] : memref<2x24x128xbf16, #tpu.memory_space<vmem>>, vector<2x16x128xbf16>
    %155 = vector.shape_cast %154 : vector<2x16x128xbf16> to vector<32x128xbf16>
    %c1_184 = arith.constant 1 : index
    %c3_185 = arith.constant 3 : index
    %c0_186 = arith.constant 0 : index
    %c0_187 = arith.constant 0 : index
    %156 = vector.load %arg2[%c1_184, %c3_185, %c0_186, %c0_187] : memref<3x8x128x256xbf16, #tpu.memory_space<vmem>>, vector<1x1x128x256xbf16>
    %157 = vector.shape_cast %156 : vector<1x1x128x256xbf16> to vector<128x256xbf16>
    %cst_188 = arith.constant dense<0.000000e+00> : vector<32x256xf32>
    %158 = tpu.matmul %155, %157, %cst_188 {dimension_numbers = #tpu.dot_dimension_numbers<[1], [0], [0], [1], [0, 0, 1, 1], [], []>} : vector<32x128xbf16>, vector<128x256xbf16>, vector<32x256xf32> -> vector<32x256xf32>
    %159 = arith.addf %153, %158 : vector<32x256xf32>
    %c0_189 = arith.constant 0 : index
    %c4_190 = arith.constant 4 : index
    %c0_191 = arith.constant 0 : index
    %160 = vector.load %arg11[%c0_189, %c4_190, %c0_191] : memref<2x24x128xbf16, #tpu.memory_space<vmem>>, vector<2x16x128xbf16>
    %161 = vector.shape_cast %160 : vector<2x16x128xbf16> to vector<32x128xbf16>
    %c1_192 = arith.constant 1 : index
    %c4_193 = arith.constant 4 : index
    %c0_194 = arith.constant 0 : index
    %c0_195 = arith.constant 0 : index
    %162 = vector.load %arg2[%c1_192, %c4_193, %c0_194, %c0_195] : memref<3x8x128x256xbf16, #tpu.memory_space<vmem>>, vector<1x1x128x256xbf16>
    %163 = vector.shape_cast %162 : vector<1x1x128x256xbf16> to vector<128x256xbf16>
    %cst_196 = arith.constant dense<0.000000e+00> : vector<32x256xf32>
    %164 = tpu.matmul %161, %163, %cst_196 {dimension_numbers = #tpu.dot_dimension_numbers<[1], [0], [0], [1], [0, 0, 1, 1], [], []>} : vector<32x128xbf16>, vector<128x256xbf16>, vector<32x256xf32> -> vector<32x256xf32>
    %165 = arith.addf %159, %164 : vector<32x256xf32>
    %c0_197 = arith.constant 0 : index
    %c5_198 = arith.constant 5 : index
    %c0_199 = arith.constant 0 : index
    %166 = vector.load %arg11[%c0_197, %c5_198, %c0_199] : memref<2x24x128xbf16, #tpu.memory_space<vmem>>, vector<2x16x128xbf16>
    %167 = vector.shape_cast %166 : vector<2x16x128xbf16> to vector<32x128xbf16>
    %c1_200 = arith.constant 1 : index
    %c5_201 = arith.constant 5 : index
    %c0_202 = arith.constant 0 : index
    %c0_203 = arith.constant 0 : index
    %168 = vector.load %arg2[%c1_200, %c5_201, %c0_202, %c0_203] : memref<3x8x128x256xbf16, #tpu.memory_space<vmem>>, vector<1x1x128x256xbf16>
    %169 = vector.shape_cast %168 : vector<1x1x128x256xbf16> to vector<128x256xbf16>
    %cst_204 = arith.constant dense<0.000000e+00> : vector<32x256xf32>
    %170 = tpu.matmul %167, %169, %cst_204 {dimension_numbers = #tpu.dot_dimension_numbers<[1], [0], [0], [1], [0, 0, 1, 1], [], []>} : vector<32x128xbf16>, vector<128x256xbf16>, vector<32x256xf32> -> vector<32x256xf32>
    %171 = arith.addf %165, %170 : vector<32x256xf32>
    %c0_205 = arith.constant 0 : index
    %c6_206 = arith.constant 6 : index
    %c0_207 = arith.constant 0 : index
    %172 = vector.load %arg11[%c0_205, %c6_206, %c0_207] : memref<2x24x128xbf16, #tpu.memory_space<vmem>>, vector<2x16x128xbf16>
    %173 = vector.shape_cast %172 : vector<2x16x128xbf16> to vector<32x128xbf16>
    %c1_208 = arith.constant 1 : index
    %c6_209 = arith.constant 6 : index
    %c0_210 = arith.constant 0 : index
    %c0_211 = arith.constant 0 : index
    %174 = vector.load %arg2[%c1_208, %c6_209, %c0_210, %c0_211] : memref<3x8x128x256xbf16, #tpu.memory_space<vmem>>, vector<1x1x128x256xbf16>
    %175 = vector.shape_cast %174 : vector<1x1x128x256xbf16> to vector<128x256xbf16>
    %cst_212 = arith.constant dense<0.000000e+00> : vector<32x256xf32>
    %176 = tpu.matmul %173, %175, %cst_212 {dimension_numbers = #tpu.dot_dimension_numbers<[1], [0], [0], [1], [0, 0, 1, 1], [], []>} : vector<32x128xbf16>, vector<128x256xbf16>, vector<32x256xf32> -> vector<32x256xf32>
    %177 = arith.addf %171, %176 : vector<32x256xf32>
    %c0_213 = arith.constant 0 : index
    %c7_214 = arith.constant 7 : index
    %c0_215 = arith.constant 0 : index
    %178 = vector.load %arg11[%c0_213, %c7_214, %c0_215] : memref<2x24x128xbf16, #tpu.memory_space<vmem>>, vector<2x16x128xbf16>
    %179 = vector.shape_cast %178 : vector<2x16x128xbf16> to vector<32x128xbf16>
    %c1_216 = arith.constant 1 : index
    %c7_217 = arith.constant 7 : index
    %c0_218 = arith.constant 0 : index
    %c0_219 = arith.constant 0 : index
    %180 = vector.load %arg2[%c1_216, %c7_217, %c0_218, %c0_219] : memref<3x8x128x256xbf16, #tpu.memory_space<vmem>>, vector<1x1x128x256xbf16>
    %181 = vector.shape_cast %180 : vector<1x1x128x256xbf16> to vector<128x256xbf16>
    %cst_220 = arith.constant dense<0.000000e+00> : vector<32x256xf32>
    %182 = tpu.matmul %179, %181, %cst_220 {dimension_numbers = #tpu.dot_dimension_numbers<[1], [0], [0], [1], [0, 0, 1, 1], [], []>} : vector<32x128xbf16>, vector<128x256xbf16>, vector<32x256xf32> -> vector<32x256xf32>
    %183 = arith.addf %177, %182 : vector<32x256xf32>
    %c1_221 = arith.constant 1 : index
    %c0_222 = arith.constant 0 : index
    %c0_223 = arith.constant 0 : index
    %184 = vector.load %arg3[%c1_221, %c0_222, %c0_223] : memref<3x1x256xf32, #tpu.memory_space<vmem>>, vector<1x1x256xf32>
    %185 = vector.shape_cast %184 : vector<1x1x256xf32> to vector<1x256xf32>
    %186 = vector.broadcast %185 : vector<1x256xf32> to vector<32x256xf32>
    %187 = arith.addf %183, %186 : vector<32x256xf32>
    %188 = vector.extract_strided_slice %187 {offsets = [0, 128], sizes = [32, 128], strides = [1, 1]} : vector<32x256xf32> to vector<32x128xf32>
    %189 = vector.extract_strided_slice %187 {offsets = [0, 0], sizes = [32, 128], strides = [1, 1]} : vector<32x256xf32> to vector<32x128xf32>
    %cst_224 = arith.constant 0.000000e+00 : f32
    %190 = vector.broadcast %cst_224 : f32 to vector<32x128xf32>
    %191 = arith.maximumf %189, %190 : vector<32x128xf32>
    %192 = vector.shape_cast %191 : vector<32x128xf32> to vector<2x16x128xf32>
    %193 = arith.truncf %192 : vector<2x16x128xf32> to vector<2x16x128xbf16>
    %c0_225 = arith.constant 0 : index
    %c3_226 = arith.constant 3 : index
    %c0_227 = arith.constant 0 : index
    %194 = vector.load %arg11[%c0_225, %c3_226, %c0_227] : memref<2x24x128xbf16, #tpu.memory_space<vmem>>, vector<2x16x128xbf16>
    tpu.vector_store %arg11[%c0_225, %c3_226, %c0_227], %193 {strides = array<i32>} : memref<2x24x128xbf16, #tpu.memory_space<vmem>>, vector<2x16x128xbf16>,
    %cst_228 = arith.constant 0.000000e+00 : f32
    %195 = vector.broadcast %cst_228 : f32 to vector<32x128xf32>
    %c0_229 = arith.constant 0 : index
    %c1_230 = arith.constant 1 : index
    %c0_231 = arith.constant 0 : index
    %196 = vector.load %arg11[%c0_229, %c1_230, %c0_231] : memref<2x24x128xbf16, #tpu.memory_space<vmem>>, vector<2x16x128xbf16>
    %197 = vector.shape_cast %196 : vector<2x16x128xbf16> to vector<32x128xbf16>
    %c1_232 = arith.constant 1 : index
    %c0_233 = arith.constant 0 : index
    %c0_234 = arith.constant 0 : index
    %c0_235 = arith.constant 0 : index
    %198 = vector.load %arg4[%c1_232, %c0_233, %c0_234, %c0_235] : memref<3x5x128x128xbf16, #tpu.memory_space<vmem>>, vector<1x1x128x128xbf16>
    %199 = vector.shape_cast %198 : vector<1x1x128x128xbf16> to vector<128x128xbf16>
    %cst_236 = arith.constant dense<0.000000e+00> : vector<32x128xf32>
    %200 = tpu.matmul %197, %199, %cst_236 {dimension_numbers = #tpu.dot_dimension_numbers<[1], [0], [0], [1], [0, 0, 1, 1], [], []>} : vector<32x128xbf16>, vector<128x128xbf16>, vector<32x128xf32> -> vector<32x128xf32>
    %201 = arith.addf %195, %200 : vector<32x128xf32>
    %c0_237 = arith.constant 0 : index
    %c2_238 = arith.constant 2 : index
    %c0_239 = arith.constant 0 : index
    %202 = vector.load %arg11[%c0_237, %c2_238, %c0_239] : memref<2x24x128xbf16, #tpu.memory_space<vmem>>, vector<2x16x128xbf16>
    %203 = vector.shape_cast %202 : vector<2x16x128xbf16> to vector<32x128xbf16>
    %c1_240 = arith.constant 1 : index
    %c1_241 = arith.constant 1 : index
    %c0_242 = arith.constant 0 : index
    %c0_243 = arith.constant 0 : index
    %204 = vector.load %arg4[%c1_240, %c1_241, %c0_242, %c0_243] : memref<3x5x128x128xbf16, #tpu.memory_space<vmem>>, vector<1x1x128x128xbf16>
    %205 = vector.shape_cast %204 : vector<1x1x128x128xbf16> to vector<128x128xbf16>
    %cst_244 = arith.constant dense<0.000000e+00> : vector<32x128xf32>
    %206 = tpu.matmul %203, %205, %cst_244 {dimension_numbers = #tpu.dot_dimension_numbers<[1], [0], [0], [1], [0, 0, 1, 1], [], []>} : vector<32x128xbf16>, vector<128x128xbf16>, vector<32x128xf32> -> vector<32x128xf32>
    %207 = arith.addf %201, %206 : vector<32x128xf32>
    %c0_245 = arith.constant 0 : index
    %c3_246 = arith.constant 3 : index
    %c0_247 = arith.constant 0 : index
    %208 = vector.load %arg11[%c0_245, %c3_246, %c0_247] : memref<2x24x128xbf16, #tpu.memory_space<vmem>>, vector<2x16x128xbf16>
    %209 = vector.shape_cast %208 : vector<2x16x128xbf16> to vector<32x128xbf16>
    %c1_248 = arith.constant 1 : index
    %c2_249 = arith.constant 2 : index
    %c0_250 = arith.constant 0 : index
    %c0_251 = arith.constant 0 : index
    %210 = vector.load %arg4[%c1_248, %c2_249, %c0_250, %c0_251] : memref<3x5x128x128xbf16, #tpu.memory_space<vmem>>, vector<1x1x128x128xbf16>
    %211 = vector.shape_cast %210 : vector<1x1x128x128xbf16> to vector<128x128xbf16>
    %cst_252 = arith.constant dense<0.000000e+00> : vector<32x128xf32>
    %212 = tpu.matmul %209, %211, %cst_252 {dimension_numbers = #tpu.dot_dimension_numbers<[1], [0], [0], [1], [0, 0, 1, 1], [], []>} : vector<32x128xbf16>, vector<128x128xbf16>, vector<32x128xf32> -> vector<32x128xf32>
    %213 = arith.addf %207, %212 : vector<32x128xf32>
    %c0_253 = arith.constant 0 : index
    %c4_254 = arith.constant 4 : index
    %c0_255 = arith.constant 0 : index
    %214 = vector.load %arg11[%c0_253, %c4_254, %c0_255] : memref<2x24x128xbf16, #tpu.memory_space<vmem>>, vector<2x16x128xbf16>
    %215 = vector.shape_cast %214 : vector<2x16x128xbf16> to vector<32x128xbf16>
    %c1_256 = arith.constant 1 : index
    %c3_257 = arith.constant 3 : index
    %c0_258 = arith.constant 0 : index
    %c0_259 = arith.constant 0 : index
    %216 = vector.load %arg4[%c1_256, %c3_257, %c0_258, %c0_259] : memref<3x5x128x128xbf16, #tpu.memory_space<vmem>>, vector<1x1x128x128xbf16>
    %217 = vector.shape_cast %216 : vector<1x1x128x128xbf16> to vector<128x128xbf16>
    %cst_260 = arith.constant dense<0.000000e+00> : vector<32x128xf32>
    %218 = tpu.matmul %215, %217, %cst_260 {dimension_numbers = #tpu.dot_dimension_numbers<[1], [0], [0], [1], [0, 0, 1, 1], [], []>} : vector<32x128xbf16>, vector<128x128xbf16>, vector<32x128xf32> -> vector<32x128xf32>
    %219 = arith.addf %213, %218 : vector<32x128xf32>
    %c0_261 = arith.constant 0 : index
    %c5_262 = arith.constant 5 : index
    %c0_263 = arith.constant 0 : index
    %220 = vector.load %arg11[%c0_261, %c5_262, %c0_263] : memref<2x24x128xbf16, #tpu.memory_space<vmem>>, vector<2x16x128xbf16>
    %221 = vector.shape_cast %220 : vector<2x16x128xbf16> to vector<32x128xbf16>
    %c1_264 = arith.constant 1 : index
    %c4_265 = arith.constant 4 : index
    %c0_266 = arith.constant 0 : index
    %c0_267 = arith.constant 0 : index
    %222 = vector.load %arg4[%c1_264, %c4_265, %c0_266, %c0_267] : memref<3x5x128x128xbf16, #tpu.memory_space<vmem>>, vector<1x1x128x128xbf16>
    %223 = vector.shape_cast %222 : vector<1x1x128x128xbf16> to vector<128x128xbf16>
    %cst_268 = arith.constant dense<0.000000e+00> : vector<32x128xf32>
    %224 = tpu.matmul %221, %223, %cst_268 {dimension_numbers = #tpu.dot_dimension_numbers<[1], [0], [0], [1], [0, 0, 1, 1], [], []>} : vector<32x128xbf16>, vector<128x128xbf16>, vector<32x128xf32> -> vector<32x128xf32>
    %225 = arith.addf %219, %224 : vector<32x128xf32>
    %c1_269 = arith.constant 1 : index
    %c0_270 = arith.constant 0 : index
    %c0_271 = arith.constant 0 : index
    %226 = vector.load %arg5[%c1_269, %c0_270, %c0_271] : memref<3x1x128xf32, #tpu.memory_space<vmem>>, vector<1x1x128xf32>
    %227 = vector.shape_cast %226 : vector<1x1x128xf32> to vector<1x128xf32>
    %228 = vector.broadcast %227 : vector<1x128xf32> to vector<32x128xf32>
    %229 = arith.addf %225, %228 : vector<32x128xf32>
    %cst_272 = arith.constant 0.000000e+00 : f32
    %230 = vector.broadcast %cst_272 : f32 to vector<32x128xf32>
    %231 = arith.maximumf %229, %230 : vector<32x128xf32>
    %232 = vector.shape_cast %231 : vector<32x128xf32> to vector<2x16x128xf32>
    %233 = arith.truncf %232 : vector<2x16x128xf32> to vector<2x16x128xbf16>
    %c0_273 = arith.constant 0 : index
    %c3_274 = arith.constant 3 : index
    %c0_275 = arith.constant 0 : index
    %234 = vector.load %arg11[%c0_273, %c3_274, %c0_275] : memref<2x24x128xbf16, #tpu.memory_space<vmem>>, vector<2x16x128xbf16>
    tpu.vector_store %arg11[%c0_273, %c3_274, %c0_275], %233 {strides = array<i32>} : memref<2x24x128xbf16, #tpu.memory_space<vmem>>, vector<2x16x128xbf16>,
    %cst_276 = arith.constant 0.000000e+00 : f32
    %235 = vector.broadcast %cst_276 : f32 to vector<32x128xf32>
    %c0_277 = arith.constant 0 : index
    %c2_278 = arith.constant 2 : index
    %c0_279 = arith.constant 0 : index
    %236 = vector.load %arg11[%c0_277, %c2_278, %c0_279] : memref<2x24x128xbf16, #tpu.memory_space<vmem>>, vector<2x16x128xbf16>
    %237 = vector.shape_cast %236 : vector<2x16x128xbf16> to vector<32x128xbf16>
    %c1_280 = arith.constant 1 : index
    %c0_281 = arith.constant 0 : index
    %c0_282 = arith.constant 0 : index
    %c0_283 = arith.constant 0 : index
    %238 = vector.load %arg6[%c1_280, %c0_281, %c0_282, %c0_283] : memref<3x3x128x128xbf16, #tpu.memory_space<vmem>>, vector<1x1x128x128xbf16>
    %239 = vector.shape_cast %238 : vector<1x1x128x128xbf16> to vector<128x128xbf16>
    %cst_284 = arith.constant dense<0.000000e+00> : vector<32x128xf32>
    %240 = tpu.matmul %237, %239, %cst_284 {dimension_numbers = #tpu.dot_dimension_numbers<[1], [0], [0], [1], [0, 0, 1, 1], [], []>} : vector<32x128xbf16>, vector<128x128xbf16>, vector<32x128xf32> -> vector<32x128xf32>
    %241 = arith.addf %235, %240 : vector<32x128xf32>
    %c0_285 = arith.constant 0 : index
    %c3_286 = arith.constant 3 : index
    %c0_287 = arith.constant 0 : index
    %242 = vector.load %arg11[%c0_285, %c3_286, %c0_287] : memref<2x24x128xbf16, #tpu.memory_space<vmem>>, vector<2x16x128xbf16>
    %243 = vector.shape_cast %242 : vector<2x16x128xbf16> to vector<32x128xbf16>
    %c1_288 = arith.constant 1 : index
    %c1_289 = arith.constant 1 : index
    %c0_290 = arith.constant 0 : index
    %c0_291 = arith.constant 0 : index
    %244 = vector.load %arg6[%c1_288, %c1_289, %c0_290, %c0_291] : memref<3x3x128x128xbf16, #tpu.memory_space<vmem>>, vector<1x1x128x128xbf16>
    %245 = vector.shape_cast %244 : vector<1x1x128x128xbf16> to vector<128x128xbf16>
    %cst_292 = arith.constant dense<0.000000e+00> : vector<32x128xf32>
    %246 = tpu.matmul %243, %245, %cst_292 {dimension_numbers = #tpu.dot_dimension_numbers<[1], [0], [0], [1], [0, 0, 1, 1], [], []>} : vector<32x128xbf16>, vector<128x128xbf16>, vector<32x128xf32> -> vector<32x128xf32>
    %247 = arith.addf %241, %246 : vector<32x128xf32>
    %c0_293 = arith.constant 0 : index
    %c4_294 = arith.constant 4 : index
    %c0_295 = arith.constant 0 : index
    %248 = vector.load %arg11[%c0_293, %c4_294, %c0_295] : memref<2x24x128xbf16, #tpu.memory_space<vmem>>, vector<2x16x128xbf16>
    %249 = vector.shape_cast %248 : vector<2x16x128xbf16> to vector<32x128xbf16>
    %c1_296 = arith.constant 1 : index
    %c2_297 = arith.constant 2 : index
    %c0_298 = arith.constant 0 : index
    %c0_299 = arith.constant 0 : index
    %250 = vector.load %arg6[%c1_296, %c2_297, %c0_298, %c0_299] : memref<3x3x128x128xbf16, #tpu.memory_space<vmem>>, vector<1x1x128x128xbf16>
    %251 = vector.shape_cast %250 : vector<1x1x128x128xbf16> to vector<128x128xbf16>
    %cst_300 = arith.constant dense<0.000000e+00> : vector<32x128xf32>
    %252 = tpu.matmul %249, %251, %cst_300 {dimension_numbers = #tpu.dot_dimension_numbers<[1], [0], [0], [1], [0, 0, 1, 1], [], []>} : vector<32x128xbf16>, vector<128x128xbf16>, vector<32x128xf32> -> vector<32x128xf32>
    %253 = arith.addf %247, %252 : vector<32x128xf32>
    %c1_301 = arith.constant 1 : index
    %c0_302 = arith.constant 0 : index
    %c0_303 = arith.constant 0 : index
    %254 = vector.load %arg7[%c1_301, %c0_302, %c0_303] : memref<3x1x128xf32, #tpu.memory_space<vmem>>, vector<1x1x128xf32>
    %255 = vector.shape_cast %254 : vector<1x1x128xf32> to vector<1x128xf32>
    %256 = vector.broadcast %255 : vector<1x128xf32> to vector<32x128xf32>
    %257 = arith.addf %253, %256 : vector<32x128xf32>
    %258 = arith.addf %257, %188 : vector<32x128xf32>
    %cst_304 = arith.constant 0.000000e+00 : f32
    %259 = vector.broadcast %cst_304 : f32 to vector<32x128xf32>
    %260 = arith.maximumf %258, %259 : vector<32x128xf32>
    %261 = vector.shape_cast %260 : vector<32x128xf32> to vector<2x16x128xf32>
    %262 = arith.truncf %261 : vector<2x16x128xf32> to vector<2x16x128xbf16>
    %c0_305 = arith.constant 0 : index
    %c3_306 = arith.constant 3 : index
    %c0_307 = arith.constant 0 : index
    %263 = vector.load %arg11[%c0_305, %c3_306, %c0_307] : memref<2x24x128xbf16, #tpu.memory_space<vmem>>, vector<2x16x128xbf16>
    tpu.vector_store %arg11[%c0_305, %c3_306, %c0_307], %262 {strides = array<i32>} : memref<2x24x128xbf16, #tpu.memory_space<vmem>>, vector<2x16x128xbf16>,
    %cst_308 = arith.constant 0.000000e+00 : f32
    %264 = vector.broadcast %cst_308 : f32 to vector<32x256xf32>
    %c0_309 = arith.constant 0 : index
    %c0_310 = arith.constant 0 : index
    %c0_311 = arith.constant 0 : index
    %265 = vector.load %arg11[%c0_309, %c0_310, %c0_311] : memref<2x24x128xbf16, #tpu.memory_space<vmem>>, vector<2x16x128xbf16>
    %266 = vector.shape_cast %265 : vector<2x16x128xbf16> to vector<32x128xbf16>
    %c2_312 = arith.constant 2 : index
    %c0_313 = arith.constant 0 : index
    %c0_314 = arith.constant 0 : index
    %c0_315 = arith.constant 0 : index
    %267 = vector.load %arg2[%c2_312, %c0_313, %c0_314, %c0_315] : memref<3x8x128x256xbf16, #tpu.memory_space<vmem>>, vector<1x1x128x256xbf16>
    %268 = vector.shape_cast %267 : vector<1x1x128x256xbf16> to vector<128x256xbf16>
    %cst_316 = arith.constant dense<0.000000e+00> : vector<32x256xf32>
    %269 = tpu.matmul %266, %268, %cst_316 {dimension_numbers = #tpu.dot_dimension_numbers<[1], [0], [0], [1], [0, 0, 1, 1], [], []>} : vector<32x128xbf16>, vector<128x256xbf16>, vector<32x256xf32> -> vector<32x256xf32>
    %270 = arith.addf %264, %269 : vector<32x256xf32>
    %c0_317 = arith.constant 0 : index
    %c1_318 = arith.constant 1 : index
    %c0_319 = arith.constant 0 : index
    %271 = vector.load %arg11[%c0_317, %c1_318, %c0_319] : memref<2x24x128xbf16, #tpu.memory_space<vmem>>, vector<2x16x128xbf16>
    %272 = vector.shape_cast %271 : vector<2x16x128xbf16> to vector<32x128xbf16>
    %c2_320 = arith.constant 2 : index
    %c1_321 = arith.constant 1 : index
    %c0_322 = arith.constant 0 : index
    %c0_323 = arith.constant 0 : index
    %273 = vector.load %arg2[%c2_320, %c1_321, %c0_322, %c0_323] : memref<3x8x128x256xbf16, #tpu.memory_space<vmem>>, vector<1x1x128x256xbf16>
    %274 = vector.shape_cast %273 : vector<1x1x128x256xbf16> to vector<128x256xbf16>
    %cst_324 = arith.constant dense<0.000000e+00> : vector<32x256xf32>
    %275 = tpu.matmul %272, %274, %cst_324 {dimension_numbers = #tpu.dot_dimension_numbers<[1], [0], [0], [1], [0, 0, 1, 1], [], []>} : vector<32x128xbf16>, vector<128x256xbf16>, vector<32x256xf32> -> vector<32x256xf32>
    %276 = arith.addf %270, %275 : vector<32x256xf32>
    %c0_325 = arith.constant 0 : index
    %c2_326 = arith.constant 2 : index
    %c0_327 = arith.constant 0 : index
    %277 = vector.load %arg11[%c0_325, %c2_326, %c0_327] : memref<2x24x128xbf16, #tpu.memory_space<vmem>>, vector<2x16x128xbf16>
    %278 = vector.shape_cast %277 : vector<2x16x128xbf16> to vector<32x128xbf16>
    %c2_328 = arith.constant 2 : index
    %c2_329 = arith.constant 2 : index
    %c0_330 = arith.constant 0 : index
    %c0_331 = arith.constant 0 : index
    %279 = vector.load %arg2[%c2_328, %c2_329, %c0_330, %c0_331] : memref<3x8x128x256xbf16, #tpu.memory_space<vmem>>, vector<1x1x128x256xbf16>
    %280 = vector.shape_cast %279 : vector<1x1x128x256xbf16> to vector<128x256xbf16>
    %cst_332 = arith.constant dense<0.000000e+00> : vector<32x256xf32>
    %281 = tpu.matmul %278, %280, %cst_332 {dimension_numbers = #tpu.dot_dimension_numbers<[1], [0], [0], [1], [0, 0, 1, 1], [], []>} : vector<32x128xbf16>, vector<128x256xbf16>, vector<32x256xf32> -> vector<32x256xf32>
    %282 = arith.addf %276, %281 : vector<32x256xf32>
    %c0_333 = arith.constant 0 : index
    %c3_334 = arith.constant 3 : index
    %c0_335 = arith.constant 0 : index
    %283 = vector.load %arg11[%c0_333, %c3_334, %c0_335] : memref<2x24x128xbf16, #tpu.memory_space<vmem>>, vector<2x16x128xbf16>
    %284 = vector.shape_cast %283 : vector<2x16x128xbf16> to vector<32x128xbf16>
    %c2_336 = arith.constant 2 : index
    %c3_337 = arith.constant 3 : index
    %c0_338 = arith.constant 0 : index
    %c0_339 = arith.constant 0 : index
    %285 = vector.load %arg2[%c2_336, %c3_337, %c0_338, %c0_339] : memref<3x8x128x256xbf16, #tpu.memory_space<vmem>>, vector<1x1x128x256xbf16>
    %286 = vector.shape_cast %285 : vector<1x1x128x256xbf16> to vector<128x256xbf16>
    %cst_340 = arith.constant dense<0.000000e+00> : vector<32x256xf32>
    %287 = tpu.matmul %284, %286, %cst_340 {dimension_numbers = #tpu.dot_dimension_numbers<[1], [0], [0], [1], [0, 0, 1, 1], [], []>} : vector<32x128xbf16>, vector<128x256xbf16>, vector<32x256xf32> -> vector<32x256xf32>
    %288 = arith.addf %282, %287 : vector<32x256xf32>
    %c0_341 = arith.constant 0 : index
    %c4_342 = arith.constant 4 : index
    %c0_343 = arith.constant 0 : index
    %289 = vector.load %arg11[%c0_341, %c4_342, %c0_343] : memref<2x24x128xbf16, #tpu.memory_space<vmem>>, vector<2x16x128xbf16>
    %290 = vector.shape_cast %289 : vector<2x16x128xbf16> to vector<32x128xbf16>
    %c2_344 = arith.constant 2 : index
    %c4_345 = arith.constant 4 : index
    %c0_346 = arith.constant 0 : index
    %c0_347 = arith.constant 0 : index
    %291 = vector.load %arg2[%c2_344, %c4_345, %c0_346, %c0_347] : memref<3x8x128x256xbf16, #tpu.memory_space<vmem>>, vector<1x1x128x256xbf16>
    %292 = vector.shape_cast %291 : vector<1x1x128x256xbf16> to vector<128x256xbf16>
    %cst_348 = arith.constant dense<0.000000e+00> : vector<32x256xf32>
    %293 = tpu.matmul %290, %292, %cst_348 {dimension_numbers = #tpu.dot_dimension_numbers<[1], [0], [0], [1], [0, 0, 1, 1], [], []>} : vector<32x128xbf16>, vector<128x256xbf16>, vector<32x256xf32> -> vector<32x256xf32>
    %294 = arith.addf %288, %293 : vector<32x256xf32>
    %c0_349 = arith.constant 0 : index
    %c5_350 = arith.constant 5 : index
    %c0_351 = arith.constant 0 : index
    %295 = vector.load %arg11[%c0_349, %c5_350, %c0_351] : memref<2x24x128xbf16, #tpu.memory_space<vmem>>, vector<2x16x128xbf16>
    %296 = vector.shape_cast %295 : vector<2x16x128xbf16> to vector<32x128xbf16>
    %c2_352 = arith.constant 2 : index
    %c5_353 = arith.constant 5 : index
    %c0_354 = arith.constant 0 : index
    %c0_355 = arith.constant 0 : index
    %297 = vector.load %arg2[%c2_352, %c5_353, %c0_354, %c0_355] : memref<3x8x128x256xbf16, #tpu.memory_space<vmem>>, vector<1x1x128x256xbf16>
    %298 = vector.shape_cast %297 : vector<1x1x128x256xbf16> to vector<128x256xbf16>
    %cst_356 = arith.constant dense<0.000000e+00> : vector<32x256xf32>
    %299 = tpu.matmul %296, %298, %cst_356 {dimension_numbers = #tpu.dot_dimension_numbers<[1], [0], [0], [1], [0, 0, 1, 1], [], []>} : vector<32x128xbf16>, vector<128x256xbf16>, vector<32x256xf32> -> vector<32x256xf32>
    %300 = arith.addf %294, %299 : vector<32x256xf32>
    %c0_357 = arith.constant 0 : index
    %c6_358 = arith.constant 6 : index
    %c0_359 = arith.constant 0 : index
    %301 = vector.load %arg11[%c0_357, %c6_358, %c0_359] : memref<2x24x128xbf16, #tpu.memory_space<vmem>>, vector<2x16x128xbf16>
    %302 = vector.shape_cast %301 : vector<2x16x128xbf16> to vector<32x128xbf16>
    %c2_360 = arith.constant 2 : index
    %c6_361 = arith.constant 6 : index
    %c0_362 = arith.constant 0 : index
    %c0_363 = arith.constant 0 : index
    %303 = vector.load %arg2[%c2_360, %c6_361, %c0_362, %c0_363] : memref<3x8x128x256xbf16, #tpu.memory_space<vmem>>, vector<1x1x128x256xbf16>
    %304 = vector.shape_cast %303 : vector<1x1x128x256xbf16> to vector<128x256xbf16>
    %cst_364 = arith.constant dense<0.000000e+00> : vector<32x256xf32>
    %305 = tpu.matmul %302, %304, %cst_364 {dimension_numbers = #tpu.dot_dimension_numbers<[1], [0], [0], [1], [0, 0, 1, 1], [], []>} : vector<32x128xbf16>, vector<128x256xbf16>, vector<32x256xf32> -> vector<32x256xf32>
    %306 = arith.addf %300, %305 : vector<32x256xf32>
    %c0_365 = arith.constant 0 : index
    %c7_366 = arith.constant 7 : index
    %c0_367 = arith.constant 0 : index
    %307 = vector.load %arg11[%c0_365, %c7_366, %c0_367] : memref<2x24x128xbf16, #tpu.memory_space<vmem>>, vector<2x16x128xbf16>
    %308 = vector.shape_cast %307 : vector<2x16x128xbf16> to vector<32x128xbf16>
    %c2_368 = arith.constant 2 : index
    %c7_369 = arith.constant 7 : index
    %c0_370 = arith.constant 0 : index
    %c0_371 = arith.constant 0 : index
    %309 = vector.load %arg2[%c2_368, %c7_369, %c0_370, %c0_371] : memref<3x8x128x256xbf16, #tpu.memory_space<vmem>>, vector<1x1x128x256xbf16>
    %310 = vector.shape_cast %309 : vector<1x1x128x256xbf16> to vector<128x256xbf16>
    %cst_372 = arith.constant dense<0.000000e+00> : vector<32x256xf32>
    %311 = tpu.matmul %308, %310, %cst_372 {dimension_numbers = #tpu.dot_dimension_numbers<[1], [0], [0], [1], [0, 0, 1, 1], [], []>} : vector<32x128xbf16>, vector<128x256xbf16>, vector<32x256xf32> -> vector<32x256xf32>
    %312 = arith.addf %306, %311 : vector<32x256xf32>
    %c2_373 = arith.constant 2 : index
    %c0_374 = arith.constant 0 : index
    %c0_375 = arith.constant 0 : index
    %313 = vector.load %arg3[%c2_373, %c0_374, %c0_375] : memref<3x1x256xf32, #tpu.memory_space<vmem>>, vector<1x1x256xf32>
    %314 = vector.shape_cast %313 : vector<1x1x256xf32> to vector<1x256xf32>
    %315 = vector.broadcast %314 : vector<1x256xf32> to vector<32x256xf32>
    %316 = arith.addf %312, %315 : vector<32x256xf32>
    %317 = vector.extract_strided_slice %316 {offsets = [0, 128], sizes = [32, 128], strides = [1, 1]} : vector<32x256xf32> to vector<32x128xf32>
    %318 = vector.extract_strided_slice %316 {offsets = [0, 0], sizes = [32, 128], strides = [1, 1]} : vector<32x256xf32> to vector<32x128xf32>
    %cst_376 = arith.constant 0.000000e+00 : f32
    %319 = vector.broadcast %cst_376 : f32 to vector<32x128xf32>
    %320 = arith.maximumf %318, %319 : vector<32x128xf32>
    %321 = vector.shape_cast %320 : vector<32x128xf32> to vector<2x16x128xf32>
    %322 = arith.truncf %321 : vector<2x16x128xf32> to vector<2x16x128xbf16>
    %c0_377 = arith.constant 0 : index
    %c3_378 = arith.constant 3 : index
    %c0_379 = arith.constant 0 : index
    %323 = vector.load %arg11[%c0_377, %c3_378, %c0_379] : memref<2x24x128xbf16, #tpu.memory_space<vmem>>, vector<2x16x128xbf16>
    tpu.vector_store %arg11[%c0_377, %c3_378, %c0_379], %322 {strides = array<i32>} : memref<2x24x128xbf16, #tpu.memory_space<vmem>>, vector<2x16x128xbf16>,
    %cst_380 = arith.constant 0.000000e+00 : f32
    %324 = vector.broadcast %cst_380 : f32 to vector<32x128xf32>
    %c0_381 = arith.constant 0 : index
    %c1_382 = arith.constant 1 : index
    %c0_383 = arith.constant 0 : index
    %325 = vector.load %arg11[%c0_381, %c1_382, %c0_383] : memref<2x24x128xbf16, #tpu.memory_space<vmem>>, vector<2x16x128xbf16>
    %326 = vector.shape_cast %325 : vector<2x16x128xbf16> to vector<32x128xbf16>
    %c2_384 = arith.constant 2 : index
    %c0_385 = arith.constant 0 : index
    %c0_386 = arith.constant 0 : index
    %c0_387 = arith.constant 0 : index
    %327 = vector.load %arg4[%c2_384, %c0_385, %c0_386, %c0_387] : memref<3x5x128x128xbf16, #tpu.memory_space<vmem>>, vector<1x1x128x128xbf16>
    %328 = vector.shape_cast %327 : vector<1x1x128x128xbf16> to vector<128x128xbf16>
    %cst_388 = arith.constant dense<0.000000e+00> : vector<32x128xf32>
    %329 = tpu.matmul %326, %328, %cst_388 {dimension_numbers = #tpu.dot_dimension_numbers<[1], [0], [0], [1], [0, 0, 1, 1], [], []>} : vector<32x128xbf16>, vector<128x128xbf16>, vector<32x128xf32> -> vector<32x128xf32>
    %330 = arith.addf %324, %329 : vector<32x128xf32>
    %c0_389 = arith.constant 0 : index
    %c2_390 = arith.constant 2 : index
    %c0_391 = arith.constant 0 : index
    %331 = vector.load %arg11[%c0_389, %c2_390, %c0_391] : memref<2x24x128xbf16, #tpu.memory_space<vmem>>, vector<2x16x128xbf16>
    %332 = vector.shape_cast %331 : vector<2x16x128xbf16> to vector<32x128xbf16>
    %c2_392 = arith.constant 2 : index
    %c1_393 = arith.constant 1 : index
    %c0_394 = arith.constant 0 : index
    %c0_395 = arith.constant 0 : index
    %333 = vector.load %arg4[%c2_392, %c1_393, %c0_394, %c0_395] : memref<3x5x128x128xbf16, #tpu.memory_space<vmem>>, vector<1x1x128x128xbf16>
    %334 = vector.shape_cast %333 : vector<1x1x128x128xbf16> to vector<128x128xbf16>
    %cst_396 = arith.constant dense<0.000000e+00> : vector<32x128xf32>
    %335 = tpu.matmul %332, %334, %cst_396 {dimension_numbers = #tpu.dot_dimension_numbers<[1], [0], [0], [1], [0, 0, 1, 1], [], []>} : vector<32x128xbf16>, vector<128x128xbf16>, vector<32x128xf32> -> vector<32x128xf32>
    %336 = arith.addf %330, %335 : vector<32x128xf32>
    %c0_397 = arith.constant 0 : index
    %c3_398 = arith.constant 3 : index
    %c0_399 = arith.constant 0 : index
    %337 = vector.load %arg11[%c0_397, %c3_398, %c0_399] : memref<2x24x128xbf16, #tpu.memory_space<vmem>>, vector<2x16x128xbf16>
    %338 = vector.shape_cast %337 : vector<2x16x128xbf16> to vector<32x128xbf16>
    %c2_400 = arith.constant 2 : index
    %c2_401 = arith.constant 2 : index
    %c0_402 = arith.constant 0 : index
    %c0_403 = arith.constant 0 : index
    %339 = vector.load %arg4[%c2_400, %c2_401, %c0_402, %c0_403] : memref<3x5x128x128xbf16, #tpu.memory_space<vmem>>, vector<1x1x128x128xbf16>
    %340 = vector.shape_cast %339 : vector<1x1x128x128xbf16> to vector<128x128xbf16>
    %cst_404 = arith.constant dense<0.000000e+00> : vector<32x128xf32>
    %341 = tpu.matmul %338, %340, %cst_404 {dimension_numbers = #tpu.dot_dimension_numbers<[1], [0], [0], [1], [0, 0, 1, 1], [], []>} : vector<32x128xbf16>, vector<128x128xbf16>, vector<32x128xf32> -> vector<32x128xf32>
    %342 = arith.addf %336, %341 : vector<32x128xf32>
    %c0_405 = arith.constant 0 : index
    %c4_406 = arith.constant 4 : index
    %c0_407 = arith.constant 0 : index
    %343 = vector.load %arg11[%c0_405, %c4_406, %c0_407] : memref<2x24x128xbf16, #tpu.memory_space<vmem>>, vector<2x16x128xbf16>
    %344 = vector.shape_cast %343 : vector<2x16x128xbf16> to vector<32x128xbf16>
    %c2_408 = arith.constant 2 : index
    %c3_409 = arith.constant 3 : index
    %c0_410 = arith.constant 0 : index
    %c0_411 = arith.constant 0 : index
    %345 = vector.load %arg4[%c2_408, %c3_409, %c0_410, %c0_411] : memref<3x5x128x128xbf16, #tpu.memory_space<vmem>>, vector<1x1x128x128xbf16>
    %346 = vector.shape_cast %345 : vector<1x1x128x128xbf16> to vector<128x128xbf16>
    %cst_412 = arith.constant dense<0.000000e+00> : vector<32x128xf32>
    %347 = tpu.matmul %344, %346, %cst_412 {dimension_numbers = #tpu.dot_dimension_numbers<[1], [0], [0], [1], [0, 0, 1, 1], [], []>} : vector<32x128xbf16>, vector<128x128xbf16>, vector<32x128xf32> -> vector<32x128xf32>
    %348 = arith.addf %342, %347 : vector<32x128xf32>
    %c0_413 = arith.constant 0 : index
    %c5_414 = arith.constant 5 : index
    %c0_415 = arith.constant 0 : index
    %349 = vector.load %arg11[%c0_413, %c5_414, %c0_415] : memref<2x24x128xbf16, #tpu.memory_space<vmem>>, vector<2x16x128xbf16>
    %350 = vector.shape_cast %349 : vector<2x16x128xbf16> to vector<32x128xbf16>
    %c2_416 = arith.constant 2 : index
    %c4_417 = arith.constant 4 : index
    %c0_418 = arith.constant 0 : index
    %c0_419 = arith.constant 0 : index
    %351 = vector.load %arg4[%c2_416, %c4_417, %c0_418, %c0_419] : memref<3x5x128x128xbf16, #tpu.memory_space<vmem>>, vector<1x1x128x128xbf16>
    %352 = vector.shape_cast %351 : vector<1x1x128x128xbf16> to vector<128x128xbf16>
    %cst_420 = arith.constant dense<0.000000e+00> : vector<32x128xf32>
    %353 = tpu.matmul %350, %352, %cst_420 {dimension_numbers = #tpu.dot_dimension_numbers<[1], [0], [0], [1], [0, 0, 1, 1], [], []>} : vector<32x128xbf16>, vector<128x128xbf16>, vector<32x128xf32> -> vector<32x128xf32>
    %354 = arith.addf %348, %353 : vector<32x128xf32>
    %c2_421 = arith.constant 2 : index
    %c0_422 = arith.constant 0 : index
    %c0_423 = arith.constant 0 : index
    %355 = vector.load %arg5[%c2_421, %c0_422, %c0_423] : memref<3x1x128xf32, #tpu.memory_space<vmem>>, vector<1x1x128xf32>
    %356 = vector.shape_cast %355 : vector<1x1x128xf32> to vector<1x128xf32>
    %357 = vector.broadcast %356 : vector<1x128xf32> to vector<32x128xf32>
    %358 = arith.addf %354, %357 : vector<32x128xf32>
    %cst_424 = arith.constant 0.000000e+00 : f32
    %359 = vector.broadcast %cst_424 : f32 to vector<32x128xf32>
    %360 = arith.maximumf %358, %359 : vector<32x128xf32>
    %361 = vector.shape_cast %360 : vector<32x128xf32> to vector<2x16x128xf32>
    %362 = arith.truncf %361 : vector<2x16x128xf32> to vector<2x16x128xbf16>
    %c0_425 = arith.constant 0 : index
    %c3_426 = arith.constant 3 : index
    %c0_427 = arith.constant 0 : index
    %363 = vector.load %arg11[%c0_425, %c3_426, %c0_427] : memref<2x24x128xbf16, #tpu.memory_space<vmem>>, vector<2x16x128xbf16>
    tpu.vector_store %arg11[%c0_425, %c3_426, %c0_427], %362 {strides = array<i32>} : memref<2x24x128xbf16, #tpu.memory_space<vmem>>, vector<2x16x128xbf16>,
    %cst_428 = arith.constant 0.000000e+00 : f32
    %364 = vector.broadcast %cst_428 : f32 to vector<32x128xf32>
    %c0_429 = arith.constant 0 : index
    %c2_430 = arith.constant 2 : index
    %c0_431 = arith.constant 0 : index
    %365 = vector.load %arg11[%c0_429, %c2_430, %c0_431] : memref<2x24x128xbf16, #tpu.memory_space<vmem>>, vector<2x16x128xbf16>
    %366 = vector.shape_cast %365 : vector<2x16x128xbf16> to vector<32x128xbf16>
    %c2_432 = arith.constant 2 : index
    %c0_433 = arith.constant 0 : index
    %c0_434 = arith.constant 0 : index
    %c0_435 = arith.constant 0 : index
    %367 = vector.load %arg6[%c2_432, %c0_433, %c0_434, %c0_435] : memref<3x3x128x128xbf16, #tpu.memory_space<vmem>>, vector<1x1x128x128xbf16>
    %368 = vector.shape_cast %367 : vector<1x1x128x128xbf16> to vector<128x128xbf16>
    %cst_436 = arith.constant dense<0.000000e+00> : vector<32x128xf32>
    %369 = tpu.matmul %366, %368, %cst_436 {dimension_numbers = #tpu.dot_dimension_numbers<[1], [0], [0], [1], [0, 0, 1, 1], [], []>} : vector<32x128xbf16>, vector<128x128xbf16>, vector<32x128xf32> -> vector<32x128xf32>
    %370 = arith.addf %364, %369 : vector<32x128xf32>
    %c0_437 = arith.constant 0 : index
    %c3_438 = arith.constant 3 : index
    %c0_439 = arith.constant 0 : index
    %371 = vector.load %arg11[%c0_437, %c3_438, %c0_439] : memref<2x24x128xbf16, #tpu.memory_space<vmem>>, vector<2x16x128xbf16>
    %372 = vector.shape_cast %371 : vector<2x16x128xbf16> to vector<32x128xbf16>
    %c2_440 = arith.constant 2 : index
    %c1_441 = arith.constant 1 : index
    %c0_442 = arith.constant 0 : index
    %c0_443 = arith.constant 0 : index
    %373 = vector.load %arg6[%c2_440, %c1_441, %c0_442, %c0_443] : memref<3x3x128x128xbf16, #tpu.memory_space<vmem>>, vector<1x1x128x128xbf16>
    %374 = vector.shape_cast %373 : vector<1x1x128x128xbf16> to vector<128x128xbf16>
    %cst_444 = arith.constant dense<0.000000e+00> : vector<32x128xf32>
    %375 = tpu.matmul %372, %374, %cst_444 {dimension_numbers = #tpu.dot_dimension_numbers<[1], [0], [0], [1], [0, 0, 1, 1], [], []>} : vector<32x128xbf16>, vector<128x128xbf16>, vector<32x128xf32> -> vector<32x128xf32>
    %376 = arith.addf %370, %375 : vector<32x128xf32>
    %c0_445 = arith.constant 0 : index
    %c4_446 = arith.constant 4 : index
    %c0_447 = arith.constant 0 : index
    %377 = vector.load %arg11[%c0_445, %c4_446, %c0_447] : memref<2x24x128xbf16, #tpu.memory_space<vmem>>, vector<2x16x128xbf16>
    %378 = vector.shape_cast %377 : vector<2x16x128xbf16> to vector<32x128xbf16>
    %c2_448 = arith.constant 2 : index
    %c2_449 = arith.constant 2 : index
    %c0_450 = arith.constant 0 : index
    %c0_451 = arith.constant 0 : index
    %379 = vector.load %arg6[%c2_448, %c2_449, %c0_450, %c0_451] : memref<3x3x128x128xbf16, #tpu.memory_space<vmem>>, vector<1x1x128x128xbf16>
    %380 = vector.shape_cast %379 : vector<1x1x128x128xbf16> to vector<128x128xbf16>
    %cst_452 = arith.constant dense<0.000000e+00> : vector<32x128xf32>
    %381 = tpu.matmul %378, %380, %cst_452 {dimension_numbers = #tpu.dot_dimension_numbers<[1], [0], [0], [1], [0, 0, 1, 1], [], []>} : vector<32x128xbf16>, vector<128x128xbf16>, vector<32x128xf32> -> vector<32x128xf32>
    %382 = arith.addf %376, %381 : vector<32x128xf32>
    %c2_453 = arith.constant 2 : index
    %c0_454 = arith.constant 0 : index
    %c0_455 = arith.constant 0 : index
    %383 = vector.load %arg7[%c2_453, %c0_454, %c0_455] : memref<3x1x128xf32, #tpu.memory_space<vmem>>, vector<1x1x128xf32>
    %384 = vector.shape_cast %383 : vector<1x1x128xf32> to vector<1x128xf32>
    %385 = vector.broadcast %384 : vector<1x128xf32> to vector<32x128xf32>
    %386 = arith.addf %382, %385 : vector<32x128xf32>
    %387 = arith.addf %386, %317 : vector<32x128xf32>
    %cst_456 = arith.constant 0.000000e+00 : f32
    %388 = vector.broadcast %cst_456 : f32 to vector<32x128xf32>
    %389 = arith.maximumf %387, %388 : vector<32x128xf32>
    %390 = vector.shape_cast %389 : vector<32x128xf32> to vector<2x16x128xf32>
    %cst_457 = arith.constant dense<0.000000e+00> : vector<2x128xf32>
    %391 = vector.multi_reduction <add>, %390, %cst_457 [1] : vector<2x16x128xf32> to vector<2x128xf32>
    %cst_458 = arith.constant 1.600000e+01 : f32
    %392 = vector.broadcast %cst_458 : f32 to vector<2x128xf32>
    %393 = arith.divf %391, %392 : vector<2x128xf32>
    %394 = arith.truncf %393 : vector<2x128xf32> to vector<2x128xbf16>
    %c0_459 = arith.constant 0 : index
    %c0_460 = arith.constant 0 : index
    %395 = vector.load %arg8[%c0_459, %c0_460] : memref<128x128xbf16, #tpu.memory_space<vmem>>, vector<128x128xbf16>
    %cst_461 = arith.constant dense<0.000000e+00> : vector<2x128xf32>
    %396 = tpu.matmul %394, %395, %cst_461 {dimension_numbers = #tpu.dot_dimension_numbers<[1], [0], [0], [1], [0, 0, 1, 1], [], []>} : vector<2x128xbf16>, vector<128x128xbf16>, vector<2x128xf32> -> vector<2x128xf32>
    %c0_462 = arith.constant 0 : index
    %c0_463 = arith.constant 0 : index
    %397 = vector.load %arg9[%c0_462, %c0_463] : memref<1x128xf32, #tpu.memory_space<vmem>>, vector<1x128xf32>
    %398 = vector.broadcast %397 : vector<1x128xf32> to vector<2x128xf32>
    %399 = arith.addf %396, %398 : vector<2x128xf32>
    %c0_464 = arith.constant 0 : index
    %c0_465 = arith.constant 0 : index
    %400 = vector.load %arg10[%c0_464, %c0_465] : memref<2x128xf32, #tpu.memory_space<vmem>>, vector<2x128xf32>
    tpu.vector_store %arg10[%c0_464, %c0_465], %399 {strides = array<i32>} : memref<2x128xf32, #tpu.memory_space<vmem>>, vector<2x128xf32>,
    return
  }
  func.func @transform_0(%arg0: i32) -> (i32, i32, i32) {
    %c0_i32 = arith.constant 0 : i32
    %c0_i32_0 = arith.constant 0 : i32
    %c0_i32_1 = arith.constant 0 : i32
    return %arg0, %c0_i32, %c0_i32_0 : i32, i32, i32
  }
  func.func @transform_1(%arg0: i32) -> (i32, i32, i32, i32) {
    %c0_i32 = arith.constant 0 : i32
    %c0_i32_0 = arith.constant 0 : i32
    %c0_i32_1 = arith.constant 0 : i32
    %c0_i32_2 = arith.constant 0 : i32
    %c0_i32_3 = arith.constant 0 : i32
    return %c0_i32, %c0_i32_0, %c0_i32_1, %c0_i32_2 : i32, i32, i32, i32
  }
  func.func @transform_2(%arg0: i32) -> (i32, i32, i32) {
    %c0_i32 = arith.constant 0 : i32
    %c0_i32_0 = arith.constant 0 : i32
    %c0_i32_1 = arith.constant 0 : i32
    %c0_i32_2 = arith.constant 0 : i32
    return %c0_i32, %c0_i32_0, %c0_i32_1 : i32, i32, i32
  }
  func.func @transform_3(%arg0: i32) -> (i32, i32, i32, i32) {
    %c0_i32 = arith.constant 0 : i32
    %c0_i32_0 = arith.constant 0 : i32
    %c0_i32_1 = arith.constant 0 : i32
    %c0_i32_2 = arith.constant 0 : i32
    %c0_i32_3 = arith.constant 0 : i32
    return %c0_i32, %c0_i32_0, %c0_i32_1, %c0_i32_2 : i32, i32, i32, i32
  }
  func.func @transform_4(%arg0: i32) -> (i32, i32, i32) {
    %c0_i32 = arith.constant 0 : i32
    %c0_i32_0 = arith.constant 0 : i32
    %c0_i32_1 = arith.constant 0 : i32
    %c0_i32_2 = arith.constant 0 : i32
    return %c0_i32, %c0_i32_0, %c0_i32_1 : i32, i32, i32
  }
  func.func @transform_5(%arg0: i32) -> (i32, i32, i32, i32) {
    %c0_i32 = arith.constant 0 : i32
    %c0_i32_0 = arith.constant 0 : i32
    %c0_i32_1 = arith.constant 0 : i32
    %c0_i32_2 = arith.constant 0 : i32
    %c0_i32_3 = arith.constant 0 : i32
    return %c0_i32, %c0_i32_0, %c0_i32_1, %c0_i32_2 : i32, i32, i32, i32
  }
  func.func @transform_6(%arg0: i32) -> (i32, i32, i32) {
    %c0_i32 = arith.constant 0 : i32
    %c0_i32_0 = arith.constant 0 : i32
    %c0_i32_1 = arith.constant 0 : i32
    %c0_i32_2 = arith.constant 0 : i32
    return %c0_i32, %c0_i32_0, %c0_i32_1 : i32, i32, i32
  }
  func.func @transform_7(%arg0: i32) -> (i32, i32) {
    %c0_i32 = arith.constant 0 : i32
    %c0_i32_0 = arith.constant 0 : i32
    %c0_i32_1 = arith.constant 0 : i32
    return %c0_i32, %c0_i32_0 : i32, i32
  }
  func.func @transform_8(%arg0: i32) -> (i32, i32) {
    %c0_i32 = arith.constant 0 : i32
    %c0_i32_0 = arith.constant 0 : i32
    %c0_i32_1 = arith.constant 0 : i32
    return %c0_i32, %c0_i32_0 : i32, i32
  }
  func.func @transform_9(%arg0: i32) -> (i32, i32) {
    %c0_i32 = arith.constant 0 : i32
    %c0_i32_0 = arith.constant 0 : i32
    return %arg0, %c0_i32 : i32, i32
  }
}

</mosaic_0001>

<bundles_post_ra>
// kernel: tpu_custom_call.1
= control target key start
LH: loop header
LB: loop body
LE: loop exit
PB: predicated region body
PF: predicated region fallthrough
CT: control target
= control target key end

     0   :  { %14 = vsyncpa [#allocation4], 0  ;;  %s13375_s0 = inlined_call_operand.hbm [shape: bf16[2,16,128], index: 0, kind: input, shape index: {}]   ;;  %s13376_s1 = inlined_call_operand.hbm [shape: bf16[3,8,128,256], index: 1, kind: input, shape index: {}]   ;;  %s13377_s2 = inlined_call_operand.hbm [shape: f32[3,1,256], index: 2, kind: input, shape index: {}]   ;;  %s13378_s3 = inlined_call_operand.hbm [shape: bf16[3,5,128,128], index: 3, kind: input, shape index: {}]   ;;  %s13379_s4 = inlined_call_operand.hbm [shape: f32[3,1,128], index: 4, kind: input, shape index: {}]   ;;  %s13380_s5 = inlined_call_operand.hbm [shape: bf16[3,3,128,128], index: 5, kind: input, shape index: {}]   ;;  %s13381_s6 = inlined_call_operand.hbm [shape: f32[3,1,128], index: 6, kind: input, shape index: {}]   ;;  %s13382_s7 = inlined_call_operand.hbm [shape: bf16[128,128], index: 7, kind: input, shape index: {}]   ;;  %s13383_s8 = inlined_call_operand.hbm [shape: f32[1,128], index: 8, kind: input, shape index: {}]   ;;  %s13384_s9 = inlined_call_operand.hbm [shape: f32[2,128], index: 9, kind: output, shape index: {}]  }
   0x1   :  { %15 = vsyncpa [#allocation7], 0 }
   0x2   :  { %16 = vsyncpa [#allocation10], 0 }
   0x3   :  { %17 = vsyncpa [#allocation13], 0 }
   0x4   :  { %18 = vsyncpa [#allocation16], 0  ;;  %s37_s11 = sshll.u32 %s13376_s1, 4  ;;  %s38_s11 = int_to_ptr.hbm [resolvable:$true] %s37_s11 }
   0x5   :  { %19 = vsyncpa [#allocation5], 0  ;;  %s11810_s12 = smov [#allocation6]   ;;  %s11811_s14 = smov 128  }
   0x6   :  { %s39_s13 = sshll.u32 %s11810_s12, 4  ;;  %s11812_s15 = smov 8   ;;  %s40_s13 = int_to_ptr.vmem [resolvable:$true] %s39_s13 }
   0x7   :  { %45 = dma.hbm_to_vmem [thread:$0]  %s38_s11, 49152, %s40_s13, [#allocation7], %s11811_s14, %s11811_s14, %s11812_s15  }
   0x8   :  { %s63_s18 = sshll.u32 %s13378_s3, 4  ;;  %s11813_s19 = smov [#allocation9]   ;;  %s64_s18 = int_to_ptr.hbm [resolvable:$true] %s63_s18 }
   0x9   :  { %s65_s20 = sshll.u32 %s11813_s19, 4  ;;  %s89_s23 = sshll.u32 %s13380_s5, 4  ;;  %s66_s20 = int_to_ptr.vmem [resolvable:$true] %s65_s20  ;;  %s90_s23 = int_to_ptr.hbm [resolvable:$true] %s89_s23 }
   0xa   :  { %s11814_s1 = smov 64   ;;  %s11815_s24 = smov 4  }
   0xb   :  { %71 = dma.hbm_to_vmem [thread:$0]  %s64_s18, 15360, %s66_s20, [#allocation10], %s11814_s1, %s11814_s1, %s11815_s24  }
   0xc   :  { %s115_s27 = sshll.u32 %s13382_s7, 4  ;;  %s11816_s28 = smov [#allocation12]   ;;  %s116_s27 = int_to_ptr.hbm [resolvable:$true] %s115_s27 }
   0xd   :  { %s91_s29 = sshll.u32 %s11816_s28, 4  ;;  %s11817_s3 = smov [#allocation15]   ;;  %s92_s29 = int_to_ptr.vmem [resolvable:$true] %s91_s29 }
   0xe   :  { %97 = dma.hbm_to_vmem [thread:$0]  %s90_s23, 9216, %s92_s29, [#allocation13], %s11814_s1, %s11814_s1, %s11815_s24  }
   0xf   :  { %s117_s30 = sshll.u32 %s11817_s3, 4  ;;  %s24_s5 = sshll.u32 %s13375_s0, 4  ;;  %s118_s30 = int_to_ptr.vmem [resolvable:$true] %s117_s30  ;;  %s25_s5 = int_to_ptr.hbm [resolvable:$true] %s24_s5 }
  0x10   :  { %123 = dma.hbm_to_vmem [thread:$0]  %s116_s27, 1024, %s118_s30, [#allocation16], %s11814_s1, %s11814_s1, %s11815_s24  }
  0x11   :  { %s50_s14 = sshll.u32 %s13377_s2, 4  ;;  %s11818_s15 = smov [#allocation3]   ;;  %s51_s14 = int_to_ptr.hbm [resolvable:$true] %s50_s14 }
  0x12   :  { %s26_s7 = sshll.u32 %s11818_s15, 4  ;;  %s11819_s16 = smov [#allocation8]   ;;  %s27_s7 = int_to_ptr.vmem [resolvable:$true] %s26_s7 }
  0x13   :  { %32 = dma.hbm_to_vmem [thread:$0]  %s25_s5, 256, %s27_s7, [#allocation4], %s11814_s1, %s11814_s1, %s11815_s24  }
  0x14   :  { %s52_s17 = sshll.u32 %s11819_s16, 4  ;;  %s11820_s18 = smov 32   ;;  %s53_s17 = int_to_ptr.vmem [resolvable:$true] %s52_s17 }
  0x15   :  { %s11821_s19 = smov 2   ;;  %s76_s21 = sshll.u32 %s13379_s4, 4  ;;  %s77_s21 = int_to_ptr.hbm [resolvable:$true] %s76_s21 }
  0x16   :  { %58 = dma.hbm_to_vmem [thread:$0]  %s51_s14, 96, %s53_s17, [#allocation7], %s11820_s18, %s11820_s18, %s11821_s19  }
  0x17   :  { %s11822_s22 = smov [#allocation11]   ;;  %s102_s26 = sshll.u32 %s13381_s6, 4  ;;  %s103_s26 = int_to_ptr.hbm [resolvable:$true] %s102_s26 }
  0x18   :  { %s78_s23 = sshll.u32 %s11822_s22, 4  ;;  %s11823_s27 = smov 16   ;;  %s79_s23 = int_to_ptr.vmem [resolvable:$true] %s78_s23 }
  0x19   :  { %s11824_s1 = smov 1   ;;  %s11825_s24 = smov [#allocation14]  }
  0x1a   :  { %84 = dma.hbm_to_vmem [thread:$0]  %s77_s21, 48, %s79_s23, [#allocation10], %s11823_s27, %s11823_s27, %s11824_s1  }
  0x1b   :  { %s104_s28 = sshll.u32 %s11825_s24, 4  ;;  %s129_s30 = sshll.u32 %s13383_s8, 4  ;;  %s105_s28 = int_to_ptr.vmem [resolvable:$true] %s104_s28  ;;  %s130_s30 = int_to_ptr.hbm [resolvable:$true] %s129_s30 }
  0x1c   :  { %110 = dma.hbm_to_vmem [thread:$0]  %s103_s26, 48, %s105_s28, [#allocation13], %s11823_s27, %s11823_s27, %s11824_s1  }
  0x1d   :  { %s11826_s4 = smov [#allocation17]  }
  0x1e   :  { %s131_s10 = sshll.u32 %s11826_s4, 4  ;;  %s132_s10 = int_to_ptr.vmem [resolvable:$true] %s131_s10 }
  0x1f   :  { %134 = dma.hbm_to_vmem [thread:$0]  %s130_s30, 16, %s132_s10, [#allocation16]  }
  0x20   :  { %11798 = dma.done.wait [#allocation4], 256  }
  0x21   :  { %11799 = vsyncadd [#allocation4], 4294967040 }
  0x22   :  { %11800 = dma.done.wait [#allocation7], 49248  }
  0x23   :  { %11801 = vsyncadd [#allocation7], 4294918048 }
  0x24   :  { %11802 = dma.done.wait [#allocation10], 15408  }
  0x25   :  { %11803 = vsyncadd [#allocation10], 4294951888 }
  0x26   :  { %11804 = dma.done.wait [#allocation13], 9264  }
  0x27   :  { %11805 = vsyncadd [#allocation13], 4294958032 }
  0x28   :  { %11806 = dma.done.wait [#allocation16], 1040  }
  0x29   :  { %11807 = vsyncadd [#allocation16], 4294966256  ;;  %v8582_v0 = vld [vmem:[#allocation6 + $0xf0] sm:$0xf]  ;;  %v10965_v1 = vld [vmem:[#allocation6 + $0xf4] sm:$0xf0] }
  0x2a   :  { %v8654_v2 = vld [vmem:[#allocation6 + $0x70] sm:$0xf]  ;;  %v8583_v3 = vor.u32 %v10965_v1, %v8582_v0  ;;  %v10949_v4 = vld [vmem:[#allocation6 + $0x74] sm:$0xf0]  ;;  %v8574_v5 = vld [vmem:[#allocation6 + $0xe0] sm:$0xf] }
  0x2b   :  { %v10963_v6 = vld [vmem:[#allocation6 + $0xe4] sm:$0xf0]  ;;  %v8655_v7 = vor.u32 %v10949_v4, %v8654_v2  ;;  %v8646_v8 = vld [vmem:[#allocation6 + $0x60] sm:$0xf]  ;;  %v8566_v12 = vld [vmem:[#allocation6 + $0xd0] sm:$0xf] }
  0x2c   :  { %v10947_v9 = vld [vmem:[#allocation6 + $0x64] sm:$0xf0]  ;;  %436 = vmatpush.bf16.msra.mxu0 %v8583_v3  ;;  %v8575_v10 = vor.u32 %v10963_v6, %v8574_v5  ;;  %v10961_v13 = vld [vmem:[#allocation6 + $0xd4] sm:$0xf0]  ;;  %vm172_vm0 = vcmask 1041408   ;;  %vm181_vm2 = vcmask 1043457  }
  0x2d   :  { %566 = vmatpush.bf16.msra.mxu2 %v8655_v7  ;;  %v8647_v11 = vor.u32 %v10947_v9, %v8646_v8  ;;  %v8638_v14 = vld [vmem:[#allocation6 + $0x50] sm:$0xf]  ;;  %v10945_v15 = vld [vmem:[#allocation6 + $0x54] sm:$0xf0]  ;;  %vm173_vm1 = vsmask.f32 1280  ;;  %v8567_v16 = vor.u32 %v10961_v13, %v8566_v12 }
  0x2e   :  { %vm182_vm3 = vsmask.f32 7942  ;;  %v8639_v17 = vor.u32 %v10945_v15, %v8638_v14  ;;  %v8558_v18 = vld [vmem:[#allocation6 + $0xc0] sm:$0xf]  ;;  %v10959_v19 = vld [vmem:[#allocation6 + $0xc4] sm:$0xf0]  ;;  %vm11908_vm4 = vmand %vm172_vm0, %vm173_vm1 }
  0x2f   :  { %v8630_v21 = vld [vmem:[#allocation6 + $0x40] sm:$0xf]  ;;  %v10943_v22 = vld [vmem:[#allocation6 + $0x44] sm:$0xf0]  ;;  %vm11912_vm5 = vmand %vm181_vm2, %vm182_vm3  ;;  %v8559_v27 = vor.u32 %v10959_v19, %v8558_v18  ;;  %vm194_vm6 = vsmask.f32 5392 }
  0x30   :  { %437 = vmatpush.bf16.msra.mxu0 %v8575_v10  ;;  %v8550_v24 = vld [vmem:[#allocation6 + $0xb0] sm:$0xf]  ;;  %v10957_v25 = vld [vmem:[#allocation6 + $0xb4] sm:$0xf0]  ;;  %v184_v31 = vld [vmem:[#allocation2 + $0x8] sm:$0xe]  ;;  %v8631_v33 = vor.u32 %v10943_v22, %v8630_v21 }
  0x31   :  { %567 = vmatpush.bf16.msra.mxu2 %v8647_v11  ;;  %v175_v26 = vld [vmem:[#allocation2] sm:$0x3]  ;;  %v8622_v28 = vld [vmem:[#allocation6 + $0x30] sm:$0xf]  ;;  %v185_v34 = vsel %vm11912_vm5, 0, %v184_v31  ;;  %v8551_v41 = vor.u32 %v10957_v25, %v8550_v24  ;;  %vm11922_vm7 = vmor %vm173_vm1, %vm194_vm6  ;;  %vm612_vm11 = vcmask 1042432  }
  0x32   :  { %v10941_v29 = vld [vmem:[#allocation6 + $0x34] sm:$0xf0]  ;;  %v176_v30 = vsel %vm11908_vm4, 0, %v175_v26  ;;  %v190_v32 = vld [vmem:[#allocation3] sm:$0xf]  ;;  %vm613_vm14 = vcmask 1046532  }
  0x33   :  { %177 = vst [vmem:[#allocation2] sm:$0x3] %v176_v30  ;;  %v191_v35 = vld [vmem:[#allocation3 + $0x4] sm:$0xf]  ;;  %v197_v36 = vshrl.u32 %v190_v32, 16  ;;  %v200_v37 = vshll.u32 %v190_v32, 16  ;;  %v8623_v45 = vor.u32 %v10941_v29, %v8622_v28  ;;  %vm12044_vm1 = vmor %vm612_vm11, %vm613_vm14 }
  0x34   :  { %438 = vmatpush.bf16.msra.mxu0 %v8567_v16  ;;  %186 = vst [vmem:[#allocation2 + $0x8] sm:$0xe] %v185_v34  ;;  %v206_v38 = vshrl.u32 %v191_v35, 16  ;;  %v209_v39 = vshll.u32 %v191_v35, 16  ;;  %v8542_v46 = vld [vmem:[#allocation6 + $0xa0] sm:$0xf] }
  0x35   :  { %568 = vmatpush.bf16.msra.mxu2 %v8639_v17  ;;  %v199_v40 = vrot.slane %v197_v36, 6  ;;  %v202_v42 = vrot.slane %v200_v37, 7  ;;  %v10955_v47 = vld [vmem:[#allocation6 + $0xa4] sm:$0xf0]  ;;  %v8614_v48 = vld [vmem:[#allocation6 + $0x20] sm:$0xf] }
  0x36   :  { %v208_v43 = vrot.slane %v206_v38, 6  ;;  %v211_v44 = vrot.slane %v209_v39, 7  ;;  %v10939_v49 = vld [vmem:[#allocation6 + $0x24] sm:$0xf0]  ;;  %v8543_v53 = vor.u32 %v10955_v47, %v8542_v46  ;;  %v8534_v58 = vld [vmem:[#allocation6 + $0x90] sm:$0xf] }
  0x37   :  { %v203_v50 = vor.u32 %v202_v42, %v199_v40  ;;  %v8615_v57 = vor.u32 %v10939_v49, %v8614_v48  ;;  %v10953_v59 = vld [vmem:[#allocation6 + $0x94] sm:$0xf0]  ;;  %v8606_v62 = vld [vmem:[#allocation6 + $0x10] sm:$0xf]  ;;  %v8526_v2 = vld [vmem:[#allocation6 + $0x80] sm:$0xf] }
  0x38   :  { %439 = vmatpush.bf16.msra.mxu0 %v8559_v27  ;;  %v212_v51 = vor.u32 %v211_v44, %v208_v43  ;;  %v10937_v63 = vld [vmem:[#allocation6 + $0x14] sm:$0xf0]  ;;  %v10951_v3 = vld [vmem:[#allocation6 + $0x84] sm:$0xf0]  ;;  %v178_v4 = vld [vmem:[#allocation2 + $0xc] sm:$0x3]  ;;  %v8535_v5 = vor.u32 %v10953_v59, %v8534_v58 }
  0x39   :  { %569 = vmatpush.bf16.msra.mxu2 %v8631_v33  ;;  %v204_v54 = vrot.slane %v203_v50, 4  ;;  %v8598_v6 = vld [vmem:[#allocation6] sm:$0xf]  ;;  %v10935_v7 = vld [vmem:[#allocation6 + $0x4] sm:$0xf0]  ;;  %v179_v10 = vsel %vm11908_vm4, 0, %v178_v4  ;;  %v8607_v12 = vor.u32 %v10937_v63, %v8606_v62  ;;  %v8527_v24 = vor.u32 %v10951_v3, %v8526_v2 }
  0x3a   :  { %v214_v55 = vrot.slane %v212_v51, 4  ;;  %v240_v56 = vld [vmem:[#allocation2] sm:$0xe]  ;;  %vm280_vm8 = vsmask.f32 3328  ;;  %v8599_v29 = vor.u32 %v10935_v7, %v8598_v6  ;;  %vm988_vm2 = vcmask 1045508  }
  0x3b   :  { %v241_v60 = vsel %vm11912_vm5, %v203_v50, %v240_v56  ;;  %v244_v61 = vld [vmem:[#allocation2 + $0x8] sm:$0x3]  ;;  %v213_v0 = vsel %vm11922_vm7, %v204_v54, %v212_v51  ;;  %vm281_vm9 = vsmask.f32 7440  ;;  %v8720_v8 = vld [vmem:[#allocation6 + $0x170] sm:$0xf]  ;;  %vm12123_vm3 = vmor %vm172_vm0, %vm988_vm2 }
  0x3c   :  { %440 = vmatpush.bf16.msra.mxu0 %v8551_v41  ;;  %242 = vst [vmem:[#allocation2] sm:$0xe] %v241_v60  ;;  %v245_v1 = vsel %vm11908_vm4, %v214_v55, %v244_v61  ;;  %v10981_v9 = vld [vmem:[#allocation6 + $0x174] sm:$0xf0]  ;;  %v187_v11 = vld [vmem:[#allocation2 + $0x14] sm:$0xe]  ;;  %vm11957_vm10 = vmor %vm280_vm8, %vm281_vm9 }
  0x3d   :  { %570 = vmatpush.bf16.msra.mxu2 %v8623_v45  ;;  %243 = vst [vmem:[#allocation2 + $0x4] sm:$0xf] %v213_v0  ;;  %v188_v13 = vsel %vm11912_vm5, 0, %v187_v11  ;;  %v192_v14 = vld [vmem:[#allocation3 + $0x8] sm:$0xf]  ;;  %v8721_v31 = vor.u32 %v10981_v9, %v8720_v8  ;;  %vm1360_vm9 = vcmask 1040384  }
  0x3e   :  { %246 = vst [vmem:[#allocation2 + $0x8] sm:$0x3] %v245_v1  ;;  %v193_v15 = vld [vmem:[#allocation3 + $0xc] sm:$0xf]  ;;  %v216_v16 = vshrl.u32 %v192_v14, 16  ;;  %v219_v17 = vshll.u32 %v192_v14, 16 }
  0x3f   :  { %180 = vst [vmem:[#allocation2 + $0xc] sm:$0x3] %v179_v10  ;;  %v8784_v18 = vld [vmem:[#allocation6 + $0x1f0] sm:$0xf]  ;;  %v10997_v19 = vld [vmem:[#allocation6 + $0x1f4] sm:$0xf0] }
  0x40   :  { %441 = vmatpush.bf16.msra.mxu0 %v8543_v53  ;;  %189 = vst [vmem:[#allocation2 + $0x14] sm:$0xe] %v188_v13  ;;  %v225_v21 = vshrl.u32 %v193_v15, 16  ;;  %v228_v22 = vshll.u32 %v193_v15, 16  ;;  %v8712_v25 = vld [vmem:[#allocation6 + $0x160] sm:$0xf]  ;;  %v8785_v38 = vor.u32 %v10997_v19, %v8784_v18 }
  0x41   :  { %571 = vmatpush.bf16.msra.mxu2 %v8615_v57  ;;  %v10979_v26 = vld [vmem:[#allocation6 + $0x164] sm:$0xf0]  ;;  %v218_v27 = vrot.slane %v216_v16, 6  ;;  %v221_v28 = vrot.slane %v219_v17, 7  ;;  %v8776_v32 = vld [vmem:[#allocation6 + $0x1e0] sm:$0xf] }
  0x42   :  { %v227_v33 = vrot.slane %v225_v21, 6  ;;  %v230_v34 = vrot.slane %v228_v22, 7  ;;  %v10995_v39 = vld [vmem:[#allocation6 + $0x1e4] sm:$0xf0]  ;;  %v8713_v45 = vor.u32 %v10979_v26, %v8712_v25  ;;  %v8768_v55 = vld [vmem:[#allocation6 + $0x1d0] sm:$0xf] }
  0x43   :  { %v274_v30 = vld [vmem:[#allocation2] sm:$0xf]  ;;  %v222_v40 = vor.u32 %v221_v28, %v218_v27  ;;  %v8777_v60 = vor.u32 %v10995_v39, %v8776_v32  ;;  %v8704_v61 = vld [vmem:[#allocation6 + $0x150] sm:$0xf]  ;;  %v8760_v10 = vld [vmem:[#allocation6 + $0x1c0] sm:$0xf] }
  0x44   :  { %442 = vmatpush.bf16.msra.mxu0 %v8535_v5  ;;  %v11936_v35 = vld [vmem:[#allocation2 + $0x4] sm:$0xf]  ;;  %v284_v36 = vshrl.u32 %v274_v30, 16  ;;  %v287_v37 = vshll.u32 %v274_v30, 16  ;;  %v231_v46 = vor.u32 %v230_v34, %v227_v33  ;;  %v10977_v62 = vld [vmem:[#allocation6 + $0x154] sm:$0xf0] }
  0x45   :  { %572 = vmatpush.bf16.msra.mxu2 %v8607_v12  ;;  %v11938_v41 = vld [vmem:[#allocation2 + $0x8] sm:$0x1]  ;;  %v11941_v42 = vshll.u32 %v11936_v35, 16  ;;  %v11944_v43 = vshrl.u32 %v11936_v35, 16  ;;  %v11946_v44 = vld [vmem:[#allocation2] sm:$0xff]  ;;  %v223_v50 = vrot.slane %v222_v40, 4  ;;  %v8705_v7 = vor.u32 %v10977_v62, %v8704_v61 }
  0x46   :  { %v286_v47 = vrot.slane %v284_v36, 4  ;;  %v289_v48 = vrot.slane %v287_v37, 5  ;;  %v303_v49 = vshll.u32 %v11938_v41, 16  ;;  %v247_v51 = vld [vmem:[#allocation2 + $0xc] sm:$0xe]  ;;  %v233_v56 = vrot.slane %v231_v46, 4 }
  0x47   :  { %v295_v53 = vrot.slane %v11941_v42, 5  ;;  %v299_v54 = vrot.slane %v11944_v43, 4  ;;  %v248_v57 = vsel %vm11912_vm5, %v222_v40, %v247_v51  ;;  %v251_v58 = vld [vmem:[#allocation2 + $0x14] sm:$0x3]  ;;  %v232_v63 = vsel %vm11922_vm7, %v223_v50, %v231_v46  ;;  %v10993_v3 = vld [vmem:[#allocation6 + $0x1d4] sm:$0xf0] }
  0x48   :  { %443 = vmatpush.bf16.msra.mxu0 %v8527_v24  ;;  %v290_v59 = vor.u32 %v289_v48, %v286_v47  ;;  %249 = vst [vmem:[#allocation2 + $0xc] sm:$0xe] %v248_v57  ;;  %v305_v2 = vrot.slane %v303_v49, 5  ;;  %v252_v4 = vsel %vm11908_vm4, %v233_v56, %v251_v58  ;;  %v8769_v9 = vor.u32 %v10993_v3, %v8768_v55  ;;  %v8696_v11 = vld [vmem:[#allocation6 + $0x140] sm:$0xf]  ;;  %s11828_s6 = smov [#allocation18]  }
  0x49   :  { %573 = vmatpush.bf16.msra.mxu2 %v8599_v29  ;;  %v300_v1 = vor.u32 %v299_v54, %v295_v53  ;;  %250 = vst [vmem:[#allocation2 + $0x10] sm:$0xf] %v232_v63  ;;  %v10975_v12 = vld [vmem:[#allocation6 + $0x144] sm:$0xf0]  ;;  %v8752_v16 = vld [vmem:[#allocation6 + $0x1b0] sm:$0xf] }
  0x4a   :  { %v291_v5 = vrot.slane %v290_v59, 4  ;;  %253 = vst [vmem:[#allocation2 + $0x14] sm:$0x3] %v252_v4  ;;  %v10991_v15 = vld [vmem:[#allocation6 + $0x1c4] sm:$0xf0]  ;;  %v8697_v22 = vor.u32 %v10975_v12, %v8696_v11  ;;  %v617_v57 = vrot.slane %v11936_v35, 5 }
  0x4b   :  { %v301_v6 = vrot.slane %v300_v1, 4  ;;  %v10989_v17 = vld [vmem:[#allocation6 + $0x1b4] sm:$0xf0]  ;;  %v8688_v19 = vld [vmem:[#allocation6 + $0x130] sm:$0xf]  ;;  %v8761_v28 = vor.u32 %v10991_v15, %v8760_v10  ;;  %v794_v58 = vrot.slane %v11944_v43, 5 }
  0x4c   :  { %734 = vmatpush.bf16.msrb.mxu0 %v8721_v31  ;;  %574 = vmatmul.bf16.vlgmr.msra.gmra.mxu2 %v11946_v44  ;;  %v296_v8 = vsel %vm11957_vm10, %v291_v5, %v295_v53  ;;  %v10973_v21 = vld [vmem:[#allocation6 + $0x134] sm:$0xf0]  ;;  %v11968_v25 = vld [vmem:[#allocation6 + $0x1a0] sm:$0xf]  ;;  %v11970_v26 = vld [vmem:[#allocation6 + $0x1a4] sm:$0xf0]  ;;  %v8753_v37 = vor.u32 %v10989_v17, %v8752_v16 }
  0x4d   :  { %936 = vmatpush.bf16.msrb.mxu2 %v8785_v38  ;;  %v306_v13 = vsel %vm11957_vm10, %v301_v6, %v305_v2  ;;  %v348_v14 = vunpack.c.l.b16 %v296_v8  ;;  %v11976_v32 = vld [vmem:[#allocation2] sm:$0xe]  ;;  %v8689_v38 = vor.u32 %v10973_v21, %v8688_v19  ;;  %v8745_v46 = vor.u32 %v11970_v26, %v11968_v25  ;;  %v8680_v47 = vld [vmem:[#allocation6 + $0x120] sm:$0xf]  ;;  %v10971_v56 = vld [vmem:[#allocation6 + $0x124] sm:$0xf0] }
  0x4e   :  { %v349_v18 = vunpack.c.l.b16 %v306_v13  ;;  %v11992_v50 = vld [vmem:[#allocation2 + $0x8] sm:$0x3]  ;;  %v786_v51 = vshrl.u32 %v11976_v32, 16  ;;  %v789_v53 = vshll.u32 %v11976_v32, 16  ;;  %v12000_v61 = vld [vmem:[#allocation6 + $0x114] sm:$0xf0] }
  0x4f   :  { %v277_v24 = vld [vmem:[#allocation2 + $0xc] sm:$0xf]  ;;  %v795_v1 = vrot.slane %v11941_v42, 6  ;;  %vm782_vm12 = vsmask.f32 2304  ;;  %v800_v4 = vshrl.u32 %v11992_v50, 16 }
  0x50   :  { %735 = vmatpush.bf16.msrb.mxu0 %v8713_v45  ;;  %v11972_v27 = vpack.c.b16 %v349_v18, %v348_v14  ;;  %v11974_v29 = vld [vmem:[#allocation2 + $0x10] sm:$0xf]  ;;  %v308_v30 = vshrl.u32 %v277_v24, 16  ;;  %v311_v31 = vshll.u32 %v277_v24, 16  ;;  %v788_v62 = vrot.slane %v786_v51, 5  ;;  %s8508_s8 = sshll.u32 %s11828_s6, 4  ;;  %s8509_s8 = int_to_ptr.vmem [resolvable:$true] %s8508_s8 }
  0x51   :  { %937 = vmatpush.bf16.msrb.mxu2 %v8777_v60  ;;  %v11978_v33 = vld [vmem:[#allocation2 + $0x14] sm:$0x1]  ;;  %v11981_v34 = vshll.u32 %v11974_v29, 16  ;;  %v11984_v36 = vshrl.u32 %v11974_v29, 16  ;;  %v11998_v60 = vld [vmem:[#allocation6 + $0x110] sm:$0xf] }
  0x52   :  { %444 = vmatmul.bf16.vlgmr.msra.gmra.mxu0 %v11972_v27  ;;  %v310_v39 = vrot.slane %v308_v30, 4  ;;  %v313_v40 = vrot.slane %v311_v31, 5  ;;  %v327_v45 = vshll.u32 %v11978_v33, 16  ;;  %v791_v63 = vrot.slane %v789_v53, 6  ;;  %v12003_v3 = vld [vmem:[#allocation2 + $0xc] sm:$0xff]  ;;  %s8510_s12 = sshll.u32 %s13384_s9, 4  ;;  %s8511_s12 = int_to_ptr.hbm [resolvable:$true] %s8510_s12 }
  0x53   :  { %v319_v48 = vrot.slane %v11981_v34, 5  ;;  %v323_v49 = vrot.slane %v11984_v36, 4  ;;  %v803_v5 = vshll.u32 %v11992_v50, 16  ;;  %v10948_v10 = vld [vmem:[#allocation6 + $0x74] sm:$0xf]  ;;  %v802_v14 = vrot.slane %v800_v4, 5 }
  0x54   :  { %736 = vmatpush.bf16.msrb.mxu0 %v8705_v7  ;;  %v314_v54 = vor.u32 %v313_v40, %v310_v39  ;;  %v329_v55 = vrot.slane %v327_v45, 5  ;;  %v8681_v7 = vor.u32 %v10971_v56, %v8680_v47  ;;  %v792_v8 = vor.u32 %v791_v63, %v788_v62  ;;  %v8656_v11 = vld [vmem:[#allocation6 + $0x78] sm:$0xf0]  ;;  %v8736_v13 = vld [vmem:[#allocation6 + $0x190] sm:$0xf] }
  0x55   :  { %938 = vmatpush.bf16.msrb.mxu2 %v8769_v9  ;;  %v324_v59 = vor.u32 %v323_v49, %v319_v48  ;;  %v12007_v9 = vor.u32 %v795_v1, %v794_v58  ;;  %vm783_vm13 = vsmask.f32 6416  ;;  %v805_v15 = vrot.slane %v803_v5, 6  ;;  %v10985_v17 = vld [vmem:[#allocation6 + $0x194] sm:$0xf0] }
  0x56   :  { %v315_v2 = vrot.slane %v314_v54, 4  ;;  %v12015_v18 = vrot.slane %v617_v57, 4  ;;  %v10964_v19 = vld [vmem:[#allocation6 + $0xf4] sm:$0xf]  ;;  %v8673_v24 = vor.u32 %v12000_v61, %v11998_v60  ;;  %v8659_v25 = vor.u32 %v10948_v10, %v8656_v11  ;;  %v8584_v26 = vld [vmem:[#allocation6 + $0xf8] sm:$0xf0]  ;;  %vm12022_vm15 = vmor %vm782_vm12, %vm783_vm13 }
  0x57   :  { %v325_v6 = vrot.slane %v324_v59, 4  ;;  %v8648_v30 = vld [vmem:[#allocation6 + $0x68] sm:$0xf0]  ;;  %v8728_v31 = vld [vmem:[#allocation6 + $0x180] sm:$0xf]  ;;  %v793_v45 = vrot.slane %v792_v8, 4  ;;  %v8587_v49 = vor.u32 %v10964_v19, %v8584_v26  ;;  %v8737_v51 = vor.u32 %v10985_v17, %v8736_v13 }
  0x58   :  { %737 = vmatpush.bf16.msrb.mxu0 %v8697_v22  ;;  %v320_v12 = vsel %vm11957_vm10, %v315_v2, %v319_v48  ;;  %v10967_v39 = vld [vmem:[#allocation6 + $0x104] sm:$0xf0]  ;;  %v798_v47 = vrot.slane %v12007_v9, 4  ;;  %v806_v48 = vor.u32 %v805_v15, %v802_v14  ;;  %v8914_v53 = vld [vmem:[#allocation6 + $0x2f0] sm:$0xf]  ;;  %585 = vmatpush.bf16.msra.mxu3 %v8659_v25  ;;  %v620_v11 = vrot.slane %v11938_v41, 5 }
  0x59   :  { %939 = vmatpush.bf16.msrb.mxu2 %v8761_v28  ;;  %v330_v16 = vsel %vm11957_vm10, %v325_v6, %v329_v55  ;;  %v350_v21 = vunpack.c.l.b16 %v320_v12  ;;  %v10946_v28 = vld [vmem:[#allocation6 + $0x64] sm:$0xf]  ;;  %v8576_v56 = vld [vmem:[#allocation6 + $0xe8] sm:$0xf0]  ;;  %v11029_v58 = vld [vmem:[#allocation6 + $0x2f4] sm:$0xf0]  ;;  %455 = vmatpush.bf16.msra.mxu1 %v8587_v49  ;;  %v797_v5 = vsel %vm12022_vm15, %v793_v45, %v12007_v9 }
  0x5a   :  { %v351_v22 = vunpack.c.l.b16 %v330_v16  ;;  %v8651_v54 = vor.u32 %v10946_v28, %v8648_v30  ;;  %v10962_v55 = vld [vmem:[#allocation6 + $0xe4] sm:$0xf]  ;;  %v8850_v59 = vld [vmem:[#allocation6 + $0x270] sm:$0xf]  ;;  %v11013_v60 = vld [vmem:[#allocation6 + $0x274] sm:$0xf0]  ;;  %v807_v6 = vsel %vm12022_vm15, %v798_v47, %v806_v48  ;;  %v8915_v15 = vor.u32 %v11029_v58, %v8914_v53 }
  0x5b   :  { %v8579_v61 = vor.u32 %v10962_v55, %v8576_v56  ;;  %v10944_v1 = vld [vmem:[#allocation6 + $0x54] sm:$0xf]  ;;  %v8640_v2 = vld [vmem:[#allocation6 + $0x58] sm:$0xf0]  ;;  %v12029_v4 = vld [vmem:[#allocation2 + $0xc] sm:$0xe]  ;;  %v8851_v12 = vor.u32 %v11013_v60, %v8850_v59  ;;  %v621_v53 = vsel %vm12044_vm1, %v12015_v18, %v620_v11 }
  0x5c   :  { %738 = vmatpush.bf16.msrb.mxu0 %v8689_v38  ;;  %579 = vmatmul.bf16.gmra.mxu2 %v12003_v3  ;;  %v8664_v38 = vld [vmem:[#allocation6 + $0x100] sm:$0xf]  ;;  %v12027_v62 = vpack.c.b16 %v351_v22, %v350_v21  ;;  %v809_v8 = vshrl.u32 %v12029_v4, 16  ;;  %v11027_v14 = vld [vmem:[#allocation6 + $0x2e4] sm:$0xf0]  ;;  %v8643_v19 = vor.u32 %v10944_v1, %v8640_v2  ;;  %v817_v21 = vrot.slane %v11984_v36, 5 }
  0x5d   :  { %940 = vmatpush.bf16.msrb.mxu2 %v8753_v37  ;;  %v10983_v37 = vld [vmem:[#allocation6 + $0x184] sm:$0xf0]  ;;  %v8665_v63 = vor.u32 %v10967_v39, %v8664_v38  ;;  %v8906_v13 = vld [vmem:[#allocation6 + $0x2e0] sm:$0xf]  ;;  %586 = vmatpush.bf16.msra.mxu3 %v8651_v54  ;;  %v818_v41 = vrot.slane %v11981_v34, 6  ;;  %v848_v22 = vunpack.c.l.b16 %v797_v5  ;;  %vm1361_vm11 = vcmask 1044484  }
  0x5e   :  { %v8729_v10 = vor.u32 %v10983_v37, %v8728_v31  ;;  %v8842_v16 = vld [vmem:[#allocation6 + $0x260] sm:$0xf]  ;;  %v11011_v17 = vld [vmem:[#allocation6 + $0x264] sm:$0xf0]  ;;  %456 = vmatpush.bf16.msra.mxu1 %v8579_v61  ;;  %v10960_v28 = vld [vmem:[#allocation6 + $0xd4] sm:$0xf]  ;;  %v8907_v54 = vor.u32 %v11027_v14, %v8906_v13  ;;  %v647_v13 = vunpack.c.l.b16 %v621_v53 }
  0x5f   :  { %v8568_v30 = vld [vmem:[#allocation6 + $0xd8] sm:$0xf0]  ;;  %v811_v31 = vrot.slane %v809_v8, 5  ;;  %v10942_v38 = vld [vmem:[#allocation6 + $0x44] sm:$0xf]  ;;  %v8843_v47 = vor.u32 %v11011_v17, %v8842_v16  ;;  %v12062_v61 = vor.u32 %v818_v41, %v817_v21  ;;  %vm12189_vm12 = vmor %vm1360_vm9, %vm1361_vm11 }
  0x60   :  { %739 = vmatpush.bf16.msrb.mxu0 %v8681_v7  ;;  %v12037_v7 = vld [vmem:[#allocation2 + $0x14] sm:$0x3]  ;;  %v8898_v48 = vld [vmem:[#allocation6 + $0x2d0] sm:$0xf]  ;;  %v11025_v49 = vld [vmem:[#allocation6 + $0x2d4] sm:$0xf0] }
  0x61   :  { %941 = vmatpush.bf16.msrb.mxu2 %v8745_v46  ;;  %v8660_v46 = vrot.slane %v11976_v32, 9  ;;  %v812_v32 = vshll.u32 %v12029_v4, 16  ;;  %v823_v25 = vshrl.u32 %v12037_v7, 16  ;;  %v826_v26 = vshll.u32 %v12037_v7, 16  ;;  %v8632_v39 = vld [vmem:[#allocation6 + $0x48] sm:$0xf0]  ;;  %587 = vmatpush.bf16.msra.mxu3 %v8643_v19 }
  0x62   :  { %449 = vmatmul.bf16.gmra.mxu0 %v12027_v62  ;;  %v8834_v55 = vld [vmem:[#allocation6 + $0x250] sm:$0xf]  ;;  %v11009_v56 = vld [vmem:[#allocation6 + $0x254] sm:$0xf0]  ;;  %v8635_v58 = vor.u32 %v10942_v38, %v8632_v39  ;;  %v10958_v59 = vld [vmem:[#allocation6 + $0xc4] sm:$0xf]  ;;  %v8899_v14 = vor.u32 %v11025_v49, %v8898_v48 }
  0x63   :  { %v814_v37 = vrot.slane %v812_v32, 6  ;;  %v618_v45 = vsel %vm12044_vm1, %v8660_v46, %v617_v57  ;;  %v825_v57 = vrot.slane %v823_v25, 5  ;;  %v8560_v1 = vld [vmem:[#allocation6 + $0xc8] sm:$0xf0]  ;;  %v10940_v2 = vld [vmem:[#allocation6 + $0x34] sm:$0xf]  ;;  %v8835_v18 = vor.u32 %v11009_v56, %v8834_v55 }
  0x64   :  { %740 = vmatpush.bf16.msrb.mxu0 %v8673_v24  ;;  %v849_v24 = vunpack.c.l.b16 %v807_v6  ;;  %v8563_v5 = vor.u32 %v10958_v59, %v8560_v1  ;;  %v8624_v6 = vld [vmem:[#allocation6 + $0x38] sm:$0xf0]  ;;  %v8890_v8 = vld [vmem:[#allocation6 + $0x2c0] sm:$0xf]  ;;  %v10956_v11 = vld [vmem:[#allocation6 + $0xb4] sm:$0xf] }
  0x65   :  { %942 = vmatpush.bf16.msrb.mxu2 %v8737_v51  ;;  %v8571_v51 = vor.u32 %v10960_v28, %v8568_v30  ;;  %v815_v46 = vor.u32 %v814_v37, %v811_v31  ;;  %v8826_v32 = vld [vmem:[#allocation6 + $0x240] sm:$0xf]  ;;  %588 = vmatpush.bf16.msra.mxu3 %v8635_v58  ;;  %v8627_v16 = vor.u32 %v10940_v2, %v8624_v6  ;;  %v8552_v17 = vld [vmem:[#allocation6 + $0xb8] sm:$0xf0]  ;;  %v821_v19 = vrot.slane %v12062_v61, 4 }
  0x66   :  { %v12060_v60 = vpack.c.b16 %v849_v24, %v848_v22  ;;  %v8555_v41 = vor.u32 %v10956_v11, %v8552_v17  ;;  %v10938_v22 = vld [vmem:[#allocation6 + $0x24] sm:$0xf]  ;;  %v8616_v24 = vld [vmem:[#allocation6 + $0x28] sm:$0xf0]  ;;  %v624_v25 = vrot.slane %v11974_v29, 5  ;;  %v627_v1 = vrot.slane %v11978_v33, 5 }
  0x67   :  { %457 = vmatpush.bf16.msra.mxu1 %v8571_v51  ;;  %v10954_v28 = vld [vmem:[#allocation6 + $0xa4] sm:$0xf]  ;;  %v8544_v30 = vld [vmem:[#allocation6 + $0xa8] sm:$0xf0]  ;;  %v8882_v37 = vld [vmem:[#allocation6 + $0x2b0] sm:$0xf]  ;;  %v8619_v49 = vor.u32 %v10938_v22, %v8616_v24 }
  0x68   :  { %741 = vmatpush.bf16.msrb.mxu0 %v8665_v63  ;;  %v828_v63 = vrot.slane %v826_v26, 6  ;;  %v816_v26 = vrot.slane %v815_v46, 4  ;;  %v11021_v38 = vld [vmem:[#allocation6 + $0x2b4] sm:$0xf0]  ;;  %v10936_v55 = vld [vmem:[#allocation6 + $0x14] sm:$0xf] }
  0x69   :  { %943 = vmatpush.bf16.msrb.mxu2 %v8729_v10  ;;  %v11023_v10 = vld [vmem:[#allocation6 + $0x2c4] sm:$0xf0]  ;;  %v11005_v48 = vld [vmem:[#allocation6 + $0x234] sm:$0xf0]  ;;  %589 = vmatpush.bf16.msra.mxu3 %v8627_v16  ;;  %v8608_v56 = vld [vmem:[#allocation6 + $0x18] sm:$0xf0]  ;;  %v8883_v11 = vor.u32 %v11021_v38, %v8882_v37 }
  0x6a   :  { %v829_v21 = vor.u32 %v828_v63, %v825_v57  ;;  %v12069_v51 = vld [vmem:[#allocation2] sm:$0xc]  ;;  %v8661_v57 = vrot.slane %v12029_v4, 9  ;;  %v626_v63 = vrot.slane %v624_v25, 4  ;;  %v820_v2 = vsel %vm12022_vm15, %v816_v26, %v12062_v61  ;;  %v11019_v6 = vld [vmem:[#allocation6 + $0x2a4] sm:$0xf0] }
  0x6b   :  { %458 = vmatpush.bf16.msra.mxu1 %v8563_v5  ;;  %v1158_v58 = vshrl.u32 %v12069_v51, 16  ;;  %v1161_v59 = vshll.u32 %v12069_v51, 16  ;;  %v8874_v5 = vld [vmem:[#allocation6 + $0x2a0] sm:$0xf]  ;;  %v8611_v4 = vor.u32 %v10936_v55, %v8608_v56  ;;  %v850_v33 = vunpack.c.l.b16 %v820_v2  ;;  %v10934_v16 = vld [vmem:[#allocation6 + $0x4] sm:$0xf] }
  0x6c   :  { %1109 = vmatpush.bf16.msra.mxu0 %v8851_v12  ;;  %v646_v12 = vunpack.c.l.b16 %v618_v45  ;;  %944 = vmatmul.bf16.vlgmr.msrb.gmra.mxu2 %v12060_v60  ;;  %v8891_v45 = vor.u32 %v11023_v10, %v8890_v8  ;;  %v830_v53 = vsel %vm12022_vm15, %v821_v19, %v829_v21  ;;  %v12080_v8 = vld [vmem:[#allocation2 + $0x8] sm:$0x7]  ;;  %v8600_v17 = vld [vmem:[#allocation6 + $0x8] sm:$0xf0]  ;;  %v1166_v19 = vrot.slane %v11944_v43, 6 }
  0x6d   :  { %1308 = vmatpush.bf16.msra.mxu2 %v8915_v15  ;;  %v11007_v15 = vld [vmem:[#allocation6 + $0x244] sm:$0xf0]  ;;  %v851_v10 = vunpack.c.l.b16 %v830_v53  ;;  %590 = vmatpush.bf16.msra.mxu3 %v8619_v49  ;;  %v1160_v61 = vrot.slane %v1158_v58, 6  ;;  %v1167_v21 = vrot.slane %v11941_v42, 7  ;;  %v1175_v22 = vshll.u32 %v12080_v8, 16 }
  0x6e   :  { %v8827_v31 = vor.u32 %v11007_v15, %v8826_v32  ;;  %v12067_v39 = vpack.c.b16 %v647_v13, %v646_v12  ;;  %v11003_v12 = vld [vmem:[#allocation6 + $0x224] sm:$0xf0]  ;;  %v10952_v13 = vld [vmem:[#allocation6 + $0x94] sm:$0xf]  ;;  %v1163_v32 = vrot.slane %v1161_v59, 7  ;;  %v8875_v37 = vor.u32 %v11019_v6, %v8874_v5 }
  0x6f   :  { %459 = vmatpush.bf16.msra.mxu1 %v8555_v41  ;;  %v1172_v41 = vshrl.u32 %v12080_v8, 16  ;;  %v8802_v26 = vld [vmem:[#allocation6 + $0x210] sm:$0xf]  ;;  %v8603_v38 = vor.u32 %v10934_v16, %v8600_v17  ;;  %v628_v49 = vsel %vm12044_vm1, %v626_v63, %v627_v1  ;;  %v12091_v53 = vpack.c.b16 %v851_v10, %v850_v33  ;;  %v11017_v55 = vld [vmem:[#allocation6 + $0x294] sm:$0xf0] }
  0x70   :  { %1110 = vmatpush.bf16.msra.mxu0 %v8843_v47  ;;  %v8818_v47 = vld [vmem:[#allocation6 + $0x230] sm:$0xf]  ;;  %v1164_v56 = vor.u32 %v1163_v32, %v1160_v61  ;;  %v12093_v59 = vor.u32 %v1167_v21, %v1166_v19  ;;  %v8722_v5 = vld [vmem:[#allocation6 + $0x178] sm:$0xf0]  ;;  %v8794_v63 = vld [vmem:[#allocation6 + $0x200] sm:$0xf] }
  0x71   :  { %1309 = vmatpush.bf16.msra.mxu2 %v8907_v54  ;;  %v8547_v54 = vor.u32 %v10954_v28, %v8544_v30  ;;  %v8819_v46 = vor.u32 %v11005_v48, %v8818_v47  ;;  %v11001_v28 = vld [vmem:[#allocation6 + $0x214] sm:$0xf0]  ;;  %v10950_v30 = vld [vmem:[#allocation6 + $0x84] sm:$0xf]  ;;  %591 = vmatpush.bf16.msra.mxu3 %v8611_v4  ;;  %v10996_v47 = vld [vmem:[#allocation6 + $0x1f4] sm:$0xf] }
  0x72   :  { %742 = vmatmul.bf16.vlgmr.msrb.gmra.mxu0 %v12067_v39  ;;  %v8786_v48 = vld [vmem:[#allocation6 + $0x1f8] sm:$0xf0]  ;;  %v8803_v6 = vor.u32 %v11001_v28, %v8802_v26  ;;  %v10994_v10 = vld [vmem:[#allocation6 + $0x1e4] sm:$0xf]  ;;  %v10999_v33 = vld [vmem:[#allocation6 + $0x204] sm:$0xf0] }
  0x73   :  { %460 = vmatpush.bf16.msra.mxu1 %v8547_v54  ;;  %v8866_v54 = vld [vmem:[#allocation6 + $0x290] sm:$0xf]  ;;  %v8789_v2 = vor.u32 %v10996_v47, %v8786_v48  ;;  %v11045_v32 = vld [vmem:[#allocation6 + $0x374] sm:$0xf0]  ;;  %v1165_v16 = vrot.slane %v1164_v56, 4  ;;  %v1170_v21 = vrot.slane %v12093_v59, 4 }
  0x74   :  { %1111 = vmatpush.bf16.msra.mxu0 %v8835_v18  ;;  %v8810_v18 = vld [vmem:[#allocation6 + $0x220] sm:$0xf]  ;;  %v8980_v61 = vld [vmem:[#allocation6 + $0x370] sm:$0xf]  ;;  %v10978_v17 = vld [vmem:[#allocation6 + $0x164] sm:$0xf] }
  0x75   :  { %1310 = vmatpush.bf16.msra.mxu2 %v8899_v14  ;;  %v8536_v14 = vld [vmem:[#allocation6 + $0x98] sm:$0xf0]  ;;  %v8811_v24 = vor.u32 %v11003_v12, %v8810_v18  ;;  %v8858_v18 = vld [vmem:[#allocation6 + $0x280] sm:$0xf]  ;;  %v8778_v12 = vld [vmem:[#allocation6 + $0x1e8] sm:$0xf0]  ;;  %592 = vmatpush.bf16.msra.mxu3 %v8603_v38 }
  0x76   :  { %v8539_v15 = vor.u32 %v10952_v13, %v8536_v14  ;;  %v649_v13 = vunpack.c.l.b16 %v628_v49  ;;  %v8867_v14 = vor.u32 %v11017_v55, %v8866_v54  ;;  %v8714_v19 = vld [vmem:[#allocation6 + $0x168] sm:$0xf0]  ;;  %v8781_v26 = vor.u32 %v10994_v10, %v8778_v12  ;;  %v10992_v38 = vld [vmem:[#allocation6 + $0x1d4] sm:$0xf]  ;;  %v12101_v47 = vld [vmem:[#allocation2 + $0xc] sm:$0xc] }
  0x77   :  { %v8717_v28 = vor.u32 %v10978_v17, %v8714_v19  ;;  %v8981_v54 = vor.u32 %v11045_v32, %v8980_v61  ;;  %v8972_v55 = vld [vmem:[#allocation6 + $0x360] sm:$0xf]  ;;  %v12106_v56 = vld [vmem:[#allocation2 + $0x14] sm:$0x7]  ;;  %vm1530_vm0 = vsmask.f32 256 }
  0x78   :  { %1112 = vmatpush.bf16.msra.mxu0 %v8827_v31  ;;  %v625_v31 = vsel %vm12044_vm1, %v8661_v57, %v624_v25  ;;  %461 = vmatpush.bf16.msra.mxu1 %v8539_v15  ;;  %v1174_v25 = vrot.slane %v1172_v41, 6  ;;  %v1177_v57 = vrot.slane %v1175_v22, 7  ;;  %v992_v15 = vrot.slane %v11936_v35, 6  ;;  %v9046_v22 = vld [vmem:[#allocation6 + $0x3f0] sm:$0xf] }
  0x79   :  { %1311 = vmatpush.bf16.msra.mxu2 %v8891_v45  ;;  %v8528_v45 = vld [vmem:[#allocation6 + $0x88] sm:$0xf0]  ;;  %v648_v4 = vunpack.c.l.b16 %v625_v31  ;;  %955 = vmatpush.bf16.msrb.mxu3 %v8789_v2  ;;  %v12099_v31 = vld [vmem:[#allocation6 + $0x3e0] sm:$0xf]  ;;  %v1184_v2 = vshll.u32 %v12101_v47, 16  ;;  %v999_v35 = vrot.slane %v11974_v29, 6 }
  0x7a   :  { %v8531_v58 = vor.u32 %v10950_v30, %v8528_v45  ;;  %v1178_v41 = vor.u32 %v1177_v57, %v1174_v25  ;;  %v8795_v30 = vor.u32 %v10999_v33, %v8794_v63  ;;  %593 = vmatmul.bf16.vlgmr.msra.gmra.mxu3 %v11946_v44  ;;  %v8770_v45 = vld [vmem:[#allocation6 + $0x1d8] sm:$0xf0]  ;;  %v1169_v44 = vsel %vm11922_vm7, %v1165_v16, %v12093_v59  ;;  %v11043_v25 = vld [vmem:[#allocation6 + $0x364] sm:$0xf0]  ;;  %v8762_v17 = vld [vmem:[#allocation6 + $0x1c8] sm:$0xf0] }
  0x7b   :  { %v12103_v48 = vpack.c.b16 %v649_v13, %v648_v4  ;;  %v1181_v57 = vshrl.u32 %v12101_v47, 16  ;;  %v1195_v59 = vshrl.u32 %v12106_v56, 16  ;;  %v1198_v63 = vshll.u32 %v12106_v56, 16  ;;  %v10976_v4 = vld [vmem:[#allocation6 + $0x154] sm:$0xf] }
  0x7c   :  { %1113 = vmatpush.bf16.msra.mxu0 %v8819_v46  ;;  %v10980_v46 = vld [vmem:[#allocation6 + $0x174] sm:$0xf]  ;;  %949 = vmatmul.bf16.gmra.mxu2 %v12091_v53  ;;  %v8973_v12 = vor.u32 %v11043_v25, %v8972_v55  ;;  %v8706_v13 = vld [vmem:[#allocation6 + $0x158] sm:$0xf0]  ;;  %v1186_v32 = vrot.slane %v1184_v2, 7 }
  0x7d   :  { %1312 = vmatpush.bf16.msra.mxu2 %v8883_v11  ;;  %v11015_v11 = vld [vmem:[#allocation6 + $0x284] sm:$0xf0]  ;;  %v8725_v1 = vor.u32 %v10980_v46, %v8722_v5  ;;  %462 = vmatpush.bf16.msra.mxu1 %v8531_v58  ;;  %v1179_v46 = vsel %vm11922_vm7, %v1170_v21, %v1178_v41  ;;  %v8964_v5 = vld [vmem:[#allocation6 + $0x350] sm:$0xf]  ;;  %v1183_v61 = vrot.slane %v1181_v57, 6  ;;  %v8709_v16 = vor.u32 %v10976_v4, %v8706_v13 }
  0x7e   :  { %v8859_v49 = vor.u32 %v11015_v11, %v8858_v18  ;;  %956 = vmatpush.bf16.msrb.mxu3 %v8781_v26  ;;  %v1189_v18 = vrot.slane %v11984_v36, 6  ;;  %v1190_v11 = vrot.slane %v11981_v34, 7  ;;  %v1221_v33 = vunpack.c.l.b16 %v1179_v46  ;;  %v8754_v55 = vld [vmem:[#allocation6 + $0x1b8] sm:$0xf0]  ;;  %v8948_v4 = vld [vmem:[#allocation6 + $0x330] sm:$0xf] }
  0x7f   :  { %v8790_v21 = vrot.slane %v12069_v51, 10  ;;  %v994_v41 = vrot.slane %v992_v15, 4  ;;  %v10988_v51 = vld [vmem:[#allocation6 + $0x1b4] sm:$0xf]  ;;  %v1187_v25 = vor.u32 %v1186_v32, %v1183_v61  ;;  %v10970_v13 = vld [vmem:[#allocation6 + $0x124] sm:$0xf] }
  0x80   :  { %1114 = vmatpush.bf16.msra.mxu0 %v8811_v24  ;;  %v11061_v24 = vld [vmem:[#allocation6 + $0x3f4] sm:$0xf0]  ;;  %463 = vmatmul.bf16.vlgmr.msra.gmra.mxu1 %v11972_v27  ;;  %vm1531_vm6 = vsmask.f32 4368 }
  0x81   :  { %1313 = vmatpush.bf16.msra.mxu2 %v8875_v37  ;;  %753 = vmatpush.bf16.msrb.mxu1 %v8725_v1  ;;  %v11059_v37 = vld [vmem:[#allocation6 + $0x3e4] sm:$0xf0]  ;;  %v9047_v58 = vor.u32 %v11061_v24, %v9046_v22  ;;  %v11041_v27 = vld [vmem:[#allocation6 + $0x354] sm:$0xf0]  ;;  %v1220_v1 = vunpack.c.l.b16 %v1169_v44  ;;  %v995_v22 = vrot.slane %v11992_v50, 6  ;;  %v993_v57 = vsel %vm12123_vm3, %v8790_v21, %v992_v15  ;;  %vm12177_vm8 = vmor %vm1530_vm0, %vm1531_vm6 }
  0x82   :  { %v9039_v10 = vor.u32 %v11059_v37, %v12099_v31  ;;  %747 = vmatmul.bf16.gmra.mxu0 %v12103_v48  ;;  %v9030_v24 = vld [vmem:[#allocation6 + $0x3d0] sm:$0xf]  ;;  %v10974_v31 = vld [vmem:[#allocation6 + $0x144] sm:$0xf]  ;;  %v8698_v37 = vld [vmem:[#allocation6 + $0x148] sm:$0xf0] }
  0x83   :  { %v12133_v44 = vpack.c.b16 %v1221_v33, %v1220_v1  ;;  %v8956_v50 = vld [vmem:[#allocation6 + $0x340] sm:$0xf]  ;;  %v996_v2 = vsel %vm12123_vm3, %v994_v41, %v995_v22  ;;  %v8746_v1 = vld [vmem:[#allocation6 + $0x1a8] sm:$0xf0]  ;;  %v1188_v61 = vrot.slane %v1187_v25, 4 }
  0x84   :  { %1115 = vmatpush.bf16.msra.mxu0 %v8803_v6  ;;  %v8773_v6 = vor.u32 %v10992_v38, %v8770_v45  ;;  %v12131_v38 = vor.u32 %v1190_v11, %v1189_v18  ;;  %v1197_v45 = vrot.slane %v1195_v59, 6  ;;  %v8690_v18 = vld [vmem:[#allocation6 + $0x138] sm:$0xf0]  ;;  %v11055_v11 = vld [vmem:[#allocation6 + $0x3c4] sm:$0xf0]  ;;  %v1022_v33 = vunpack.c.l.b16 %v996_v2 }
  0x85   :  { %1314 = vmatpush.bf16.msra.mxu2 %v8867_v14  ;;  %754 = vmatpush.bf16.msrb.mxu1 %v8717_v28  ;;  %v10990_v14 = vld [vmem:[#allocation6 + $0x1c4] sm:$0xf]  ;;  %v11057_v28 = vld [vmem:[#allocation6 + $0x3d4] sm:$0xf0]  ;;  %v9014_v21 = vld [vmem:[#allocation6 + $0x3b0] sm:$0xf] }
  0x86   :  { %957 = vmatpush.bf16.msrb.mxu3 %v8773_v6  ;;  %v8765_v26 = vor.u32 %v10990_v14, %v8762_v17  ;;  %v9031_v46 = vor.u32 %v11057_v28, %v9030_v24  ;;  %v8757_v6 = vor.u32 %v10988_v51, %v8754_v55  ;;  %v1193_v15 = vrot.slane %v12131_v38, 4  ;;  %v11037_v32 = vld [vmem:[#allocation6 + $0x334] sm:$0xf0]  ;;  %v8738_v28 = vld [vmem:[#allocation6 + $0x198] sm:$0xf0] }
  0x87   :  { %v1021_v14 = vunpack.c.l.b16 %v993_v57  ;;  %v11053_v22 = vld [vmem:[#allocation6 + $0x3b4] sm:$0xf0]  ;;  %v12155_v51 = vld [vmem:[#allocation2 + $0x8] sm:$0xf]  ;;  %v8791_v55 = vrot.slane %v12101_v47, 10 }
  0x88   :  { %1116 = vmatpush.bf16.msra.mxu0 %v8795_v30  ;;  %v8965_v30 = vor.u32 %v11041_v27, %v8964_v5  ;;  %v9022_v5 = vld [vmem:[#allocation6 + $0x3c0] sm:$0xf]  ;;  %v10972_v27 = vld [vmem:[#allocation6 + $0x134] sm:$0xf]  ;;  %v11051_v57 = vld [vmem:[#allocation6 + $0x3a4] sm:$0xf0] }
  0x89   :  { %1315 = vmatpush.bf16.msra.mxu2 %v8859_v49  ;;  %755 = vmatpush.bf16.msrb.mxu1 %v8709_v16  ;;  %v1200_v49 = vrot.slane %v1198_v63, 7  ;;  %v8693_v59 = vor.u32 %v10972_v27, %v8690_v18  ;;  %v10986_v63 = vld [vmem:[#allocation6 + $0x1a4] sm:$0xf]  ;;  %v8682_v16 = vld [vmem:[#allocation6 + $0x128] sm:$0xf0]  ;;  %v9023_v17 = vor.u32 %v11055_v11, %v9022_v5  ;;  %v1543_v47 = vshrl.u32 %v12155_v51, 16 }
  0x8a   :  { %958 = vmatpush.bf16.msrb.mxu3 %v8765_v26  ;;  %v8749_v41 = vor.u32 %v10986_v63, %v8746_v1  ;;  %v8685_v24 = vor.u32 %v10970_v13, %v8682_v16  ;;  %v10984_v26 = vld [vmem:[#allocation6 + $0x194] sm:$0xf]  ;;  %v9006_v25 = vld [vmem:[#allocation6 + $0x3a0] sm:$0xf]  ;;  %v11033_v5 = vld [vmem:[#allocation6 + $0x314] sm:$0xf0] }
  0x8b   :  { %598 = vmatmul.bf16.gmra.mxu3 %v12003_v3  ;;  %v1192_v3 = vsel %vm11922_vm7, %v1188_v61, %v12131_v38  ;;  %v8674_v38 = vld [vmem:[#allocation6 + $0x118] sm:$0xf0]  ;;  %v12159_v11 = vld [vmem:[#allocation2] sm:$0x8]  ;;  %v8730_v63 = vld [vmem:[#allocation6 + $0x188] sm:$0xf0] }
  0x8c   :  { %1482 = vmatpush.bf16.msrb.mxu0 %v8981_v54  ;;  %v8701_v54 = vor.u32 %v10974_v31, %v8698_v37  ;;  %1316 = vmatmul.bf16.vlgmr.msra.gmra.mxu2 %v12133_v44  ;;  %v8949_v37 = vor.u32 %v11037_v32, %v8948_v4  ;;  %v1222_v27 = vunpack.c.l.b16 %v1192_v3  ;;  %v10966_v1 = vld [vmem:[#allocation6 + $0x104] sm:$0xf]  ;;  %v8916_v13 = vld [vmem:[#allocation6 + $0x2f8] sm:$0xf0]  ;;  %v8998_v61 = vld [vmem:[#allocation6 + $0x390] sm:$0xf] }
  0x8d   :  { %1672 = vmatpush.bf16.msrb.mxu2 %v9047_v58  ;;  %v11039_v58 = vld [vmem:[#allocation6 + $0x344] sm:$0xf0]  ;;  %v11049_v32 = vld [vmem:[#allocation6 + $0x394] sm:$0xf0]  ;;  %v1534_v3 = vshrl.u32 %v12159_v11, 16 }
  0x8e   :  { %756 = vmatpush.bf16.msrb.mxu1 %v8701_v54  ;;  %959 = vmatpush.bf16.msrb.mxu3 %v8757_v6  ;;  %v11035_v54 = vld [vmem:[#allocation6 + $0x324] sm:$0xf0]  ;;  %v10968_v6 = vld [vmem:[#allocation6 + $0x114] sm:$0xf] }
  0x90   :  { %1483 = vmatpush.bf16.msrb.mxu0 %v8973_v12  ;;  %v1201_v12 = vor.u32 %v1200_v49, %v1197_v45  ;;  %468 = vmatmul.bf16.gmra.mxu1 %v12027_v62  ;;  %v12150_v45 = vpack.c.b16 %v1022_v33, %v1021_v14  ;;  %v8940_v49 = vld [vmem:[#allocation6 + $0x320] sm:$0xf]  ;;  %v8741_v62 = vor.u32 %v10984_v26, %v8738_v28  ;;  %v11012_v14 = vld [vmem:[#allocation6 + $0x274] sm:$0xf]  ;;  %v8852_v33 = vld [vmem:[#allocation6 + $0x278] sm:$0xf0] }
  0x91   :  { %1673 = vmatpush.bf16.msrb.mxu2 %v9039_v10  ;;  %v8957_v10 = vor.u32 %v11039_v58, %v8956_v50  ;;  %v1002_v50 = vrot.slane %v12037_v7, 6  ;;  %v9015_v58 = vor.u32 %v11053_v22, %v9014_v21  ;;  %v8941_v18 = vor.u32 %v11035_v54, %v8940_v49  ;;  %v10982_v7 = vld [vmem:[#allocation6 + $0x184] sm:$0xf]  ;;  %v11047_v26 = vld [vmem:[#allocation6 + $0x384] sm:$0xf0] }
  0x92   :  { %757 = vmatpush.bf16.msrb.mxu1 %v8693_v59  ;;  %v1202_v31 = vsel %vm11922_vm7, %v1193_v15, %v1201_v12  ;;  %960 = vmatpush.bf16.msrb.mxu3 %v8749_v41  ;;  %v8677_v59 = vor.u32 %v10968_v6, %v8674_v38  ;;  %v11028_v15 = vld [vmem:[#allocation6 + $0x2f4] sm:$0xf]  ;;  %v9007_v12 = vor.u32 %v11051_v57, %v9006_v25  ;;  %v8924_v28 = vld [vmem:[#allocation6 + $0x300] sm:$0xf]  ;;  %v1538_v49 = vrot.slane %v11944_v43, 7 }
  0x93   :  { %v1223_v2 = vunpack.c.l.b16 %v1202_v31  ;;  %1117 = vmatmul.bf16.vlgmr.msra.gmra.mxu0 %v12150_v45  ;;  %v8733_v4 = vor.u32 %v10982_v7, %v8730_v63  ;;  %v11031_v31 = vld [vmem:[#allocation6 + $0x304] sm:$0xf0]  ;;  %v1545_v54 = vrot.slane %v1543_v47, 7  ;;  %v11026_v25 = vld [vmem:[#allocation6 + $0x2e4] sm:$0xf] }
  0x94   :  { %1484 = vmatpush.bf16.msrb.mxu0 %v8965_v30  ;;  %v1001_v30 = vrot.slane %v999_v35, 4  ;;  %v8908_v57 = vld [vmem:[#allocation6 + $0x2e8] sm:$0xf0]  ;;  %v8925_v43 = vor.u32 %v11031_v31, %v8924_v28  ;;  %v1539_v6 = vor.u32 %v1538_v49, %v11941_v42  ;;  %v1541_v38 = vrot.slane %v1538_v49, 4  ;;  %v8900_v47 = vld [vmem:[#allocation6 + $0x2d8] sm:$0xf0] }
  0x95   :  { %1674 = vmatpush.bf16.msrb.mxu2 %v9031_v46  ;;  %v8932_v46 = vld [vmem:[#allocation6 + $0x310] sm:$0xf]  ;;  %v12165_v41 = vpack.c.b16 %v1223_v2, %v1222_v27  ;;  %v8844_v2 = vld [vmem:[#allocation6 + $0x268] sm:$0xf0]  ;;  %v11550_v63 = vld [vmem:[#allocation2 + $0x4] sm:$0xf] }
  0x96   :  { %758 = vmatpush.bf16.msrb.mxu1 %v8685_v24  ;;  %961 = vmatpush.bf16.msrb.mxu3 %v8741_v62  ;;  %v1003_v21 = vsel %vm12123_vm3, %v1001_v30, %v1002_v50  ;;  %v8933_v22 = vor.u32 %v11033_v5, %v8932_v46  ;;  %v8990_v24 = vld [vmem:[#allocation6 + $0x380] sm:$0xf]  ;;  %v1000_v30 = vsel %vm12123_vm3, %v8791_v55, %v999_v35  ;;  %v11010_v62 = vld [vmem:[#allocation6 + $0x264] sm:$0xf]  ;;  %v8986_v55 = vrot.slane %v1534_v3, 11 }
  0x97   :  { %v8999_v50 = vor.u32 %v11049_v32, %v8998_v61  ;;  %v1024_v46 = vunpack.c.l.b16 %v1003_v21  ;;  %v8991_v29 = vor.u32 %v11047_v26, %v8990_v24  ;;  %v8911_v5 = vor.u32 %v11026_v25, %v8908_v57  ;;  %v8892_v32 = vld [vmem:[#allocation6 + $0x2c8] sm:$0xf0]  ;;  %v12196_v21 = vld [vmem:[#allocation2 + $0xc] sm:$0x8]  ;;  %v11020_v3 = vld [vmem:[#allocation6 + $0x2b4] sm:$0xf] }
  0x98   :  { %1485 = vmatpush.bf16.msrb.mxu0 %v8957_v10  ;;  %v8666_v10 = vld [vmem:[#allocation6 + $0x108] sm:$0xf0]  ;;  %v8847_v35 = vor.u32 %v11010_v62, %v8844_v2  ;;  %v11006_v24 = vld [vmem:[#allocation6 + $0x244] sm:$0xf]  ;;  %v11004_v49 = vld [vmem:[#allocation6 + $0x234] sm:$0xf] }
  0x99   :  { %1675 = vmatpush.bf16.msrb.mxu2 %v9023_v17  ;;  %v8669_v16 = vor.u32 %v10966_v1, %v8666_v10  ;;  %v8919_v17 = vor.u32 %v11028_v15, %v8916_v13  ;;  %v1365_v1 = vrot.slane %v11550_v63, 7  ;;  %v1540_v10 = vsel %vm12177_vm8, %v8986_v55, %v1539_v6  ;;  %v8828_v26 = vld [vmem:[#allocation6 + $0x248] sm:$0xf0]  ;;  %v8868_v63 = vld [vmem:[#allocation6 + $0x298] sm:$0xf0] }
  0x9a   :  { %759 = vmatpush.bf16.msrb.mxu1 %v8677_v59  ;;  %962 = vmatpush.bf16.msrb.mxu3 %v8733_v4  ;;  %v8836_v4 = vld [vmem:[#allocation6 + $0x258] sm:$0xf0]  ;;  %v1551_v25 = vshrl.u32 %v12196_v21, 16 }
  0x9b   :  { %v1367_v28 = vrot.slane %v1365_v1, 4 }
  0x9c   :  { %1486 = vmatpush.bf16.msrb.mxu0 %v8949_v37  ;;  %v8855_v37 = vor.u32 %v11012_v14, %v8852_v33  ;;  %1321 = vmatmul.bf16.gmra.mxu2 %v12165_v41  ;;  %v8920_v14 = vrot.slane %v12159_v11, 11  ;;  %v1368_v33 = vrot.slane %v12080_v8, 7  ;;  %v8884_v11 = vld [vmem:[#allocation6 + $0x2b8] sm:$0xf0]  ;;  %v8987_v55 = vrot.slane %v1551_v25, 11 }
  0x9d   :  { %1676 = vmatpush.bf16.msrb.mxu2 %v9015_v58  ;;  %v1546_v58 = vshll.u32 %v12155_v51, 16  ;;  %v1023_v51 = vunpack.c.l.b16 %v1000_v30  ;;  %963 = vmatmul.bf16.vlgmr.msrb.gmra.mxu3 %v12060_v60  ;;  %v1529_v60 = vld [vmem:[#allocation2 + $0x14] sm:$0xf]  ;;  %v8820_v8 = vld [vmem:[#allocation6 + $0x238] sm:$0xf0]  ;;  %v1555_v30 = vrot.slane %v11984_v36, 7 }
  0x9e   :  { %760 = vmatpush.bf16.msrb.mxu1 %v8669_v16  ;;  %1327 = vmatpush.bf16.msra.mxu3 %v8919_v17  ;;  %v1584_v16 = vunpack.c.l.b16 %v1540_v10  ;;  %v1560_v31 = vshrl.u32 %v1529_v60, 16  ;;  %v1369_v57 = vsel %vm12189_vm12, %v1367_v28, %v1368_v33  ;;  %v1563_v2 = vshll.u32 %v1529_v60, 16  ;;  %v11551_v10 = vld [vmem:[#allocation2 + $0x10] sm:$0xf]  ;;  %v11060_v28 = vld [vmem:[#allocation6 + $0x3f4] sm:$0xf] }
  0x9f   :  { %v1548_v27 = vor.u32 %v1546_v58, %v1545_v54  ;;  %v12183_v7 = vpack.c.b16 %v1024_v46, %v1023_v51  ;;  %v1366_v54 = vsel %vm12189_vm12, %v8920_v14, %v1365_v1  ;;  %v8823_v46 = vor.u32 %v11004_v49, %v8820_v8  ;;  %v8876_v51 = vld [vmem:[#allocation6 + $0x2a8] sm:$0xf0] }
  0xa0   :  { %1487 = vmatpush.bf16.msrb.mxu0 %v8941_v18  ;;  %v11024_v18 = vld [vmem:[#allocation6 + $0x2d4] sm:$0xf]  ;;  %v1562_v62 = vrot.slane %v1560_v31, 7  ;;  %v1556_v36 = vor.u32 %v1555_v30, %v11981_v34  ;;  %v1558_v6 = vrot.slane %v1555_v30, 4  ;;  %v9040_v30 = vld [vmem:[#allocation6 + $0x3e8] sm:$0xf0] }
  0xa1   :  { %1677 = vmatpush.bf16.msrb.mxu2 %v9007_v12  ;;  %761 = vmatmul.bf16.vlgmr.msrb.gmra.mxu1 %v12067_v39  ;;  %v8903_v42 = vor.u32 %v11024_v18, %v8900_v47  ;;  %v1549_v15 = vsel %vm12177_vm8, %v1541_v38, %v1548_v27  ;;  %v11008_v12 = vld [vmem:[#allocation6 + $0x254] sm:$0xf]  ;;  %v11022_v39 = vld [vmem:[#allocation6 + $0x2c4] sm:$0xf]  ;;  %v8812_v18 = vld [vmem:[#allocation6 + $0x228] sm:$0xf0] }
  0xa2   :  { %1128 = vmatpush.bf16.msra.mxu1 %v8855_v37  ;;  %1328 = vmatpush.bf16.msra.mxu3 %v8911_v5  ;;  %v8839_v61 = vor.u32 %v11008_v12, %v8836_v4  ;;  %v1585_v17 = vunpack.c.l.b16 %v1549_v15  ;;  %v8831_v37 = vor.u32 %v11006_v24, %v8828_v26  ;;  %v1395_v5 = vunpack.c.l.b16 %v1369_v57  ;;  %v11002_v27 = vld [vmem:[#allocation6 + $0x224] sm:$0xf]  ;;  %v11016_v47 = vld [vmem:[#allocation6 + $0x294] sm:$0xf]  ;;  %v8804_v4 = vld [vmem:[#allocation6 + $0x218] sm:$0xf0] }
  0xa3   :  { %1122 = vmatmul.bf16.gmra.mxu0 %v12183_v7  ;;  %v1565_v38 = vor.u32 %v1563_v2, %v1562_v62  ;;  %v1372_v15 = vrot.slane %v11551_v10, 7  ;;  %v8871_v60 = vor.u32 %v11016_v47, %v8868_v63  ;;  %v1557_v34 = vsel %vm12177_vm8, %v8987_v55, %v1556_v36  ;;  %v10998_v24 = vld [vmem:[#allocation6 + $0x204] sm:$0xf]  ;;  %v8796_v26 = vld [vmem:[#allocation6 + $0x208] sm:$0xf0] }
  0xa4   :  { %1488 = vmatpush.bf16.msrb.mxu0 %v8933_v22  ;;  %v8895_v22 = vor.u32 %v11022_v39, %v8892_v32  ;;  %v12200_v58 = vpack.c.b16 %v1585_v17, %v1584_v16  ;;  %v11014_v39 = vld [vmem:[#allocation6 + $0x284] sm:$0xf]  ;;  %v1586_v33 = vunpack.c.l.b16 %v1557_v34  ;;  %v8921_v16 = vrot.slane %v12196_v21, 11  ;;  %v11044_v21 = vld [vmem:[#allocation6 + $0x374] sm:$0xf] }
  0xa5   :  { %1678 = vmatpush.bf16.msrb.mxu2 %v8999_v50  ;;  %v8887_v50 = vor.u32 %v11020_v3, %v8884_v11  ;;  %v1566_v12 = vsel %vm12177_vm8, %v1558_v6, %v1565_v38  ;;  %v1374_v17 = vrot.slane %v1372_v15, 4  ;;  %v8799_v31 = vor.u32 %v10998_v24, %v8796_v26  ;;  %v11042_v2 = vld [vmem:[#allocation6 + $0x364] sm:$0xf]  ;;  %v11040_v55 = vld [vmem:[#allocation6 + $0x354] sm:$0xf] }
  0xa6   :  { %1129 = vmatpush.bf16.msra.mxu1 %v8847_v35  ;;  %1329 = vmatpush.bf16.msra.mxu3 %v8903_v42  ;;  %v8815_v42 = vor.u32 %v11002_v27, %v8812_v18  ;;  %v1373_v49 = vsel %vm12189_vm12, %v8921_v16, %v1372_v15  ;;  %v8966_v36 = vld [vmem:[#allocation6 + $0x358] sm:$0xf0]  ;;  %v11054_v6 = vld [vmem:[#allocation6 + $0x3c4] sm:$0xf]  ;;  %v9024_v27 = vld [vmem:[#allocation6 + $0x3c8] sm:$0xf0] }
  0xa7   :  { %v1396_v57 = vunpack.c.l.b16 %v1373_v49  ;;  %v8969_v38 = vor.u32 %v11040_v55, %v8966_v36  ;;  %v9027_v18 = vor.u32 %v11054_v6, %v9024_v27  ;;  %v8958_v47 = vld [vmem:[#allocation6 + $0x348] sm:$0xf0]  ;;  %v9016_v63 = vld [vmem:[#allocation6 + $0x3b8] sm:$0xf0]  ;;  %v11036_v15 = vld [vmem:[#allocation6 + $0x334] sm:$0xf] }
  0xa8   :  { %1489 = vmatpush.bf16.msrb.mxu0 %v8925_v43  ;;  %v11018_v43 = vld [vmem:[#allocation6 + $0x2a4] sm:$0xf]  ;;  %v11032_v24 = vld [vmem:[#allocation6 + $0x314] sm:$0xf]  ;;  %v8934_v26 = vld [vmem:[#allocation6 + $0x318] sm:$0xf0] }
  0xa9   :  { %1679 = vmatpush.bf16.msrb.mxu2 %v8991_v29  ;;  %v1394_v29 = vunpack.c.l.b16 %v1366_v54  ;;  %v8879_v35 = vor.u32 %v11018_v43, %v8876_v51  ;;  %v8982_v54 = vld [vmem:[#allocation6 + $0x378] sm:$0xf0]  ;;  %v11056_v43 = vld [vmem:[#allocation6 + $0x3d4] sm:$0xf]  ;;  %v11050_v34 = vld [vmem:[#allocation6 + $0x3a4] sm:$0xf] }
  0xaa   :  { %1130 = vmatpush.bf16.msra.mxu1 %v8839_v61  ;;  %1330 = vmatpush.bf16.msra.mxu3 %v8895_v22  ;;  %v1587_v61 = vunpack.c.l.b16 %v1566_v12  ;;  %v1375_v22 = vrot.slane %v12106_v56, 7  ;;  %v11058_v56 = vld [vmem:[#allocation6 + $0x3e4] sm:$0xf]  ;;  %v8985_v25 = vor.u32 %v11044_v21, %v8982_v54  ;;  %v8926_v49 = vld [vmem:[#allocation6 + $0x308] sm:$0xf0] }
  0xab   :  { %v12210_v1 = vpack.c.b16 %v1395_v5, %v1394_v29  ;;  %v9032_v29 = vld [vmem:[#allocation6 + $0x3d8] sm:$0xf0] }
  0xac   :  { %1680 = vmatmul.bf16.vlgmr.msrb.gmra.mxu2 %v12200_v58  ;;  %v12219_v3 = vpack.c.b16 %v1587_v61, %v1586_v33  ;;  %v1376_v8 = vsel %vm12189_vm12, %v1374_v17, %v1375_v22 }
  0xad   :  { %968 = vmatmul.bf16.gmra.mxu3 %v12091_v53  ;;  %v11000_v53 = vld [vmem:[#allocation6 + $0x214] sm:$0xf]  ;;  %v1397_v62 = vunpack.c.l.b16 %v1376_v8 }
  0xae   :  { %1131 = vmatpush.bf16.msra.mxu1 %v8831_v37  ;;  %1331 = vmatpush.bf16.msra.mxu3 %v8887_v50  ;;  %v8807_v14 = vor.u32 %v11000_v53, %v8804_v4  ;;  %v9048_v37 = vld [vmem:[#allocation6 + $0x3f8] sm:$0xf0]  ;;  %v9043_v50 = vor.u32 %v11058_v56, %v9040_v30  ;;  %v9008_v53 = vld [vmem:[#allocation6 + $0x3a8] sm:$0xf0] }
  0xaf   :  { %v9051_v11 = vor.u32 %v11060_v28, %v9048_v37  ;;  %v12228_v5 = vpack.c.b16 %v1397_v62, %v1396_v57  ;;  %v9011_v4 = vor.u32 %v11050_v34, %v9008_v53  ;;  %v11046_v28 = vld [vmem:[#allocation6 + $0x384] sm:$0xf] }
  0xb1   :  { %766 = vmatmul.bf16.gmra.mxu1 %v12103_v48  ;;  %v8860_v48 = vld [vmem:[#allocation6 + $0x288] sm:$0xf0] }
  0xb2   :  { %1132 = vmatpush.bf16.msra.mxu1 %v8823_v46  ;;  %1332 = vmatpush.bf16.msra.mxu3 %v8879_v35  ;;  %v8863_v32 = vor.u32 %v11014_v39, %v8860_v48  ;;  %v8974_v46 = vld [vmem:[#allocation6 + $0x368] sm:$0xf0]  ;;  %v9035_v35 = vor.u32 %v11056_v43, %v9032_v29  ;;  %v11034_v39 = vld [vmem:[#allocation6 + $0x324] sm:$0xf]  ;;  %v11048_v48 = vld [vmem:[#allocation6 + $0x394] sm:$0xf] }
  0xb3   :  { %1490 = vmatmul.bf16.vlgmr.msrb.gmra.mxu0 %v12210_v1  ;;  %v8977_v51 = vor.u32 %v11042_v2, %v8974_v46 }
  0xb6   :  { %1133 = vmatpush.bf16.msra.mxu1 %v8815_v42  ;;  %1333 = vmatpush.bf16.msra.mxu3 %v8871_v60  ;;  %v8950_v60 = vld [vmem:[#allocation6 + $0x338] sm:$0xf0] }
  0xb7   :  { %v8953_v12 = vor.u32 %v11036_v15, %v8950_v60  ;;  %v11077_v15 = vld [vmem:[#allocation9 + $0x78] sm:$0xff] }
  0xb8   :  { %v11093_v60 = vld [vmem:[#allocation9 + $0xf8] sm:$0xff]  ;;  %1962 = vmatpush.bf16.msra.mxu0 %v11077_v15 }
  0xb9   :  { %v11089_v15 = vld [vmem:[#allocation9 + $0xd8] sm:$0xff] }
  0xba   :  { %1134 = vmatpush.bf16.msra.mxu1 %v8807_v14  ;;  %1334 = vmatpush.bf16.msra.mxu3 %v8863_v32  ;;  %v8942_v14 = vld [vmem:[#allocation6 + $0x328] sm:$0xf0]  ;;  %v9000_v32 = vld [vmem:[#allocation6 + $0x398] sm:$0xf0] }
  0xbb   :  { %v8945_v61 = vor.u32 %v11034_v39, %v8942_v14  ;;  %v9003_v16 = vor.u32 %v11048_v48, %v9000_v32  ;;  %v11069_v39 = vld [vmem:[#allocation9 + $0x38] sm:$0xff] }
  0xbc   :  { %1685 = vmatmul.bf16.gmra.mxu2 %v12219_v3  ;;  %v11085_v14 = vld [vmem:[#allocation9 + $0xb8] sm:$0xff] }
  0xbd   :  { %1335 = vmatmul.bf16.vlgmr.msra.gmra.mxu3 %v12133_v44  ;;  %v11038_v44 = vld [vmem:[#allocation6 + $0x344] sm:$0xf]  ;;  %2177 = vmatpush.bf16.msra.mxu2 %v11085_v14 }
  0xbe   :  { %1135 = vmatpush.bf16.msra.mxu1 %v8799_v31  ;;  %1691 = vmatpush.bf16.msrb.mxu3 %v9051_v11  ;;  %v8961_v42 = vor.u32 %v11038_v44, %v8958_v47  ;;  %v8937_v31 = vor.u32 %v11032_v24, %v8934_v26  ;;  %v11030_v11 = vld [vmem:[#allocation6 + $0x304] sm:$0xf]  ;;  %v11084_v24 = vld [vmem:[#allocation9 + $0xb0] sm:$0xff]  ;;  %v11091_v26 = vld [vmem:[#allocation9 + $0xe8] sm:$0xff] }
  0xbf   :  { %v11065_v14 = vld [vmem:[#allocation9 + $0x18] sm:$0xff] }
  0xc1   :  { %1136 = vmatmul.bf16.vlgmr.msra.gmra.mxu1 %v12150_v45  ;;  %v11052_v45 = vld [vmem:[#allocation6 + $0x3b4] sm:$0xf]  ;;  %2178 = vmatpush.bf16.msra.mxu2 %v11084_v24 }
  0xc2   :  { %1501 = vmatpush.bf16.msrb.mxu1 %v8985_v25  ;;  %1692 = vmatpush.bf16.msrb.mxu3 %v9043_v50  ;;  %v9019_v10 = vor.u32 %v11052_v45, %v9016_v63 }
  0xc3   :  { %1495 = vmatmul.bf16.gmra.mxu0 %v12228_v5 }
  0xc6   :  { %1502 = vmatpush.bf16.msrb.mxu1 %v8977_v51  ;;  %1693 = vmatpush.bf16.msrb.mxu3 %v9035_v35 }
  0xca   :  { %1503 = vmatpush.bf16.msrb.mxu1 %v8969_v38  ;;  %1694 = vmatpush.bf16.msrb.mxu3 %v9027_v18 }
  0xcd   :  { %1340 = vmatmul.bf16.gmra.mxu3 %v12165_v41  ;;  %v8992_v41 = vld [vmem:[#allocation6 + $0x388] sm:$0xf0] }
  0xce   :  { %1504 = vmatpush.bf16.msrb.mxu1 %v8961_v42  ;;  %1695 = vmatpush.bf16.msrb.mxu3 %v9019_v10  ;;  %v8995_v37 = vor.u32 %v11046_v28, %v8992_v41 }
  0xcf   :  { %v575_v33 = vpop.f32.mrf.mxu2  ;;  %v445_v17 = vpop.f32.mrf.mxu0 }
  0xd0   :  { %v12233_v22 = vadd.f32 %v575_v33, %v445_v17  ;;  %v11092_v33 = vld [vmem:[#allocation9 + $0xf0] sm:$0xff] }
  0xd1   :  { %1141 = vmatmul.bf16.gmra.mxu1 %v12183_v7  ;;  %v8929_v7 = vor.u32 %v11030_v11, %v8926_v49  ;;  %v11068_v17 = vld [vmem:[#allocation9 + $0x30] sm:$0xff]  ;;  %v11067_v11 = vld [vmem:[#allocation9 + $0x28] sm:$0xff] }
  0xd2   :  { %1505 = vmatpush.bf16.msrb.mxu1 %v8953_v12  ;;  %1696 = vmatpush.bf16.msrb.mxu3 %v9011_v4  ;;  %v11076_v4 = vld [vmem:[#allocation9 + $0x70] sm:$0xff] }
  0xd3   :  { %1963 = vmatpush.bf16.msra.mxu0 %v11076_v4 }
  0xd6   :  { %1506 = vmatpush.bf16.msrb.mxu1 %v8945_v61  ;;  %1697 = vmatpush.bf16.msrb.mxu3 %v9003_v16  ;;  %v11075_v16 = vld [vmem:[#allocation9 + $0x68] sm:$0xff] }
  0xd7   :  { %v12235_v8 = vpop.f32.mrf.mxu2  ;;  %v12237_v21 = vpop.f32.mrf.mxu0  ;;  %1964 = vmatpush.bf16.msra.mxu0 %v11075_v16  ;;  %v11088_v16 = vld [vmem:[#allocation9 + $0xd0] sm:$0xff] }
  0xda   :  { %1507 = vmatpush.bf16.msrb.mxu1 %v8937_v31  ;;  %1698 = vmatpush.bf16.msrb.mxu3 %v8995_v37  ;;  %v11074_v37 = vld [vmem:[#allocation9 + $0x60] sm:$0xff] }
  0xdb   :  { %1965 = vmatpush.bf16.msra.mxu0 %v11074_v37  ;;  %v11080_v37 = vld [vmem:[#allocation9 + $0x90] sm:$0xff] }
  0xdd   :  { %1699 = vmatmul.bf16.vlgmr.msrb.gmra.mxu3 %v12200_v58 }
  0xde   :  { %1508 = vmatpush.bf16.msrb.mxu1 %v8929_v7  ;;  %2293 = vmatpush.bf16.msra.mxu3 %v11093_v60 }
  0xdf   :  { %v580_v54 = vpop.f32.mrf.mxu2  ;;  %v450_v56 = vpop.f32.mrf.mxu0 }
  0xe0   :  { %v12241_v25 = vadd.f32 %v580_v54, %v450_v56  ;;  %v11083_v54 = vld [vmem:[#allocation9 + $0xa8] sm:$0xff]  ;;  %v11090_v56 = vld [vmem:[#allocation9 + $0xe0] sm:$0xff] }
  0xe1   :  { %1509 = vmatmul.bf16.vlgmr.msrb.gmra.mxu1 %v12210_v1  ;;  %2179 = vmatpush.bf16.msra.mxu2 %v11083_v54 }
  0xe2   :  { %2037 = vmatpush.bf16.msra.mxu1 %v11069_v39  ;;  %2294 = vmatpush.bf16.msra.mxu3 %v11092_v33  ;;  %v11072_v39 = vld [vmem:[#allocation9 + $0x50] sm:$0xff]  ;;  %v11081_v33 = vld [vmem:[#allocation9 + $0x98] sm:$0xff] }
  0xe6   :  { %2038 = vmatpush.bf16.msra.mxu1 %v11068_v17  ;;  %2295 = vmatpush.bf16.msra.mxu3 %v11091_v26  ;;  %v11071_v26 = vld [vmem:[#allocation9 + $0x48] sm:$0xff] }
  0xe7   :  { %v12243_v30 = vpop.f32.mrf.mxu2  ;;  %v12245_v50 = vpop.f32.mrf.mxu0 }
  0xea   :  { %2039 = vmatpush.bf16.msra.mxu1 %v11067_v11  ;;  %2296 = vmatpush.bf16.msra.mxu3 %v11090_v56 }
  0xed   :  { %1704 = vmatmul.bf16.gmra.mxu3 %v12219_v3 }
  0xee   :  { %2297 = vmatpush.bf16.msra.mxu3 %v11089_v15  ;;  %v11086_v15 = vld [vmem:[#allocation9 + $0xc0] sm:$0xff] }
  0xef   :  { %v945_v57 = vpop.f32.mrf.mxu2  ;;  %v743_v62 = vpop.f32.mrf.mxu0 }
  0xf0   :  { %v772_v41 = vadd.f32 %v743_v62, %v12233_v22  ;;  %v578_v22 = vadd.f32 %v12235_v8, %v12237_v21 }
  0xf1   :  { %1514 = vmatmul.bf16.gmra.mxu1 %v12228_v5 }
  0xf2   :  { %v974_v49 = vadd.f32 %v945_v57, %v772_v41  ;;  %2298 = vmatpush.bf16.msra.mxu3 %v11088_v16  ;;  %v11064_v41 = vld [vmem:[#allocation9 + $0x10] sm:$0xff] }
  0xf7   :  { %v12249_v2 = vpop.f32.mrf.mxu2  ;;  %v12251_v46 = vpop.f32.mrf.mxu0 }
  0xfd   :  { %v464_v58 = vpop.f32.mrf.mxu1  ;;  %v594_v51 = vpop.f32.mrf.mxu3 }
  0xfe   :  { %v595_v29 = vadd.f32 %v594_v51, %v464_v58  ;;  %v1718_v51 = vld [vmem:[#allocation8] sm:$0x3] }
  0xff   :  { %v12253_v43 = vpop.f32.mrf.mxu2  ;;  %v12255_v1 = vpop.f32.mrf.mxu0 }
 0x105   :  { %v12257_v35 = vpop.f32.mrf.mxu1  ;;  %v12263_v36 = vpop.f32.mrf.mxu3 }
 0x107   :  { %v12259_v55 = vpop.f32.mrf.mxu2  ;;  %v12261_v3 = vpop.f32.mrf.mxu0 }
 0x10d   :  { %v469_v5 = vpop.f32.mrf.mxu1 }
 0x10e   :  { %v599_v27 = vpop.f32.mrf.mxu3 }
 0x10f   :  { %v1317_v6 = vpop.f32.mrf.mxu2  ;;  %v12265_v18 = vadd.f32 %v599_v27, %v469_v5  ;;  %v11073_v5 = vld [vmem:[#allocation9 + $0x58] sm:$0xff]  ;;  %v11066_v27 = vld [vmem:[#allocation9 + $0x20] sm:$0xff] }
 0x110   :  { %v1118_v38 = vpop.f32.mrf.mxu0  ;;  %1966 = vmatpush.bf16.msra.mxu0 %v11073_v5  ;;  %2040 = vmatpush.bf16.msra.mxu1 %v11066_v27 }
 0x111   :  { %v1147_v58 = vadd.f32 %v1118_v38, %v974_v49  ;;  %v12293_v38 = vperm.slane %v1718_v51, 0  ;;  %v11087_v49 = vld [vmem:[#allocation9 + $0xc8] sm:$0xff]  ;;  %v11070_v51 = vld [vmem:[#allocation9 + $0x40] sm:$0xff] }
 0x112   :  { %2299 = vmatpush.bf16.msra.mxu3 %v11087_v49 }
 0x113   :  { %v1346_v62 = vadd.f32 %v1317_v6, %v1147_v58 }
 0x114   :  { %1967 = vmatpush.bf16.msra.mxu0 %v11072_v39  ;;  %2041 = vmatpush.bf16.msra.mxu1 %v11065_v14  ;;  %v583_v14 = vadd.f32 %v12243_v30, %v12245_v50 }
 0x115   :  { %v12267_v44 = vpop.f32.mrf.mxu1 }
 0x116   :  { %v12273_v42 = vpop.f32.mrf.mxu3  ;;  %2300 = vmatpush.bf16.msra.mxu3 %v11086_v15  ;;  %v778_v16 = vadd.f32 %v12261_v3, %v583_v14 }
 0x117   :  { %v12269_v47 = vpop.f32.mrf.mxu2 }
 0x118   :  { %v12271_v45 = vpop.f32.mrf.mxu0  ;;  %1968 = vmatpush.bf16.msra.mxu0 %v11071_v26  ;;  %2042 = vmatpush.bf16.msra.mxu1 %v11064_v41  ;;  %v980_v30 = vadd.f32 %v12259_v55, %v778_v16  ;;  %v1790_v16 = vld [vmem:[#allocation2 + $0xc] sm:$0xe] }
 0x11c   :  { %1969 = vmatpush.bf16.msra.mxu0 %v11070_v51 }
 0x11e   :  { %v762_v63 = vpop.f32.mrf.mxu1 }
 0x11f   :  { %v12275_v10 = vpop.f32.mrf.mxu2  ;;  %v773_v53 = vadd.f32 %v762_v63, %v595_v29  ;;  %v11082_v63 = vld [vmem:[#allocation9 + $0xa0] sm:$0xff] }
 0x120   :  { %v12277_v34 = vpop.f32.mrf.mxu0  ;;  %v964_v12 = vpop.f32.mrf.mxu3  ;;  %2180 = vmatpush.bf16.msra.mxu2 %v11082_v63 }
 0x121   :  { %v12281_v61 = vadd.f32 %v964_v12, %v773_v53  ;;  %v774_v12 = vadd.f32 %v12251_v46, %v578_v22 }
 0x123   :  { %v976_v8 = vadd.f32 %v12249_v2, %v774_v12 }
 0x124   :  { %2181 = vmatpush.bf16.msra.mxu2 %v11081_v33 }
 0x125   :  { %v1149_v46 = vadd.f32 %v12271_v45, %v976_v8  ;;  %v776_v45 = vadd.f32 %v12255_v1, %v12241_v25 }
 0x126   :  { %v12279_v48 = vpop.f32.mrf.mxu1 }
 0x127   :  { %v12283_v32 = vpop.f32.mrf.mxu2  ;;  %v1348_v2 = vadd.f32 %v12269_v47, %v1149_v46  ;;  %v978_v5 = vadd.f32 %v12253_v43, %v776_v45  ;;  %v11062_v43 = vld [vmem:[#allocation9] sm:$0xff]  ;;  %v11552_v46 = vld [vmem:[#allocation2] sm:$0xe] }
 0x128   :  { %v12285_v28 = vpop.f32.mrf.mxu0  ;;  %v12287_v31 = vpop.f32.mrf.mxu3  ;;  %2182 = vmatpush.bf16.msra.mxu2 %v11080_v37  ;;  %v11100_v45 = vld [vmem:[#allocation9 + $0x130] sm:$0xff] }
 0x129   :  { %v1151_v25 = vadd.f32 %v12277_v34, %v978_v5 }
 0x12b   :  { %v1350_v33 = vadd.f32 %v12275_v10, %v1151_v25 }
 0x12e   :  { %v767_v7 = vpop.f32.mrf.mxu1 }
 0x12f   :  { %v1681_v29 = vpop.f32.mrf.mxu2  ;;  %v777_v4 = vadd.f32 %v767_v7, %v12265_v18 }
 0x130   :  { %v1491_v60 = vpop.f32.mrf.mxu0  ;;  %v969_v57 = vpop.f32.mrf.mxu3 }
 0x131   :  { %v1520_v53 = vadd.f32 %v1491_v60, %v1346_v62  ;;  %v12299_v17 = vadd.f32 %v969_v57, %v777_v4  ;;  %v11079_v62 = vld [vmem:[#allocation9 + $0x88] sm:$0xff]  ;;  %v11078_v4 = vld [vmem:[#allocation9 + $0x80] sm:$0xff] }
 0x132   :  { %2183 = vmatpush.bf16.msra.mxu2 %v11079_v62 }
 0x133   :  { %v1710_v21 = vadd.f32 %v1681_v29, %v1520_v53  ;;  %v11063_v29 = vld [vmem:[#allocation9 + $0x8] sm:$0xff]  ;;  %v11101_v53 = vld [vmem:[#allocation9 + $0x138] sm:$0xff] }
 0x134   :  { %2043 = vmatpush.bf16.msra.mxu1 %v11063_v29  ;;  %2437 = vmatpush.bf16.msrb.mxu0 %v11101_v53 }
 0x135   :  { %v1724_v24 = vadd.f32 %v12293_v38, %v1710_v21 }
 0x136   :  { %v12297_v6 = vpop.f32.mrf.mxu1  ;;  %2184 = vmatpush.bf16.msra.mxu2 %v11078_v4 }
 0x137   :  { %v1683_v18 = vpop.f32.mrf.mxu2  ;;  %v1732_v11 = vmax.f32 %v1724_v24, 0.0 }
 0x138   :  { %v1493_v7 = vpop.f32.mrf.mxu0  ;;  %v12304_v54 = vpop.f32.mrf.mxu3  ;;  %2044 = vmatpush.bf16.msra.mxu1 %v11062_v43  ;;  %2438 = vmatpush.bf16.msrb.mxu0 %v11100_v45  ;;  %v11098_v43 = vld [vmem:[#allocation9 + $0x120] sm:$0xff] }
 0x139   :  { %v1736_v56 = vpack.c.bf16 %v1732_v11, %v1732_v11  ;;  %v1522_v58 = vadd.f32 %v1493_v7, %v1348_v2  ;;  %v1153_v11 = vadd.f32 %v12285_v28, %v980_v30 }
 0x13b   :  { %v1741_v27 = vshrl.u32 %v1736_v56, 16  ;;  %v1744_v47 = vshll.u32 %v1736_v56, 16  ;;  %v1712_v63 = vadd.f32 %v1683_v18, %v1522_v58  ;;  %v1352_v56 = vadd.f32 %v12283_v32, %v1153_v11 }
 0x13d   :  { %v1743_v1 = vrot.slane %v1741_v27, 6  ;;  %v1746_v57 = vrot.slane %v1744_v47, 7  ;;  %v1726_v12 = vadd.f32 %v12293_v38, %v1712_v63  ;;  %v1787_v27 = vld [vmem:[#allocation2 + $0x8] sm:$0x3]  ;;  %v11099_v63 = vld [vmem:[#allocation9 + $0x128] sm:$0xff] }
 0x13e   :  { %v1137_v22 = vpop.f32.mrf.mxu1  ;;  %2439 = vmatpush.bf16.msrb.mxu0 %v11099_v63 }
 0x13f   :  { %v1148_v60 = vadd.f32 %v1137_v22, %v12281_v61  ;;  %v1686_v39 = vpop.f32.mrf.mxu2  ;;  %v1747_v61 = vor.u32 %v1746_v57, %v1743_v1  ;;  %v1733_v8 = vmax.f32 %v1726_v12, 0.0 }
 0x140   :  { %v1496_v21 = vpop.f32.mrf.mxu0  ;;  %v1336_v34 = vpop.f32.mrf.mxu3 }
 0x141   :  { %v1784_v24 = vsel %vm11912_vm5, %v1747_v61, %v11552_v46  ;;  %v1737_v18 = vpack.c.bf16 %v1733_v8, %v1733_v8  ;;  %v1524_v26 = vadd.f32 %v1496_v21, %v1350_v33  ;;  %v12318_v41 = vadd.f32 %v1336_v34, %v1148_v60 }
 0x142   :  { %1785 = vst [vmem:[#allocation2] sm:$0xe] %v1784_v24  ;;  %v1748_v58 = vrot.slane %v1747_v61, 4  ;;  %2440 = vmatpush.bf16.msrb.mxu0 %v11098_v43 }
 0x143   :  { %v1750_v50 = vshrl.u32 %v1737_v18, 16  ;;  %v1753_v10 = vshll.u32 %v1737_v18, 16  ;;  %v1714_v37 = vadd.f32 %v1686_v39, %v1524_v26 }
 0x145   :  { %v1752_v3 = vrot.slane %v1750_v50, 6  ;;  %v1755_v49 = vrot.slane %v1753_v10, 7  ;;  %v1728_v7 = vadd.f32 %v12293_v38, %v1714_v37 }
 0x146   :  { %v12321_v2 = vpop.f32.mrf.mxu1 }
 0x147   :  { %v1756_v51 = vor.u32 %v1755_v49, %v1752_v3  ;;  %v1734_v29 = vmax.f32 %v1728_v7, 0.0  ;;  %v1688_v5 = vpop.f32.mrf.mxu2  ;;  %v11097_v3 = vld [vmem:[#allocation9 + $0x118] sm:$0xff] }
 0x148   :  { %v1498_v55 = vpop.f32.mrf.mxu0  ;;  %v12326_v47 = vpop.f32.mrf.mxu3  ;;  %2441 = vmatpush.bf16.msrb.mxu0 %v11097_v3 }
 0x149   :  { %v1757_v28 = vsel %vm11922_vm7, %v1748_v58, %v1756_v51  ;;  %v1758_v22 = vrot.slane %v1756_v51, 4  ;;  %v1738_v62 = vpack.c.bf16 %v1734_v29, %v1734_v29  ;;  %v1526_v15 = vadd.f32 %v1498_v55, %v1352_v56  ;;  %v12330_v60 = vld [vmem:[#allocation2] sm:$0xe] }
 0x14a   :  { %1786 = vst [vmem:[#allocation2 + $0x4] sm:$0xf] %v1757_v28  ;;  %v1797_v32 = vld [vmem:[#allocation2] sm:$0xf]  ;;  %v2059_v14 = vshrl.u32 %v12330_v60, 16  ;;  %v2062_v33 = vshll.u32 %v12330_v60, 16 }
 0x14b   :  { %v1788_v25 = vsel %vm11908_vm4, %v1758_v22, %v1787_v27  ;;  %v1760_v1 = vshrl.u32 %v1738_v62, 16  ;;  %v1763_v57 = vshll.u32 %v1738_v62, 16  ;;  %v1716_v12 = vadd.f32 %v1688_v5, %v1526_v15  ;;  %v12338_v46 = vld [vmem:[#allocation2] sm:$0xc] }
 0x14c   :  { %1789 = vst [vmem:[#allocation2 + $0x8] sm:$0x3] %v1788_v25  ;;  %v1804_v4 = vshrl.u32 %v1797_v32, 16  ;;  %v1807_v39 = vshll.u32 %v1797_v32, 16  ;;  %v12340_v50 = vrot.slane %v2059_v14, 5  ;;  %v12342_v10 = vrot.slane %v2062_v33, 6 }
 0x14d   :  { %v1762_v61 = vrot.slane %v1760_v1, 6  ;;  %v1765_v8 = vrot.slane %v1763_v57, 7  ;;  %v1730_v21 = vadd.f32 %v12293_v38, %v1716_v12  ;;  %v9052_v37 = vrot.slane %v12330_v60, 9  ;;  %v11096_v33 = vld [vmem:[#allocation9 + $0x110] sm:$0xff] }
 0x14e   :  { %v1142_v53 = vpop.f32.mrf.mxu1  ;;  %v1806_v24 = vrot.slane %v1804_v4, 4  ;;  %v1809_v18 = vrot.slane %v1807_v39, 5  ;;  %v9150_v7 = vrot.slane %v12338_v46, 10  ;;  %v2065_v28 = vor.u32 %v12342_v10, %v12340_v50  ;;  %2442 = vmatpush.bf16.msrb.mxu0 %v11096_v33  ;;  %v11095_v10 = vld [vmem:[#allocation9 + $0x108] sm:$0xff] }
 0x14f   :  { %v1152_v34 = vadd.f32 %v1142_v53, %v12299_v17  ;;  %v1766_v26 = vor.u32 %v1765_v8, %v1762_v61  ;;  %v1735_v30 = vmax.f32 %v1730_v21, 0.0 }
 0x150   :  { %v1341_v11 = vpop.f32.mrf.mxu3  ;;  %v1810_v51 = vor.u32 %v1809_v18, %v1806_v24 }
 0x151   :  { %v1791_v38 = vsel %vm11912_vm5, %v1766_v26, %v1790_v16  ;;  %v1739_v17 = vpack.c.bf16 %v1735_v30, %v1735_v30  ;;  %v1798_v49 = vld [vmem:[#allocation2 + $0x4] sm:$0xf]  ;;  %v12348_v45 = vadd.f32 %v1341_v11, %v1152_v34  ;;  %v1767_v62 = vrot.slane %v1766_v26, 4  ;;  %v1794_v16 = vld [vmem:[#allocation2 + $0x14] sm:$0x3] }
 0x152   :  { %1792 = vst [vmem:[#allocation2 + $0xc] sm:$0xe] %v1791_v38  ;;  %v1877_v56 = vrot.slane %v1798_v49, 5  ;;  %v2208_v58 = vrot.slane %v1798_v49, 6  ;;  %v12350_v29 = vshll.u32 %v1798_v49, 16  ;;  %v1811_v39 = vrot.slane %v1810_v51, 4  ;;  %2443 = vmatpush.bf16.msrb.mxu0 %v11095_v10 }
 0x153   :  { %v1769_v5 = vshrl.u32 %v1739_v17, 16  ;;  %v1772_v27 = vshll.u32 %v1739_v17, 16  ;;  %v1799_v55 = vld [vmem:[#allocation2 + $0x8] sm:$0x1]  ;;  %v12363_v34 = vshrl.u32 %v1798_v49, 16 }
 0x154   :  { %v2056_v63 = vld [vmem:[#allocation2 + $0x8] sm:$0x3]  ;;  %v1878_v15 = vsel %vm12044_vm1, %v9052_v37, %v1877_v56  ;;  %v1879_v32 = vrot.slane %v1877_v56, 4  ;;  %v1880_v25 = vrot.slane %v1799_v55, 5  ;;  %v2209_v12 = vsel %vm12123_vm3, %v9150_v7, %v2208_v58  ;;  %v11094_v56 = vld [vmem:[#allocation9 + $0x100] sm:$0xff] }
 0x155   :  { %v1771_v1 = vrot.slane %v1769_v5, 6  ;;  %v1774_v57 = vrot.slane %v1772_v27, 7  ;;  %v2210_v53 = vrot.slane %v2208_v58, 4  ;;  %v2211_v4 = vrot.slane %v2056_v63, 6 }
 0x156   :  { %v12354_v22 = vpop.f32.mrf.mxu1  ;;  %v1881_v43 = vsel %vm12044_vm1, %v1879_v32, %v1880_v25  ;;  %v1815_v14 = vrot.slane %v12350_v29, 5  ;;  %v1906_v8 = vunpack.c.l.b16 %v1878_v15  ;;  %v2237_v18 = vunpack.c.l.b16 %v2209_v12  ;;  %2444 = vmatpush.bf16.msrb.mxu0 %v11094_v56 }
 0x157   :  { %v1775_v61 = vor.u32 %v1774_v57, %v1771_v1  ;;  %v1907_v21 = vunpack.c.l.b16 %v1881_v43  ;;  %v2212_v24 = vsel %vm12123_vm3, %v2210_v53, %v2211_v4  ;;  %v1823_v26 = vshll.u32 %v1799_v55, 16 }
 0x158   :  { %v2068_v30 = vrot.slane %v12350_v29, 6  ;;  %v12368_v50 = vpop.f32.mrf.mxu3  ;;  %v2238_v38 = vunpack.c.l.b16 %v2212_v24  ;;  %v1816_v17 = vsel %vm11957_vm10, %v1811_v39, %v1815_v14  ;;  %v1819_v49 = vrot.slane %v12363_v34, 4 }
 0x159   :  { %v1776_v37 = vsel %vm11922_vm7, %v1767_v62, %v1775_v61  ;;  %v1777_v11 = vrot.slane %v1775_v61, 4  ;;  %v1910_v3 = vpack.c.b16 %v1907_v21, %v1906_v8  ;;  %v2067_v7 = vrot.slane %v12363_v34, 5  ;;  %v12379_v62 = vld [vmem:[#allocation2 + $0xc] sm:$0xe] }
 0x15a   :  { %1793 = vst [vmem:[#allocation2 + $0x10] sm:$0xf] %v1776_v37  ;;  %v2319_v58 = vshrl.u32 %v12338_v46, 16  ;;  %v2241_v5 = vpack.c.b16 %v2238_v38, %v2237_v18  ;;  %v2073_v27 = vshrl.u32 %v2056_v63, 16  ;;  %v2076_v55 = vshll.u32 %v2056_v63, 16 }
 0x15b   :  { %v1795_v51 = vsel %vm11908_vm4, %v1777_v11, %v1794_v16  ;;  %1970 = vmatmul.bf16.vlgmr.msra.gmra.mxu0 %v1910_v3  ;;  %v1800_v15 = vld [vmem:[#allocation2 + $0xc] sm:$0xf]  ;;  %v1820_v32 = vor.u32 %v1819_v49, %v1815_v14  ;;  %v1825_v25 = vrot.slane %v1823_v26, 5  ;;  %v2066_v1 = vrot.slane %v2065_v28, 4 }
 0x15c   :  { %1796 = vst [vmem:[#allocation2 + $0x14] sm:$0x3] %v1795_v51  ;;  %v2069_v57 = vor.u32 %v2068_v30, %v2067_v7  ;;  %v12381_v12 = vld [vmem:[#allocation2 + $0xc] sm:$0xc]  ;;  %2301 = vmatmul.bf16.vlgmr.msra.gmra.mxu3 %v2241_v5  ;;  %v1981_v43 = vunpack.c.l.b16 %v1816_v17  ;;  %v2075_v4 = vrot.slane %v2073_v27, 5  ;;  %v2078_v39 = vrot.slane %v2076_v55, 6 }
 0x15d   :  { %v1828_v33 = vshrl.u32 %v1800_v15, 16  ;;  %v1821_v61 = vrot.slane %v1820_v32, 4  ;;  %v1831_v21 = vshll.u32 %v1800_v15, 16  ;;  %v9053_v14 = vrot.slane %v12379_v62, 9 }
 0x15e   :  { %v1510_v53 = vpop.f32.mrf.mxu1  ;;  %v2070_v63 = vsel %vm12022_vm15, %v2066_v1, %v2069_v57  ;;  %v2071_v8 = vrot.slane %v2069_v57, 4  ;;  %v2079_v16 = vor.u32 %v2078_v39, %v2075_v4  ;;  %v9151_v28 = vrot.slane %v12381_v12, 10 }
 0x15f   :  { %v1830_v24 = vrot.slane %v1828_v33, 4  ;;  %v1826_v18 = vsel %vm11957_vm10, %v1821_v61, %v1825_v25  ;;  %v2121_v26 = vunpack.c.l.b16 %v2070_v63  ;;  %v1833_v30 = vrot.slane %v1831_v21, 5 }
 0x160   :  { %v2082_v10 = vshrl.u32 %v12379_v62, 16  ;;  %v1700_v37 = vpop.f32.mrf.mxu3  ;;  %v1982_v11 = vunpack.c.l.b16 %v1826_v18  ;;  %v2080_v3 = vsel %vm12022_vm15, %v2071_v8, %v2079_v16  ;;  %v2085_v17 = vshll.u32 %v12379_v62, 16 }
 0x161   :  { %v1801_v38 = vld [vmem:[#allocation2 + $0x10] sm:$0xf]  ;;  %v1521_v49 = vadd.f32 %v1510_v53, %v12318_v41  ;;  %v2122_v7 = vunpack.c.l.b16 %v2080_v3  ;;  %v1834_v27 = vor.u32 %v1833_v30, %v1830_v24  ;;  %v2322_v33 = vshll.u32 %v12338_v46, 16 }
 0x162   :  { %v1884_v51 = vrot.slane %v1801_v38, 5  ;;  %v2215_v5 = vrot.slane %v1801_v38, 6  ;;  %v1985_v55 = vpack.c.b16 %v1982_v11, %v1981_v43  ;;  %v12394_v25 = vshll.u32 %v1801_v38, 16 }
 0x163   :  { %v1802_v15 = vld [vmem:[#allocation2 + $0x14] sm:$0x1]  ;;  %v12396_v1 = vshrl.u32 %v1801_v38, 16  ;;  %v12398_v56 = vadd.f32 %v1700_v37, %v1521_v49  ;;  %v2125_v57 = vpack.c.b16 %v2122_v7, %v2121_v26  ;;  %v1835_v8 = vrot.slane %v1834_v27, 4 }
 0x164   :  { %v2057_v32 = vld [vmem:[#allocation2 + $0x14] sm:$0x3]  ;;  %v1885_v4 = vsel %vm12044_vm1, %v9053_v14, %v1884_v51  ;;  %v1886_v62 = vrot.slane %v1884_v51, 4  ;;  %v1887_v39 = vrot.slane %v1802_v15, 5  ;;  %2045 = vmatmul.bf16.vlgmr.msra.gmra.mxu1 %v1985_v55  ;;  %v2216_v41 = vsel %vm12123_vm3, %v9151_v28, %v2215_v5 }
 0x165   :  { %v2217_v53 = vrot.slane %v2215_v5, 4  ;;  %v2218_v43 = vrot.slane %v2057_v32, 6  ;;  %2185 = vmatmul.bf16.vlgmr.msra.gmra.mxu2 %v2125_v57  ;;  %v1908_v63 = vunpack.c.l.b16 %v1885_v4  ;;  %v1839_v21 = vrot.slane %v12394_v25, 5 }
 0x166   :  { %v1888_v61 = vsel %vm12044_vm1, %v1886_v62, %v1887_v39  ;;  %v12408_v16 = vpop.f32.mrf.mxu1  ;;  %v1843_v28 = vrot.slane %v12396_v1, 4  ;;  %v1847_v18 = vshll.u32 %v1802_v15, 16  ;;  %v2239_v26 = vunpack.c.l.b16 %v2216_v41  ;;  %v2316_v39 = vld [vmem:[#allocation2 + $0x8] sm:$0x7] }
 0x167   :  { %v1909_v14 = vunpack.c.l.b16 %v1888_v61  ;;  %v2219_v24 = vsel %vm12123_vm3, %v2217_v53, %v2218_v43  ;;  %v2084_v37 = vrot.slane %v2082_v10, 5  ;;  %v2087_v11 = vrot.slane %v2085_v17, 6 }
 0x168   :  { %v2240_v30 = vunpack.c.l.b16 %v2219_v24  ;;  %v12413_v3 = vpop.f32.mrf.mxu3  ;;  %v1840_v49 = vsel %vm11957_vm10, %v1835_v8, %v1839_v21  ;;  %v1844_v7 = vor.u32 %v1843_v28, %v1839_v21  ;;  %v2090_v27 = vrot.slane %v12396_v1, 5 }
 0x169   :  { %v1911_v38 = vpack.c.b16 %v1909_v14, %v1908_v63  ;;  %v2088_v5 = vor.u32 %v2087_v11, %v2084_v37  ;;  %v2091_v55 = vrot.slane %v12394_v25, 6  ;;  %v1849_v15 = vrot.slane %v1847_v18, 5 }
 0x16a   :  { %v2242_v51 = vpack.c.b16 %v2240_v30, %v2239_v26  ;;  %v1845_v57 = vrot.slane %v1844_v7, 4  ;;  %v2096_v4 = vshrl.u32 %v2057_v32, 16  ;;  %v2099_v62 = vshll.u32 %v2057_v32, 16 }
 0x16b   :  { %1975 = vmatmul.bf16.gmra.mxu0 %v1911_v38  ;;  %v2089_v10 = vrot.slane %v2088_v5, 4  ;;  %v2092_v17 = vor.u32 %v2091_v55, %v2090_v27  ;;  %v2321_v41 = vrot.slane %v2319_v58, 6  ;;  %v2324_v53 = vrot.slane %v2322_v33, 7 }
 0x16c   :  { %2306 = vmatmul.bf16.gmra.mxu3 %v2242_v51  ;;  %v1850_v43 = vsel %vm11957_vm10, %v1845_v57, %v1849_v15  ;;  %v2098_v61 = vrot.slane %v2096_v4, 5  ;;  %v2101_v63 = vrot.slane %v2099_v62, 6  ;;  %v2327_v8 = vrot.slane %v12363_v34, 6 }
 0x16d   :  { %v1983_v21 = vunpack.c.l.b16 %v1840_v49  ;;  %v1984_v14 = vunpack.c.l.b16 %v1850_v43  ;;  %v2094_v24 = vrot.slane %v2092_v17, 4  ;;  %v2325_v28 = vor.u32 %v2324_v53, %v2321_v41 }
 0x16e   :  { %v2093_v32 = vsel %vm12022_vm15, %v2089_v10, %v2092_v17  ;;  %v2102_v18 = vor.u32 %v2101_v63, %v2098_v61  ;;  %v2328_v46 = vrot.slane %v12350_v29, 7  ;;  %v2333_v58 = vshrl.u32 %v2316_v39, 16  ;;  %v1515_v30 = vpop.f32.mrf.mxu1  ;;  %v2317_v29 = vld [vmem:[#allocation2 + $0x14] sm:$0x7] }
 0x16f   :  { %v1986_v33 = vpack.c.b16 %v1984_v14, %v1983_v21  ;;  %v2336_v26 = vshll.u32 %v2316_v39, 16  ;;  %v1525_v34 = vadd.f32 %v1515_v30, %v12348_v45  ;;  %v2123_v49 = vunpack.c.l.b16 %v2093_v32 }
 0x170   :  { %v2103_v37 = vsel %vm12022_vm15, %v2094_v24, %v2102_v18  ;;  %v2329_v11 = vor.u32 %v2328_v46, %v2327_v8  ;;  %v2335_v38 = vrot.slane %v2333_v58, 6  ;;  %v2326_v51 = vrot.slane %v2325_v28, 4  ;;  %v1705_v27 = vpop.f32.mrf.mxu3 }
 0x171   :  { %v2124_v7 = vunpack.c.l.b16 %v2103_v37  ;;  %v2338_v5 = vrot.slane %v2336_v26, 7  ;;  %v12430_v57 = vadd.f32 %v1705_v27, %v1525_v34  ;;  %v2342_v10 = vshrl.u32 %v12381_v12, 16 }
 0x172   :  { %v2331_v55 = vrot.slane %v2329_v11, 4  ;;  %v2330_v4 = vsel %vm11922_vm7, %v2326_v51, %v2329_v11  ;;  %v2345_v17 = vshll.u32 %v12381_v12, 16  ;;  %v2350_v45 = vrot.slane %v12396_v1, 6 }
 0x173   :  { %v2126_v15 = vpack.c.b16 %v2124_v7, %v2123_v49  ;;  %v2339_v62 = vor.u32 %v2338_v5, %v2335_v38  ;;  %v2351_v41 = vrot.slane %v12394_v25, 7  ;;  %v2356_v53 = vshrl.u32 %v2317_v29, 16 }
 0x174   :  { %2050 = vmatmul.bf16.gmra.mxu1 %v1986_v33  ;;  %v2359_v43 = vshll.u32 %v2317_v29, 16  ;;  %v2381_v61 = vunpack.c.l.b16 %v2330_v4  ;;  %v2344_v21 = vrot.slane %v2342_v10, 6  ;;  %v2347_v14 = vrot.slane %v2345_v17, 7  ;;  %v11125_v4 = vld [vmem:[#allocation12 + $0xb8] sm:$0xff] }
 0x175   :  { %2190 = vmatmul.bf16.gmra.mxu2 %v2126_v15  ;;  %v2340_v39 = vsel %vm11922_vm7, %v2331_v55, %v2339_v62  ;;  %v2352_v24 = vor.u32 %v2351_v41, %v2350_v45  ;;  %v2358_v28 = vrot.slane %v2356_v53, 6  ;;  %v11109_v15 = vld [vmem:[#allocation12 + $0x38] sm:$0xff]  ;;  %2893 = vmatpush.bf16.msrb.mxu3 %v11125_v4  ;;  %v11108_v45 = vld [vmem:[#allocation12 + $0x30] sm:$0xff] }
 0x176   :  { %v2382_v63 = vunpack.c.l.b16 %v2340_v39  ;;  %v2361_v32 = vrot.slane %v2359_v43, 7  ;;  %v2348_v12 = vor.u32 %v2347_v14, %v2344_v21  ;;  %v12444_v11 = vpop.f32.mrf.mxu1  ;;  %v11117_v10 = vld [vmem:[#allocation12 + $0x78] sm:$0xff]  ;;  %2781 = vmatpush.bf16.msrb.mxu2 %v11109_v15  ;;  %v11124_v39 = vld [vmem:[#allocation12 + $0xb0] sm:$0xff] }
 0x177   :  { %v2354_v18 = vrot.slane %v2352_v24, 4  ;;  %2706 = vmatpush.bf16.msrb.mxu1 %v11117_v10  ;;  %v12450_v53 = vld [vmem:[#allocation11] ss:$0 sm:$0xff] }
 0x178   :  { %v2385_v8 = vpack.c.b16 %v2382_v63, %v2381_v61  ;;  %v2362_v1 = vor.u32 %v2361_v32, %v2358_v28  ;;  %v2349_v46 = vrot.slane %v2348_v12, 4  ;;  %v12446_v34 = vpop.f32.mrf.mxu3  ;;  %v11107_v61 = vld [vmem:[#allocation12 + $0x28] sm:$0xff]  ;;  %v11116_v63 = vld [vmem:[#allocation12 + $0x70] sm:$0xff] }
 0x179   :  { %2894 = vmatpush.bf16.msrb.mxu3 %v11124_v39  ;;  %v11115_v28 = vld [vmem:[#allocation12 + $0x68] sm:$0xff]  ;;  %v11113_v39 = vld [vmem:[#allocation12 + $0x58] sm:$0xff] }
 0x17a   :  { %v2363_v58 = vsel %vm11922_vm7, %v2354_v18, %v2362_v1  ;;  %v2353_v25 = vsel %vm11922_vm7, %v2349_v46, %v2352_v24  ;;  %2782 = vmatpush.bf16.msrb.mxu2 %v11108_v45  ;;  %v11106_v1 = vld [vmem:[#allocation12 + $0x20] sm:$0xff]  ;;  %v11104_v45 = vld [vmem:[#allocation12 + $0x10] sm:$0xff] }
 0x17b   :  { %2445 = vmatmul.bf16.vlgmr.msrb.gmra.mxu0 %v2385_v8  ;;  %v2384_v33 = vunpack.c.l.b16 %v2363_v58  ;;  %v2383_v26 = vunpack.c.l.b16 %v2353_v25  ;;  %v11123_v8 = vld [vmem:[#allocation12 + $0xa8] sm:$0xff]  ;;  %2707 = vmatpush.bf16.msrb.mxu1 %v11116_v63  ;;  %v11122_v46 = vld [vmem:[#allocation12 + $0xa0] sm:$0xff] }
 0x17d   :  { %v2386_v30 = vpack.c.b16 %v2384_v33, %v2383_v26  ;;  %2895 = vmatpush.bf16.msrb.mxu3 %v11123_v8 }
 0x17e   :  { %2783 = vmatpush.bf16.msrb.mxu2 %v11107_v61 }
 0x17f   :  { %2708 = vmatpush.bf16.msrb.mxu1 %v11115_v28  ;;  %v11103_v28 = vld [vmem:[#allocation12 + $0x8] sm:$0xff] }
 0x181   :  { %2896 = vmatpush.bf16.msrb.mxu3 %v11122_v46 }
 0x182   :  { %2784 = vmatpush.bf16.msrb.mxu2 %v11106_v1 }
 0x18b   :  { %2450 = vmatmul.bf16.gmra.mxu0 %v2386_v30 }
 0x1d8   :  { %v1971_v37 = vpop.f32.mrf.mxu0 }
 0x1df   :  { %v2302_v5 = vpop.f32.mrf.mxu3 }
 0x1e0   :  { %v1973_v38 = vpop.f32.mrf.mxu0 }
 0x1e1   :  { %v2046_v49 = vpop.f32.mrf.mxu1 }
 0x1e2   :  { %v2047_v55 = vadd.f32 %v2046_v49, %v1971_v37 }
 0x1e7   :  { %v2304_v24 = vpop.f32.mrf.mxu3 }
 0x1e8   :  { %v1976_v7 = vpop.f32.mrf.mxu0  ;;  %v2186_v51 = vpop.f32.mrf.mxu2 }
 0x1e9   :  { %v2048_v29 = vpop.f32.mrf.mxu1  ;;  %v2196_v62 = vadd.f32 %v2186_v51, %v2047_v55  ;;  %v11114_v55 = vld [vmem:[#allocation12 + $0x60] sm:$0xff] }
 0x1ea   :  { %v2049_v21 = vadd.f32 %v2048_v29, %v1973_v38  ;;  %v11121_v29 = vld [vmem:[#allocation12 + $0x98] sm:$0xff]  ;;  %2709 = vmatpush.bf16.msrb.mxu1 %v11114_v55 }
 0x1eb   :  { %v2312_v41 = vadd.f32 %v2302_v5, %v2196_v62  ;;  %v11105_v5 = vld [vmem:[#allocation12 + $0x18] sm:$0xff]  ;;  %2897 = vmatpush.bf16.msrb.mxu3 %v11121_v29 }
 0x1ec   :  { %2785 = vmatpush.bf16.msrb.mxu2 %v11105_v5  ;;  %v11118_v5 = vld [vmem:[#allocation12 + $0x80] sm:$0xff] }
 0x1ee   :  { %2710 = vmatpush.bf16.msrb.mxu1 %v11113_v39 }
 0x1f0   :  { %v12448_v27 = vpop.f32.mrf.mxu0  ;;  %v2188_v17 = vpop.f32.mrf.mxu2  ;;  %2786 = vmatpush.bf16.msrb.mxu2 %v11104_v45  ;;  %v11110_v45 = vld [vmem:[#allocation12 + $0x40] sm:$0xff] }
 0x1f1   :  { %v2197_v32 = vadd.f32 %v2188_v17, %v2049_v21  ;;  %v2051_v18 = vpop.f32.mrf.mxu1  ;;  %v2307_v17 = vpop.f32.mrf.mxu3 }
 0x1f2   :  { %v2052_v37 = vadd.f32 %v2051_v18, %v1976_v7  ;;  %v11120_v7 = vld [vmem:[#allocation12 + $0x90] sm:$0xff] }
 0x1f3   :  { %v2313_v26 = vadd.f32 %v2304_v24, %v2197_v32  ;;  %v11112_v32 = vld [vmem:[#allocation12 + $0x50] sm:$0xff]  ;;  %2898 = vmatpush.bf16.msrb.mxu3 %v11120_v7 }
 0x1f4   :  { %2787 = vmatpush.bf16.msrb.mxu2 %v11103_v28  ;;  %2711 = vmatpush.bf16.msrb.mxu1 %v11112_v32 }
 0x1f8   :  { %v2446_v43 = vpop.f32.mrf.mxu0  ;;  %v2191_v25 = vpop.f32.mrf.mxu2 }
 0x1f9   :  { %v2456_v14 = vadd.f32 %v2446_v43, %v2312_v41  ;;  %v2198_v15 = vadd.f32 %v2191_v25, %v2052_v37  ;;  %v2053_v61 = vpop.f32.mrf.mxu1  ;;  %v11111_v37 = vld [vmem:[#allocation12 + $0x48] sm:$0xff] }
 0x1fa   :  { %2712 = vmatpush.bf16.msrb.mxu1 %v11111_v37 }
 0x1fb   :  { %v2464_v12 = vadd.f32 %v12450_v53, %v2456_v14  ;;  %v2314_v21 = vadd.f32 %v2307_v17, %v2198_v15  ;;  %v2523_v15 = vld [vmem:[#allocation2 + $0x8] sm:$0x3] }
 0x1fd   :  { %v2468_v58 = vmax.f32 %v2464_v12, 0.0  ;;  %v2054_v12 = vadd.f32 %v2053_v61, %v12448_v27  ;;  %v2309_v27 = vpop.f32.mrf.mxu3 }
 0x1fe   :  { %2713 = vmatpush.bf16.msrb.mxu1 %v11110_v45 }
 0x1ff   :  { %v2472_v33 = vpack.c.bf16 %v2468_v58, %v2468_v58  ;;  %v11119_v58 = vld [vmem:[#allocation12 + $0x88] sm:$0xff] }
 0x200   :  { %v2448_v30 = vpop.f32.mrf.mxu0  ;;  %v2193_v14 = vpop.f32.mrf.mxu2  ;;  %2899 = vmatpush.bf16.msrb.mxu3 %v11119_v58 }
 0x201   :  { %v2477_v38 = vshrl.u32 %v2472_v33, 16  ;;  %v2480_v49 = vshll.u32 %v2472_v33, 16  ;;  %v2457_v51 = vadd.f32 %v2448_v30, %v2313_v26  ;;  %v2199_v25 = vadd.f32 %v2193_v14, %v2054_v12  ;;  %v11102_v30 = vld [vmem:[#allocation12] sm:$0xff] }
 0x202   :  { %2788 = vmatpush.bf16.msrb.mxu2 %v11102_v30 }
 0x203   :  { %v2479_v4 = vrot.slane %v2477_v38, 6  ;;  %v2482_v62 = vrot.slane %v2480_v49, 7  ;;  %v2465_v10 = vadd.f32 %v12450_v53, %v2457_v51 }
 0x204   :  { %2900 = vmatpush.bf16.msrb.mxu3 %v11118_v5 }
 0x205   :  { %v2483_v41 = vor.u32 %v2482_v62, %v2479_v4  ;;  %v2469_v43 = vmax.f32 %v2465_v10, 0.0  ;;  %v2315_v62 = vadd.f32 %v2309_v27, %v2199_v25 }
 0x207   :  { %v2520_v63 = vsel %vm11912_vm5, %v2483_v41, %v12330_v60  ;;  %v2473_v8 = vpack.c.bf16 %v2469_v43, %v2469_v43  ;;  %v2484_v38 = vrot.slane %v2483_v41, 4 }
 0x208   :  { %2521 = vst [vmem:[#allocation2] sm:$0xe] %v2520_v63  ;;  %v2451_v24 = vpop.f32.mrf.mxu0 }
 0x209   :  { %v2486_v18 = vshrl.u32 %v2473_v8, 16  ;;  %v2489_v1 = vshll.u32 %v2473_v8, 16  ;;  %v2458_v46 = vadd.f32 %v2451_v24, %v2314_v21 }
 0x20b   :  { %v2488_v33 = vrot.slane %v2486_v18, 6  ;;  %v2491_v26 = vrot.slane %v2489_v1, 7  ;;  %v2466_v60 = vadd.f32 %v12450_v53, %v2458_v46  ;;  %v2526_v1 = vld [vmem:[#allocation2 + $0xc] sm:$0xe] }
 0x20d   :  { %v2492_v49 = vor.u32 %v2491_v26, %v2488_v33  ;;  %v2470_v51 = vmax.f32 %v2466_v60, 0.0 }
 0x20f   :  { %v2493_v55 = vsel %vm11922_vm7, %v2484_v38, %v2492_v49  ;;  %v2494_v29 = vrot.slane %v2492_v49, 4  ;;  %v2474_v4 = vpack.c.bf16 %v2470_v51, %v2470_v51  ;;  %v12461_v10 = vld [vmem:[#allocation2] sm:$0xe] }
 0x210   :  { %2522 = vst [vmem:[#allocation2 + $0x4] sm:$0xf] %v2493_v55  ;;  %v2453_v17 = vpop.f32.mrf.mxu0  ;;  %v2578_v39 = vshrl.u32 %v12461_v10, 16  ;;  %v2581_v41 = vshll.u32 %v12461_v10, 16  ;;  %v2800_v24 = vld [vmem:[#allocation2] sm:$0xc] }
 0x211   :  { %v2524_v43 = vsel %vm11908_vm4, %v2494_v29, %v2523_v15  ;;  %v2496_v7 = vshrl.u32 %v2474_v4, 16  ;;  %v2499_v61 = vshll.u32 %v2474_v4, 16  ;;  %v2459_v63 = vadd.f32 %v2453_v17, %v2315_v62 }
 0x212   :  { %2525 = vst [vmem:[#allocation2 + $0x8] sm:$0x3] %v2524_v43  ;;  %v2580_v12 = vrot.slane %v2578_v39, 5  ;;  %v2583_v18 = vrot.slane %v2581_v41, 6  ;;  %v9216_v33 = vrot.slane %v12461_v10, 9  ;;  %v9282_v26 = vrot.slane %v2800_v24, 10 }
 0x213   :  { %v2498_v8 = vrot.slane %v2496_v7, 6  ;;  %v2501_v21 = vrot.slane %v2499_v61, 7  ;;  %v2467_v14 = vadd.f32 %v12450_v53, %v2459_v63 }
 0x214   :  { %v2584_v27 = vor.u32 %v2583_v18, %v2580_v12 }
 0x215   :  { %v2502_v28 = vor.u32 %v2501_v21, %v2498_v8  ;;  %v2471_v32 = vmax.f32 %v2467_v14, 0.0 }
 0x217   :  { %v2527_v46 = vsel %vm11912_vm5, %v2502_v28, %v2526_v1  ;;  %v2475_v58 = vpack.c.bf16 %v2471_v32, %v2471_v32  ;;  %v2534_v25 = vld [vmem:[#allocation2 + $0x4] sm:$0xf]  ;;  %v2503_v55 = vrot.slane %v2502_v28, 4  ;;  %v2585_v32 = vrot.slane %v2584_v27, 4 }
 0x218   :  { %2528 = vst [vmem:[#allocation2 + $0xc] sm:$0xe] %v2527_v46  ;;  %v2547_v60 = vrot.slane %v2534_v25, 5  ;;  %v2808_v30 = vrot.slane %v2534_v25, 6  ;;  %v2587_v37 = vshrl.u32 %v2534_v25, 16  ;;  %v2590_v53 = vshll.u32 %v2534_v25, 16 }
 0x219   :  { %v2505_v38 = vshrl.u32 %v2475_v58, 16  ;;  %v2508_v49 = vshll.u32 %v2475_v58, 16  ;;  %v2535_v51 = vld [vmem:[#allocation2 + $0x8] sm:$0x1]  ;;  %v2530_v46 = vld [vmem:[#allocation2 + $0x14] sm:$0x3] }
 0x21a   :  { %v2575_v5 = vld [vmem:[#allocation2 + $0x8] sm:$0x3]  ;;  %v2548_v29 = vsel %vm12044_vm1, %v9216_v33, %v2547_v60  ;;  %v2549_v15 = vrot.slane %v2547_v60, 4  ;;  %v2550_v4 = vrot.slane %v2535_v51, 5  ;;  %v2809_v45 = vsel %vm12123_vm3, %v9282_v26, %v2808_v30 }
 0x21b   :  { %v2507_v62 = vrot.slane %v2505_v38, 6  ;;  %v2510_v17 = vrot.slane %v2508_v49, 7  ;;  %v2810_v39 = vrot.slane %v2808_v30, 4  ;;  %v2725_v43 = vunpack.c.l.b16 %v2548_v29 }
 0x21c   :  { %v2551_v41 = vsel %vm12044_vm1, %v2549_v15, %v2550_v4  ;;  %v2811_v7 = vrot.slane %v2575_v5, 6  ;;  %v2589_v61 = vrot.slane %v2587_v37, 5  ;;  %v2592_v21 = vrot.slane %v2590_v53, 6 }
 0x21d   :  { %v2511_v63 = vor.u32 %v2510_v17, %v2507_v62  ;;  %v2726_v8 = vunpack.c.l.b16 %v2551_v41  ;;  %v2597_v14 = vshrl.u32 %v2575_v5, 16  ;;  %v2837_v28 = vunpack.c.l.b16 %v2809_v45 }
 0x21e   :  { %v2812_v24 = vsel %vm12123_vm3, %v2810_v39, %v2811_v7  ;;  %v2600_v12 = vshll.u32 %v2575_v5, 16  ;;  %v2593_v33 = vor.u32 %v2592_v21, %v2589_v61 }
 0x21f   :  { %v2512_v18 = vsel %vm11922_vm7, %v2503_v55, %v2511_v63  ;;  %v2513_v1 = vrot.slane %v2511_v63, 4  ;;  %v2729_v58 = vpack.c.b16 %v2726_v8, %v2725_v43  ;;  %v2838_v25 = vunpack.c.l.b16 %v2812_v24  ;;  %v2536_v30 = vld [vmem:[#allocation2 + $0xc] sm:$0xe] }
 0x220   :  { %2529 = vst [vmem:[#allocation2 + $0x10] sm:$0xf] %v2512_v18  ;;  %v2599_v26 = vrot.slane %v2597_v14, 5  ;;  %v2602_v60 = vrot.slane %v2600_v12, 6  ;;  %v2594_v38 = vsel %vm12022_vm15, %v2585_v32, %v2593_v33  ;;  %v2595_v49 = vrot.slane %v2593_v33, 4 }
 0x221   :  { %v2531_v37 = vsel %vm11908_vm4, %v2513_v1, %v2530_v46  ;;  %2789 = vmatmul.bf16.vlgmr.msrb.gmra.mxu2 %v2729_v58  ;;  %v2841_v53 = vpack.c.b16 %v2838_v25, %v2837_v28  ;;  %v2606_v5 = vshrl.u32 %v2536_v30, 16  ;;  %v2609_v27 = vshll.u32 %v2536_v30, 16  ;;  %v2801_v4 = vld [vmem:[#allocation2 + $0xc] sm:$0xc] }
 0x222   :  { %2532 = vst [vmem:[#allocation2 + $0x14] sm:$0x3] %v2531_v37  ;;  %v2603_v51 = vor.u32 %v2602_v60, %v2599_v26  ;;  %v2650_v29 = vunpack.c.l.b16 %v2594_v38  ;;  %v9217_v41 = vrot.slane %v2536_v30, 9  ;;  %v9283_v21 = vrot.slane %v2801_v4, 10 }
 0x223   :  { %2901 = vmatmul.bf16.vlgmr.msrb.gmra.mxu3 %v2841_v53  ;;  %v2608_v45 = vrot.slane %v2606_v5, 5  ;;  %v2611_v39 = vrot.slane %v2609_v27, 6 }
 0x224   :  { %v2604_v55 = vsel %vm12022_vm15, %v2595_v49, %v2603_v51 }
 0x225   :  { %v2651_v15 = vunpack.c.l.b16 %v2604_v55  ;;  %v2612_v46 = vor.u32 %v2611_v39, %v2608_v45 }
 0x227   :  { %v2654_v62 = vpack.c.b16 %v2651_v15, %v2650_v29  ;;  %v2537_v17 = vld [vmem:[#allocation2 + $0x10] sm:$0xf]  ;;  %v2613_v55 = vrot.slane %v2612_v46, 4  ;;  %v9438_v46 = vld [vmem:[#allocation6 + $0x460] sm:$0xf] }
 0x228   :  { %v2554_v43 = vrot.slane %v2537_v17, 5  ;;  %v2815_v7 = vrot.slane %v2537_v17, 6  ;;  %v2615_v61 = vshrl.u32 %v2537_v17, 16  ;;  %v2618_v14 = vshll.u32 %v2537_v17, 16 }
 0x229   :  { %2714 = vmatmul.bf16.vlgmr.msrb.gmra.mxu1 %v2654_v62  ;;  %v2538_v63 = vld [vmem:[#allocation2 + $0x14] sm:$0x1] }
 0x22a   :  { %v2576_v8 = vld [vmem:[#allocation2 + $0x14] sm:$0x3]  ;;  %v2555_v24 = vsel %vm12044_vm1, %v9217_v41, %v2554_v43  ;;  %v2556_v28 = vrot.slane %v2554_v43, 4  ;;  %v2557_v32 = vrot.slane %v2538_v63, 5  ;;  %v2816_v12 = vsel %vm12123_vm3, %v9283_v21, %v2815_v7  ;;  %v11143_v63 = vld [vmem:[#allocation6 + $0x474] sm:$0xf0] }
 0x22b   :  { %v2817_v18 = vrot.slane %v2815_v7, 4  ;;  %v2818_v1 = vrot.slane %v2576_v8, 6  ;;  %v2617_v25 = vrot.slane %v2615_v61, 5  ;;  %v2620_v33 = vrot.slane %v2618_v14, 6  ;;  %v9446_v61 = vld [vmem:[#allocation6 + $0x470] sm:$0xf] }
 0x22c   :  { %v2558_v58 = vsel %vm12044_vm1, %v2556_v28, %v2557_v32  ;;  %v2625_v26 = vshrl.u32 %v2576_v8, 16  ;;  %v2727_v60 = vunpack.c.l.b16 %v2555_v24  ;;  %v2628_v53 = vshll.u32 %v2576_v8, 16  ;;  %v11142_v8 = vld [vmem:[#allocation6 + $0x474] sm:$0xf]  ;;  %v9448_v24 = vld [vmem:[#allocation6 + $0x478] sm:$0xf0] }
 0x22d   :  { %v2728_v30 = vunpack.c.l.b16 %v2558_v58  ;;  %v2819_v37 = vsel %vm12123_vm3, %v2817_v18, %v2818_v1  ;;  %v2839_v38 = vunpack.c.l.b16 %v2816_v12  ;;  %v2621_v51 = vor.u32 %v2620_v33, %v2617_v25  ;;  %v9440_v25 = vld [vmem:[#allocation6 + $0x468] sm:$0xf0]  ;;  %v9430_v33 = vld [vmem:[#allocation6 + $0x450] sm:$0xf] }
 0x22e   :  { %v2840_v49 = vunpack.c.l.b16 %v2819_v37  ;;  %v2627_v5 = vrot.slane %v2625_v26, 5  ;;  %v2630_v29 = vrot.slane %v2628_v53, 6  ;;  %v597_v7 = vadd.f32 %v12263_v36, %v12257_v35  ;;  %v11141_v35 = vld [vmem:[#allocation6 + $0x464] sm:$0xf0]  ;;  %v11140_v36 = vld [vmem:[#allocation6 + $0x464] sm:$0xf] }
 0x22f   :  { %v2730_v27 = vpack.c.b16 %v2728_v30, %v2727_v60  ;;  %v2623_v4 = vrot.slane %v2621_v51, 4  ;;  %v2622_v62 = vsel %vm12022_vm15, %v2613_v55, %v2621_v51  ;;  %v9447_v14 = vor.u32 %v11143_v63, %v9446_v61  ;;  %v11138_v37 = vld [vmem:[#allocation6 + $0x454] sm:$0xf]  ;;  %v9432_v53 = vld [vmem:[#allocation6 + $0x458] sm:$0xf0] }
 0x230   :  { %v2842_v15 = vpack.c.b16 %v2840_v49, %v2839_v38  ;;  %v2631_v17 = vor.u32 %v2630_v29, %v2627_v5  ;;  %v2652_v39 = vunpack.c.l.b16 %v2622_v62  ;;  %v775_v21 = vadd.f32 %v12279_v48, %v597_v7  ;;  %v11139_v48 = vld [vmem:[#allocation6 + $0x454] sm:$0xf0]  ;;  %v11553_v38 = vld [vmem:[#allocation8] sm:$0x3]  ;;  %v9374_v55 = vld [vmem:[#allocation6 + $0x4f0] sm:$0xf] }
 0x231   :  { %2794 = vmatmul.bf16.gmra.mxu2 %v2730_v27  ;;  %v9451_v28 = vor.u32 %v11142_v8, %v9448_v24  ;;  %v602_v18 = vadd.f32 %v12273_v42, %v12267_v44  ;;  %v9439_v58 = vor.u32 %v11141_v35, %v9438_v46  ;;  %v9443_v30 = vor.u32 %v11140_v36, %v9440_v25  ;;  %v12509_v44 = vld [vmem:[#allocation14] ss:$0 sm:$0xff]  ;;  %v11159_v29 = vld [vmem:[#allocation6 + $0x4f4] sm:$0xf0]  ;;  %v11136_v63 = vld [vmem:[#allocation6 + $0x444] sm:$0xf] }
 0x232   :  { %v2632_v45 = vsel %vm12022_vm15, %v2623_v4, %v2631_v17  ;;  %3303 = vmatpush.bf16.msra.mxu2 %v9447_v14  ;;  %v977_v32 = vadd.f32 %v12287_v31, %v775_v21  ;;  %v9431_v42 = vor.u32 %v11139_v48, %v9430_v33  ;;  %v9435_v5 = vor.u32 %v11138_v37, %v9432_v53  ;;  %v9424_v8 = vld [vmem:[#allocation6 + $0x448] sm:$0xf0]  ;;  %v9366_v21 = vld [vmem:[#allocation6 + $0x4e0] sm:$0xf]  ;;  %v11156_v24 = vld [vmem:[#allocation6 + $0x4e4] sm:$0xf] }
 0x233   :  { %2906 = vmatmul.bf16.gmra.mxu3 %v2842_v15  ;;  %v2653_v41 = vunpack.c.l.b16 %v2632_v45  ;;  %v779_v51 = vadd.f32 %v12297_v6, %v602_v18  ;;  %v11158_v15 = vld [vmem:[#allocation6 + $0x4f4] sm:$0xf]  ;;  %v9375_v17 = vor.u32 %v11159_v29, %v9374_v55  ;;  %v9376_v45 = vld [vmem:[#allocation6 + $0x4f8] sm:$0xf0]  ;;  %v9414_v46 = vld [vmem:[#allocation6 + $0x430] sm:$0xf] }
 0x234   :  { %3322 = vmatpush.bf16.msra.mxu3 %v9451_v28  ;;  %v1150_v12 = vadd.f32 %v12321_v2, %v977_v32  ;;  %v12507_v2 = vperm.slane %v11553_v38, 1  ;;  %v9379_v7 = vor.u32 %v11158_v15, %v9376_v45  ;;  %v9368_v28 = vld [vmem:[#allocation6 + $0x4e8] sm:$0xf0]  ;;  %v11134_v35 = vld [vmem:[#allocation6 + $0x434] sm:$0xf] }
 0x235   :  { %v2655_v43 = vpack.c.b16 %v2653_v41, %v2652_v39  ;;  %v9422_v39 = vld [vmem:[#allocation6 + $0x440] sm:$0xf]  ;;  %v11137_v41 = vld [vmem:[#allocation6 + $0x444] sm:$0xf0]  ;;  %v981_v6 = vadd.f32 %v12304_v54, %v779_v51  ;;  %3173 = vmatpush.bf16.msra.mxu0 %v9375_v17  ;;  %v11135_v54 = vld [vmem:[#allocation6 + $0x434] sm:$0xf0] }
 0x236   :  { %v1349_v31 = vadd.f32 %v12326_v47, %v1150_v12  ;;  %3304 = vmatpush.bf16.msra.mxu2 %v9439_v58  ;;  %v1725_v4 = vadd.f32 %v12507_v2, %v12398_v56  ;;  %v9423_v61 = vor.u32 %v11137_v41, %v9422_v39  ;;  %v9427_v56 = vor.u32 %v11136_v63, %v9424_v8  ;;  %v9416_v48 = vld [vmem:[#allocation6 + $0x438] sm:$0xf0]  ;;  %v9358_v51 = vld [vmem:[#allocation6 + $0x4d0] sm:$0xf]  ;;  %v11133_v39 = vld [vmem:[#allocation6 + $0x424] sm:$0xf0] }
 0x237   :  { %3192 = vmatpush.bf16.msra.mxu1 %v9379_v7  ;;  %v9415_v33 = vor.u32 %v11135_v54, %v9414_v46  ;;  %v11132_v41 = vld [vmem:[#allocation6 + $0x424] sm:$0xf]  ;;  %v9350_v63 = vld [vmem:[#allocation6 + $0x4c0] sm:$0xf]  ;;  %v11153_v8 = vld [vmem:[#allocation6 + $0x4c4] sm:$0xf0] }
 0x238   :  { %3323 = vmatpush.bf16.msra.mxu3 %v9443_v30  ;;  %v1523_v47 = vadd.f32 %v12408_v16, %v1349_v31  ;;  %v11157_v16 = vld [vmem:[#allocation6 + $0x4e4] sm:$0xf0]  ;;  %v11131_v46 = vld [vmem:[#allocation6 + $0x414] sm:$0xf0]  ;;  %v11130_v54 = vld [vmem:[#allocation6 + $0x414] sm:$0xf] }
 0x239   :  { %2719 = vmatmul.bf16.gmra.mxu1 %v2655_v43  ;;  %v9367_v18 = vor.u32 %v11157_v16, %v9366_v21  ;;  %v11152_v16 = vld [vmem:[#allocation6 + $0x4c4] sm:$0xf] }
 0x23a   :  { %3305 = vmatpush.bf16.msra.mxu2 %v9431_v42  ;;  %v1713_v36 = vadd.f32 %v12413_v3, %v1523_v47  ;;  %v9406_v47 = vld [vmem:[#allocation6 + $0x420] sm:$0xf] }
 0x23b   :  { %3174 = vmatpush.bf16.msra.mxu0 %v9367_v18 }
 0x23c   :  { %3324 = vmatpush.bf16.msra.mxu3 %v9435_v5  ;;  %v1727_v53 = vadd.f32 %v12507_v2, %v1713_v36  ;;  %v11155_v5 = vld [vmem:[#allocation6 + $0x4d4] sm:$0xf0] }
 0x23d   :  { %v9359_v15 = vor.u32 %v11155_v5, %v9358_v51 }
 0x23e   :  { %3306 = vmatpush.bf16.msra.mxu2 %v9423_v61  ;;  %v9407_v61 = vor.u32 %v11133_v39, %v9406_v47  ;;  %v11149_v47 = vld [vmem:[#allocation6 + $0x4a4] sm:$0xf0] }
 0x23f   :  { %3175 = vmatpush.bf16.msra.mxu0 %v9359_v15 }
 0x240   :  { %3325 = vmatpush.bf16.msra.mxu3 %v9427_v56  ;;  %v9351_v56 = vor.u32 %v11153_v8, %v9350_v63  ;;  %v11191_v63 = vld [vmem:[#allocation6 + $0x5f4] sm:$0xf0]  ;;  %v11190_v8 = vld [vmem:[#allocation6 + $0x5f4] sm:$0xf] }
 0x242   :  { %3307 = vmatpush.bf16.msra.mxu2 %v9415_v33 }
 0x243   :  { %3176 = vmatpush.bf16.msra.mxu0 %v9351_v56 }
 0x246   :  { %3308 = vmatpush.bf16.msra.mxu2 %v9407_v61 }
 0x2a4   :  { %v2790_v1 = vpop.f32.mrf.mxu2 }
 0x2a6   :  { %v2715_v26 = vpop.f32.mrf.mxu1  ;;  %v2902_v60 = vpop.f32.mrf.mxu3 }
 0x2a7   :  { %v2791_v49 = vadd.f32 %v2790_v1, %v2715_v26  ;;  %v9371_v1 = vor.u32 %v11156_v24, %v9368_v28  ;;  %v1154_v26 = vadd.f32 %v12354_v22, %v981_v6  ;;  %v11154_v22 = vld [vmem:[#allocation6 + $0x4d4] sm:$0xf]  ;;  %v9408_v6 = vld [vmem:[#allocation6 + $0x428] sm:$0xf0]  ;;  %v9398_v28 = vld [vmem:[#allocation6 + $0x410] sm:$0xf] }
 0x2a8   :  { %v9352_v24 = vld [vmem:[#allocation6 + $0x4c8] sm:$0xf0]  ;;  %v9399_v36 = vor.u32 %v11131_v46, %v9398_v28  ;;  %v9326_v28 = vld [vmem:[#allocation6 + $0x490] sm:$0xf]  ;;  %v11146_v46 = vld [vmem:[#allocation6 + $0x494] sm:$0xf] }
 0x2a9   :  { %v2912_v27 = vadd.f32 %v2902_v60, %v2791_v49  ;;  %v9419_v60 = vor.u32 %v11134_v35, %v9416_v48  ;;  %3193 = vmatpush.bf16.msra.mxu1 %v9371_v1  ;;  %v1353_v3 = vadd.f32 %v12368_v50, %v1154_v26  ;;  %v9355_v35 = vor.u32 %v11152_v16, %v9352_v24 }
 0x2aa   :  { %3309 = vmatpush.bf16.msra.mxu2 %v9399_v36 }
 0x2ab   :  { %v2920_v62 = vadd.f32 %v12509_v44, %v2912_v27  ;;  %3326 = vmatpush.bf16.msra.mxu3 %v9419_v60  ;;  %v1527_v21 = vadd.f32 %v12444_v11, %v1353_v3  ;;  %v1729_v11 = vadd.f32 %v12507_v2, %v12430_v57  ;;  %v11151_v60 = vld [vmem:[#allocation6 + $0x4b4] sm:$0xf0]  ;;  %v9344_v57 = vld [vmem:[#allocation6 + $0x4b8] sm:$0xf0] }
 0x2ac   :  { %v2792_v43 = vpop.f32.mrf.mxu2 }
 0x2ad   :  { %v2924_v14 = vadd.f32 %v2920_v62, %v1725_v4  ;;  %v9360_v4 = vld [vmem:[#allocation6 + $0x4d8] sm:$0xf0] }
 0x2ae   :  { %v2717_v32 = vpop.f32.mrf.mxu1  ;;  %v2904_v12 = vpop.f32.mrf.mxu3  ;;  %v9363_v45 = vor.u32 %v11154_v22, %v9360_v4  ;;  %v11128_v22 = vld [vmem:[#allocation6 + $0x404] sm:$0xf]  ;;  %v9334_v4 = vld [vmem:[#allocation6 + $0x4a0] sm:$0xf] }
 0x2af   :  { %v2928_v58 = vmax.f32 %v2924_v14, 0.0  ;;  %v2793_v25 = vadd.f32 %v2792_v43, %v2717_v32  ;;  %v9411_v14 = vor.u32 %v11132_v41, %v9408_v6  ;;  %v9335_v39 = vor.u32 %v11149_v47, %v9334_v4  ;;  %v9336_v41 = vld [vmem:[#allocation6 + $0x4a8] sm:$0xf0]  ;;  %v9576_v6 = vld [vmem:[#allocation6 + $0x5f0] sm:$0xf] }
 0x2b0   :  { %3194 = vmatpush.bf16.msra.mxu1 %v9363_v45  ;;  %v9512_v47 = vld [vmem:[#allocation6 + $0x570] sm:$0xf] }
 0x2b1   :  { %v2932_v30 = vpack.c.bf16 %v2928_v58, %v2928_v58  ;;  %v2913_v37 = vadd.f32 %v2904_v12, %v2793_v25  ;;  %3327 = vmatpush.bf16.msra.mxu3 %v9411_v14  ;;  %v9400_v58 = vld [vmem:[#allocation6 + $0x418] sm:$0xf0]  ;;  %v9342_v25 = vld [vmem:[#allocation6 + $0x4b0] sm:$0xf] }
 0x2b3   :  { %v2937_v31 = vshrl.u32 %v2932_v30, 16  ;;  %v2940_v38 = vshll.u32 %v2932_v30, 16  ;;  %v2921_v49 = vadd.f32 %v12509_v44, %v2913_v37  ;;  %v11150_v30 = vld [vmem:[#allocation6 + $0x4b4] sm:$0xf]  ;;  %v1717_v37 = vadd.f32 %v12446_v34, %v1527_v21  ;;  %v11148_v34 = vld [vmem:[#allocation6 + $0x4a4] sm:$0xf] }
 0x2b4   :  { %v2795_v42 = vpop.f32.mrf.mxu2  ;;  %3195 = vmatpush.bf16.msra.mxu1 %v9355_v35  ;;  %v9347_v5 = vor.u32 %v11150_v30, %v9344_v57  ;;  %v9339_v61 = vor.u32 %v11148_v34, %v9336_v41  ;;  %v9578_v21 = vld [vmem:[#allocation6 + $0x5f8] sm:$0xf0]  ;;  %v11145_v57 = vld [vmem:[#allocation6 + $0x484] sm:$0xf0] }
 0x2b5   :  { %v2939_v27 = vrot.slane %v2937_v31, 6  ;;  %v2942_v55 = vrot.slane %v2940_v38, 7  ;;  %v2925_v29 = vadd.f32 %v2921_v49, %v1727_v53  ;;  %v9343_v31 = vor.u32 %v11151_v60, %v9342_v25  ;;  %v9390_v38 = vld [vmem:[#allocation6 + $0x400] sm:$0xf]  ;;  %v11129_v49 = vld [vmem:[#allocation6 + $0x404] sm:$0xf0] }
 0x2b6   :  { %v2720_v62 = vpop.f32.mrf.mxu1  ;;  %v2907_v17 = vpop.f32.mrf.mxu3  ;;  %v11189_v25 = vld [vmem:[#allocation6 + $0x5e4] sm:$0xf0] }
 0x2b7   :  { %v12522_v43 = vor.u32 %v2942_v55, %v2939_v27  ;;  %v2929_v50 = vmax.f32 %v2925_v29, 0.0  ;;  %v2796_v7 = vadd.f32 %v2795_v42, %v2720_v62  ;;  %v9392_v27 = vld [vmem:[#allocation6 + $0x408] sm:$0xf0]  ;;  %v9391_v29 = vor.u32 %v11129_v49, %v9390_v38  ;;  %3177 = vmatpush.bf16.msra.mxu0 %v9343_v31  ;;  %v9318_v31 = vld [vmem:[#allocation6 + $0x480] sm:$0xf] }
 0x2b8   :  { %v9395_v15 = vor.u32 %v11128_v22, %v9392_v27  ;;  %3196 = vmatpush.bf16.msra.mxu1 %v9347_v5  ;;  %v2986_v38 = vld [vmem:[#allocation2 + $0xc] sm:$0xe]  ;;  %v11187_v5 = vld [vmem:[#allocation6 + $0x5d4] sm:$0xf0]  ;;  %v11186_v22 = vld [vmem:[#allocation6 + $0x5d4] sm:$0xf]  ;;  %v9319_v27 = vor.u32 %v11145_v57, %v9318_v31 }
 0x2b9   :  { %v2944_v32 = vrot.slane %v12522_v43, 4  ;;  %v2980_v12 = vsel %vm11912_vm5, %v12522_v43, %v12461_v10  ;;  %v2933_v18 = vpack.c.bf16 %v2929_v50, %v2929_v50  ;;  %v2914_v1 = vadd.f32 %v2907_v17, %v2796_v7  ;;  %v2983_v50 = vld [vmem:[#allocation2 + $0x8] sm:$0x3]  ;;  %3310 = vmatpush.bf16.msra.mxu2 %v9391_v29  ;;  %v11144_v49 = vld [vmem:[#allocation6 + $0x484] sm:$0xf] }
 0x2ba   :  { %2981 = vst [vmem:[#allocation2] sm:$0xe] %v2980_v12  ;;  %v9403_v10 = vor.u32 %v11130_v54, %v9400_v58  ;;  %v1731_v43 = vadd.f32 %v12507_v2, %v1717_v37  ;;  %v11147_v12 = vld [vmem:[#allocation6 + $0x494] sm:$0xf0]  ;;  %v9581_v2 = vor.u32 %v11190_v8, %v9578_v21  ;;  %v9328_v54 = vld [vmem:[#allocation6 + $0x498] sm:$0xf0] }
 0x2bb   :  { %v2946_v33 = vshrl.u32 %v2933_v18, 16  ;;  %v2949_v48 = vshll.u32 %v2933_v18, 16  ;;  %v2922_v26 = vadd.f32 %v12509_v44, %v2914_v1  ;;  %v9577_v18 = vor.u32 %v11191_v63, %v9576_v6  ;;  %3178 = vmatpush.bf16.msra.mxu0 %v9335_v39  ;;  %v9568_v58 = vld [vmem:[#allocation6 + $0x5e0] sm:$0xf]  ;;  %v11175_v6 = vld [vmem:[#allocation6 + $0x574] sm:$0xf0] }
 0x2bc   :  { %v2797_v53 = vpop.f32.mrf.mxu2  ;;  %3328 = vmatpush.bf16.msra.mxu3 %v9403_v10  ;;  %v9327_v1 = vor.u32 %v11147_v12, %v9326_v28  ;;  %3197 = vmatpush.bf16.msra.mxu1 %v9339_v61  ;;  %v9570_v10 = vld [vmem:[#allocation6 + $0x5e8] sm:$0xf0] }
 0x2bd   :  { %v2948_v3 = vrot.slane %v2946_v33, 6  ;;  %v2951_v42 = vrot.slane %v2949_v48, 7  ;;  %v2926_v51 = vadd.f32 %v2922_v26, %v1729_v11  ;;  %3667 = vmatpush.bf16.msrb.mxu2 %v9577_v18  ;;  %v9331_v33 = vor.u32 %v11146_v46, %v9328_v54  ;;  %v11188_v26 = vld [vmem:[#allocation6 + $0x5e4] sm:$0xf]  ;;  %v9514_v18 = vld [vmem:[#allocation6 + $0x578] sm:$0xf0] }
 0x2be   :  { %v2722_v55 = vpop.f32.mrf.mxu1  ;;  %v2909_v7 = vpop.f32.mrf.mxu3  ;;  %v9569_v48 = vor.u32 %v11189_v25, %v9568_v58  ;;  %v11184_v58 = vld [vmem:[#allocation6 + $0x5c4] sm:$0xf]  ;;  %v9554_v25 = vld [vmem:[#allocation6 + $0x5c8] sm:$0xf0] }
 0x2bf   :  { %v2952_v62 = vor.u32 %v2951_v42, %v2948_v3  ;;  %v2930_v17 = vmax.f32 %v2926_v51, 0.0  ;;  %v2798_v45 = vadd.f32 %v2797_v53, %v2722_v55  ;;  %v9573_v53 = vor.u32 %v11188_v26, %v9570_v10  ;;  %v9560_v3 = vld [vmem:[#allocation6 + $0x5d0] sm:$0xf]  ;;  %3179 = vmatpush.bf16.msra.mxu0 %v9327_v1 }
 0x2c0   :  { %3329 = vmatpush.bf16.msra.mxu3 %v9395_v15  ;;  %3198 = vmatpush.bf16.msra.mxu1 %v9331_v33  ;;  %v9561_v29 = vor.u32 %v11187_v5, %v9560_v3  ;;  %v9562_v15 = vld [vmem:[#allocation6 + $0x5d8] sm:$0xf0]  ;;  %v9557_v10 = vor.u32 %v11184_v58, %v9554_v25  ;;  %v11183_v5 = vld [vmem:[#allocation6 + $0x5b4] sm:$0xf0]  ;;  %v11178_v58 = vld [vmem:[#allocation6 + $0x594] sm:$0xf] }
 0x2c1   :  { %v2953_v14 = vsel %vm11922_vm7, %v2944_v32, %v2952_v62  ;;  %v2954_v56 = vrot.slane %v2952_v62, 4  ;;  %v2934_v16 = vpack.c.bf16 %v2930_v17, %v2930_v17  ;;  %v2915_v24 = vadd.f32 %v2909_v7, %v2798_v45  ;;  %3668 = vmatpush.bf16.msrb.mxu2 %v9569_v48  ;;  %v3014_v4 = vld [vmem:[#allocation2] sm:$0xf]  ;;  %v9530_v25 = vld [vmem:[#allocation6 + $0x598] sm:$0xf0] }
 0x2c2   :  { %2982 = vst [vmem:[#allocation2 + $0x4] sm:$0xf] %v2953_v14  ;;  %v9565_v39 = vor.u32 %v11186_v22, %v9562_v15  ;;  %v9513_v14 = vor.u32 %v11175_v6, %v9512_v47  ;;  %v11182_v15 = vld [vmem:[#allocation6 + $0x5b4] sm:$0xf] }
 0x2c3   :  { %v2984_v11 = vsel %vm11908_vm4, %v2954_v56, %v2983_v50  ;;  %v2956_v35 = vshrl.u32 %v2934_v16, 16  ;;  %v2959_v36 = vshll.u32 %v2934_v16, 16  ;;  %v2923_v32 = vadd.f32 %v12509_v44, %v2915_v24  ;;  %v9320_v44 = vld [vmem:[#allocation6 + $0x488] sm:$0xf0]  ;;  %v11174_v56 = vld [vmem:[#allocation6 + $0x574] sm:$0xf]  ;;  %3180 = vmatpush.bf16.msra.mxu0 %v9319_v27 }
 0x2c4   :  { %2985 = vst [vmem:[#allocation2 + $0x8] sm:$0x3] %v2984_v11  ;;  %3686 = vmatpush.bf16.msrb.mxu3 %v9581_v2  ;;  %v9323_v55 = vor.u32 %v11144_v49, %v9320_v44  ;;  %v3024_v50 = vshll.u32 %v3014_v4, 16  ;;  %v9517_v54 = vor.u32 %v11174_v56, %v9514_v18  ;;  %v9552_v11 = vld [vmem:[#allocation6 + $0x5c0] sm:$0xf] }
 0x2c5   :  { %v2958_v60 = vrot.slane %v2956_v35, 6  ;;  %v2961_v30 = vrot.slane %v2959_v36, 7  ;;  %v2927_v37 = vadd.f32 %v2923_v32, %v1731_v43  ;;  %v3021_v43 = vshrl.u32 %v3014_v4, 16  ;;  %3669 = vmatpush.bf16.msrb.mxu2 %v9561_v29  ;;  %v11185_v32 = vld [vmem:[#allocation6 + $0x5c4] sm:$0xf0] }
 0x2c6   :  { %3199 = vmatpush.bf16.msra.mxu1 %v9323_v55  ;;  %v3026_v24 = vrot.slane %v3024_v50, 5  ;;  %v9553_v26 = vor.u32 %v11185_v32, %v9552_v11  ;;  %v9506_v49 = vld [vmem:[#allocation6 + $0x568] sm:$0xf0]  ;;  %v9546_v4 = vld [vmem:[#allocation6 + $0x5b8] sm:$0xf0] }
 0x2c7   :  { %v12540_v42 = vor.u32 %v2961_v30, %v2958_v60  ;;  %v2931_v51 = vmax.f32 %v2927_v37, 0.0  ;;  %v3023_v16 = vrot.slane %v3021_v43, 4  ;;  %3468 = vmatpush.bf16.msrb.mxu0 %v9513_v14  ;;  %v9504_v60 = vld [vmem:[#allocation6 + $0x560] sm:$0xf]  ;;  %v11173_v30 = vld [vmem:[#allocation6 + $0x564] sm:$0xf0] }
 0x2c8   :  { %3687 = vmatpush.bf16.msrb.mxu3 %v9573_v53  ;;  %v2990_v37 = vld [vmem:[#allocation2 + $0x14] sm:$0x3]  ;;  %v9505_v57 = vor.u32 %v11173_v30, %v9504_v60  ;;  %v11170_v6 = vld [vmem:[#allocation6 + $0x554] sm:$0xf]  ;;  %v9498_v50 = vld [vmem:[#allocation6 + $0x558] sm:$0xf0] }
 0x2c9   :  { %v2963_v34 = vrot.slane %v12540_v42, 4  ;;  %v2987_v62 = vsel %vm11912_vm5, %v12540_v42, %v2986_v38  ;;  %v2935_v17 = vpack.c.bf16 %v2931_v51, %v2931_v51  ;;  %v11126_v45 = vld [vmem:[#allocation2] sm:$0xff]  ;;  %v3027_v35 = vor.u32 %v3026_v24, %v3023_v16  ;;  %v11172_v38 = vld [vmem:[#allocation6 + $0x564] sm:$0xf]  ;;  %3670 = vmatpush.bf16.msrb.mxu2 %v9553_v26  ;;  %v9544_v51 = vld [vmem:[#allocation6 + $0x5b0] sm:$0xf] }
 0x2ca   :  { %v12546_v41 = vld [vmem:[#allocation2 + $0x4] sm:$0xf]  ;;  %2988 = vst [vmem:[#allocation2 + $0xc] sm:$0xe] %v2987_v62  ;;  %3311 = vmatmul.bf16.vlgmr.msra.gmra.mxu2 %v11126_v45  ;;  %3330 = vmatmul.bf16.vlgmr.msra.gmra.mxu3 %v11126_v45  ;;  %v9509_v42 = vor.u32 %v11172_v38, %v9506_v49  ;;  %v9545_v29 = vor.u32 %v11183_v5, %v9544_v51  ;;  %v9496_v45 = vld [vmem:[#allocation6 + $0x550] sm:$0xf] }
 0x2cb   :  { %v12549_v7 = vshll.u32 %v12546_v41, 16  ;;  %v12552_v61 = vshrl.u32 %v12546_v41, 16  ;;  %v2965_v63 = vshrl.u32 %v2935_v17, 16  ;;  %v2968_v8 = vshll.u32 %v2935_v17, 16  ;;  %v12554_v21 = vld [vmem:[#allocation2 + $0x8] sm:$0x1]  ;;  %3487 = vmatpush.bf16.msrb.mxu1 %v9517_v54  ;;  %3469 = vmatpush.bf16.msrb.mxu0 %v9505_v57 }
 0x2cc   :  { %3688 = vmatpush.bf16.msrb.mxu3 %v9565_v39  ;;  %v3040_v46 = vshll.u32 %v12554_v21, 16  ;;  %v3028_v53 = vrot.slane %v3027_v35, 4  ;;  %v9549_v17 = vor.u32 %v11182_v15, %v9546_v4  ;;  %v11171_v39 = vld [vmem:[#allocation6 + $0x554] sm:$0xf0]  ;;  %v9501_v14 = vor.u32 %v11170_v6, %v9498_v50  ;;  %v11181_v56 = vld [vmem:[#allocation6 + $0x5a4] sm:$0xf0] }
 0x2cd   :  { %v3032_v28 = vrot.slane %v12549_v7, 5  ;;  %v3036_v12 = vrot.slane %v12552_v61, 4  ;;  %v2967_v2 = vrot.slane %v2965_v63, 6  ;;  %v2970_v1 = vrot.slane %v2968_v8, 7  ;;  %v9536_v63 = vld [vmem:[#allocation6 + $0x5a0] sm:$0xf]  ;;  %3671 = vmatpush.bf16.msrb.mxu2 %v9545_v29 }
 0x2ce   :  { %v3042_v48 = vrot.slane %v3040_v46, 5  ;;  %v3525_v22 = vrot.slane %v12552_v61, 5  ;;  %v9497_v43 = vor.u32 %v11171_v39, %v9496_v45  ;;  %v11180_v16 = vld [vmem:[#allocation6 + $0x5a4] sm:$0xf]  ;;  %v9538_v24 = vld [vmem:[#allocation6 + $0x5a8] sm:$0xf0]  ;;  %v9533_v26 = vor.u32 %v11178_v58, %v9530_v25 }
 0x2cf   :  { %v3037_v36 = vor.u32 %v3036_v12, %v3032_v28  ;;  %v2971_v33 = vor.u32 %v2970_v1, %v2967_v2  ;;  %v3033_v27 = vsel %vm11957_vm10, %v3028_v53, %v3032_v28  ;;  %3488 = vmatpush.bf16.msrb.mxu1 %v9509_v42  ;;  %v9537_v28 = vor.u32 %v11181_v56, %v9536_v63  ;;  %v9488_v18 = vld [vmem:[#allocation6 + $0x540] sm:$0xf]  ;;  %v11169_v2 = vld [vmem:[#allocation6 + $0x544] sm:$0xf0]  ;;  %v11168_v1 = vld [vmem:[#allocation6 + $0x544] sm:$0xf] }
 0x2d0   :  { %3689 = vmatpush.bf16.msrb.mxu3 %v9557_v10  ;;  %3470 = vmatpush.bf16.msrb.mxu0 %v9497_v43  ;;  %v9541_v12 = vor.u32 %v11180_v16, %v9538_v24  ;;  %v9489_v46 = vor.u32 %v11169_v2, %v9488_v18  ;;  %v9490_v54 = vld [vmem:[#allocation6 + $0x548] sm:$0xf0]  ;;  %v9528_v11 = vld [vmem:[#allocation6 + $0x590] sm:$0xf]  ;;  %v11179_v35 = vld [vmem:[#allocation6 + $0x594] sm:$0xf0] }
 0x2d1   :  { %v3038_v31 = vrot.slane %v3037_v36, 4  ;;  %v2972_v44 = vsel %vm11922_vm7, %v2963_v34, %v2971_v33  ;;  %v2973_v3 = vrot.slane %v2971_v33, 4  ;;  %v3085_v34 = vunpack.c.l.b16 %v3033_v27  ;;  %v3017_v33 = vld [vmem:[#allocation2 + $0xc] sm:$0xf]  ;;  %3672 = vmatpush.bf16.msrb.mxu2 %v9537_v28  ;;  %v9480_v57 = vld [vmem:[#allocation6 + $0x530] sm:$0xf] }
 0x2d2   :  { %2989 = vst [vmem:[#allocation2 + $0x10] sm:$0xf] %v2972_v44  ;;  %v9493_v36 = vor.u32 %v11168_v1, %v9490_v54  ;;  %v9529_v32 = vor.u32 %v11179_v35, %v9528_v11  ;;  %v3045_v60 = vshrl.u32 %v3017_v33, 16  ;;  %v3048_v30 = vshll.u32 %v3017_v33, 16  ;;  %v11167_v38 = vld [vmem:[#allocation6 + $0x534] sm:$0xf0] }
 0x2d3   :  { %v3043_v55 = vsel %vm11957_vm10, %v3038_v31, %v3042_v48  ;;  %v2991_v47 = vsel %vm11908_vm4, %v2973_v3, %v2990_v37  ;;  %3489 = vmatpush.bf16.msrb.mxu1 %v9501_v14  ;;  %v3526_v37 = vrot.slane %v12549_v7, 6  ;;  %v9481_v42 = vor.u32 %v11167_v38, %v9480_v57  ;;  %v11166_v51 = vld [vmem:[#allocation6 + $0x534] sm:$0xf]  ;;  %v9482_v15 = vld [vmem:[#allocation6 + $0x538] sm:$0xf0] }
 0x2d4   :  { %v3086_v62 = vunpack.c.l.b16 %v3043_v55  ;;  %2992 = vst [vmem:[#allocation2 + $0x14] sm:$0x3] %v2991_v47  ;;  %3690 = vmatpush.bf16.msrb.mxu3 %v9549_v17  ;;  %3471 = vmatpush.bf16.msrb.mxu0 %v9489_v46  ;;  %v3047_v44 = vrot.slane %v3045_v60, 4  ;;  %v3050_v3 = vrot.slane %v3048_v30, 5  ;;  %v3351_v4 = vrot.slane %v12546_v41, 5 }
 0x2d5   :  { %v12581_v5 = vor.u32 %v3526_v37, %v3525_v22  ;;  %3673 = vmatpush.bf16.msrb.mxu2 %v9529_v32  ;;  %v11177_v17 = vld [vmem:[#allocation6 + $0x584] sm:$0xf0]  ;;  %v11176_v45 = vld [vmem:[#allocation6 + $0x584] sm:$0xf]  ;;  %v9522_v43 = vld [vmem:[#allocation6 + $0x588] sm:$0xf0] }
 0x2d6   :  { %v3089_v8 = vpack.c.b16 %v3086_v62, %v3085_v34  ;;  %v3051_v47 = vor.u32 %v3050_v3, %v3047_v44  ;;  %v9485_v34 = vor.u32 %v11166_v51, %v9482_v15  ;;  %v9520_v62 = vld [vmem:[#allocation6 + $0x580] sm:$0xf]  ;;  %v9525_v14 = vor.u32 %v11176_v45, %v9522_v43  ;;  %v11165_v56 = vld [vmem:[#allocation6 + $0x524] sm:$0xf0]  ;;  %v11164_v16 = vld [vmem:[#allocation6 + $0x524] sm:$0xf] }
 0x2d7   :  { %3490 = vmatpush.bf16.msrb.mxu1 %v9493_v36  ;;  %v9521_v6 = vor.u32 %v11177_v17, %v9520_v62  ;;  %v9472_v50 = vld [vmem:[#allocation6 + $0x520] sm:$0xf]  ;;  %v3529_v63 = vrot.slane %v12581_v5, 4  ;;  %v3353_v24 = vrot.slane %v3351_v4, 4  ;;  %v9474_v18 = vld [vmem:[#allocation6 + $0x528] sm:$0xf0] }
 0x2d8   :  { %3181 = vmatmul.bf16.vlgmr.msra.gmra.mxu0 %v3089_v8  ;;  %3200 = vmatmul.bf16.vlgmr.msra.gmra.mxu1 %v3089_v8  ;;  %v3052_v8 = vrot.slane %v3051_v47, 4  ;;  %v12590_v2 = vld [vmem:[#allocation2] sm:$0xe]  ;;  %v3354_v1 = vrot.slane %v12554_v21, 5  ;;  %v9477_v54 = vor.u32 %v11164_v16, %v9474_v18  ;;  %v12595_v11 = vld [vmem:[#allocation2 + $0x8] sm:$0x3] }
 0x2d9   :  { %v11127_v48 = vld [vmem:[#allocation2 + $0xc] sm:$0xff]  ;;  %3691 = vmatpush.bf16.msrb.mxu3 %v9541_v12  ;;  %3472 = vmatpush.bf16.msrb.mxu0 %v9481_v42  ;;  %v9473_v12 = vor.u32 %v11165_v56, %v9472_v50  ;;  %v3517_v35 = vshrl.u32 %v12590_v2, 16  ;;  %v3520_v36 = vshll.u32 %v12590_v2, 16  ;;  %v9706_v32 = vld [vmem:[#allocation6 + $0x6f0] sm:$0xf]  ;;  %v3531_v21 = vshrl.u32 %v12595_v11, 16 }
 0x2da   :  { %v12568_v10 = vld [vmem:[#allocation2 + $0x10] sm:$0xf]  ;;  %3316 = vmatmul.bf16.gmra.mxu2 %v11127_v48  ;;  %3335 = vmatmul.bf16.gmra.mxu3 %v11127_v48  ;;  %v3534_v33 = vshll.u32 %v12595_v11, 16  ;;  %v11223_v48 = vld [vmem:[#allocation6 + $0x6f4] sm:$0xf0] }
 0x2db   :  { %v12572_v53 = vshll.u32 %v12568_v10, 16  ;;  %v12575_v31 = vshrl.u32 %v12568_v10, 16  ;;  %v12577_v49 = vld [vmem:[#allocation2 + $0x14] sm:$0x1]  ;;  %3491 = vmatpush.bf16.msrb.mxu1 %v9485_v34  ;;  %3674 = vmatpush.bf16.msrb.mxu2 %v9521_v6  ;;  %v3519_v30 = vrot.slane %v3517_v35, 5  ;;  %v3522_v37 = vrot.slane %v3520_v36, 6 }
 0x2dc   :  { %v3064_v29 = vshll.u32 %v12577_v49, 16  ;;  %v9707_v57 = vor.u32 %v11223_v48, %v9706_v32  ;;  %v9708_v38 = vld [vmem:[#allocation6 + $0x6f8] sm:$0xf0]  ;;  %v9464_v44 = vld [vmem:[#allocation6 + $0x510] sm:$0xf]  ;;  %v3533_v3 = vrot.slane %v3531_v21, 5  ;;  %v12607_v35 = vsel %vm12044_vm1, %v3353_v24, %v3354_v1 }
 0x2dd   :  { %v3056_v27 = vrot.slane %v12572_v53, 5  ;;  %v3060_v55 = vrot.slane %v12575_v31, 4  ;;  %3692 = vmatpush.bf16.msrb.mxu3 %v9533_v26  ;;  %3473 = vmatpush.bf16.msrb.mxu0 %v9473_v12  ;;  %v11222_v26 = vld [vmem:[#allocation6 + $0x6f4] sm:$0xf]  ;;  %v3536_v42 = vrot.slane %v3534_v33, 6  ;;  %v3523_v15 = vor.u32 %v3522_v37, %v3519_v30 }
 0x2de   :  { %v3066_v22 = vrot.slane %v3064_v29, 5  ;;  %v9711_v51 = vor.u32 %v11222_v26, %v9708_v38  ;;  %v9466_v34 = vld [vmem:[#allocation6 + $0x518] sm:$0xf0]  ;;  %v9698_v62 = vld [vmem:[#allocation6 + $0x6e0] sm:$0xf] }
 0x2df   :  { %v3061_v39 = vor.u32 %v3060_v55, %v3056_v27  ;;  %v3057_v46 = vsel %vm11957_vm10, %v3052_v8, %v3056_v27  ;;  %3492 = vmatpush.bf16.msrb.mxu1 %v9477_v54  ;;  %v11163_v27 = vld [vmem:[#allocation6 + $0x514] sm:$0xf0]  ;;  %v11162_v55 = vld [vmem:[#allocation6 + $0x514] sm:$0xf]  ;;  %4037 = vmatpush.bf16.msra.mxu2 %v9707_v57  ;;  %v11221_v17 = vld [vmem:[#allocation6 + $0x6e4] sm:$0xf0]  ;;  %v3537_v45 = vor.u32 %v3536_v42, %v3533_v3 }
 0x2e0   :  { %v3087_v25 = vunpack.c.l.b16 %v3057_v46  ;;  %v9465_v47 = vor.u32 %v11163_v27, %v9464_v44  ;;  %v11220_v6 = vld [vmem:[#allocation6 + $0x6e4] sm:$0xf]  ;;  %v9700_v43 = vld [vmem:[#allocation6 + $0x6e8] sm:$0xf0]  ;;  %v9456_v50 = vld [vmem:[#allocation6 + $0x500] sm:$0xf] }
 0x2e1   :  { %v3062_v28 = vrot.slane %v3061_v39, 4  ;;  %3693 = vmatpush.bf16.msrb.mxu3 %v9525_v14  ;;  %v9469_v39 = vor.u32 %v11162_v55, %v9466_v34  ;;  %v3524_v8 = vrot.slane %v3523_v15, 4  ;;  %v9703_v14 = vor.u32 %v11220_v6, %v9700_v43  ;;  %v11161_v56 = vld [vmem:[#allocation6 + $0x504] sm:$0xf0]  ;;  %v11160_v16 = vld [vmem:[#allocation6 + $0x504] sm:$0xf] }
 0x2e2   :  { %3474 = vmatpush.bf16.msrb.mxu0 %v9465_v47  ;;  %v9457_v12 = vor.u32 %v11161_v56, %v9456_v50  ;;  %v9458_v18 = vld [vmem:[#allocation6 + $0x508] sm:$0xf0]  ;;  %v9690_v46 = vld [vmem:[#allocation6 + $0x6d0] sm:$0xf]  ;;  %v11219_v54 = vld [vmem:[#allocation6 + $0x6d4] sm:$0xf0] }
 0x2e3   :  { %v3067_v58 = vsel %vm11957_vm10, %v3062_v28, %v3066_v22  ;;  %v9699_v22 = vor.u32 %v11221_v17, %v9698_v62  ;;  %v3538_v28 = vsel %vm12022_vm15, %v3529_v63, %v3537_v45  ;;  %3493 = vmatpush.bf16.msrb.mxu1 %v9469_v39  ;;  %v3528_v36 = vsel %vm12022_vm15, %v3524_v8, %v12581_v5  ;;  %v11218_v21 = vld [vmem:[#allocation6 + $0x6d4] sm:$0xf]  ;;  %v9692_v63 = vld [vmem:[#allocation6 + $0x6d8] sm:$0xf0]  ;;  %v9642_v33 = vld [vmem:[#allocation6 + $0x670] sm:$0xf] }
 0x2e4   :  { %v3088_v60 = vunpack.c.l.b16 %v3067_v58  ;;  %v3580_v32 = vunpack.c.l.b16 %v3538_v28  ;;  %v9461_v58 = vor.u32 %v11160_v16, %v9458_v18  ;;  %v3579_v48 = vunpack.c.l.b16 %v3528_v36  ;;  %v11207_v26 = vld [vmem:[#allocation6 + $0x674] sm:$0xf0]  ;;  %v9644_v30 = vld [vmem:[#allocation6 + $0x678] sm:$0xf0]  ;;  %v9682_v1 = vld [vmem:[#allocation6 + $0x6c0] sm:$0xf] }
 0x2e5   :  { %4056 = vmatpush.bf16.msra.mxu3 %v9711_v51  ;;  %4038 = vmatpush.bf16.msra.mxu2 %v9699_v22  ;;  %v9695_v37 = vor.u32 %v11218_v21, %v9692_v63  ;;  %v9643_v57 = vor.u32 %v11207_v26, %v9642_v33  ;;  %v11217_v38 = vld [vmem:[#allocation6 + $0x6c4] sm:$0xf0]  ;;  %v11216_v44 = vld [vmem:[#allocation6 + $0x6c4] sm:$0xf]  ;;  %v3381_v5 = vunpack.c.l.b16 %v12607_v35  ;;  %v9684_v42 = vld [vmem:[#allocation6 + $0x6c8] sm:$0xf0] }
 0x2e6   :  { %v3090_v29 = vpack.c.b16 %v3088_v60, %v3087_v25  ;;  %v9691_v25 = vor.u32 %v11219_v54, %v9690_v46  ;;  %v11206_v60 = vld [vmem:[#allocation6 + $0x674] sm:$0xf]  ;;  %v3583_v3 = vpack.c.b16 %v3580_v32, %v3579_v48  ;;  %3475 = vmatpush.bf16.msrb.mxu0 %v9457_v12  ;;  %v9634_v51 = vld [vmem:[#allocation6 + $0x660] sm:$0xf]  ;;  %v11205_v27 = vld [vmem:[#allocation6 + $0x664] sm:$0xf0]  ;;  %v9687_v43 = vor.u32 %v11216_v44, %v9684_v42 }
 0x2e7   :  { %v9647_v24 = vor.u32 %v11206_v60, %v9644_v30  ;;  %3494 = vmatpush.bf16.msrb.mxu1 %v9461_v58  ;;  %v9452_v55 = vrot.slane %v12590_v2, 9  ;;  %v9635_v15 = vor.u32 %v11205_v27, %v9634_v51  ;;  %v12614_v47 = vld [vmem:[#allocation2 + $0xc] sm:$0xe]  ;;  %v12616_v34 = vld [vmem:[#allocation2 + $0x14] sm:$0x3]  ;;  %v3548_v62 = vrot.slane %v12575_v31, 5 }
 0x2e8   :  { %3186 = vmatmul.bf16.gmra.mxu0 %v3090_v29  ;;  %3205 = vmatmul.bf16.gmra.mxu1 %v3090_v29  ;;  %v9683_v29 = vor.u32 %v11217_v38, %v9682_v1  ;;  %v3540_v17 = vshrl.u32 %v12614_v47, 16  ;;  %v3543_v45 = vshll.u32 %v12614_v47, 16  ;;  %v3549_v39 = vrot.slane %v12572_v53, 6  ;;  %v11204_v2 = vld [vmem:[#allocation6 + $0x664] sm:$0xf] }
 0x2e9   :  { %4057 = vmatpush.bf16.msra.mxu3 %v9703_v14  ;;  %4039 = vmatpush.bf16.msra.mxu2 %v9691_v25  ;;  %v3554_v22 = vshrl.u32 %v12616_v34, 16  ;;  %v3352_v6 = vsel %vm12044_vm1, %v9452_v55, %v3351_v4  ;;  %v3557_v50 = vshll.u32 %v12616_v34, 16  ;;  %v9636_v8 = vld [vmem:[#allocation6 + $0x668] sm:$0xf0]  ;;  %v9674_v14 = vld [vmem:[#allocation6 + $0x6b0] sm:$0xf] }
 0x2ea   :  { %3838 = vmatpush.bf16.msra.mxu0 %v9643_v57  ;;  %3675 = vmatmul.bf16.vlgmr.msrb.gmra.mxu2 %v3583_v3  ;;  %v9453_v56 = vrot.slane %v12614_v47, 9  ;;  %v3542_v16 = vrot.slane %v3540_v17, 5  ;;  %v3545_v28 = vrot.slane %v3543_v45, 6  ;;  %v3550_v12 = vor.u32 %v3549_v39, %v3548_v62  ;;  %v11215_v46 = vld [vmem:[#allocation6 + $0x6b4] sm:$0xf0] }
 0x2eb   :  { %3694 = vmatmul.bf16.vlgmr.msrb.gmra.mxu3 %v3583_v3  ;;  %3857 = vmatpush.bf16.msra.mxu1 %v9647_v24  ;;  %v3556_v18 = vrot.slane %v3554_v22, 5  ;;  %v3559_v54 = vrot.slane %v3557_v50, 6  ;;  %v9639_v35 = vor.u32 %v11204_v2, %v9636_v8  ;;  %v9675_v36 = vor.u32 %v11215_v46, %v9674_v14  ;;  %v11214_v32 = vld [vmem:[#allocation6 + $0x6b4] sm:$0xf]  ;;  %v9676_v4 = vld [vmem:[#allocation6 + $0x6b8] sm:$0xf0] }
 0x2ec   :  { %v3358_v58 = vrot.slane %v12568_v10, 5  ;;  %v3546_v25 = vor.u32 %v3545_v28, %v3542_v16  ;;  %v3552_v21 = vrot.slane %v3550_v12, 4  ;;  %v9626_v63 = vld [vmem:[#allocation6 + $0x650] sm:$0xf]  ;;  %v11203_v33 = vld [vmem:[#allocation6 + $0x654] sm:$0xf0]  ;;  %v3380_v26 = vunpack.c.l.b16 %v3352_v6 }
 0x2ed   :  { %4058 = vmatpush.bf16.msra.mxu3 %v9695_v37  ;;  %4040 = vmatpush.bf16.msra.mxu2 %v9683_v29  ;;  %v3361_v48 = vrot.slane %v12577_v49, 5  ;;  %v3560_v60 = vor.u32 %v3559_v54, %v3556_v18  ;;  %v9627_v30 = vor.u32 %v11203_v33, %v9626_v63  ;;  %v11202_v37 = vld [vmem:[#allocation6 + $0x654] sm:$0xf]  ;;  %v9628_v57 = vld [vmem:[#allocation6 + $0x658] sm:$0xf0]  ;;  %v9679_v38 = vor.u32 %v11214_v32, %v9676_v4 }
 0x2ee   :  { %3839 = vmatpush.bf16.msra.mxu0 %v9635_v15  ;;  %v9666_v24 = vld [vmem:[#allocation6 + $0x6a0] sm:$0xf]  ;;  %v3547_v1 = vrot.slane %v3546_v25, 4  ;;  %v9631_v44 = vor.u32 %v11202_v37, %v9628_v57  ;;  %v11213_v3 = vld [vmem:[#allocation6 + $0x6a4] sm:$0xf0]  ;;  %v3360_v51 = vrot.slane %v3358_v58, 4  ;;  %v3384_v27 = vpack.c.b16 %v3381_v5, %v3380_v26 }
 0x2ef   :  { %3858 = vmatpush.bf16.msra.mxu1 %v9639_v35  ;;  %v11212_v42 = vld [vmem:[#allocation6 + $0x6a4] sm:$0xf]  ;;  %v3561_v49 = vsel %vm12022_vm15, %v3552_v21, %v3560_v60  ;;  %v9667_v55 = vor.u32 %v11213_v3, %v9666_v24  ;;  %v9668_v29 = vld [vmem:[#allocation6 + $0x6a8] sm:$0xf0]  ;;  %v9618_v15 = vld [vmem:[#allocation6 + $0x640] sm:$0xf] }
 0x2f0   :  { %v11201_v62 = vld [vmem:[#allocation6 + $0x644] sm:$0xf0]  ;;  %v3551_v17 = vsel %vm12022_vm15, %v3547_v1, %v3550_v12  ;;  %v11200_v39 = vld [vmem:[#allocation6 + $0x644] sm:$0xf]  ;;  %v9620_v22 = vld [vmem:[#allocation6 + $0x648] sm:$0xf0]  ;;  %v3582_v6 = vunpack.c.l.b16 %v3561_v49  ;;  %v9671_v8 = vor.u32 %v11212_v42, %v9668_v29  ;;  %v3362_v26 = vsel %vm12044_vm1, %v3360_v51, %v3361_v48 }
 0x2f1   :  { %4059 = vmatpush.bf16.msra.mxu3 %v9687_v43  ;;  %4041 = vmatpush.bf16.msra.mxu2 %v9675_v36  ;;  %v9619_v45 = vor.u32 %v11201_v62, %v9618_v15  ;;  %v9658_v2 = vld [vmem:[#allocation6 + $0x690] sm:$0xf]  ;;  %v11211_v5 = vld [vmem:[#allocation6 + $0x694] sm:$0xf0]  ;;  %v11210_v43 = vld [vmem:[#allocation6 + $0x694] sm:$0xf]  ;;  %v9623_v14 = vor.u32 %v11200_v39, %v9620_v22  ;;  %v3581_v46 = vunpack.c.l.b16 %v3551_v17  ;;  %v3359_v29 = vsel %vm12044_vm1, %v9453_v56, %v3358_v58 }
 0x2f2   :  { %3840 = vmatpush.bf16.msra.mxu0 %v9627_v30  ;;  %v9660_v50 = vld [vmem:[#allocation6 + $0x698] sm:$0xf0]  ;;  %v9610_v16 = vld [vmem:[#allocation6 + $0x630] sm:$0xf]  ;;  %v11199_v28 = vld [vmem:[#allocation6 + $0x634] sm:$0xf0]  ;;  %v9659_v12 = vor.u32 %v11211_v5, %v9658_v2  ;;  %v3383_v15 = vunpack.c.l.b16 %v3362_v26 }
 0x2f3   :  { %3859 = vmatpush.bf16.msra.mxu1 %v9631_v44  ;;  %v11198_v18 = vld [vmem:[#allocation6 + $0x634] sm:$0xf]  ;;  %v9611_v54 = vor.u32 %v11199_v28, %v9610_v16  ;;  %v9612_v35 = vld [vmem:[#allocation6 + $0x638] sm:$0xf0]  ;;  %v9650_v36 = vld [vmem:[#allocation6 + $0x680] sm:$0xf]  ;;  %v3584_v63 = vpack.c.b16 %v3582_v6, %v3581_v46  ;;  %v9663_v33 = vor.u32 %v11210_v43, %v9660_v50 }
 0x2f4   :  { %v11209_v32 = vld [vmem:[#allocation6 + $0x684] sm:$0xf0]  ;;  %v12637_v4 = vld [vmem:[#allocation6 + $0x684] sm:$0xf]  ;;  %v12639_v25 = vld [vmem:[#allocation6 + $0x688] sm:$0xf0]  ;;  %v9615_v60 = vor.u32 %v11198_v18, %v9612_v35 }
 0x2f5   :  { %4060 = vmatpush.bf16.msra.mxu3 %v9679_v38  ;;  %4042 = vmatpush.bf16.msra.mxu2 %v9667_v55  ;;  %v9602_v21 = vld [vmem:[#allocation6 + $0x620] sm:$0xf]  ;;  %v11197_v30 = vld [vmem:[#allocation6 + $0x624] sm:$0xf0]  ;;  %v11196_v37 = vld [vmem:[#allocation6 + $0x624] sm:$0xf]  ;;  %v9651_v24 = vor.u32 %v11209_v32, %v9650_v36  ;;  %v9655_v62 = vor.u32 %v12637_v4, %v12639_v25  ;;  %v3382_v36 = vunpack.c.l.b16 %v3359_v29 }
 0x2f6   :  { %3841 = vmatpush.bf16.msra.mxu0 %v9619_v45  ;;  %v9604_v57 = vld [vmem:[#allocation6 + $0x628] sm:$0xf0]  ;;  %v9603_v1 = vor.u32 %v11197_v30, %v9602_v21  ;;  %v12643_v38 = vld [vmem:[#allocation2] sm:$0xc]  ;;  %v12645_v44 = vld [vmem:[#allocation2 + $0x8] sm:$0x7] }
 0x2f7   :  { %3860 = vmatpush.bf16.msra.mxu1 %v9623_v14  ;;  %v3895_v3 = vrot.slane %v12552_v61, 6  ;;  %v3896_v42 = vrot.slane %v12549_v7, 7  ;;  %v3887_v48 = vshrl.u32 %v12643_v38, 16  ;;  %v3890_v51 = vshll.u32 %v12643_v38, 16  ;;  %v9838_v55 = vld [vmem:[#allocation6 + $0x7f0] sm:$0xf] }
 0x2f8   :  { %3476 = vmatmul.bf16.vlgmr.msrb.gmra.mxu0 %v3384_v27  ;;  %3495 = vmatmul.bf16.vlgmr.msrb.gmra.mxu1 %v3384_v27  ;;  %v3901_v27 = vshrl.u32 %v12645_v44, 16  ;;  %v3904_v49 = vshll.u32 %v12645_v44, 16  ;;  %v11255_v45 = vld [vmem:[#allocation6 + $0x7f4] sm:$0xf0]  ;;  %v11254_v39 = vld [vmem:[#allocation6 + $0x7f4] sm:$0xf] }
 0x2f9   :  { %4061 = vmatpush.bf16.msra.mxu3 %v9671_v8  ;;  %4043 = vmatpush.bf16.msra.mxu2 %v9659_v12  ;;  %v3897_v17 = vor.u32 %v3896_v42, %v3895_v3  ;;  %v9840_v22 = vld [vmem:[#allocation6 + $0x7f8] sm:$0xf0]  ;;  %v3889_v2 = vrot.slane %v3887_v48, 6  ;;  %v3892_v6 = vrot.slane %v3890_v51, 7  ;;  %v9594_v50 = vld [vmem:[#allocation6 + $0x610] sm:$0xf]  ;;  %v9607_v8 = vor.u32 %v11196_v37, %v9604_v57 }
 0x2fa   :  { %3842 = vmatpush.bf16.msra.mxu0 %v9611_v54  ;;  %3680 = vmatmul.bf16.gmra.mxu2 %v3584_v63  ;;  %v3903_v5 = vrot.slane %v3901_v27, 6  ;;  %v3906_v43 = vrot.slane %v3904_v49, 7  ;;  %v9839_v14 = vor.u32 %v11255_v45, %v9838_v55  ;;  %v9843_v16 = vor.u32 %v11254_v39, %v9840_v22  ;;  %v11195_v56 = vld [vmem:[#allocation6 + $0x614] sm:$0xf0]  ;;  %v11194_v58 = vld [vmem:[#allocation6 + $0x614] sm:$0xf] }
 0x2fb   :  { %3699 = vmatmul.bf16.gmra.mxu3 %v3584_v63  ;;  %3861 = vmatpush.bf16.msra.mxu1 %v9615_v60  ;;  %v3899_v47 = vrot.slane %v3897_v17, 4  ;;  %v3893_v28 = vor.u32 %v3892_v6, %v3889_v2  ;;  %v9595_v46 = vor.u32 %v11195_v56, %v9594_v50  ;;  %v9596_v12 = vld [vmem:[#allocation6 + $0x618] sm:$0xf0]  ;;  %v9830_v54 = vld [vmem:[#allocation6 + $0x7e0] sm:$0xf]  ;;  %v9582_v60 = vrot.slane %v12643_v38, 10 }
 0x2fc   :  { %v3907_v18 = vor.u32 %v3906_v43, %v3903_v5  ;;  %v11253_v35 = vld [vmem:[#allocation6 + $0x7e4] sm:$0xf0]  ;;  %v11252_v4 = vld [vmem:[#allocation6 + $0x7e4] sm:$0xf]  ;;  %v9832_v25 = vld [vmem:[#allocation6 + $0x7e8] sm:$0xf0]  ;;  %v3385_v37 = vpack.c.b16 %v3383_v15, %v3382_v36  ;;  %v9599_v57 = vor.u32 %v11194_v58, %v9596_v12 }
 0x2fd   :  { %4062 = vmatpush.bf16.msra.mxu3 %v9663_v33  ;;  %4044 = vmatpush.bf16.msra.mxu2 %v9651_v24  ;;  %v9831_v32 = vor.u32 %v11253_v35, %v9830_v54  ;;  %v9586_v21 = vld [vmem:[#allocation6 + $0x600] sm:$0xf]  ;;  %v3894_v63 = vrot.slane %v3893_v28, 4  ;;  %v11193_v26 = vld [vmem:[#allocation6 + $0x604] sm:$0xf0]  ;;  %v3721_v30 = vrot.slane %v12546_v41, 6  ;;  %v9835_v51 = vor.u32 %v11252_v4, %v9832_v25 }
 0x2fe   :  { %3843 = vmatpush.bf16.msra.mxu0 %v9603_v1  ;;  %v3908_v33 = vsel %vm11922_vm7, %v3899_v47, %v3907_v18  ;;  %v11192_v24 = vld [vmem:[#allocation6 + $0x604] sm:$0xf]  ;;  %v9822_v1 = vld [vmem:[#allocation6 + $0x7d0] sm:$0xf]  ;;  %v11251_v3 = vld [vmem:[#allocation6 + $0x7d4] sm:$0xf0]  ;;  %v9587_v27 = vor.u32 %v11193_v26, %v9586_v21 }
 0x2ff   :  { %3862 = vmatpush.bf16.msra.mxu1 %v9607_v8  ;;  %v3898_v42 = vsel %vm11922_vm7, %v3894_v63, %v3897_v17  ;;  %v3950_v48 = vunpack.c.l.b16 %v3908_v33  ;;  %v9588_v49 = vld [vmem:[#allocation6 + $0x608] sm:$0xf0]  ;;  %v11250_v55 = vld [vmem:[#allocation6 + $0x7d4] sm:$0xf]  ;;  %v9824_v29 = vld [vmem:[#allocation6 + $0x7d8] sm:$0xf0]  ;;  %v9823_v45 = vor.u32 %v11251_v3, %v9822_v1 }
 0x300   :  { %v3723_v15 = vrot.slane %v3721_v30, 4  ;;  %v9772_v39 = vld [vmem:[#allocation6 + $0x770] sm:$0xf]  ;;  %v11239_v22 = vld [vmem:[#allocation6 + $0x774] sm:$0xf0]  ;;  %v3949_v17 = vunpack.c.l.b16 %v3898_v42  ;;  %v9591_v50 = vor.u32 %v11192_v24, %v9588_v49  ;;  %v9827_v56 = vor.u32 %v11250_v55, %v9824_v29 }
 0x301   :  { %4395 = vmatpush.bf16.msrb.mxu2 %v9839_v14  ;;  %4063 = vmatpush.bf16.msra.mxu3 %v9655_v62  ;;  %v3724_v62 = vrot.slane %v12595_v11, 6  ;;  %v9773_v2 = vor.u32 %v11239_v22, %v9772_v39  ;;  %v11238_v6 = vld [vmem:[#allocation6 + $0x774] sm:$0xf]  ;;  %v9774_v5 = vld [vmem:[#allocation6 + $0x778] sm:$0xf0]  ;;  %v3918_v36 = vrot.slane %v12575_v31, 6  ;;  %v3722_v55 = vsel %vm12123_vm3, %v9582_v60, %v3721_v30 }
 0x302   :  { %3844 = vmatpush.bf16.msra.mxu0 %v9595_v46  ;;  %v9814_v43 = vld [vmem:[#allocation6 + $0x7c0] sm:$0xf]  ;;  %v11249_v8 = vld [vmem:[#allocation6 + $0x7c4] sm:$0xf0]  ;;  %v11248_v47 = vld [vmem:[#allocation6 + $0x7c4] sm:$0xf]  ;;  %v9777_v58 = vor.u32 %v11238_v6, %v9774_v5 }
 0x303   :  { %3863 = vmatpush.bf16.msra.mxu1 %v9599_v57  ;;  %v9816_v14 = vld [vmem:[#allocation6 + $0x7c8] sm:$0xf0]  ;;  %v9764_v11 = vld [vmem:[#allocation6 + $0x760] sm:$0xf]  ;;  %v11237_v28 = vld [vmem:[#allocation6 + $0x764] sm:$0xf0]  ;;  %v9815_v46 = vor.u32 %v11249_v8, %v9814_v43  ;;  %v3725_v33 = vsel %vm12123_vm3, %v3723_v15, %v3724_v62 }
 0x304   :  { %v12670_v18 = vld [vmem:[#allocation2 + $0xc] sm:$0xc]  ;;  %v12672_v12 = vld [vmem:[#allocation2 + $0x14] sm:$0x7]  ;;  %v3919_v4 = vrot.slane %v12572_v53, 7  ;;  %v9819_v26 = vor.u32 %v11248_v47, %v9816_v14  ;;  %v3751_v6 = vunpack.c.l.b16 %v3725_v33  ;;  %v3750_v14 = vunpack.c.l.b16 %v3722_v55 }
 0x305   :  { %4414 = vmatpush.bf16.msrb.mxu3 %v9843_v16  ;;  %4396 = vmatpush.bf16.msrb.mxu2 %v9831_v32  ;;  %v3953_v16 = vpack.c.b16 %v3950_v48, %v3949_v17  ;;  %v3910_v54 = vshrl.u32 %v12670_v18, 16  ;;  %v3913_v35 = vshll.u32 %v12670_v18, 16  ;;  %v9765_v32 = vor.u32 %v11237_v28, %v9764_v11  ;;  %v11236_v63 = vld [vmem:[#allocation6 + $0x764] sm:$0xf]  ;;  %v9766_v24 = vld [vmem:[#allocation6 + $0x768] sm:$0xf0] }
 0x306   :  { %3845 = vmatpush.bf16.msra.mxu0 %v9587_v27  ;;  %v3924_v25 = vshrl.u32 %v12672_v12, 16  ;;  %v3927_v21 = vshll.u32 %v12672_v12, 16  ;;  %v9806_v1 = vld [vmem:[#allocation6 + $0x7b0] sm:$0xf]  ;;  %v12682_v3 = vor.u32 %v3919_v4, %v3918_v36  ;;  %v11247_v27 = vld [vmem:[#allocation6 + $0x7b4] sm:$0xf0]  ;;  %v3754_v28 = vpack.c.b16 %v3751_v6, %v3750_v14 }
 0x307   :  { %3864 = vmatpush.bf16.msra.mxu1 %v9591_v50  ;;  %v3915_v57 = vrot.slane %v3913_v35, 7  ;;  %v11246_v49 = vld [vmem:[#allocation6 + $0x7b4] sm:$0xf]  ;;  %v9808_v29 = vld [vmem:[#allocation6 + $0x7b8] sm:$0xf0]  ;;  %v9807_v39 = vor.u32 %v11247_v27, %v9806_v1 }
 0x308   :  { %3481 = vmatmul.bf16.gmra.mxu0 %v3385_v37  ;;  %3500 = vmatmul.bf16.gmra.mxu1 %v3385_v37  ;;  %v3912_v37 = vrot.slane %v3910_v54, 6  ;;  %v3926_v42 = vrot.slane %v3924_v25, 6  ;;  %v3929_v48 = vrot.slane %v3927_v21, 7  ;;  %v11235_v15 = vld [vmem:[#allocation6 + $0x754] sm:$0xf0]  ;;  %v3922_v5 = vrot.slane %v12682_v3, 4 }
 0x309   :  { %4415 = vmatpush.bf16.msrb.mxu3 %v9835_v51  ;;  %4397 = vmatpush.bf16.msrb.mxu2 %v9823_v45  ;;  %v9769_v51 = vor.u32 %v11236_v63, %v9766_v24  ;;  %v9756_v45 = vld [vmem:[#allocation6 + $0x750] sm:$0xf]  ;;  %v11234_v17 = vld [vmem:[#allocation6 + $0x754] sm:$0xf]  ;;  %v9798_v43 = vld [vmem:[#allocation6 + $0x7a0] sm:$0xf]  ;;  %v9811_v50 = vor.u32 %v11246_v49, %v9808_v29 }
 0x30a   :  { %4208 = vmatpush.bf16.msrb.mxu0 %v9773_v2  ;;  %4045 = vmatmul.bf16.vlgmr.msra.gmra.mxu2 %v3953_v16  ;;  %v3916_v62 = vor.u32 %v3915_v57, %v3912_v37  ;;  %v9757_v22 = vor.u32 %v11235_v15, %v9756_v45  ;;  %v9758_v2 = vld [vmem:[#allocation6 + $0x758] sm:$0xf0]  ;;  %v11245_v41 = vld [vmem:[#allocation6 + $0x7a4] sm:$0xf0]  ;;  %v3930_v38 = vor.u32 %v3929_v48, %v3926_v42  ;;  %v11244_v30 = vld [vmem:[#allocation6 + $0x7a4] sm:$0xf] }
 0x30b   :  { %4227 = vmatpush.bf16.msrb.mxu1 %v9777_v58  ;;  %4064 = vmatmul.bf16.vlgmr.msra.gmra.mxu3 %v3953_v16  ;;  %v9761_v60 = vor.u32 %v11234_v17, %v9758_v2  ;;  %v9800_v8 = vld [vmem:[#allocation6 + $0x7a8] sm:$0xf0]  ;;  %v9748_v47 = vld [vmem:[#allocation6 + $0x740] sm:$0xf]  ;;  %v11233_v16 = vld [vmem:[#allocation6 + $0x744] sm:$0xf0] }
 0x30c   :  { %v9750_v58 = vld [vmem:[#allocation6 + $0x748] sm:$0xf0]  ;;  %v3917_v11 = vrot.slane %v3916_v62, 4  ;;  %v9749_v54 = vor.u32 %v11233_v16, %v9748_v47  ;;  %v9790_v35 = vld [vmem:[#allocation6 + $0x790] sm:$0xf]  ;;  %v3931_v4 = vsel %vm11922_vm7, %v3922_v5, %v3930_v38  ;;  %v9803_v25 = vor.u32 %v11244_v30, %v9800_v8 }
 0x30d   :  { %4416 = vmatpush.bf16.msrb.mxu3 %v9827_v56  ;;  %4398 = vmatpush.bf16.msrb.mxu2 %v9815_v46  ;;  %v11232_v56 = vld [vmem:[#allocation6 + $0x744] sm:$0xf]  ;;  %v9799_v46 = vor.u32 %v11245_v41, %v9798_v43  ;;  %v11243_v36 = vld [vmem:[#allocation6 + $0x794] sm:$0xf0]  ;;  %v9792_v63 = vld [vmem:[#allocation6 + $0x798] sm:$0xf0] }
 0x30e   :  { %4209 = vmatpush.bf16.msrb.mxu0 %v9765_v32  ;;  %v11242_v32 = vld [vmem:[#allocation6 + $0x794] sm:$0xf]  ;;  %v9753_v21 = vor.u32 %v11232_v56, %v9750_v58  ;;  %v9740_v33 = vld [vmem:[#allocation6 + $0x730] sm:$0xf]  ;;  %v3728_v37 = vrot.slane %v12568_v10, 6  ;;  %v3921_v1 = vsel %vm11922_vm7, %v3917_v11, %v12682_v3  ;;  %v3731_v42 = vrot.slane %v12616_v34, 6 }
 0x30f   :  { %4228 = vmatpush.bf16.msrb.mxu1 %v9769_v51  ;;  %v11230_v57 = vld [vmem:[#allocation6 + $0x734] sm:$0xf]  ;;  %v9742_v24 = vld [vmem:[#allocation6 + $0x738] sm:$0xf0]  ;;  %v9782_v48 = vld [vmem:[#allocation6 + $0x780] sm:$0xf]  ;;  %v3952_v51 = vunpack.c.l.b16 %v3931_v4  ;;  %v9791_v27 = vor.u32 %v11243_v36, %v9790_v35  ;;  %v9795_v15 = vor.u32 %v11242_v32, %v9792_v63  ;;  %v3951_v2 = vunpack.c.l.b16 %v3921_v1 }
 0x310   :  { %v11241_v55 = vld [vmem:[#allocation6 + $0x784] sm:$0xf0]  ;;  %v11240_v29 = vld [vmem:[#allocation6 + $0x784] sm:$0xf]  ;;  %v9784_v45 = vld [vmem:[#allocation6 + $0x788] sm:$0xf0]  ;;  %v9745_v62 = vor.u32 %v11230_v57, %v9742_v24 }
 0x311   :  { %4417 = vmatpush.bf16.msrb.mxu3 %v9819_v26  ;;  %4399 = vmatpush.bf16.msrb.mxu2 %v9807_v39  ;;  %v11231_v26 = vld [vmem:[#allocation6 + $0x734] sm:$0xf0]  ;;  %v9732_v39 = vld [vmem:[#allocation6 + $0x720] sm:$0xf]  ;;  %v3730_v3 = vrot.slane %v3728_v37, 4  ;;  %v3954_v43 = vpack.c.b16 %v3952_v51, %v3951_v2  ;;  %v9783_v41 = vor.u32 %v11241_v55, %v9782_v48 }
 0x312   :  { %4210 = vmatpush.bf16.msrb.mxu0 %v9757_v22  ;;  %v9741_v49 = vor.u32 %v11231_v26, %v9740_v33  ;;  %v11229_v22 = vld [vmem:[#allocation6 + $0x724] sm:$0xf0]  ;;  %v4254_v17 = vld [vmem:[#allocation2 + $0x8] sm:$0xf]  ;;  %v11228_v6 = vld [vmem:[#allocation6 + $0x724] sm:$0xf] }
 0x313   :  { %4229 = vmatpush.bf16.msrb.mxu1 %v9761_v60  ;;  %v9734_v34 = vld [vmem:[#allocation6 + $0x728] sm:$0xf0]  ;;  %v4266_v5 = vshrl.u32 %v4254_v17, 16  ;;  %v9733_v38 = vor.u32 %v11229_v22, %v9732_v39  ;;  %v9787_v60 = vor.u32 %v11240_v29, %v9784_v45  ;;  %v9724_v47 = vld [vmem:[#allocation6 + $0x710] sm:$0xf]  ;;  %v3732_v16 = vsel %vm12123_vm3, %v3730_v3, %v3731_v42 }
 0x314   :  { %v9737_v30 = vor.u32 %v11228_v6, %v9734_v34  ;;  %v11227_v14 = vld [vmem:[#allocation6 + $0x714] sm:$0xf0]  ;;  %v11226_v58 = vld [vmem:[#allocation6 + $0x714] sm:$0xf]  ;;  %v9726_v11 = vld [vmem:[#allocation6 + $0x718] sm:$0xf0]  ;;  %v3753_v35 = vunpack.c.l.b16 %v3732_v16 }
 0x315   :  { %4418 = vmatpush.bf16.msrb.mxu3 %v9811_v50  ;;  %4400 = vmatpush.bf16.msrb.mxu2 %v9799_v46  ;;  %v9583_v50 = vrot.slane %v12670_v18, 10  ;;  %v4268_v8 = vrot.slane %v4266_v5, 7  ;;  %v4083_v56 = vld [vmem:[#allocation2] sm:$0x8]  ;;  %v4269_v46 = vshll.u32 %v4254_v17, 16  ;;  %v9729_v4 = vor.u32 %v11226_v58, %v9726_v11 }
 0x316   :  { %4211 = vmatpush.bf16.msrb.mxu0 %v9749_v54  ;;  %v9725_v54 = vor.u32 %v11227_v14, %v9724_v47  ;;  %v4257_v36 = vshrl.u32 %v4083_v56, 16  ;;  %v11224_v63 = vld [vmem:[#allocation6 + $0x704] sm:$0xf]  ;;  %v9718_v33 = vld [vmem:[#allocation6 + $0x708] sm:$0xf0]  ;;  %v9712_v17 = vrot.slane %v4083_v56, 11 }
 0x317   :  { %4230 = vmatpush.bf16.msrb.mxu1 %v9753_v21  ;;  %v3729_v18 = vsel %vm12123_vm3, %v9583_v50, %v3728_v37  ;;  %v4271_v32 = vor.u32 %v4269_v46, %v4268_v8  ;;  %v11225_v21 = vld [vmem:[#allocation6 + $0x704] sm:$0xf0]  ;;  %v9721_v48 = vor.u32 %v11224_v63, %v9718_v33  ;;  %v11554_v51 = vld [vmem:[#allocation2 + $0x4] sm:$0xf]  ;;  %v4084_v3 = vld [vmem:[#allocation2 + $0xc] sm:$0x8] }
 0x318   :  { %3846 = vmatmul.bf16.vlgmr.msra.gmra.mxu0 %v3754_v28  ;;  %3865 = vmatmul.bf16.vlgmr.msra.gmra.mxu1 %v3754_v28  ;;  %v4261_v28 = vrot.slane %v12552_v61, 7  ;;  %v3752_v26 = vunpack.c.l.b16 %v3729_v18  ;;  %v9778_v1 = vrot.slane %v4257_v36, 11  ;;  %v4278_v6 = vrot.slane %v12575_v31, 7 }
 0x319   :  { %4419 = vmatpush.bf16.msrb.mxu3 %v9803_v25  ;;  %4401 = vmatpush.bf16.msrb.mxu2 %v9791_v27  ;;  %v9716_v25 = vld [vmem:[#allocation6 + $0x700] sm:$0xf]  ;;  %v4091_v27 = vrot.slane %v11554_v51, 7  ;;  %v4098_v14 = vrot.slane %v12568_v10, 7  ;;  %v4101_v11 = vrot.slane %v12672_v12, 7 }
 0x31a   :  { %4212 = vmatpush.bf16.msrb.mxu0 %v9741_v49  ;;  %4050 = vmatmul.bf16.gmra.mxu2 %v3954_v43  ;;  %v4262_v61 = vor.u32 %v4261_v28, %v12549_v7  ;;  %v4264_v57 = vrot.slane %v4261_v28, 4  ;;  %v9717_v24 = vor.u32 %v11225_v21, %v9716_v25  ;;  %v3755_v37 = vpack.c.b16 %v3753_v35, %v3752_v26  ;;  %v4255_v49 = vld [vmem:[#allocation2 + $0x14] sm:$0xf] }
 0x31b   :  { %4231 = vmatpush.bf16.msrb.mxu1 %v9745_v62  ;;  %4069 = vmatmul.bf16.gmra.mxu3 %v3954_v43  ;;  %v4283_v7 = vshrl.u32 %v4255_v49, 16  ;;  %v4094_v62 = vrot.slane %v12645_v44, 7  ;;  %v4286_v34 = vshll.u32 %v4255_v49, 16  ;;  %v4092_v5 = vsel %vm12189_vm12, %v9712_v17, %v4091_v27 }
 0x31c   :  { %v4272_v42 = vsel %vm12177_vm8, %v4264_v57, %v4271_v32  ;;  %v4263_v55 = vsel %vm12177_vm8, %v9778_v1, %v4262_v61  ;;  %v4120_v50 = vunpack.c.l.b16 %v4092_v5  ;;  %v4279_v44 = vor.u32 %v4278_v6, %v12572_v53 }
 0x31d   :  { %4420 = vmatpush.bf16.msrb.mxu3 %v9795_v15  ;;  %4402 = vmatpush.bf16.msrb.mxu2 %v9783_v41  ;;  %v4308_v29 = vunpack.c.l.b16 %v4272_v42  ;;  %v4307_v45 = vunpack.c.l.b16 %v4263_v55  ;;  %v4093_v15 = vrot.slane %v4091_v27, 4  ;;  %v4285_v22 = vrot.slane %v4283_v7, 7 }
 0x31e   :  { %4213 = vmatpush.bf16.msrb.mxu0 %v9733_v38  ;;  %v4274_v41 = vshrl.u32 %v4084_v3, 16  ;;  %v4100_v58 = vrot.slane %v4098_v14, 4  ;;  %v9713_v53 = vrot.slane %v4084_v3, 11 }
 0x31f   :  { %4232 = vmatpush.bf16.msrb.mxu1 %v9737_v30  ;;  %v4311_v39 = vpack.c.b16 %v4308_v29, %v4307_v45  ;;  %v4095_v2 = vsel %vm12189_vm12, %v4093_v15, %v4094_v62  ;;  %v4288_v38 = vor.u32 %v4286_v34, %v4285_v22 }
 0x320   :  { %v4121_v43 = vunpack.c.l.b16 %v4095_v2  ;;  %v9779_v8 = vrot.slane %v4274_v41, 11  ;;  %v4102_v46 = vsel %vm12189_vm12, %v4100_v58, %v4101_v11  ;;  %v4099_v10 = vsel %vm12189_vm12, %v9713_v53, %v4098_v14 }
 0x321   :  { %4421 = vmatpush.bf16.msrb.mxu3 %v9787_v60  ;;  %v4281_v60 = vrot.slane %v4278_v6, 4  ;;  %v4123_v18 = vunpack.c.l.b16 %v4102_v46 }
 0x322   :  { %4214 = vmatpush.bf16.msrb.mxu0 %v9725_v54  ;;  %v4124_v30 = vpack.c.b16 %v4121_v43, %v4120_v50  ;;  %v4280_v31 = vsel %vm12177_vm8, %v9779_v8, %v4279_v44  ;;  %v4122_v54 = vunpack.c.l.b16 %v4099_v10 }
 0x323   :  { %4233 = vmatpush.bf16.msrb.mxu1 %v9729_v4  ;;  %v4289_v47 = vsel %vm12177_vm8, %v4281_v60, %v4288_v38  ;;  %v4309_v56 = vunpack.c.l.b16 %v4280_v31 }
 0x324   :  { %v4310_v16 = vunpack.c.l.b16 %v4289_v47  ;;  %v4125_v35 = vpack.c.b16 %v4123_v18, %v4122_v54 }
 0x326   :  { %4215 = vmatpush.bf16.msrb.mxu0 %v9717_v24  ;;  %v4312_v28 = vpack.c.b16 %v4310_v16, %v4309_v56 }
 0x327   :  { %4234 = vmatpush.bf16.msrb.mxu1 %v9721_v48 }
 0x328   :  { %3851 = vmatmul.bf16.gmra.mxu0 %v3755_v37  ;;  %3870 = vmatmul.bf16.gmra.mxu1 %v3755_v37 }
 0x32a   :  { %4403 = vmatmul.bf16.vlgmr.msrb.gmra.mxu2 %v4311_v39 }
 0x32b   :  { %4422 = vmatmul.bf16.vlgmr.msrb.gmra.mxu3 %v4311_v39 }
 0x338   :  { %4216 = vmatmul.bf16.vlgmr.msrb.gmra.mxu0 %v4124_v30  ;;  %4235 = vmatmul.bf16.vlgmr.msrb.gmra.mxu1 %v4124_v30 }
 0x33a   :  { %4408 = vmatmul.bf16.gmra.mxu2 %v4312_v28 }
 0x33b   :  { %4427 = vmatmul.bf16.gmra.mxu3 %v4312_v28 }
 0x348   :  { %4221 = vmatmul.bf16.gmra.mxu0 %v4125_v35  ;;  %4240 = vmatmul.bf16.gmra.mxu1 %v4125_v35 }
 0x34d   :  { %v3312_v36 = vpop.f32.mrf.mxu2  ;;  %v3331_v32 = vpop.f32.mrf.mxu3 }
 0x355   :  { %v3182_v4 = vpop.f32.mrf.mxu0  ;;  %v3201_v25 = vpop.f32.mrf.mxu1 }
 0x356   :  { %v3313_v12 = vadd.f32 %v3312_v36, %v3182_v4  ;;  %v3332_v21 = vadd.f32 %v3331_v32, %v3201_v25  ;;  %v3314_v63 = vpop.f32.mrf.mxu2  ;;  %v12726_v33 = vpop.f32.mrf.mxu3 }
 0x35d   :  { %v3184_v26 = vpop.f32.mrf.mxu0  ;;  %v12728_v61 = vpop.f32.mrf.mxu1 }
 0x35e   :  { %v3317_v57 = vpop.f32.mrf.mxu2  ;;  %v3336_v24 = vpop.f32.mrf.mxu3 }
 0x365   :  { %v3187_v37 = vpop.f32.mrf.mxu0  ;;  %v3206_v1 = vpop.f32.mrf.mxu1 }
 0x366   :  { %v12730_v42 = vadd.f32 %v3317_v57, %v3187_v37  ;;  %v3337_v48 = vadd.f32 %v3336_v24, %v3206_v1  ;;  %v12732_v51 = vpop.f32.mrf.mxu2  ;;  %v12734_v27 = vpop.f32.mrf.mxu3  ;;  %v3315_v24 = vadd.f32 %v3314_v63, %v3184_v26  ;;  %v11263_v26 = vld [vmem:[#allocation9 + $0x178] sm:$0xff] }
 0x367   :  { %4762 = vmatpush.bf16.msra.mxu1 %v11263_v26 }
 0x36d   :  { %v12736_v49 = vpop.f32.mrf.mxu0  ;;  %v12738_v55 = vpop.f32.mrf.mxu1 }
 0x36e   :  { %v3676_v29 = vpop.f32.mrf.mxu2  ;;  %v3695_v7 = vpop.f32.mrf.mxu3 }
 0x375   :  { %v3477_v45 = vpop.f32.mrf.mxu0  ;;  %v3496_v15 = vpop.f32.mrf.mxu1 }
 0x376   :  { %v3507_v62 = vadd.f32 %v3496_v15, %v3332_v21  ;;  %v3678_v22 = vpop.f32.mrf.mxu2  ;;  %v12740_v17 = vpop.f32.mrf.mxu3  ;;  %v3506_v36 = vadd.f32 %v3477_v45, %v3313_v12 }
 0x378   :  { %v3706_v39 = vadd.f32 %v3695_v7, %v3507_v62  ;;  %v3705_v57 = vadd.f32 %v3676_v29, %v3506_v36  ;;  %v11287_v7 = vld [vmem:[#allocation9 + $0x238] sm:$0xff] }
 0x379   :  { %v4442_v62 = vld [vmem:[#allocation8 + $0x2] sm:$0x3]  ;;  %5018 = vmatpush.bf16.msra.mxu3 %v11287_v7 }
 0x37a   :  { %v12772_v29 = vperm.slane %v4442_v62, 1 }
 0x37d   :  { %v3479_v2 = vpop.f32.mrf.mxu0  ;;  %v12742_v3 = vpop.f32.mrf.mxu1 }
 0x37e   :  { %v12744_v6 = vpop.f32.mrf.mxu2  ;;  %v3700_v34 = vpop.f32.mrf.mxu3  ;;  %v3508_v1 = vadd.f32 %v3479_v2, %v3315_v24  ;;  %v11279_v2 = vld [vmem:[#allocation9 + $0x1f8] sm:$0xff] }
 0x37f   :  { %4902 = vmatpush.bf16.msra.mxu2 %v11279_v2 }
 0x385   :  { %v3482_v5 = vpop.f32.mrf.mxu0  ;;  %v3501_v43 = vpop.f32.mrf.mxu1 }
 0x386   :  { %v3511_v41 = vadd.f32 %v3501_v43, %v3337_v48  ;;  %v12746_v50 = vpop.f32.mrf.mxu2  ;;  %v12748_v44 = vpop.f32.mrf.mxu3  ;;  %v11271_v48 = vld [vmem:[#allocation9 + $0x1b8] sm:$0xff]  ;;  %v3510_v24 = vadd.f32 %v3482_v5, %v12730_v42 }
 0x387   :  { %4687 = vmatpush.bf16.msra.mxu0 %v11271_v48 }
 0x388   :  { %v3710_v38 = vadd.f32 %v3700_v34, %v3511_v41  ;;  %v3707_v34 = vadd.f32 %v3678_v22, %v3508_v1  ;;  %v11262_v22 = vld [vmem:[#allocation9 + $0x170] sm:$0xff]  ;;  %v11268_v1 = vld [vmem:[#allocation9 + $0x1a0] sm:$0xff] }
 0x389   :  { %4763 = vmatpush.bf16.msra.mxu1 %v11262_v22  ;;  %v11283_v22 = vld [vmem:[#allocation9 + $0x218] sm:$0xff] }
 0x38d   :  { %v12750_v60 = vpop.f32.mrf.mxu0  ;;  %v12752_v30 = vpop.f32.mrf.mxu1 }
 0x38e   :  { %v4046_v8 = vpop.f32.mrf.mxu2  ;;  %v4065_v47 = vpop.f32.mrf.mxu3 }
 0x395   :  { %v3847_v14 = vpop.f32.mrf.mxu0  ;;  %v3866_v31 = vpop.f32.mrf.mxu1 }
 0x396   :  { %v3877_v16 = vadd.f32 %v3866_v31, %v3706_v39  ;;  %v4048_v56 = vpop.f32.mrf.mxu2  ;;  %v12754_v58 = vpop.f32.mrf.mxu3  ;;  %v3876_v37 = vadd.f32 %v3847_v14, %v3705_v57  ;;  %v11270_v39 = vld [vmem:[#allocation9 + $0x1b0] sm:$0xff]  ;;  %v11269_v57 = vld [vmem:[#allocation9 + $0x1a8] sm:$0xff] }
 0x397   :  { %4688 = vmatpush.bf16.msra.mxu0 %v11270_v39  ;;  %v11286_v14 = vld [vmem:[#allocation9 + $0x230] sm:$0xff] }
 0x398   :  { %v4076_v35 = vadd.f32 %v4065_v47, %v3877_v16  ;;  %v4075_v45 = vadd.f32 %v4046_v8, %v3876_v37  ;;  %v12770_v47 = vperm.slane %v4442_v62, 0  ;;  %v11278_v8 = vld [vmem:[#allocation9 + $0x1f0] sm:$0xff]  ;;  %5019 = vmatpush.bf16.msra.mxu3 %v11286_v14  ;;  %v3709_v62 = vadd.f32 %v12744_v6, %v3510_v24 }
 0x399   :  { %4903 = vmatpush.bf16.msra.mxu2 %v11278_v8  ;;  %v11266_v8 = vld [vmem:[#allocation9 + $0x190] sm:$0xff] }
 0x39b   :  { %4689 = vmatpush.bf16.msra.mxu0 %v11269_v57 }
 0x39d   :  { %v3849_v11 = vpop.f32.mrf.mxu0  ;;  %v12756_v28 = vpop.f32.mrf.mxu1 }
 0x39e   :  { %v12758_v53 = vpop.f32.mrf.mxu2  ;;  %v4070_v46 = vpop.f32.mrf.mxu3  ;;  %v3878_v16 = vadd.f32 %v3849_v11, %v3707_v34 }
 0x39f   :  { %4690 = vmatpush.bf16.msra.mxu0 %v11268_v1 }
 0x3a0   :  { %v4077_v48 = vadd.f32 %v4048_v56, %v3878_v16  ;;  %v11267_v16 = vld [vmem:[#allocation9 + $0x198] sm:$0xff] }
 0x3a3   :  { %4691 = vmatpush.bf16.msra.mxu0 %v11267_v16  ;;  %v11281_v16 = vld [vmem:[#allocation9 + $0x208] sm:$0xff] }
 0x3a5   :  { %v12760_v10 = vpop.f32.mrf.mxu0  ;;  %v3871_v18 = vpop.f32.mrf.mxu1 }
 0x3a6   :  { %v3881_v54 = vadd.f32 %v3871_v18, %v3710_v38  ;;  %v12762_v32 = vpop.f32.mrf.mxu2  ;;  %v12764_v4 = vpop.f32.mrf.mxu3 }
 0x3a7   :  { %4692 = vmatpush.bf16.msra.mxu0 %v11266_v8 }
 0x3a8   :  { %v12774_v63 = vadd.f32 %v4070_v46, %v3881_v54  ;;  %v11285_v54 = vld [vmem:[#allocation9 + $0x228] sm:$0xff] }
 0x3a9   :  { %5020 = vmatpush.bf16.msra.mxu3 %v11285_v54 }
 0x3ad   :  { %v12766_v25 = vpop.f32.mrf.mxu0  ;;  %v12768_v21 = vpop.f32.mrf.mxu1 }
 0x3ae   :  { %v4404_v15 = vpop.f32.mrf.mxu2  ;;  %v4423_v12 = vpop.f32.mrf.mxu3 }
 0x3b5   :  { %v4217_v43 = vpop.f32.mrf.mxu0  ;;  %v4236_v41 = vpop.f32.mrf.mxu1 }
 0x3b6   :  { %v4246_v38 = vadd.f32 %v4217_v43, %v4075_v45  ;;  %v4247_v31 = vadd.f32 %v4236_v41, %v4076_v35  ;;  %v4406_v46 = vpop.f32.mrf.mxu2  ;;  %v12784_v5 = vpop.f32.mrf.mxu3  ;;  %v3880_v45 = vadd.f32 %v12760_v10, %v3709_v62  ;;  %v11261_v41 = vld [vmem:[#allocation9 + $0x168] sm:$0xff] }
 0x3b7   :  { %4764 = vmatpush.bf16.msra.mxu1 %v11261_v41 }
 0x3b8   :  { %v4433_v18 = vadd.f32 %v4404_v15, %v4246_v38  ;;  %v4434_v36 = vadd.f32 %v4423_v12, %v4247_v31  ;;  %v3320_v12 = vadd.f32 %v12732_v51, %v12736_v49  ;;  %v11277_v38 = vld [vmem:[#allocation9 + $0x1e8] sm:$0xff]  ;;  %v11284_v31 = vld [vmem:[#allocation9 + $0x220] sm:$0xff]  ;;  %v4079_v57 = vadd.f32 %v12758_v53, %v3880_v45  ;;  %v11259_v53 = vld [vmem:[#allocation9 + $0x158] sm:$0xff] }
 0x3b9   :  { %4904 = vmatpush.bf16.msra.mxu2 %v11277_v38  ;;  %v11276_v51 = vld [vmem:[#allocation9 + $0x1e0] sm:$0xff]  ;;  %5021 = vmatpush.bf16.msra.mxu3 %v11284_v31  ;;  %v11258_v31 = vld [vmem:[#allocation9 + $0x150] sm:$0xff] }
 0x3ba   :  { %v4448_v35 = vadd.f32 %v12770_v47, %v4433_v18  ;;  %v12779_v37 = vadd.f32 %v12772_v29, %v4434_v36  ;;  %v3512_v26 = vadd.f32 %v12750_v60, %v3320_v12  ;;  %v11260_v18 = vld [vmem:[#allocation9 + $0x160] sm:$0xff] }
 0x3bb   :  { %4765 = vmatpush.bf16.msra.mxu1 %v11260_v18  ;;  %v11264_v18 = vld [vmem:[#allocation9 + $0x180] sm:$0xff] }
 0x3bc   :  { %v4456_v11 = vmax.f32 %v4448_v35, 0.0  ;;  %v3711_v35 = vadd.f32 %v12746_v50, %v3512_v26  ;;  %v11282_v50 = vld [vmem:[#allocation9 + $0x210] sm:$0xff] }
 0x3bd   :  { %v4219_v7 = vpop.f32.mrf.mxu0  ;;  %v12781_v15 = vpop.f32.mrf.mxu1  ;;  %4905 = vmatpush.bf16.msra.mxu2 %v11276_v51  ;;  %5022 = vmatpush.bf16.msra.mxu3 %v11283_v22  ;;  %v4511_v22 = vld [vmem:[#allocation2 + $0x8] sm:$0x3] }
 0x3be   :  { %v4460_v42 = vpack.c.bf16 %v4456_v11, %v4456_v11  ;;  %v4248_v39 = vadd.f32 %v4219_v7, %v4077_v48  ;;  %v4409_v10 = vpop.f32.mrf.mxu2  ;;  %v11275_v7 = vld [vmem:[#allocation9 + $0x1d8] sm:$0xff]  ;;  %v3882_v62 = vadd.f32 %v12766_v25, %v3711_v35  ;;  %v4428_v12 = vpop.f32.mrf.mxu3  ;;  %v11274_v25 = vld [vmem:[#allocation9 + $0x1d0] sm:$0xff]  ;;  %v11273_v35 = vld [vmem:[#allocation9 + $0x1c8] sm:$0xff] }
 0x3bf   :  { %4766 = vmatpush.bf16.msra.mxu1 %v11259_v53  ;;  %v11280_v53 = vld [vmem:[#allocation9 + $0x200] sm:$0xff] }
 0x3c0   :  { %v4465_v34 = vshrl.u32 %v4460_v42, 16  ;;  %v4468_v56 = vshll.u32 %v4460_v42, 16  ;;  %v4435_v43 = vadd.f32 %v4406_v46, %v4248_v39  ;;  %v11555_v46 = vld [vmem:[#allocation2] sm:$0xe] }
 0x3c1   :  { %4906 = vmatpush.bf16.msra.mxu2 %v11275_v7  ;;  %5023 = vmatpush.bf16.msra.mxu3 %v11282_v50 }
 0x3c2   :  { %v4467_v6 = vrot.slane %v4465_v34, 6  ;;  %v4470_v2 = vrot.slane %v4468_v56, 7  ;;  %v4450_v14 = vadd.f32 %v12770_v47, %v4435_v43  ;;  %v11265_v34 = vld [vmem:[#allocation9 + $0x188] sm:$0xff] }
 0x3c3   :  { %4693 = vmatpush.bf16.msra.mxu0 %v11265_v34  ;;  %4767 = vmatpush.bf16.msra.mxu1 %v11258_v31 }
 0x3c4   :  { %v4471_v49 = vor.u32 %v4470_v2, %v4467_v6  ;;  %v4457_v36 = vmax.f32 %v4450_v14, 0.0  ;;  %v4081_v14 = vadd.f32 %v12762_v32, %v3882_v62  ;;  %v11257_v32 = vld [vmem:[#allocation9 + $0x148] sm:$0xff] }
 0x3c5   :  { %v4222_v24 = vpop.f32.mrf.mxu0  ;;  %v4241_v60 = vpop.f32.mrf.mxu1  ;;  %4907 = vmatpush.bf16.msra.mxu2 %v11274_v25  ;;  %5024 = vmatpush.bf16.msra.mxu3 %v11281_v16 }
 0x3c6   :  { %v4508_v54 = vsel %vm11912_vm5, %v4471_v49, %v11555_v46  ;;  %v4461_v1 = vpack.c.bf16 %v4457_v36, %v4457_v36  ;;  %v4250_v11 = vadd.f32 %v4222_v24, %v4079_v57  ;;  %v4251_v48 = vadd.f32 %v4241_v60, %v12774_v63  ;;  %v11295_v36 = vld [vmem:[#allocation9 + $0x278] sm:$0xff] }
 0x3c7   :  { %4509 = vst [vmem:[#allocation2] sm:$0xe] %v4508_v54  ;;  %v4472_v26 = vrot.slane %v4471_v49, 4  ;;  %v4411_v49 = vpop.f32.mrf.mxu2  ;;  %4694 = vmatpush.bf16.msra.mxu0 %v11264_v18  ;;  %4768 = vmatpush.bf16.msra.mxu1 %v11257_v32  ;;  %v11293_v18 = vld [vmem:[#allocation9 + $0x268] sm:$0xff] }
 0x3c8   :  { %v4474_v42 = vshrl.u32 %v4461_v1, 16  ;;  %v4477_v39 = vshll.u32 %v4461_v1, 16  ;;  %v4437_v45 = vadd.f32 %v4409_v10, %v4250_v11  ;;  %v4438_v56 = vadd.f32 %v4428_v12, %v4251_v48 }
 0x3c9   :  { %4908 = vmatpush.bf16.msra.mxu2 %v11273_v35  ;;  %5025 = vmatpush.bf16.msra.mxu3 %v11280_v53 }
 0x3ca   :  { %v4476_v43 = vrot.slane %v4474_v42, 6  ;;  %v4479_v41 = vrot.slane %v4477_v39, 7  ;;  %v4452_v38 = vadd.f32 %v12770_v47, %v4437_v45  ;;  %v12799_v63 = vadd.f32 %v12772_v29, %v4438_v56  ;;  %v11294_v39 = vld [vmem:[#allocation9 + $0x270] sm:$0xff] }
 0x3cb   :  { %5162 = vmatpush.bf16.msrb.mxu0 %v11295_v36 }
 0x3cc   :  { %v4480_v6 = vor.u32 %v4479_v41, %v4476_v43  ;;  %v4458_v2 = vmax.f32 %v4452_v38, 0.0  ;;  %v11256_v43 = vld [vmem:[#allocation9 + $0x140] sm:$0xff] }
 0x3cd   :  { %v4224_v51 = vpop.f32.mrf.mxu0  ;;  %v11272_v41 = vld [vmem:[#allocation9 + $0x1c0] sm:$0xff]  ;;  %4769 = vmatpush.bf16.msra.mxu1 %v11256_v43 }
 0x3ce   :  { %v4481_v10 = vsel %vm11922_vm7, %v4472_v26, %v4480_v6  ;;  %v4482_v57 = vrot.slane %v4480_v6, 4  ;;  %v4462_v8 = vpack.c.bf16 %v4458_v2, %v4458_v2  ;;  %v4252_v24 = vadd.f32 %v4224_v51, %v4081_v14  ;;  %v12804_v60 = vld [vmem:[#allocation2] sm:$0xe]  ;;  %v4514_v14 = vld [vmem:[#allocation2 + $0xc] sm:$0xe]  ;;  %4909 = vmatpush.bf16.msra.mxu2 %v11272_v41 }
 0x3cf   :  { %4510 = vst [vmem:[#allocation2 + $0x4] sm:$0xf] %v4481_v10  ;;  %v4521_v46 = vld [vmem:[#allocation2] sm:$0xf]  ;;  %v4784_v42 = vshrl.u32 %v12804_v60, 16  ;;  %v4787_v34 = vshll.u32 %v12804_v60, 16  ;;  %5163 = vmatpush.bf16.msrb.mxu0 %v11294_v39 }
 0x3d0   :  { %v4512_v54 = vsel %vm11908_vm4, %v4482_v57, %v4511_v22  ;;  %v4484_v1 = vshrl.u32 %v4462_v8, 16  ;;  %v4487_v11 = vshll.u32 %v4462_v8, 16  ;;  %v4439_v48 = vadd.f32 %v4411_v49, %v4252_v24  ;;  %v12811_v56 = vld [vmem:[#allocation2] sm:$0xc] }
 0x3d1   :  { %4513 = vst [vmem:[#allocation2 + $0x8] sm:$0x3] %v4512_v54  ;;  %v4528_v7 = vshrl.u32 %v4521_v46, 16  ;;  %v4531_v62 = vshll.u32 %v4521_v46, 16  ;;  %v4786_v6 = vrot.slane %v4784_v42, 5  ;;  %v4789_v2 = vrot.slane %v4787_v34, 6 }
 0x3d2   :  { %v4486_v12 = vrot.slane %v4484_v1, 6  ;;  %v4489_v45 = vrot.slane %v4487_v11, 7  ;;  %v4454_v50 = vadd.f32 %v12770_v47, %v4439_v48  ;;  %v9844_v10 = vrot.slane %v12804_v60, 9 }
 0x3d3   :  { %v4530_v38 = vrot.slane %v4528_v7, 4  ;;  %v4533_v31 = vrot.slane %v4531_v62, 5  ;;  %v9942_v57 = vrot.slane %v12811_v56, 10  ;;  %v4790_v1 = vor.u32 %v4789_v2, %v4786_v6  ;;  %5164 = vmatpush.bf16.msrb.mxu0 %v11293_v18  ;;  %v11292_v62 = vld [vmem:[#allocation9 + $0x260] sm:$0xff]  ;;  %v11291_v18 = vld [vmem:[#allocation9 + $0x258] sm:$0xff] }
 0x3d4   :  { %v4490_v25 = vor.u32 %v4489_v45, %v4486_v12  ;;  %v4459_v26 = vmax.f32 %v4454_v50, 0.0 }
 0x3d5   :  { %v4534_v16 = vor.u32 %v4533_v31, %v4530_v38 }
 0x3d6   :  { %v4515_v47 = vsel %vm11912_vm5, %v4490_v25, %v4514_v14  ;;  %v4463_v51 = vpack.c.bf16 %v4459_v26, %v4459_v26  ;;  %v4522_v36 = vld [vmem:[#allocation2 + $0x4] sm:$0xf]  ;;  %v4491_v22 = vrot.slane %v4490_v25, 4 }
 0x3d7   :  { %4516 = vst [vmem:[#allocation2 + $0xc] sm:$0xe] %v4515_v47  ;;  %v4602_v8 = vrot.slane %v4522_v36, 5  ;;  %v4933_v24 = vrot.slane %v4522_v36, 6  ;;  %v12817_v49 = vshll.u32 %v4522_v36, 16  ;;  %v4535_v7 = vrot.slane %v4534_v16, 4  ;;  %5165 = vmatpush.bf16.msrb.mxu0 %v11292_v62 }
 0x3d8   :  { %v4493_v32 = vshrl.u32 %v4463_v51, 16  ;;  %v4496_v35 = vshll.u32 %v4463_v51, 16  ;;  %v4523_v46 = vld [vmem:[#allocation2 + $0x8] sm:$0x1]  ;;  %v12826_v25 = vshrl.u32 %v4522_v36, 16 }
 0x3d9   :  { %v4781_v54 = vld [vmem:[#allocation2 + $0x8] sm:$0x3]  ;;  %v4603_v11 = vsel %vm12044_vm1, %v9844_v10, %v4602_v8  ;;  %v4604_v48 = vrot.slane %v4602_v8, 4  ;;  %v4605_v53 = vrot.slane %v4523_v46, 5  ;;  %v4934_v12 = vsel %vm12123_vm3, %v9942_v57, %v4933_v24  ;;  %v4518_v10 = vld [vmem:[#allocation2 + $0x14] sm:$0x3] }
 0x3da   :  { %v4495_v42 = vrot.slane %v4493_v32, 6  ;;  %v4498_v39 = vrot.slane %v4496_v35, 7  ;;  %v4935_v45 = vrot.slane %v4933_v24, 4  ;;  %v4631_v34 = vunpack.c.l.b16 %v4603_v11 }
 0x3db   :  { %v4606_v50 = vsel %vm12044_vm1, %v4604_v48, %v4605_v53  ;;  %v4936_v43 = vrot.slane %v4781_v54, 6  ;;  %v4539_v41 = vrot.slane %v12817_v49, 5  ;;  %v4547_v26 = vshll.u32 %v4523_v46, 16  ;;  %5166 = vmatpush.bf16.msrb.mxu0 %v11291_v18 }
 0x3dc   :  { %v4499_v38 = vor.u32 %v4498_v39, %v4495_v42  ;;  %v4632_v31 = vunpack.c.l.b16 %v4606_v50  ;;  %v4962_v2 = vunpack.c.l.b16 %v4934_v12  ;;  %v4793_v16 = vrot.slane %v12817_v49, 6 }
 0x3dd   :  { %v4937_v6 = vsel %vm12123_vm3, %v4935_v45, %v4936_v43  ;;  %v4540_v14 = vsel %vm11957_vm10, %v4535_v7, %v4539_v41  ;;  %v4543_v24 = vrot.slane %v12826_v25, 4  ;;  %v4549_v32 = vrot.slane %v4547_v26, 5 }
 0x3de   :  { %v4500_v47 = vsel %vm11922_vm7, %v4491_v22, %v4499_v38  ;;  %v4501_v51 = vrot.slane %v4499_v38, 4  ;;  %v4635_v57 = vpack.c.b16 %v4632_v31, %v4631_v34  ;;  %v4963_v36 = vunpack.c.l.b16 %v4937_v6  ;;  %v12835_v8 = vld [vmem:[#allocation2 + $0xc] sm:$0xe] }
 0x3df   :  { %4517 = vst [vmem:[#allocation2 + $0x10] sm:$0xf] %v4500_v47  ;;  %v4791_v35 = vrot.slane %v4790_v1, 4  ;;  %v4792_v46 = vrot.slane %v12826_v25, 5  ;;  %v4798_v53 = vshrl.u32 %v4781_v54, 16  ;;  %v4801_v22 = vshll.u32 %v4781_v54, 16 }
 0x3e0   :  { %v4519_v11 = vsel %vm11908_vm4, %v4501_v51, %v4518_v10  ;;  %4695 = vmatmul.bf16.vlgmr.msra.gmra.mxu0 %v4635_v57  ;;  %v4966_v48 = vpack.c.b16 %v4963_v36, %v4962_v2  ;;  %v4524_v7 = vld [vmem:[#allocation2 + $0xc] sm:$0xf]  ;;  %v4544_v62 = vor.u32 %v4543_v24, %v4539_v41  ;;  %v4706_v42 = vunpack.c.l.b16 %v4540_v14  ;;  %v11290_v1 = vld [vmem:[#allocation9 + $0x250] sm:$0xff]  ;;  %v11289_v57 = vld [vmem:[#allocation9 + $0x248] sm:$0xff] }
 0x3e1   :  { %4520 = vst [vmem:[#allocation2 + $0x14] sm:$0x3] %v4519_v11  ;;  %v4794_v39 = vor.u32 %v4793_v16, %v4792_v46  ;;  %v9845_v12 = vrot.slane %v12835_v8, 9  ;;  %v12842_v45 = vld [vmem:[#allocation2 + $0xc] sm:$0xc]  ;;  %v4800_v50 = vrot.slane %v4798_v53, 5  ;;  %5167 = vmatpush.bf16.msrb.mxu0 %v11290_v1 }
 0x3e2   :  { %5026 = vmatmul.bf16.vlgmr.msra.gmra.mxu3 %v4966_v48  ;;  %v4803_v34 = vrot.slane %v4801_v22, 6  ;;  %v4552_v43 = vshrl.u32 %v4524_v7, 16  ;;  %v4555_v38 = vshll.u32 %v4524_v7, 16  ;;  %v4545_v31 = vrot.slane %v4544_v62, 4 }
 0x3e3   :  { %v4795_v54 = vsel %vm12022_vm15, %v4791_v35, %v4794_v39  ;;  %v4796_v26 = vrot.slane %v4794_v39, 4  ;;  %v4807_v41 = vshrl.u32 %v12835_v8, 16  ;;  %v9943_v2 = vrot.slane %v12842_v45, 10 }
 0x3e4   :  { %v4804_v6 = vor.u32 %v4803_v34, %v4800_v50  ;;  %v4554_v14 = vrot.slane %v4552_v43, 4  ;;  %v4557_v16 = vrot.slane %v4555_v38, 5  ;;  %v4550_v18 = vsel %vm11957_vm10, %v4545_v31, %v4549_v32  ;;  %v11288_v31 = vld [vmem:[#allocation9 + $0x240] sm:$0xff] }
 0x3e5   :  { %v4846_v47 = vunpack.c.l.b16 %v4795_v54  ;;  %v4809_v51 = vrot.slane %v4807_v41, 5  ;;  %v4810_v10 = vshll.u32 %v12835_v8, 16  ;;  %v4707_v36 = vunpack.c.l.b16 %v4550_v18  ;;  %5168 = vmatpush.bf16.msrb.mxu0 %v11289_v57 }
 0x3e6   :  { %v4805_v24 = vsel %vm12022_vm15, %v4796_v26, %v4804_v6  ;;  %v4525_v35 = vld [vmem:[#allocation2 + $0x10] sm:$0xf]  ;;  %v4558_v46 = vor.u32 %v4557_v16, %v4554_v14  ;;  %v5044_v11 = vshrl.u32 %v12811_v56, 16  ;;  %v5047_v8 = vshll.u32 %v12811_v56, 16 }
 0x3e7   :  { %v4847_v48 = vunpack.c.l.b16 %v4805_v24  ;;  %v4609_v53 = vrot.slane %v4525_v35, 5  ;;  %v4940_v22 = vrot.slane %v4525_v35, 6  ;;  %v12854_v7 = vshll.u32 %v4525_v35, 16 }
 0x3e8   :  { %v4710_v32 = vpack.c.b16 %v4707_v36, %v4706_v42  ;;  %v4526_v62 = vld [vmem:[#allocation2 + $0x14] sm:$0x1]  ;;  %v12856_v50 = vshrl.u32 %v4525_v35, 16  ;;  %v4559_v41 = vrot.slane %v4558_v46, 4  ;;  %v4812_v57 = vrot.slane %v4810_v10, 6 }
 0x3e9   :  { %v4782_v39 = vld [vmem:[#allocation2 + $0x14] sm:$0x3]  ;;  %v4850_v1 = vpack.c.b16 %v4847_v48, %v4846_v47  ;;  %v4610_v34 = vsel %vm12044_vm1, %v9845_v12, %v4609_v53  ;;  %v4611_v43 = vrot.slane %v4609_v53, 4  ;;  %v4612_v38 = vrot.slane %v4526_v62, 5  ;;  %5169 = vmatpush.bf16.msrb.mxu0 %v11288_v31 }
 0x3ea   :  { %4770 = vmatmul.bf16.vlgmr.msra.gmra.mxu1 %v4710_v32  ;;  %v4941_v54 = vsel %vm12123_vm3, %v9943_v2, %v4940_v22  ;;  %v4942_v26 = vrot.slane %v4940_v22, 4  ;;  %v4943_v42 = vrot.slane %v4782_v39, 6  ;;  %v4633_v56 = vunpack.c.l.b16 %v4610_v34 }
 0x3eb   :  { %4910 = vmatmul.bf16.vlgmr.msra.gmra.mxu2 %v4850_v1  ;;  %v4613_v6 = vsel %vm12044_vm1, %v4611_v43, %v4612_v38  ;;  %v4563_v14 = vrot.slane %v12854_v7, 5  ;;  %v4567_v12 = vrot.slane %v12856_v50, 4  ;;  %v4571_v47 = vshll.u32 %v4526_v62, 16  ;;  %v5041_v38 = vld [vmem:[#allocation2 + $0x8] sm:$0x7] }
 0x3ec   :  { %v4634_v16 = vunpack.c.l.b16 %v4613_v6  ;;  %v4944_v18 = vsel %vm12123_vm3, %v4942_v26, %v4943_v42  ;;  %v4964_v36 = vunpack.c.l.b16 %v4941_v54  ;;  %v4815_v35 = vrot.slane %v12856_v50, 5 }
 0x3ed   :  { %v4965_v2 = vunpack.c.l.b16 %v4944_v18  ;;  %v4568_v24 = vor.u32 %v4567_v12, %v4563_v14  ;;  %v4564_v48 = vsel %vm11957_vm10, %v4559_v41, %v4563_v14  ;;  %v4573_v53 = vrot.slane %v4571_v47, 5 }
 0x3ee   :  { %v4636_v46 = vpack.c.b16 %v4634_v16, %v4633_v56  ;;  %v4813_v22 = vor.u32 %v4812_v57, %v4809_v51  ;;  %v4816_v34 = vrot.slane %v12854_v7, 6  ;;  %v4821_v43 = vshrl.u32 %v4782_v39, 16 }
 0x3ef   :  { %v4967_v32 = vpack.c.b16 %v4965_v2, %v4964_v36  ;;  %v4569_v1 = vrot.slane %v4568_v24, 4  ;;  %v4824_v10 = vshll.u32 %v4782_v39, 16  ;;  %v5046_v54 = vrot.slane %v5044_v11, 6 }
 0x3f0   :  { %4700 = vmatmul.bf16.gmra.mxu0 %v4636_v46  ;;  %v4814_v62 = vrot.slane %v4813_v22, 4  ;;  %v5049_v26 = vrot.slane %v5047_v8, 7  ;;  %v4817_v42 = vor.u32 %v4816_v34, %v4815_v35  ;;  %v4823_v6 = vrot.slane %v4821_v43, 5 }
 0x3f1   :  { %v4574_v31 = vsel %vm11957_vm10, %v4569_v1, %v4573_v53  ;;  %v5052_v41 = vrot.slane %v12826_v25, 6  ;;  %v4826_v56 = vrot.slane %v4824_v10, 6  ;;  %v5053_v12 = vrot.slane %v12817_v49, 7 }
 0x3f2   :  { %5031 = vmatmul.bf16.gmra.mxu3 %v4967_v32  ;;  %v4709_v51 = vunpack.c.l.b16 %v4574_v31  ;;  %v5050_v14 = vor.u32 %v5049_v26, %v5046_v54  ;;  %v4818_v16 = vsel %vm12022_vm15, %v4814_v62, %v4817_v42  ;;  %v4819_v39 = vrot.slane %v4817_v42, 4  ;;  %v5042_v32 = vld [vmem:[#allocation2 + $0x14] sm:$0x7] }
 0x3f3   :  { %v5058_v18 = vshrl.u32 %v5041_v38, 16  ;;  %v5061_v11 = vshll.u32 %v5041_v38, 16  ;;  %v4708_v8 = vunpack.c.l.b16 %v4564_v48  ;;  %v4827_v47 = vor.u32 %v4826_v56, %v4823_v6 }
 0x3f4   :  { %v5054_v57 = vor.u32 %v5053_v12, %v5052_v41  ;;  %v4848_v35 = vunpack.c.l.b16 %v4818_v16  ;;  %v5051_v53 = vrot.slane %v5050_v14, 4  ;;  %v5067_v62 = vshrl.u32 %v12842_v45, 16 }
 0x3f5   :  { %v5060_v36 = vrot.slane %v5058_v18, 6  ;;  %v5063_v2 = vrot.slane %v5061_v11, 7  ;;  %v4711_v24 = vpack.c.b16 %v4709_v51, %v4708_v8  ;;  %v4828_v25 = vsel %vm12022_vm15, %v4819_v39, %v4827_v47 }
 0x3f6   :  { %v4849_v46 = vunpack.c.l.b16 %v4828_v25  ;;  %v5056_v22 = vrot.slane %v5054_v57, 4  ;;  %v5055_v34 = vsel %vm11922_vm7, %v5051_v53, %v5054_v57  ;;  %v5070_v10 = vshll.u32 %v12842_v45, 16 }
 0x3f7   :  { %v5064_v49 = vor.u32 %v5063_v2, %v5060_v36  ;;  %v5075_v38 = vrot.slane %v12856_v50, 6  ;;  %v5076_v54 = vrot.slane %v12854_v7, 7  ;;  %v5081_v26 = vshrl.u32 %v5042_v32, 16  ;;  %v12893_v36 = vpop.f32.mrf.mxu1 }
 0x3f8   :  { %v4851_v1 = vpack.c.b16 %v4849_v46, %v4848_v35  ;;  %v5084_v31 = vshll.u32 %v5042_v32, 16  ;;  %v5106_v42 = vunpack.c.l.b16 %v5055_v34  ;;  %v5069_v41 = vrot.slane %v5067_v62, 6  ;;  %v11319_v34 = vld [vmem:[#allocation12 + $0x178] sm:$0xff] }
 0x3f9   :  { %v5065_v48 = vsel %vm11922_vm7, %v5056_v22, %v5064_v49  ;;  %v5072_v51 = vrot.slane %v5070_v10, 7  ;;  %v5077_v56 = vor.u32 %v5076_v54, %v5075_v38  ;;  %v5083_v14 = vrot.slane %v5081_v26, 6  ;;  %5620 = vmatpush.bf16.msrb.mxu3 %v11319_v34  ;;  %v11302_v10 = vld [vmem:[#allocation12 + $0xf0] sm:$0xff]  ;;  %v12899_v26 = vld [vmem:[#allocation11 + $0x1] ss:$0 sm:$0xff] }
 0x3fa   :  { %4775 = vmatmul.bf16.gmra.mxu1 %v4711_v24  ;;  %v5107_v43 = vunpack.c.l.b16 %v5065_v48  ;;  %v5086_v12 = vrot.slane %v5084_v31, 7  ;;  %v12895_v24 = vpop.f32.mrf.mxu3  ;;  %v11318_v38 = vld [vmem:[#allocation12 + $0x170] sm:$0xff] }
 0x3fb   :  { %4915 = vmatmul.bf16.gmra.mxu2 %v4851_v1  ;;  %v5073_v16 = vor.u32 %v5072_v51, %v5069_v41  ;;  %v5079_v39 = vrot.slane %v5077_v56, 4  ;;  %v11303_v1 = vld [vmem:[#allocation12 + $0xf8] sm:$0xff]  ;;  %v11317_v41 = vld [vmem:[#allocation12 + $0x168] sm:$0xff] }
 0x3fc   :  { %v5110_v6 = vpack.c.b16 %v5107_v43, %v5106_v42  ;;  %v5087_v18 = vor.u32 %v5086_v12, %v5083_v14  ;;  %v11311_v43 = vld [vmem:[#allocation12 + $0x138] sm:$0xff]  ;;  %5508 = vmatpush.bf16.msrb.mxu2 %v11303_v1  ;;  %v11301_v42 = vld [vmem:[#allocation12 + $0xe8] sm:$0xff] }
 0x3fd   :  { %v5074_v11 = vrot.slane %v5073_v16, 4  ;;  %5433 = vmatpush.bf16.msrb.mxu1 %v11311_v43  ;;  %5621 = vmatpush.bf16.msrb.mxu3 %v11318_v38  ;;  %v11309_v12 = vld [vmem:[#allocation12 + $0x128] sm:$0xff]  ;;  %v11315_v1 = vld [vmem:[#allocation12 + $0x158] sm:$0xff]  ;;  %v11298_v38 = vld [vmem:[#allocation12 + $0xd0] sm:$0xff] }
 0x3fe   :  { %v5088_v45 = vsel %vm11922_vm7, %v5079_v39, %v5087_v18 }
 0x3ff   :  { %v5078_v7 = vsel %vm11922_vm7, %v5074_v11, %v5077_v56  ;;  %v5109_v50 = vunpack.c.l.b16 %v5088_v45  ;;  %v11300_v11 = vld [vmem:[#allocation12 + $0xe0] sm:$0xff] }
 0x400   :  { %5170 = vmatmul.bf16.vlgmr.msrb.gmra.mxu0 %v5110_v6  ;;  %v5108_v8 = vunpack.c.l.b16 %v5078_v7  ;;  %5509 = vmatpush.bf16.msrb.mxu2 %v11302_v10  ;;  %v11310_v6 = vld [vmem:[#allocation12 + $0x130] sm:$0xff]  ;;  %v11316_v45 = vld [vmem:[#allocation12 + $0x160] sm:$0xff] }
 0x401   :  { %5434 = vmatpush.bf16.msrb.mxu1 %v11310_v6  ;;  %5622 = vmatpush.bf16.msrb.mxu3 %v11317_v41 }
 0x402   :  { %v5111_v47 = vpack.c.b16 %v5109_v50, %v5108_v8 }
 0x404   :  { %5510 = vmatpush.bf16.msrb.mxu2 %v11301_v42 }
 0x405   :  { %5435 = vmatpush.bf16.msrb.mxu1 %v11309_v12  ;;  %5623 = vmatpush.bf16.msrb.mxu3 %v11316_v45 }
 0x408   :  { %5511 = vmatpush.bf16.msrb.mxu2 %v11300_v11 }
 0x409   :  { %5624 = vmatpush.bf16.msrb.mxu3 %v11315_v1 }
 0x410   :  { %5175 = vmatmul.bf16.gmra.mxu0 %v5111_v47 }
 0x45d   :  { %v4696_v57 = vpop.f32.mrf.mxu0 }
 0x465   :  { %v4698_v2 = vpop.f32.mrf.mxu0  ;;  %v5027_v53 = vpop.f32.mrf.mxu3 }
 0x467   :  { %v4771_v25 = vpop.f32.mrf.mxu1 }
 0x468   :  { %v4772_v49 = vadd.f32 %v4771_v25, %v4696_v57 }
 0x46d   :  { %v4701_v35 = vpop.f32.mrf.mxu0  ;;  %v5029_v14 = vpop.f32.mrf.mxu3 }
 0x46e   :  { %v4911_v46 = vpop.f32.mrf.mxu2 }
 0x46f   :  { %v4773_v32 = vpop.f32.mrf.mxu1  ;;  %v4921_v48 = vadd.f32 %v4911_v46, %v4772_v49  ;;  %v11299_v49 = vld [vmem:[#allocation12 + $0xd8] sm:$0xff] }
 0x470   :  { %v4774_v51 = vadd.f32 %v4773_v32, %v4698_v2  ;;  %v11308_v32 = vld [vmem:[#allocation12 + $0x120] sm:$0xff]  ;;  %5512 = vmatpush.bf16.msrb.mxu2 %v11299_v49 }
 0x471   :  { %v5037_v54 = vadd.f32 %v5027_v53, %v4921_v48  ;;  %5436 = vmatpush.bf16.msrb.mxu1 %v11308_v32  ;;  %v11312_v32 = vld [vmem:[#allocation12 + $0x140] sm:$0xff] }
 0x474   :  { %5513 = vmatpush.bf16.msrb.mxu2 %v11298_v38 }
 0x475   :  { %v12897_v22 = vpop.f32.mrf.mxu0  ;;  %v5032_v10 = vpop.f32.mrf.mxu3 }
 0x476   :  { %v4913_v62 = vpop.f32.mrf.mxu2 }
 0x477   :  { %v4922_v16 = vadd.f32 %v4913_v62, %v4774_v51  ;;  %v4776_v18 = vpop.f32.mrf.mxu1 }
 0x478   :  { %v4777_v2 = vadd.f32 %v4776_v18, %v4701_v35  ;;  %v11314_v35 = vld [vmem:[#allocation12 + $0x150] sm:$0xff] }
 0x479   :  { %v5038_v47 = vadd.f32 %v5029_v14, %v4922_v16  ;;  %v11297_v16 = vld [vmem:[#allocation12 + $0xc8] sm:$0xff]  ;;  %5625 = vmatpush.bf16.msrb.mxu3 %v11314_v35 }
 0x47a   :  { %5514 = vmatpush.bf16.msrb.mxu2 %v11297_v16 }
 0x47d   :  { %v5171_v31 = vpop.f32.mrf.mxu0 }
 0x47e   :  { %v5181_v56 = vadd.f32 %v5171_v31, %v5037_v54  ;;  %v4916_v50 = vpop.f32.mrf.mxu2  ;;  %v11307_v54 = vld [vmem:[#allocation12 + $0x118] sm:$0xff] }
 0x47f   :  { %v4923_v34 = vadd.f32 %v4916_v50, %v4777_v2  ;;  %v4778_v6 = vpop.f32.mrf.mxu1  ;;  %5437 = vmatpush.bf16.msrb.mxu1 %v11307_v54  ;;  %v11313_v50 = vld [vmem:[#allocation12 + $0x148] sm:$0xff]  ;;  %v11296_v2 = vld [vmem:[#allocation12 + $0xc0] sm:$0xff] }
 0x480   :  { %v5190_v39 = vadd.f32 %v12899_v26, %v5181_v56  ;;  %v4779_v18 = vadd.f32 %v4778_v6, %v12897_v22  ;;  %5626 = vmatpush.bf16.msrb.mxu3 %v11313_v50  ;;  %v5034_v22 = vpop.f32.mrf.mxu3  ;;  %5515 = vmatpush.bf16.msrb.mxu2 %v11296_v2  ;;  %v11304_v54 = vld [vmem:[#allocation12 + $0x100] sm:$0xff] }
 0x481   :  { %v5039_v56 = vadd.f32 %v5032_v10, %v4923_v34 }
 0x482   :  { %v5194_v7 = vmax.f32 %v5190_v39, 0.0  ;;  %v11306_v39 = vld [vmem:[#allocation12 + $0x110] sm:$0xff] }
 0x483   :  { %5438 = vmatpush.bf16.msrb.mxu1 %v11306_v39 }
 0x484   :  { %v5198_v8 = vpack.c.bf16 %v5194_v7, %v5194_v7  ;;  %5627 = vmatpush.bf16.msrb.mxu3 %v11312_v32 }
 0x485   :  { %v5173_v57 = vpop.f32.mrf.mxu0 }
 0x486   :  { %v5203_v25 = vshrl.u32 %v5198_v8, 16  ;;  %v5206_v46 = vshll.u32 %v5198_v8, 16  ;;  %v5182_v53 = vadd.f32 %v5173_v57, %v5038_v47  ;;  %v4918_v14 = vpop.f32.mrf.mxu2 }
 0x487   :  { %v4924_v8 = vadd.f32 %v4918_v14, %v4779_v18 }
 0x488   :  { %v5205_v48 = vrot.slane %v5203_v25, 6  ;;  %v5208_v43 = vrot.slane %v5206_v46, 7  ;;  %v5191_v62 = vadd.f32 %v12899_v26, %v5182_v53  ;;  %v11305_v25 = vld [vmem:[#allocation12 + $0x108] sm:$0xff] }
 0x489   :  { %5439 = vmatpush.bf16.msrb.mxu1 %v11305_v25 }
 0x48a   :  { %v5209_v31 = vor.u32 %v5208_v43, %v5205_v48  ;;  %v5195_v42 = vmax.f32 %v5191_v62, 0.0  ;;  %v5249_v48 = vld [vmem:[#allocation2 + $0x8] sm:$0x3]  ;;  %v5040_v62 = vadd.f32 %v5034_v22, %v4924_v8 }
 0x48c   :  { %v5246_v41 = vsel %vm11912_vm5, %v5209_v31, %v12804_v60  ;;  %v5199_v51 = vpack.c.bf16 %v5195_v42, %v5195_v42  ;;  %v5210_v46 = vrot.slane %v5209_v31, 4 }
 0x48d   :  { %5247 = vst [vmem:[#allocation2] sm:$0xe] %v5246_v41  ;;  %v5176_v12 = vpop.f32.mrf.mxu0  ;;  %5440 = vmatpush.bf16.msrb.mxu1 %v11304_v54 }
 0x48e   :  { %v5212_v11 = vshrl.u32 %v5199_v51, 16  ;;  %v5215_v45 = vshll.u32 %v5199_v51, 16  ;;  %v5183_v7 = vadd.f32 %v5176_v12, %v5039_v56 }
 0x490   :  { %v5214_v47 = vrot.slane %v5212_v11, 6  ;;  %v5217_v57 = vrot.slane %v5215_v45, 7  ;;  %v5192_v60 = vadd.f32 %v12899_v26, %v5183_v7  ;;  %v5252_v7 = vld [vmem:[#allocation2 + $0xc] sm:$0xe] }
 0x492   :  { %v5218_v53 = vor.u32 %v5217_v57, %v5214_v47  ;;  %v5196_v49 = vmax.f32 %v5192_v60, 0.0 }
 0x494   :  { %v5219_v1 = vsel %vm11922_vm7, %v5210_v46, %v5218_v53  ;;  %v5220_v34 = vrot.slane %v5218_v53, 4  ;;  %v5200_v43 = vpack.c.bf16 %v5196_v49, %v5196_v49  ;;  %v12910_v10 = vld [vmem:[#allocation2] sm:$0xe] }
 0x495   :  { %5248 = vst [vmem:[#allocation2 + $0x4] sm:$0xf] %v5219_v1  ;;  %v5178_v38 = vpop.f32.mrf.mxu0  ;;  %v5305_v31 = vshrl.u32 %v12910_v10, 16  ;;  %v5308_v42 = vshll.u32 %v12910_v10, 16  ;;  %v5527_v16 = vld [vmem:[#allocation2] sm:$0xc] }
 0x496   :  { %v5250_v35 = vsel %vm11908_vm4, %v5220_v34, %v5249_v48  ;;  %v5222_v6 = vshrl.u32 %v5200_v43, 16  ;;  %v5225_v41 = vshll.u32 %v5200_v43, 16  ;;  %v5184_v51 = vadd.f32 %v5178_v38, %v5040_v62 }
 0x497   :  { %5251 = vst [vmem:[#allocation2 + $0x8] sm:$0x3] %v5250_v35  ;;  %v5307_v11 = vrot.slane %v5305_v31, 5  ;;  %v5310_v45 = vrot.slane %v5308_v42, 6  ;;  %v10008_v57 = vrot.slane %v12910_v10, 9  ;;  %v10074_v60 = vrot.slane %v5527_v16, 10 }
 0x498   :  { %v5224_v56 = vrot.slane %v5222_v6, 6  ;;  %v5227_v14 = vrot.slane %v5225_v41, 7  ;;  %v5193_v12 = vadd.f32 %v12899_v26, %v5184_v51 }
 0x499   :  { %v5311_v1 = vor.u32 %v5310_v45, %v5307_v11 }
 0x49a   :  { %v5228_v39 = vor.u32 %v5227_v14, %v5224_v56  ;;  %v5197_v18 = vmax.f32 %v5193_v12, 0.0 }
 0x49b   :  { %v5312_v11 = vrot.slane %v5311_v1, 4 }
 0x49c   :  { %v5253_v50 = vsel %vm11912_vm5, %v5228_v39, %v5252_v7  ;;  %v5201_v8 = vpack.c.bf16 %v5197_v18, %v5197_v18  ;;  %v5260_v47 = vld [vmem:[#allocation2 + $0x4] sm:$0xf]  ;;  %v5229_v34 = vrot.slane %v5228_v39, 4 }
 0x49d   :  { %5254 = vst [vmem:[#allocation2 + $0xc] sm:$0xe] %v5253_v50  ;;  %v5273_v2 = vrot.slane %v5260_v47, 5  ;;  %v5535_v25 = vrot.slane %v5260_v47, 6  ;;  %v5314_v46 = vshrl.u32 %v5260_v47, 16  ;;  %v5317_v26 = vshll.u32 %v5260_v47, 16 }
 0x49e   :  { %v5231_v53 = vshrl.u32 %v5201_v8, 16  ;;  %v5234_v49 = vshll.u32 %v5201_v8, 16  ;;  %v5261_v32 = vld [vmem:[#allocation2 + $0x8] sm:$0x1]  ;;  %v5256_v8 = vld [vmem:[#allocation2 + $0x14] sm:$0x3] }
 0x49f   :  { %v5302_v22 = vld [vmem:[#allocation2 + $0x8] sm:$0x3]  ;;  %v5274_v48 = vsel %vm12044_vm1, %v10008_v57, %v5273_v2  ;;  %v5275_v43 = vrot.slane %v5273_v2, 4  ;;  %v5276_v62 = vrot.slane %v5261_v32, 5  ;;  %v5536_v31 = vsel %vm12123_vm3, %v10074_v60, %v5535_v25 }
 0x4a0   :  { %v5233_v38 = vrot.slane %v5231_v53, 6  ;;  %v5236_v54 = vrot.slane %v5234_v49, 7  ;;  %v5537_v42 = vrot.slane %v5535_v25, 4  ;;  %v5452_v6 = vunpack.c.l.b16 %v5274_v48 }
 0x4a1   :  { %v5277_v35 = vsel %vm12044_vm1, %v5275_v43, %v5276_v62  ;;  %v5538_v41 = vrot.slane %v5302_v22, 6  ;;  %v5316_v51 = vrot.slane %v5314_v46, 5  ;;  %v5319_v12 = vrot.slane %v5317_v26, 6 }
 0x4a2   :  { %v5237_v56 = vor.u32 %v5236_v54, %v5233_v38  ;;  %v5453_v14 = vunpack.c.l.b16 %v5277_v35  ;;  %v5324_v16 = vshrl.u32 %v5302_v22, 16  ;;  %v5564_v18 = vunpack.c.l.b16 %v5536_v31 }
 0x4a3   :  { %v5539_v39 = vsel %vm12123_vm3, %v5537_v42, %v5538_v41  ;;  %v5327_v45 = vshll.u32 %v5302_v22, 16  ;;  %v5320_v60 = vor.u32 %v5319_v12, %v5316_v51 }
 0x4a4   :  { %v5238_v7 = vsel %vm11922_vm7, %v5229_v34, %v5237_v56  ;;  %v5239_v50 = vrot.slane %v5237_v56, 4  ;;  %v5456_v47 = vpack.c.b16 %v5453_v14, %v5452_v6  ;;  %v5565_v57 = vunpack.c.l.b16 %v5539_v39  ;;  %v5262_v46 = vld [vmem:[#allocation2 + $0xc] sm:$0xe] }
 0x4a5   :  { %5255 = vst [vmem:[#allocation2 + $0x10] sm:$0xf] %v5238_v7  ;;  %v5326_v2 = vrot.slane %v5324_v16, 5  ;;  %v5329_v25 = vrot.slane %v5327_v45, 6  ;;  %v5321_v49 = vsel %vm12022_vm15, %v5312_v11, %v5320_v60  ;;  %v5322_v32 = vrot.slane %v5320_v60, 4 }
 0x4a6   :  { %v5257_v26 = vsel %vm11908_vm4, %v5239_v50, %v5256_v8  ;;  %5516 = vmatmul.bf16.vlgmr.msrb.gmra.mxu2 %v5456_v47  ;;  %v5568_v53 = vpack.c.b16 %v5565_v57, %v5564_v18  ;;  %v5333_v1 = vshrl.u32 %v5262_v46, 16  ;;  %v5336_v34 = vshll.u32 %v5262_v46, 16  ;;  %v5528_v38 = vld [vmem:[#allocation2 + $0xc] sm:$0xc] }
 0x4a7   :  { %5258 = vst [vmem:[#allocation2 + $0x14] sm:$0x3] %v5257_v26  ;;  %v5330_v22 = vor.u32 %v5329_v25, %v5326_v2  ;;  %v5377_v43 = vunpack.c.l.b16 %v5321_v49  ;;  %v10009_v6 = vrot.slane %v5262_v46, 9  ;;  %v10075_v16 = vrot.slane %v5528_v38, 10 }
 0x4a8   :  { %5628 = vmatmul.bf16.vlgmr.msrb.gmra.mxu3 %v5568_v53  ;;  %v5335_v42 = vrot.slane %v5333_v1, 5  ;;  %v5338_v35 = vrot.slane %v5336_v34, 6 }
 0x4a9   :  { %v5331_v48 = vsel %vm12022_vm15, %v5322_v32, %v5330_v22 }
 0x4aa   :  { %v5378_v62 = vunpack.c.l.b16 %v5331_v48  ;;  %v5339_v47 = vor.u32 %v5338_v35, %v5335_v42 }
 0x4ac   :  { %v5381_v54 = vpack.c.b16 %v5378_v62, %v5377_v43  ;;  %v5263_v31 = vld [vmem:[#allocation2 + $0x10] sm:$0xf]  ;;  %v5340_v43 = vrot.slane %v5339_v47, 4 }
 0x4ad   :  { %v5280_v41 = vrot.slane %v5263_v31, 5  ;;  %v5542_v51 = vrot.slane %v5263_v31, 6  ;;  %v5342_v56 = vshrl.u32 %v5263_v31, 16  ;;  %v5345_v39 = vshll.u32 %v5263_v31, 16  ;;  %v11335_v47 = vld [vmem:[#allocation6 + $0x864] sm:$0xf0] }
 0x4ae   :  { %5441 = vmatmul.bf16.vlgmr.msrb.gmra.mxu1 %v5381_v54  ;;  %v5264_v14 = vld [vmem:[#allocation2 + $0x14] sm:$0x1] }
 0x4af   :  { %v5303_v12 = vld [vmem:[#allocation2 + $0x14] sm:$0x3]  ;;  %v5281_v18 = vsel %vm12044_vm1, %v10009_v6, %v5280_v41  ;;  %v5282_v11 = vrot.slane %v5280_v41, 4  ;;  %v5283_v45 = vrot.slane %v5264_v14, 5  ;;  %v5543_v7 = vsel %vm12123_vm3, %v10075_v16, %v5542_v51  ;;  %v11337_v14 = vld [vmem:[#allocation6 + $0x874] sm:$0xf0] }
 0x4b0   :  { %v5544_v50 = vrot.slane %v5542_v51, 4  ;;  %v5545_v8 = vrot.slane %v5303_v12, 6  ;;  %v5344_v60 = vrot.slane %v5342_v56, 5  ;;  %v5347_v2 = vrot.slane %v5345_v39, 6  ;;  %v10238_v56 = vld [vmem:[#allocation6 + $0x870] sm:$0xf] }
 0x4b1   :  { %v5284_v57 = vsel %vm12044_vm1, %v5282_v11, %v5283_v45  ;;  %v5352_v25 = vshrl.u32 %v5303_v12, 16  ;;  %v5454_v46 = vunpack.c.l.b16 %v5281_v18  ;;  %v5355_v49 = vshll.u32 %v5303_v12, 16  ;;  %v11336_v12 = vld [vmem:[#allocation6 + $0x874] sm:$0xf]  ;;  %v10240_v39 = vld [vmem:[#allocation6 + $0x878] sm:$0xf0] }
 0x4b2   :  { %v5455_v26 = vunpack.c.l.b16 %v5284_v57  ;;  %v5546_v53 = vsel %vm12123_vm3, %v5544_v50, %v5545_v8  ;;  %v5566_v32 = vunpack.c.l.b16 %v5543_v7  ;;  %v5348_v1 = vor.u32 %v5347_v2, %v5344_v60  ;;  %v10230_v8 = vld [vmem:[#allocation6 + $0x860] sm:$0xf]  ;;  %v11334_v57 = vld [vmem:[#allocation6 + $0x864] sm:$0xf] }
 0x4b3   :  { %v5567_v22 = vunpack.c.l.b16 %v5546_v53  ;;  %v5354_v34 = vrot.slane %v5352_v25, 5  ;;  %v5357_v62 = vrot.slane %v5355_v49, 6  ;;  %v10239_v16 = vor.u32 %v11337_v14, %v10238_v56  ;;  %v10232_v25 = vld [vmem:[#allocation6 + $0x868] sm:$0xf0] }
 0x4b4   :  { %v5457_v48 = vpack.c.b16 %v5455_v26, %v5454_v46  ;;  %v5350_v54 = vrot.slane %v5348_v1, 4  ;;  %v5349_v31 = vsel %vm12022_vm15, %v5340_v43, %v5348_v1  ;;  %v10243_v18 = vor.u32 %v11336_v12, %v10240_v39  ;;  %v10222_v46 = vld [vmem:[#allocation6 + $0x850] sm:$0xf]  ;;  %v11333_v26 = vld [vmem:[#allocation6 + $0x854] sm:$0xf0] }
 0x4b5   :  { %v5569_v38 = vpack.c.b16 %v5567_v22, %v5566_v32  ;;  %v5358_v42 = vor.u32 %v5357_v62, %v5354_v34  ;;  %v5379_v6 = vunpack.c.l.b16 %v5349_v31  ;;  %v3334_v11 = vadd.f32 %v12726_v33, %v12728_v61  ;;  %6031 = vmatpush.bf16.msra.mxu2 %v10239_v16  ;;  %v11332_v33 = vld [vmem:[#allocation6 + $0x854] sm:$0xf]  ;;  %v10224_v61 = vld [vmem:[#allocation6 + $0x858] sm:$0xf0]  ;;  %v12953_v1 = vld [vmem:[#allocation14 + $0x1] ss:$0 sm:$0xff] }
 0x4b6   :  { %5521 = vmatmul.bf16.gmra.mxu2 %v5457_v48  ;;  %6050 = vmatpush.bf16.msra.mxu3 %v10243_v18  ;;  %v10231_v2 = vor.u32 %v11335_v47, %v10230_v8  ;;  %v10235_v32 = vor.u32 %v11334_v57, %v10232_v25  ;;  %v10166_v43 = vld [vmem:[#allocation6 + $0x8f0] sm:$0xf]  ;;  %v11353_v62 = vld [vmem:[#allocation6 + $0x8f4] sm:$0xf0]  ;;  %v11330_v12 = vld [vmem:[#allocation6 + $0x844] sm:$0xf] }
 0x4b7   :  { %v5359_v35 = vsel %vm12022_vm15, %v5350_v54, %v5358_v42  ;;  %v3509_v45 = vadd.f32 %v12742_v3, %v3334_v11  ;;  %v10227_v3 = vor.u32 %v11332_v33, %v10224_v61  ;;  %v10167_v42 = vor.u32 %v11353_v62, %v10166_v43  ;;  %v11351_v39 = vld [vmem:[#allocation6 + $0x8e4] sm:$0xf0]  ;;  %v11350_v18 = vld [vmem:[#allocation6 + $0x8e4] sm:$0xf]  ;;  %v10160_v11 = vld [vmem:[#allocation6 + $0x8e8] sm:$0xf0] }
 0x4b8   :  { %5633 = vmatmul.bf16.gmra.mxu3 %v5569_v38  ;;  %v5380_v41 = vunpack.c.l.b16 %v5359_v35  ;;  %v11352_v38 = vld [vmem:[#allocation6 + $0x8f4] sm:$0xf]  ;;  %v10168_v35 = vld [vmem:[#allocation6 + $0x8f8] sm:$0xf0]  ;;  %v10163_v8 = vor.u32 %v11350_v18, %v10160_v11  ;;  %v11329_v47 = vld [vmem:[#allocation6 + $0x834] sm:$0xf0] }
 0x4b9   :  { %v3708_v7 = vadd.f32 %v12740_v17, %v3509_v45  ;;  %6032 = vmatpush.bf16.msra.mxu2 %v10231_v2  ;;  %v10223_v17 = vor.u32 %v11333_v26, %v10222_v46  ;;  %5901 = vmatpush.bf16.msra.mxu0 %v10167_v42  ;;  %v11328_v57 = vld [vmem:[#allocation6 + $0x834] sm:$0xf]  ;;  %v10144_v11 = vld [vmem:[#allocation6 + $0x8c8] sm:$0xf0] }
 0x4ba   :  { %v5382_v51 = vpack.c.b16 %v5380_v41, %v5379_v6  ;;  %6051 = vmatpush.bf16.msra.mxu3 %v10235_v32  ;;  %v10214_v6 = vld [vmem:[#allocation6 + $0x840] sm:$0xf]  ;;  %v11331_v41 = vld [vmem:[#allocation6 + $0x844] sm:$0xf0] }
 0x4bb   :  { %v3879_v60 = vadd.f32 %v12756_v28, %v3708_v7  ;;  %v3339_v28 = vadd.f32 %v12734_v27, %v12738_v55  ;;  %v10215_v14 = vor.u32 %v11331_v41, %v10214_v6  ;;  %v10216_v27 = vld [vmem:[#allocation6 + $0x848] sm:$0xf0]  ;;  %v10158_v55 = vld [vmem:[#allocation6 + $0x8e0] sm:$0xf]  ;;  %v11327_v41 = vld [vmem:[#allocation6 + $0x824] sm:$0xf0] }
 0x4bd   :  { %v4078_v34 = vadd.f32 %v12754_v58, %v3879_v60  ;;  %6033 = vmatpush.bf16.msra.mxu2 %v10223_v17  ;;  %v10171_v58 = vor.u32 %v11352_v38, %v10168_v35 }
 0x4be   :  { %5446 = vmatmul.bf16.gmra.mxu1 %v5382_v51  ;;  %v3513_v51 = vadd.f32 %v12752_v30, %v3339_v28  ;;  %6052 = vmatpush.bf16.msra.mxu3 %v10227_v3  ;;  %v10206_v30 = vld [vmem:[#allocation6 + $0x830] sm:$0xf] }
 0x4bf   :  { %v4249_v54 = vadd.f32 %v12781_v15, %v4078_v34  ;;  %v10219_v15 = vor.u32 %v11330_v12, %v10216_v27  ;;  %5920 = vmatpush.bf16.msra.mxu1 %v10171_v58  ;;  %v10207_v46 = vor.u32 %v11329_v47, %v10206_v30  ;;  %v10150_v34 = vld [vmem:[#allocation6 + $0x8d0] sm:$0xf]  ;;  %v11325_v47 = vld [vmem:[#allocation6 + $0x814] sm:$0xf0] }
 0x4c0   :  { %v3712_v26 = vadd.f32 %v12748_v44, %v3513_v51  ;;  %v11348_v44 = vld [vmem:[#allocation6 + $0x8d4] sm:$0xf]  ;;  %v11326_v51 = vld [vmem:[#allocation6 + $0x824] sm:$0xf] }
 0x4c1   :  { %v4436_v60 = vadd.f32 %v12784_v5, %v4249_v54  ;;  %6034 = vmatpush.bf16.msra.mxu2 %v10215_v14  ;;  %v10152_v54 = vld [vmem:[#allocation6 + $0x8d8] sm:$0xf0] }
 0x4c2   :  { %6053 = vmatpush.bf16.msra.mxu3 %v10219_v15  ;;  %v3883_v33 = vadd.f32 %v12768_v21, %v3712_v26  ;;  %v10155_v6 = vor.u32 %v11348_v44, %v10152_v54 }
 0x4c3   :  { %5921 = vmatpush.bf16.msra.mxu1 %v10163_v8  ;;  %v4451_v61 = vadd.f32 %v12772_v29, %v4436_v60 }
 0x4c4   :  { %v4082_v21 = vadd.f32 %v12764_v4, %v3883_v33  ;;  %v11346_v4 = vld [vmem:[#allocation6 + $0x8c4] sm:$0xf] }
 0x4c5   :  { %6035 = vmatpush.bf16.msra.mxu2 %v10207_v46 }
 0x4c6   :  { %v4253_v15 = vadd.f32 %v12893_v36, %v4082_v21  ;;  %v10147_v36 = vor.u32 %v11346_v4, %v10144_v11  ;;  %v11342_v21 = vld [vmem:[#allocation6 + $0x8a4] sm:$0xf]  ;;  %v10118_v11 = vld [vmem:[#allocation6 + $0x890] sm:$0xf] }
 0x4c7   :  { %5922 = vmatpush.bf16.msra.mxu1 %v10155_v6 }
 0x4cb   :  { %5923 = vmatpush.bf16.msra.mxu1 %v10147_v36 }
 0x529   :  { %v5517_v50 = vpop.f32.mrf.mxu2 }
 0x52b   :  { %v5442_v53 = vpop.f32.mrf.mxu1  ;;  %v5629_v49 = vpop.f32.mrf.mxu3 }
 0x52c   :  { %v5518_v22 = vadd.f32 %v5517_v50, %v5442_v53  ;;  %v10159_v50 = vor.u32 %v11351_v39, %v10158_v55  ;;  %v10142_v55 = vld [vmem:[#allocation6 + $0x8c0] sm:$0xf] }
 0x52e   :  { %v5639_v48 = vadd.f32 %v5629_v49, %v5518_v22  ;;  %5902 = vmatpush.bf16.msra.mxu0 %v10159_v50 }
 0x530   :  { %v5648_v31 = vadd.f32 %v12953_v1, %v5639_v48  ;;  %v11349_v48 = vld [vmem:[#allocation6 + $0x8d4] sm:$0xf0] }
 0x531   :  { %v5519_v56 = vpop.f32.mrf.mxu2  ;;  %v10151_v38 = vor.u32 %v11349_v48, %v10150_v34 }
 0x532   :  { %v5652_v16 = vadd.f32 %v5648_v31, %v12779_v37  ;;  %v10208_v37 = vld [vmem:[#allocation6 + $0x838] sm:$0xf0]  ;;  %v10198_v31 = vld [vmem:[#allocation6 + $0x820] sm:$0xf] }
 0x533   :  { %v5444_v45 = vpop.f32.mrf.mxu1  ;;  %v5631_v7 = vpop.f32.mrf.mxu3  ;;  %v10211_v53 = vor.u32 %v11328_v57, %v10208_v37  ;;  %5903 = vmatpush.bf16.msra.mxu0 %v10151_v38  ;;  %v10199_v27 = vor.u32 %v11327_v41, %v10198_v31  ;;  %v11324_v57 = vld [vmem:[#allocation6 + $0x814] sm:$0xf]  ;;  %v10126_v31 = vld [vmem:[#allocation6 + $0x8a0] sm:$0xf] }
 0x534   :  { %v5656_v2 = vmax.f32 %v5652_v16, 0.0  ;;  %v5520_v25 = vadd.f32 %v5519_v56, %v5444_v45  ;;  %v10200_v56 = vld [vmem:[#allocation6 + $0x828] sm:$0xf0]  ;;  %v11347_v16 = vld [vmem:[#allocation6 + $0x8c4] sm:$0xf0] }
 0x535   :  { %6054 = vmatpush.bf16.msra.mxu3 %v10211_v53  ;;  %v10203_v39 = vor.u32 %v11326_v51, %v10200_v56  ;;  %v10143_v18 = vor.u32 %v11347_v16, %v10142_v55  ;;  %v10190_v45 = vld [vmem:[#allocation6 + $0x810] sm:$0xf]  ;;  %6036 = vmatpush.bf16.msra.mxu2 %v10199_v27  ;;  %v10128_v51 = vld [vmem:[#allocation6 + $0x8a8] sm:$0xf0]  ;;  %v11385_v27 = vld [vmem:[#allocation6 + $0x9f4] sm:$0xf0] }
 0x536   :  { %v5660_v49 = vpack.c.bf16 %v5656_v2, %v5656_v2  ;;  %v5640_v32 = vadd.f32 %v5631_v7, %v5520_v25  ;;  %v10191_v60 = vor.u32 %v11325_v47, %v10190_v45  ;;  %v10192_v2 = vld [vmem:[#allocation6 + $0x818] sm:$0xf0]  ;;  %v10134_v25 = vld [vmem:[#allocation6 + $0x8b0] sm:$0xf]  ;;  %v11384_v55 = vld [vmem:[#allocation6 + $0x9f4] sm:$0xf] }
 0x537   :  { %5904 = vmatpush.bf16.msra.mxu0 %v10143_v18  ;;  %v10195_v53 = vor.u32 %v11324_v57, %v10192_v2  ;;  %v10368_v56 = vld [vmem:[#allocation6 + $0x9f0] sm:$0xf]  ;;  %v10370_v16 = vld [vmem:[#allocation6 + $0x9f8] sm:$0xf0]  ;;  %v11341_v45 = vld [vmem:[#allocation6 + $0x894] sm:$0xf0] }
 0x538   :  { %v5665_v22 = vshrl.u32 %v5660_v49, 16  ;;  %v5668_v17 = vshll.u32 %v5660_v49, 16  ;;  %v5649_v5 = vadd.f32 %v12953_v1, %v5640_v32  ;;  %v11345_v49 = vld [vmem:[#allocation6 + $0x8b4] sm:$0xf0]  ;;  %v11344_v32 = vld [vmem:[#allocation6 + $0x8b4] sm:$0xf] }
 0x539   :  { %v5522_v3 = vpop.f32.mrf.mxu2  ;;  %6055 = vmatpush.bf16.msra.mxu3 %v10203_v39  ;;  %6037 = vmatpush.bf16.msra.mxu2 %v10191_v60  ;;  %v10120_v47 = vld [vmem:[#allocation6 + $0x898] sm:$0xf0]  ;;  %v10360_v2 = vld [vmem:[#allocation6 + $0x9e0] sm:$0xf] }
 0x53a   :  { %v5667_v28 = vrot.slane %v5665_v22, 6  ;;  %v5670_v43 = vrot.slane %v5668_v17, 7  ;;  %v5653_v62 = vadd.f32 %v5649_v5, %v4451_v61  ;;  %v10135_v61 = vor.u32 %v11345_v49, %v10134_v25  ;;  %v10136_v22 = vld [vmem:[#allocation6 + $0x8b8] sm:$0xf0]  ;;  %v10182_v17 = vld [vmem:[#allocation6 + $0x800] sm:$0xf] }
 0x53b   :  { %v5447_v42 = vpop.f32.mrf.mxu1  ;;  %v5634_v35 = vpop.f32.mrf.mxu3  ;;  %v11323_v5 = vld [vmem:[#allocation6 + $0x804] sm:$0xf0]  ;;  %v10139_v44 = vor.u32 %v11344_v32, %v10136_v22 }
 0x53c   :  { %v12968_v58 = vor.u32 %v5670_v43, %v5667_v28  ;;  %v5657_v14 = vmax.f32 %v5653_v62, 0.0  ;;  %v5523_v12 = vadd.f32 %v5522_v3, %v5447_v42  ;;  %v11322_v28 = vld [vmem:[#allocation6 + $0x804] sm:$0xf]  ;;  %v10184_v43 = vld [vmem:[#allocation6 + $0x808] sm:$0xf0]  ;;  %v10183_v38 = vor.u32 %v11323_v5, %v10182_v17  ;;  %5905 = vmatpush.bf16.msra.mxu0 %v10135_v61 }
 0x53d   :  { %6056 = vmatpush.bf16.msra.mxu3 %v10195_v53  ;;  %v10187_v54 = vor.u32 %v11322_v28, %v10184_v43  ;;  %5924 = vmatpush.bf16.msra.mxu1 %v10139_v44  ;;  %v11383_v25 = vld [vmem:[#allocation6 + $0x9e4] sm:$0xf0]  ;;  %v10362_v53 = vld [vmem:[#allocation6 + $0x9e8] sm:$0xf0]  ;;  %v10110_v61 = vld [vmem:[#allocation6 + $0x880] sm:$0xf] }
 0x53e   :  { %v5672_v7 = vrot.slane %v12968_v58, 4  ;;  %v5708_v50 = vsel %vm11912_vm5, %v12968_v58, %v12910_v10  ;;  %v5661_v8 = vpack.c.bf16 %v5657_v14, %v5657_v14  ;;  %v5641_v30 = vadd.f32 %v5634_v35, %v5523_v12  ;;  %v5711_v58 = vld [vmem:[#allocation2 + $0x8] sm:$0x3]  ;;  %6038 = vmatpush.bf16.msra.mxu2 %v10183_v38  ;;  %v11339_v22 = vld [vmem:[#allocation6 + $0x884] sm:$0xf0] }
 0x53f   :  { %5709 = vst [vmem:[#allocation2] sm:$0xe] %v5708_v50  ;;  %v4440_v10 = vadd.f32 %v12895_v24, %v4253_v15  ;;  %v11343_v24 = vld [vmem:[#allocation6 + $0x8a4] sm:$0xf0]  ;;  %v10131_v12 = vor.u32 %v11342_v21, %v10128_v51  ;;  %v10369_v50 = vor.u32 %v11385_v27, %v10368_v56  ;;  %v5714_v17 = vld [vmem:[#allocation2 + $0xc] sm:$0xe]  ;;  %v10111_v43 = vor.u32 %v11339_v22, %v10110_v61 }
 0x540   :  { %v5674_v46 = vshrl.u32 %v5661_v8, 16  ;;  %v5677_v37 = vshll.u32 %v5661_v8, 16  ;;  %v5650_v26 = vadd.f32 %v12953_v1, %v5641_v30  ;;  %v10127_v41 = vor.u32 %v11343_v24, %v10126_v31  ;;  %v11340_v30 = vld [vmem:[#allocation6 + $0x894] sm:$0xf]  ;;  %v11338_v5 = vld [vmem:[#allocation6 + $0x884] sm:$0xf] }
 0x541   :  { %v5524_v33 = vpop.f32.mrf.mxu2  ;;  %6057 = vmatpush.bf16.msra.mxu3 %v10187_v54  ;;  %v10119_v8 = vor.u32 %v11341_v45, %v10118_v11  ;;  %5925 = vmatpush.bf16.msra.mxu1 %v10131_v12  ;;  %v11381_v44 = vld [vmem:[#allocation6 + $0x9d4] sm:$0xf0]  ;;  %v11380_v28 = vld [vmem:[#allocation6 + $0x9d4] sm:$0xf]  ;;  %v10354_v54 = vld [vmem:[#allocation6 + $0x9d8] sm:$0xf0] }
 0x542   :  { %v5676_v3 = vrot.slane %v5674_v46, 6  ;;  %v5679_v34 = vrot.slane %v5677_v37, 7  ;;  %v5654_v48 = vadd.f32 %v5650_v26, %v12799_v63  ;;  %v4455_v63 = vadd.f32 %v12772_v29, %v4440_v10  ;;  %5906 = vmatpush.bf16.msra.mxu0 %v10127_v41  ;;  %6395 = vmatpush.bf16.msrb.mxu2 %v10369_v50  ;;  %v11382_v26 = vld [vmem:[#allocation6 + $0x9e4] sm:$0xf]  ;;  %v10304_v24 = vld [vmem:[#allocation6 + $0x970] sm:$0xf] }
 0x543   :  { %v5449_v62 = vpop.f32.mrf.mxu1  ;;  %v5636_v14 = vpop.f32.mrf.mxu3  ;;  %v10373_v29 = vor.u32 %v11384_v55, %v10370_v16  ;;  %v10123_v46 = vor.u32 %v11340_v30, %v10120_v47  ;;  %v10361_v37 = vor.u32 %v11383_v25, %v10360_v2  ;;  %v10357_v41 = vor.u32 %v11380_v28, %v10354_v54  ;;  %v11369_v56 = vld [vmem:[#allocation6 + $0x974] sm:$0xf0]  ;;  %v10306_v50 = vld [vmem:[#allocation6 + $0x978] sm:$0xf0]  ;;  %v11378_v2 = vld [vmem:[#allocation6 + $0x9c4] sm:$0xf] }
 0x544   :  { %v5680_v42 = vor.u32 %v5679_v34, %v5676_v3  ;;  %v5658_v35 = vmax.f32 %v5654_v48, 0.0  ;;  %v5525_v6 = vadd.f32 %v5524_v33, %v5449_v62  ;;  %v10365_v33 = vor.u32 %v11382_v26, %v10362_v53  ;;  %v10352_v3 = vld [vmem:[#allocation6 + $0x9d0] sm:$0xf]  ;;  %v10346_v25 = vld [vmem:[#allocation6 + $0x9c8] sm:$0xf0] }
 0x545   :  { %6414 = vmatpush.bf16.msrb.mxu3 %v10373_v29  ;;  %5926 = vmatpush.bf16.msra.mxu1 %v10123_v46  ;;  %v10353_v38 = vor.u32 %v11381_v44, %v10352_v3  ;;  %v10349_v53 = vor.u32 %v11378_v2, %v10346_v25  ;;  %v11377_v44 = vld [vmem:[#allocation6 + $0x9b4] sm:$0xf0]  ;;  %v11376_v54 = vld [vmem:[#allocation6 + $0x9b4] sm:$0xf]  ;;  %v10322_v25 = vld [vmem:[#allocation6 + $0x998] sm:$0xf0] }
 0x546   :  { %v5681_v15 = vsel %vm11922_vm7, %v5672_v7, %v5680_v42  ;;  %v5682_v39 = vrot.slane %v5680_v42, 4  ;;  %v5662_v18 = vpack.c.bf16 %v5658_v35, %v5658_v35  ;;  %v5642_v4 = vadd.f32 %v5636_v14, %v5525_v6  ;;  %5907 = vmatpush.bf16.msra.mxu0 %v10119_v8  ;;  %6396 = vmatpush.bf16.msrb.mxu2 %v10361_v37  ;;  %v5742_v31 = vld [vmem:[#allocation2] sm:$0xf]  ;;  %v11372_v2 = vld [vmem:[#allocation6 + $0x994] sm:$0xf] }
 0x547   :  { %5710 = vst [vmem:[#allocation2 + $0x4] sm:$0xf] %v5681_v15  ;;  %v10305_v15 = vor.u32 %v11369_v56, %v10304_v24  ;;  %v11364_v56 = vld [vmem:[#allocation6 + $0x954] sm:$0xf] }
 0x548   :  { %v5712_v57 = vsel %vm11908_vm4, %v5682_v39, %v5711_v58  ;;  %v5684_v36 = vshrl.u32 %v5662_v18, 16  ;;  %v5687_v60 = vshll.u32 %v5662_v18, 16  ;;  %v5651_v7 = vadd.f32 %v12953_v1, %v5642_v4  ;;  %v10112_v1 = vld [vmem:[#allocation6 + $0x888] sm:$0xf0]  ;;  %v11368_v39 = vld [vmem:[#allocation6 + $0x974] sm:$0xf] }
 0x549   :  { %5713 = vst [vmem:[#allocation2 + $0x8] sm:$0x3] %v5712_v57  ;;  %v10115_v62 = vor.u32 %v11338_v5, %v10112_v1  ;;  %6415 = vmatpush.bf16.msrb.mxu3 %v10365_v33  ;;  %v5752_v58 = vshll.u32 %v5742_v31, 16  ;;  %v10309_v47 = vor.u32 %v11368_v39, %v10306_v50  ;;  %v10344_v57 = vld [vmem:[#allocation6 + $0x9c0] sm:$0xf] }
 0x54a   :  { %v5686_v49 = vrot.slane %v5684_v36, 6  ;;  %v5689_v32 = vrot.slane %v5687_v60, 7  ;;  %v5655_v10 = vadd.f32 %v5651_v7, %v4455_v63  ;;  %v5749_v63 = vshrl.u32 %v5742_v31, 16  ;;  %5908 = vmatpush.bf16.msra.mxu0 %v10111_v43  ;;  %6397 = vmatpush.bf16.msrb.mxu2 %v10353_v38  ;;  %v11379_v7 = vld [vmem:[#allocation6 + $0x9c4] sm:$0xf0] }
 0x54b   :  { %5927 = vmatpush.bf16.msra.mxu1 %v10115_v62  ;;  %v5754_v4 = vrot.slane %v5752_v58, 5  ;;  %v10345_v26 = vor.u32 %v11379_v7, %v10344_v57  ;;  %v10298_v5 = vld [vmem:[#allocation6 + $0x968] sm:$0xf0]  ;;  %v10338_v31 = vld [vmem:[#allocation6 + $0x9b8] sm:$0xf0] }
 0x54c   :  { %v12985_v34 = vor.u32 %v5689_v32, %v5686_v49  ;;  %v5659_v48 = vmax.f32 %v5655_v10, 0.0  ;;  %v5751_v18 = vrot.slane %v5749_v63, 4  ;;  %v10296_v49 = vld [vmem:[#allocation6 + $0x960] sm:$0xf]  ;;  %v11367_v32 = vld [vmem:[#allocation6 + $0x964] sm:$0xf0] }
 0x54d   :  { %6416 = vmatpush.bf16.msrb.mxu3 %v10357_v41  ;;  %v5718_v10 = vld [vmem:[#allocation2 + $0x14] sm:$0x3]  ;;  %v10297_v22 = vor.u32 %v11367_v32, %v10296_v49  ;;  %v11365_v41 = vld [vmem:[#allocation6 + $0x954] sm:$0xf0]  ;;  %v10290_v58 = vld [vmem:[#allocation6 + $0x958] sm:$0xf0] }
 0x54e   :  { %v5691_v21 = vrot.slane %v12985_v34, 4  ;;  %v5715_v42 = vsel %vm11912_vm5, %v12985_v34, %v5714_v17  ;;  %v5663_v35 = vpack.c.bf16 %v5659_v48, %v5659_v48  ;;  %v11320_v6 = vld [vmem:[#allocation2] sm:$0xff]  ;;  %v5755_v36 = vor.u32 %v5754_v4, %v5751_v18  ;;  %6196 = vmatpush.bf16.msrb.mxu0 %v10305_v15  ;;  %v11366_v17 = vld [vmem:[#allocation6 + $0x964] sm:$0xf]  ;;  %6398 = vmatpush.bf16.msrb.mxu2 %v10345_v26  ;;  %v10336_v48 = vld [vmem:[#allocation6 + $0x9b0] sm:$0xf] }
 0x54f   :  { %v12991_v51 = vld [vmem:[#allocation2 + $0x4] sm:$0xf]  ;;  %5716 = vst [vmem:[#allocation2 + $0xc] sm:$0xe] %v5715_v42  ;;  %6039 = vmatmul.bf16.vlgmr.msra.gmra.mxu2 %v11320_v6  ;;  %6058 = vmatmul.bf16.vlgmr.msra.gmra.mxu3 %v11320_v6  ;;  %v10301_v34 = vor.u32 %v11366_v17, %v10298_v5  ;;  %v10337_v38 = vor.u32 %v11377_v44, %v10336_v48  ;;  %v10288_v6 = vld [vmem:[#allocation6 + $0x950] sm:$0xf] }
 0x550   :  { %v12994_v14 = vshll.u32 %v12991_v51, 16  ;;  %v12997_v12 = vshrl.u32 %v12991_v51, 16  ;;  %v5693_v27 = vshrl.u32 %v5663_v35, 16  ;;  %v5696_v55 = vshll.u32 %v5663_v35, 16  ;;  %v12999_v16 = vld [vmem:[#allocation2 + $0x8] sm:$0x1]  ;;  %6215 = vmatpush.bf16.msrb.mxu1 %v10309_v47 }
 0x551   :  { %v5768_v30 = vshll.u32 %v12999_v16, 16  ;;  %v5756_v33 = vrot.slane %v5755_v36, 4  ;;  %6417 = vmatpush.bf16.msrb.mxu3 %v10349_v53  ;;  %v10341_v35 = vor.u32 %v11376_v54, %v10338_v31  ;;  %v10289_v63 = vor.u32 %v11365_v41, %v10288_v6  ;;  %v11375_v39 = vld [vmem:[#allocation6 + $0x9a4] sm:$0xf0]  ;;  %v11374_v18 = vld [vmem:[#allocation6 + $0x9a4] sm:$0xf] }
 0x552   :  { %v5760_v11 = vrot.slane %v12994_v14, 5  ;;  %v5764_v45 = vrot.slane %v12997_v12, 4  ;;  %v5695_v29 = vrot.slane %v5693_v27, 6  ;;  %v5698_v8 = vrot.slane %v5696_v55, 7  ;;  %6197 = vmatpush.bf16.msrb.mxu0 %v10297_v22  ;;  %v10328_v27 = vld [vmem:[#allocation6 + $0x9a0] sm:$0xf]  ;;  %6399 = vmatpush.bf16.msrb.mxu2 %v10337_v38 }
 0x553   :  { %v5770_v37 = vrot.slane %v5768_v30, 5  ;;  %v6253_v28 = vrot.slane %v12997_v12, 5  ;;  %v10293_v15 = vor.u32 %v11364_v56, %v10290_v58  ;;  %v10330_v4 = vld [vmem:[#allocation6 + $0x9a8] sm:$0xf0]  ;;  %v10280_v50 = vld [vmem:[#allocation6 + $0x940] sm:$0xf]  ;;  %v10325_v26 = vor.u32 %v11372_v2, %v10322_v25 }
 0x554   :  { %v5765_v60 = vor.u32 %v5764_v45, %v5760_v11  ;;  %v5699_v46 = vor.u32 %v5698_v8, %v5695_v29  ;;  %v5761_v43 = vsel %vm11957_vm10, %v5756_v33, %v5760_v11  ;;  %6216 = vmatpush.bf16.msrb.mxu1 %v10301_v34  ;;  %v10329_v11 = vor.u32 %v11375_v39, %v10328_v27  ;;  %v11363_v29 = vld [vmem:[#allocation6 + $0x944] sm:$0xf0]  ;;  %v11362_v8 = vld [vmem:[#allocation6 + $0x944] sm:$0xf]  ;;  %v10282_v47 = vld [vmem:[#allocation6 + $0x948] sm:$0xf0] }
 0x555   :  { %6418 = vmatpush.bf16.msrb.mxu3 %v10341_v35  ;;  %v10333_v45 = vor.u32 %v11374_v18, %v10330_v4  ;;  %v10281_v30 = vor.u32 %v11363_v29, %v10280_v50  ;;  %v10320_v57 = vld [vmem:[#allocation6 + $0x990] sm:$0xf]  ;;  %v11373_v36 = vld [vmem:[#allocation6 + $0x994] sm:$0xf0]  ;;  %v11360_v48 = vld [vmem:[#allocation6 + $0x934] sm:$0xf] }
 0x556   :  { %v5766_v61 = vrot.slane %v5765_v60, 4  ;;  %v5700_v1 = vsel %vm11922_vm7, %v5691_v21, %v5699_v46  ;;  %v5701_v3 = vrot.slane %v5699_v46, 4  ;;  %v5813_v21 = vunpack.c.l.b16 %v5761_v43  ;;  %6198 = vmatpush.bf16.msrb.mxu0 %v10289_v63  ;;  %v5745_v46 = vld [vmem:[#allocation2 + $0xc] sm:$0xf]  ;;  %6400 = vmatpush.bf16.msrb.mxu2 %v10329_v11  ;;  %v10272_v22 = vld [vmem:[#allocation6 + $0x930] sm:$0xf] }
 0x557   :  { %5717 = vst [vmem:[#allocation2 + $0x10] sm:$0xf] %v5700_v1  ;;  %v10285_v60 = vor.u32 %v11362_v8, %v10282_v47  ;;  %v10321_v7 = vor.u32 %v11373_v36, %v10320_v57  ;;  %v5773_v49 = vshrl.u32 %v5745_v46, 16  ;;  %v5776_v32 = vshll.u32 %v5745_v46, 16  ;;  %v11361_v17 = vld [vmem:[#allocation6 + $0x934] sm:$0xf0] }
 0x558   :  { %v5771_v62 = vsel %vm11957_vm10, %v5766_v61, %v5770_v37  ;;  %v5719_v24 = vsel %vm11908_vm4, %v5701_v3, %v5718_v10  ;;  %6217 = vmatpush.bf16.msrb.mxu1 %v10293_v15  ;;  %v6254_v10 = vrot.slane %v12994_v14, 6  ;;  %v10273_v34 = vor.u32 %v11361_v17, %v10272_v22  ;;  %v10274_v54 = vld [vmem:[#allocation6 + $0x938] sm:$0xf0]  ;;  %v11371_v35 = vld [vmem:[#allocation6 + $0x984] sm:$0xf0] }
 0x559   :  { %v5814_v42 = vunpack.c.l.b16 %v5771_v62  ;;  %5720 = vst [vmem:[#allocation2 + $0x14] sm:$0x3] %v5719_v24  ;;  %6419 = vmatpush.bf16.msrb.mxu3 %v10333_v45  ;;  %v5775_v1 = vrot.slane %v5773_v49, 4  ;;  %v5778_v3 = vrot.slane %v5776_v32, 5  ;;  %v6079_v31 = vrot.slane %v12991_v51, 5 }
 0x55a   :  { %6199 = vmatpush.bf16.msrb.mxu0 %v10281_v30  ;;  %v13026_v44 = vor.u32 %v6254_v10, %v6253_v28  ;;  %6401 = vmatpush.bf16.msrb.mxu2 %v10321_v7  ;;  %v11370_v6 = vld [vmem:[#allocation6 + $0x984] sm:$0xf]  ;;  %v10314_v63 = vld [vmem:[#allocation6 + $0x988] sm:$0xf0]  ;;  %v10264_v58 = vld [vmem:[#allocation6 + $0x920] sm:$0xf] }
 0x55b   :  { %v5817_v55 = vpack.c.b16 %v5814_v42, %v5813_v21  ;;  %v5779_v24 = vor.u32 %v5778_v3, %v5775_v1  ;;  %v10277_v21 = vor.u32 %v11360_v48, %v10274_v54  ;;  %v10312_v42 = vld [vmem:[#allocation6 + $0x980] sm:$0xf]  ;;  %v10317_v15 = vor.u32 %v11370_v6, %v10314_v63  ;;  %v11359_v39 = vld [vmem:[#allocation6 + $0x924] sm:$0xf0]  ;;  %v11358_v18 = vld [vmem:[#allocation6 + $0x924] sm:$0xf] }
 0x55c   :  { %6218 = vmatpush.bf16.msrb.mxu1 %v10285_v60  ;;  %v10313_v56 = vor.u32 %v11371_v35, %v10312_v42  ;;  %v6257_v27 = vrot.slane %v13026_v44, 4  ;;  %v6081_v4 = vrot.slane %v6079_v31, 4  ;;  %v10265_v45 = vor.u32 %v11359_v39, %v10264_v58  ;;  %v10266_v50 = vld [vmem:[#allocation6 + $0x928] sm:$0xf0]  ;;  %v13035_v29 = vld [vmem:[#allocation2] sm:$0xe] }
 0x55d   :  { %5909 = vmatmul.bf16.vlgmr.msra.gmra.mxu0 %v5817_v55  ;;  %5928 = vmatmul.bf16.vlgmr.msra.gmra.mxu1 %v5817_v55  ;;  %v5780_v55 = vrot.slane %v5779_v24, 4  ;;  %v6082_v8 = vrot.slane %v12999_v16, 5  ;;  %v10269_v47 = vor.u32 %v11358_v18, %v10266_v50  ;;  %v13040_v57 = vld [vmem:[#allocation2 + $0x8] sm:$0x3]  ;;  %v6245_v36 = vshrl.u32 %v13035_v29, 16 }
 0x55e   :  { %v11321_v37 = vld [vmem:[#allocation2 + $0xc] sm:$0xff]  ;;  %6420 = vmatpush.bf16.msrb.mxu3 %v10325_v26  ;;  %6200 = vmatpush.bf16.msrb.mxu0 %v10273_v34  ;;  %v6248_v60 = vshll.u32 %v13035_v29, 16  ;;  %v10498_v7 = vld [vmem:[#allocation6 + $0xaf0] sm:$0xf]  ;;  %v6259_v16 = vshrl.u32 %v13040_v57, 16  ;;  %v6262_v46 = vshll.u32 %v13040_v57, 16 }
 0x55f   :  { %v13013_v53 = vld [vmem:[#allocation2 + $0x10] sm:$0xf]  ;;  %6044 = vmatmul.bf16.gmra.mxu2 %v11321_v37  ;;  %6063 = vmatmul.bf16.gmra.mxu3 %v11321_v37  ;;  %v11417_v37 = vld [vmem:[#allocation6 + $0xaf4] sm:$0xf0]  ;;  %v11416_v26 = vld [vmem:[#allocation6 + $0xaf4] sm:$0xf] }
 0x560   :  { %v13017_v33 = vshll.u32 %v13013_v53, 16  ;;  %v13020_v61 = vshrl.u32 %v13013_v53, 16  ;;  %v13022_v5 = vld [vmem:[#allocation2 + $0x14] sm:$0x1]  ;;  %6219 = vmatpush.bf16.msrb.mxu1 %v10277_v21  ;;  %6402 = vmatpush.bf16.msrb.mxu2 %v10313_v56  ;;  %v6247_v32 = vrot.slane %v6245_v36, 5  ;;  %v6250_v10 = vrot.slane %v6248_v60, 6 }
 0x561   :  { %v5792_v38 = vshll.u32 %v13022_v5, 16  ;;  %v10499_v22 = vor.u32 %v11417_v37, %v10498_v7  ;;  %v10500_v17 = vld [vmem:[#allocation6 + $0xaf8] sm:$0xf0]  ;;  %v10256_v1 = vld [vmem:[#allocation6 + $0x910] sm:$0xf]  ;;  %v6261_v3 = vrot.slane %v6259_v16, 5  ;;  %v13052_v36 = vsel %vm12044_vm1, %v6081_v4, %v6082_v8 }
 0x562   :  { %v5784_v43 = vrot.slane %v13017_v33, 5  ;;  %v5788_v62 = vrot.slane %v13020_v61, 4  ;;  %6421 = vmatpush.bf16.msrb.mxu3 %v10317_v15  ;;  %6201 = vmatpush.bf16.msrb.mxu0 %v10265_v45  ;;  %v6264_v34 = vrot.slane %v6262_v46, 6  ;;  %v10503_v48 = vor.u32 %v11416_v26, %v10500_v17  ;;  %v10258_v21 = vld [vmem:[#allocation6 + $0x918] sm:$0xf0] }
 0x563   :  { %v5794_v28 = vrot.slane %v5792_v38, 5  ;;  %v6251_v54 = vor.u32 %v6250_v10, %v6247_v32  ;;  %v10490_v42 = vld [vmem:[#allocation6 + $0xae0] sm:$0xf]  ;;  %v11415_v35 = vld [vmem:[#allocation6 + $0xae4] sm:$0xf0] }
 0x564   :  { %v5789_v41 = vor.u32 %v5788_v62, %v5784_v43  ;;  %v5785_v30 = vsel %vm11957_vm10, %v5780_v55, %v5784_v43  ;;  %6220 = vmatpush.bf16.msrb.mxu1 %v10269_v47  ;;  %v11357_v43 = vld [vmem:[#allocation6 + $0x914] sm:$0xf0]  ;;  %v11356_v62 = vld [vmem:[#allocation6 + $0x914] sm:$0xf]  ;;  %6765 = vmatpush.bf16.msra.mxu2 %v10499_v22  ;;  %v6265_v6 = vor.u32 %v6264_v34, %v6261_v3  ;;  %v11414_v56 = vld [vmem:[#allocation6 + $0xae4] sm:$0xf] }
 0x565   :  { %v5815_v25 = vunpack.c.l.b16 %v5785_v30  ;;  %v10257_v24 = vor.u32 %v11357_v43, %v10256_v1  ;;  %v10492_v63 = vld [vmem:[#allocation6 + $0xae8] sm:$0xf0]  ;;  %v10248_v58 = vld [vmem:[#allocation6 + $0x900] sm:$0xf]  ;;  %v6252_v55 = vrot.slane %v6251_v54, 4 }
 0x566   :  { %v5790_v11 = vrot.slane %v5789_v41, 4  ;;  %6784 = vmatpush.bf16.msra.mxu3 %v10503_v48  ;;  %v10261_v41 = vor.u32 %v11356_v62, %v10258_v21  ;;  %v10495_v15 = vor.u32 %v11414_v56, %v10492_v63  ;;  %v11355_v39 = vld [vmem:[#allocation6 + $0x904] sm:$0xf0]  ;;  %v11354_v18 = vld [vmem:[#allocation6 + $0x904] sm:$0xf]  ;;  %v10244_v62 = vrot.slane %v13035_v29, 9 }
 0x567   :  { %6202 = vmatpush.bf16.msrb.mxu0 %v10257_v24  ;;  %v10249_v45 = vor.u32 %v11355_v39, %v10248_v58  ;;  %v10250_v50 = vld [vmem:[#allocation6 + $0x908] sm:$0xf0]  ;;  %v10482_v30 = vld [vmem:[#allocation6 + $0xad0] sm:$0xf]  ;;  %v11413_v47 = vld [vmem:[#allocation6 + $0xad4] sm:$0xf0]  ;;  %v6256_v60 = vsel %vm12022_vm15, %v6252_v55, %v13026_v44  ;;  %v6109_v44 = vunpack.c.l.b16 %v13052_v36 }
 0x568   :  { %v5795_v2 = vsel %vm11957_vm10, %v5790_v11, %v5794_v28  ;;  %v10491_v28 = vor.u32 %v11415_v35, %v10490_v42  ;;  %v6266_v11 = vsel %vm12022_vm15, %v6257_v27, %v6265_v6  ;;  %6221 = vmatpush.bf16.msrb.mxu1 %v10261_v41  ;;  %v11412_v16 = vld [vmem:[#allocation6 + $0xad4] sm:$0xf]  ;;  %v10484_v27 = vld [vmem:[#allocation6 + $0xad8] sm:$0xf0]  ;;  %v10434_v46 = vld [vmem:[#allocation6 + $0xa70] sm:$0xf]  ;;  %v6307_v37 = vunpack.c.l.b16 %v6256_v60 }
 0x569   :  { %v5816_v49 = vunpack.c.l.b16 %v5795_v2  ;;  %v6308_v7 = vunpack.c.l.b16 %v6266_v11  ;;  %v10253_v2 = vor.u32 %v11354_v18, %v10250_v50  ;;  %v11401_v26 = vld [vmem:[#allocation6 + $0xa74] sm:$0xf0]  ;;  %v10436_v32 = vld [vmem:[#allocation6 + $0xa78] sm:$0xf0]  ;;  %v10487_v10 = vor.u32 %v11412_v16, %v10484_v27  ;;  %v10474_v8 = vld [vmem:[#allocation6 + $0xac0] sm:$0xf] }
 0x56a   :  { %6766 = vmatpush.bf16.msra.mxu2 %v10491_v28  ;;  %6785 = vmatpush.bf16.msra.mxu3 %v10495_v15  ;;  %v10435_v22 = vor.u32 %v11401_v26, %v10434_v46  ;;  %v11411_v17 = vld [vmem:[#allocation6 + $0xac4] sm:$0xf0]  ;;  %v11410_v1 = vld [vmem:[#allocation6 + $0xac4] sm:$0xf]  ;;  %v10476_v34 = vld [vmem:[#allocation6 + $0xac8] sm:$0xf0]  ;;  %v6080_v56 = vsel %vm12044_vm1, %v10244_v62, %v6079_v31 }
 0x56b   :  { %v5818_v38 = vpack.c.b16 %v5816_v49, %v5815_v25  ;;  %v10483_v25 = vor.u32 %v11413_v47, %v10482_v30  ;;  %v11400_v49 = vld [vmem:[#allocation6 + $0xa74] sm:$0xf]  ;;  %v6311_v3 = vpack.c.b16 %v6308_v7, %v6307_v37  ;;  %6203 = vmatpush.bf16.msrb.mxu0 %v10249_v45  ;;  %v10426_v48 = vld [vmem:[#allocation6 + $0xa60] sm:$0xf]  ;;  %v11399_v43 = vld [vmem:[#allocation6 + $0xa64] sm:$0xf0]  ;;  %v10479_v63 = vor.u32 %v11410_v1, %v10476_v34 }
 0x56c   :  { %v10439_v4 = vor.u32 %v11400_v49, %v10436_v32  ;;  %6222 = vmatpush.bf16.msrb.mxu1 %v10253_v2  ;;  %v10427_v54 = vor.u32 %v11399_v43, %v10426_v48  ;;  %v13059_v24 = vld [vmem:[#allocation2 + $0xc] sm:$0xe]  ;;  %v13061_v21 = vld [vmem:[#allocation2 + $0x14] sm:$0x3]  ;;  %v6276_v42 = vrot.slane %v13020_v61, 5  ;;  %v6277_v41 = vrot.slane %v13017_v33, 6 }
 0x56d   :  { %5914 = vmatmul.bf16.gmra.mxu0 %v5818_v38  ;;  %5933 = vmatmul.bf16.gmra.mxu1 %v5818_v38  ;;  %v10475_v38 = vor.u32 %v11411_v17, %v10474_v8  ;;  %v6268_v35 = vshrl.u32 %v13059_v24, 16  ;;  %v6271_v6 = vshll.u32 %v13059_v24, 16  ;;  %v6282_v28 = vshrl.u32 %v13061_v21, 16  ;;  %v11398_v29 = vld [vmem:[#allocation6 + $0xa64] sm:$0xf] }
 0x56e   :  { %6767 = vmatpush.bf16.msra.mxu2 %v10483_v25  ;;  %6786 = vmatpush.bf16.msra.mxu3 %v10487_v10  ;;  %v6285_v58 = vshll.u32 %v13061_v21, 16  ;;  %v10428_v55 = vld [vmem:[#allocation6 + $0xa68] sm:$0xf0]  ;;  %v10466_v15 = vld [vmem:[#allocation6 + $0xab0] sm:$0xf]  ;;  %v10245_v39 = vrot.slane %v13059_v24, 9  ;;  %v6278_v45 = vor.u32 %v6277_v41, %v6276_v42  ;;  %v6108_v26 = vunpack.c.l.b16 %v6080_v56 }
 0x56f   :  { %6566 = vmatpush.bf16.msra.mxu0 %v10435_v22  ;;  %6403 = vmatmul.bf16.vlgmr.msrb.gmra.mxu2 %v6311_v3  ;;  %v6270_v18 = vrot.slane %v6268_v35, 5  ;;  %v6273_v11 = vrot.slane %v6271_v6, 6  ;;  %v6284_v50 = vrot.slane %v6282_v28, 5  ;;  %v11409_v30 = vld [vmem:[#allocation6 + $0xab4] sm:$0xf0]  ;;  %v10431_v36 = vor.u32 %v11398_v29, %v10428_v55 }
 0x570   :  { %6422 = vmatmul.bf16.vlgmr.msrb.gmra.mxu3 %v6311_v3  ;;  %6585 = vmatpush.bf16.msra.mxu1 %v10439_v4  ;;  %v6287_v47 = vrot.slane %v6285_v58, 6  ;;  %v10467_v60 = vor.u32 %v11409_v30, %v10466_v15  ;;  %v11408_v7 = vld [vmem:[#allocation6 + $0xab4] sm:$0xf]  ;;  %v10468_v31 = vld [vmem:[#allocation6 + $0xab8] sm:$0xf0]  ;;  %v6086_v2 = vrot.slane %v13013_v53, 5  ;;  %v6112_v43 = vpack.c.b16 %v6109_v44, %v6108_v26 }
 0x571   :  { %v6274_v25 = vor.u32 %v6273_v11, %v6270_v18  ;;  %v6280_v16 = vrot.slane %v6278_v45, 4  ;;  %v10418_v27 = vld [vmem:[#allocation6 + $0xa50] sm:$0xf]  ;;  %v11397_v46 = vld [vmem:[#allocation6 + $0xa54] sm:$0xf0]  ;;  %v6089_v37 = vrot.slane %v13022_v5, 5  ;;  %v10471_v17 = vor.u32 %v11408_v7, %v10468_v31 }
 0x572   :  { %6768 = vmatpush.bf16.msra.mxu2 %v10475_v38  ;;  %6787 = vmatpush.bf16.msra.mxu3 %v10479_v63  ;;  %v6288_v49 = vor.u32 %v6287_v47, %v6284_v50  ;;  %v10419_v32 = vor.u32 %v11397_v46, %v10418_v27  ;;  %v11396_v10 = vld [vmem:[#allocation6 + $0xa54] sm:$0xf]  ;;  %v10420_v22 = vld [vmem:[#allocation6 + $0xa58] sm:$0xf0]  ;;  %v10458_v4 = vld [vmem:[#allocation6 + $0xaa0] sm:$0xf] }
 0x573   :  { %6567 = vmatpush.bf16.msra.mxu0 %v10427_v54  ;;  %v6275_v8 = vrot.slane %v6274_v25, 4  ;;  %v10423_v1 = vor.u32 %v11396_v10, %v10420_v22  ;;  %v11407_v3 = vld [vmem:[#allocation6 + $0xaa4] sm:$0xf0]  ;;  %v11406_v34 = vld [vmem:[#allocation6 + $0xaa4] sm:$0xf]  ;;  %v6088_v48 = vrot.slane %v6086_v2, 4 }
 0x574   :  { %6586 = vmatpush.bf16.msra.mxu1 %v10431_v36  ;;  %v6289_v5 = vsel %vm12022_vm15, %v6280_v16, %v6288_v49  ;;  %v10459_v62 = vor.u32 %v11407_v3, %v10458_v4  ;;  %v10460_v38 = vld [vmem:[#allocation6 + $0xaa8] sm:$0xf0]  ;;  %v10410_v54 = vld [vmem:[#allocation6 + $0xa40] sm:$0xf]  ;;  %v11395_v42 = vld [vmem:[#allocation6 + $0xa44] sm:$0xf0] }
 0x575   :  { %v6279_v35 = vsel %vm12022_vm15, %v6275_v8, %v6278_v45  ;;  %v10411_v6 = vor.u32 %v11395_v42, %v10410_v54  ;;  %v11394_v41 = vld [vmem:[#allocation6 + $0xa44] sm:$0xf]  ;;  %v10412_v28 = vld [vmem:[#allocation6 + $0xa48] sm:$0xf0]  ;;  %v10450_v29 = vld [vmem:[#allocation6 + $0xa90] sm:$0xf]  ;;  %v6310_v56 = vunpack.c.l.b16 %v6289_v5  ;;  %v10463_v55 = vor.u32 %v11406_v34, %v10460_v38 }
 0x576   :  { %6769 = vmatpush.bf16.msra.mxu2 %v10467_v60  ;;  %v11405_v44 = vld [vmem:[#allocation6 + $0xa94] sm:$0xf0]  ;;  %v11404_v63 = vld [vmem:[#allocation6 + $0xa94] sm:$0xf]  ;;  %v10452_v58 = vld [vmem:[#allocation6 + $0xa98] sm:$0xf0]  ;;  %6788 = vmatpush.bf16.msra.mxu3 %v10471_v17  ;;  %v10415_v15 = vor.u32 %v11394_v41, %v10412_v28  ;;  %v6309_v30 = vunpack.c.l.b16 %v6279_v35  ;;  %v6090_v26 = vsel %vm12044_vm1, %v6088_v48, %v6089_v37  ;;  %v6087_v38 = vsel %vm12044_vm1, %v10245_v39, %v6086_v2 }
 0x577   :  { %6568 = vmatpush.bf16.msra.mxu0 %v10419_v32  ;;  %v10402_v18 = vld [vmem:[#allocation6 + $0xa30] sm:$0xf]  ;;  %v11393_v11 = vld [vmem:[#allocation6 + $0xa34] sm:$0xf0]  ;;  %v11392_v50 = vld [vmem:[#allocation6 + $0xa34] sm:$0xf]  ;;  %v10451_v45 = vor.u32 %v11405_v44, %v10450_v29  ;;  %v10455_v46 = vor.u32 %v11404_v63, %v10452_v58  ;;  %v6111_v54 = vunpack.c.l.b16 %v6090_v26 }
 0x578   :  { %6587 = vmatpush.bf16.msra.mxu1 %v10423_v1  ;;  %v10403_v47 = vor.u32 %v11393_v11, %v10402_v18  ;;  %v10404_v36 = vld [vmem:[#allocation6 + $0xa38] sm:$0xf0]  ;;  %v10442_v60 = vld [vmem:[#allocation6 + $0xa80] sm:$0xf]  ;;  %v11403_v7 = vld [vmem:[#allocation6 + $0xa84] sm:$0xf0]  ;;  %v6312_v27 = vpack.c.b16 %v6310_v56, %v6309_v30 }
 0x579   :  { %v13082_v31 = vld [vmem:[#allocation6 + $0xa84] sm:$0xf]  ;;  %v13084_v25 = vld [vmem:[#allocation6 + $0xa88] sm:$0xf0]  ;;  %v10394_v16 = vld [vmem:[#allocation6 + $0xa20] sm:$0xf]  ;;  %v10407_v49 = vor.u32 %v11392_v50, %v10404_v36  ;;  %v10443_v4 = vor.u32 %v11403_v7, %v10442_v60  ;;  %v6110_v60 = vunpack.c.l.b16 %v6087_v38 }
 0x57a   :  { %6770 = vmatpush.bf16.msra.mxu2 %v10459_v62  ;;  %v11391_v32 = vld [vmem:[#allocation6 + $0xa24] sm:$0xf0]  ;;  %v11390_v10 = vld [vmem:[#allocation6 + $0xa24] sm:$0xf]  ;;  %v10396_v22 = vld [vmem:[#allocation6 + $0xa28] sm:$0xf0]  ;;  %6789 = vmatpush.bf16.msra.mxu3 %v10463_v55  ;;  %v10447_v42 = vor.u32 %v13082_v31, %v13084_v25 }
 0x57b   :  { %6569 = vmatpush.bf16.msra.mxu0 %v10411_v6  ;;  %v10395_v8 = vor.u32 %v11391_v32, %v10394_v16  ;;  %v13088_v17 = vld [vmem:[#allocation2] sm:$0xc]  ;;  %v13090_v1 = vld [vmem:[#allocation2 + $0x8] sm:$0x7]  ;;  %v6623_v3 = vrot.slane %v12997_v12, 6  ;;  %v6624_v34 = vrot.slane %v12994_v14, 7  ;;  %v10399_v55 = vor.u32 %v11390_v10, %v10396_v22 }
 0x57c   :  { %6588 = vmatpush.bf16.msra.mxu1 %v10415_v15  ;;  %v6615_v37 = vshrl.u32 %v13088_v17, 16  ;;  %v6618_v48 = vshll.u32 %v13088_v17, 16  ;;  %v6632_v5 = vshll.u32 %v13090_v1, 16  ;;  %v10630_v62 = vld [vmem:[#allocation6 + $0xbf0] sm:$0xf]  ;;  %v6449_v32 = vrot.slane %v12991_v51, 6 }
 0x57d   :  { %6204 = vmatmul.bf16.vlgmr.msrb.gmra.mxu0 %v6112_v43  ;;  %6223 = vmatmul.bf16.vlgmr.msrb.gmra.mxu1 %v6112_v43  ;;  %v6629_v43 = vshrl.u32 %v13090_v1, 16  ;;  %v6625_v35 = vor.u32 %v6624_v34, %v6623_v3  ;;  %v11449_v6 = vld [vmem:[#allocation6 + $0xbf4] sm:$0xf0]  ;;  %v11448_v41 = vld [vmem:[#allocation6 + $0xbf4] sm:$0xf]  ;;  %v6113_v10 = vpack.c.b16 %v6111_v54, %v6110_v60  ;;  %v6646_v60 = vrot.slane %v13020_v61, 6 }
 0x57e   :  { %6771 = vmatpush.bf16.msra.mxu2 %v10451_v45  ;;  %v10632_v28 = vld [vmem:[#allocation6 + $0xbf8] sm:$0xf0]  ;;  %v6617_v29 = vrot.slane %v6615_v37, 6  ;;  %v6620_v56 = vrot.slane %v6618_v48, 7  ;;  %v6634_v63 = vrot.slane %v6632_v5, 7  ;;  %6790 = vmatpush.bf16.msra.mxu3 %v10455_v46  ;;  %v10631_v15 = vor.u32 %v11449_v6, %v10630_v62 }
 0x57f   :  { %6570 = vmatpush.bf16.msra.mxu0 %v10403_v47  ;;  %6408 = vmatmul.bf16.gmra.mxu2 %v6312_v27  ;;  %v6631_v44 = vrot.slane %v6629_v43, 6  ;;  %v10386_v58 = vld [vmem:[#allocation6 + $0xa10] sm:$0xf]  ;;  %v6627_v24 = vrot.slane %v6625_v35, 4  ;;  %v10635_v18 = vor.u32 %v11448_v41, %v10632_v28  ;;  %v11389_v39 = vld [vmem:[#allocation6 + $0xa14] sm:$0xf0] }
 0x580   :  { %6427 = vmatmul.bf16.gmra.mxu3 %v6312_v27  ;;  %6589 = vmatpush.bf16.msra.mxu1 %v10407_v49  ;;  %v11388_v2 = vld [vmem:[#allocation6 + $0xa14] sm:$0xf]  ;;  %v6621_v11 = vor.u32 %v6620_v56, %v6617_v29  ;;  %v10387_v30 = vor.u32 %v11389_v39, %v10386_v58  ;;  %v10388_v45 = vld [vmem:[#allocation6 + $0xa18] sm:$0xf0]  ;;  %v10622_v47 = vld [vmem:[#allocation6 + $0xbe0] sm:$0xf] }
 0x581   :  { %v6635_v50 = vor.u32 %v6634_v63, %v6631_v44  ;;  %v11447_v36 = vld [vmem:[#allocation6 + $0xbe4] sm:$0xf0]  ;;  %v11446_v31 = vld [vmem:[#allocation6 + $0xbe4] sm:$0xf]  ;;  %v10624_v25 = vld [vmem:[#allocation6 + $0xbe8] sm:$0xf0]  ;;  %v10391_v22 = vor.u32 %v11388_v2, %v10388_v45 }
 0x582   :  { %6772 = vmatpush.bf16.msra.mxu2 %v10443_v4  ;;  %v10623_v7 = vor.u32 %v11447_v36, %v10622_v47  ;;  %v10378_v16 = vld [vmem:[#allocation6 + $0xa00] sm:$0xf]  ;;  %v6622_v27 = vrot.slane %v6621_v11, 4  ;;  %v11387_v26 = vld [vmem:[#allocation6 + $0xa04] sm:$0xf0]  ;;  %v10374_v49 = vrot.slane %v13088_v17, 10  ;;  %6791 = vmatpush.bf16.msra.mxu3 %v10447_v42  ;;  %v10627_v48 = vor.u32 %v11446_v31, %v10624_v25 }
 0x583   :  { %6571 = vmatpush.bf16.msra.mxu0 %v10395_v8  ;;  %v6636_v46 = vsel %vm11922_vm7, %v6627_v24, %v6635_v50  ;;  %v11386_v4 = vld [vmem:[#allocation6 + $0xa04] sm:$0xf]  ;;  %v10614_v8 = vld [vmem:[#allocation6 + $0xbd0] sm:$0xf]  ;;  %v11445_v3 = vld [vmem:[#allocation6 + $0xbd4] sm:$0xf0]  ;;  %v10379_v43 = vor.u32 %v11387_v26, %v10378_v16 }
 0x584   :  { %6590 = vmatpush.bf16.msra.mxu1 %v10399_v55  ;;  %v6626_v34 = vsel %vm11922_vm7, %v6622_v27, %v6625_v35  ;;  %v6678_v37 = vunpack.c.l.b16 %v6636_v46  ;;  %v10380_v5 = vld [vmem:[#allocation6 + $0xa08] sm:$0xf0]  ;;  %v11444_v62 = vld [vmem:[#allocation6 + $0xbd4] sm:$0xf]  ;;  %v10616_v38 = vld [vmem:[#allocation6 + $0xbd8] sm:$0xf0]  ;;  %v10615_v6 = vor.u32 %v11445_v3, %v10614_v8 }
 0x585   :  { %v6451_v54 = vrot.slane %v6449_v32, 4  ;;  %v6452_v42 = vrot.slane %v13040_v57, 6  ;;  %v10564_v41 = vld [vmem:[#allocation6 + $0xb70] sm:$0xf]  ;;  %v11433_v28 = vld [vmem:[#allocation6 + $0xb74] sm:$0xf0]  ;;  %v6677_v35 = vunpack.c.l.b16 %v6626_v34  ;;  %v10383_v58 = vor.u32 %v11386_v4, %v10380_v5 }
 0x586   :  { %7123 = vmatpush.bf16.msrb.mxu2 %v10631_v15  ;;  %7142 = vmatpush.bf16.msrb.mxu3 %v10635_v18  ;;  %v10565_v29 = vor.u32 %v11433_v28, %v10564_v41  ;;  %v11432_v56 = vld [vmem:[#allocation6 + $0xb74] sm:$0xf]  ;;  %v10566_v44 = vld [vmem:[#allocation6 + $0xb78] sm:$0xf0]  ;;  %v10606_v63 = vld [vmem:[#allocation6 + $0xbc0] sm:$0xf]  ;;  %v10619_v39 = vor.u32 %v11444_v62, %v10616_v38  ;;  %v6450_v62 = vsel %vm12123_vm3, %v10374_v49, %v6449_v32 }
 0x587   :  { %6572 = vmatpush.bf16.msra.mxu0 %v10387_v30  ;;  %v11443_v55 = vld [vmem:[#allocation6 + $0xbc4] sm:$0xf0]  ;;  %v11442_v24 = vld [vmem:[#allocation6 + $0xbc4] sm:$0xf]  ;;  %v10608_v15 = vld [vmem:[#allocation6 + $0xbc8] sm:$0xf0]  ;;  %v6681_v18 = vpack.c.b16 %v6678_v37, %v6677_v35  ;;  %v10569_v2 = vor.u32 %v11432_v56, %v10566_v44  ;;  %v6453_v46 = vsel %vm12123_vm3, %v6451_v54, %v6452_v42 }
 0x588   :  { %6591 = vmatpush.bf16.msra.mxu1 %v10391_v22  ;;  %v10556_v57 = vld [vmem:[#allocation6 + $0xb60] sm:$0xf]  ;;  %v11431_v11 = vld [vmem:[#allocation6 + $0xb64] sm:$0xf0]  ;;  %v13115_v50 = vld [vmem:[#allocation2 + $0xc] sm:$0xc]  ;;  %v10607_v30 = vor.u32 %v11443_v55, %v10606_v63  ;;  %v10611_v26 = vor.u32 %v11442_v24, %v10608_v15  ;;  %v6479_v56 = vunpack.c.l.b16 %v6453_v46  ;;  %v6478_v15 = vunpack.c.l.b16 %v6450_v62 }
 0x589   :  { %v13117_v45 = vld [vmem:[#allocation2 + $0x14] sm:$0x7]  ;;  %v6638_v47 = vshrl.u32 %v13115_v50, 16  ;;  %v6641_v36 = vshll.u32 %v13115_v50, 16  ;;  %v6647_v31 = vrot.slane %v13017_v33, 7 }
 0x58a   :  { %7124 = vmatpush.bf16.msrb.mxu2 %v10623_v7  ;;  %7143 = vmatpush.bf16.msrb.mxu3 %v10627_v48  ;;  %v10557_v7 = vor.u32 %v11431_v11, %v10556_v57  ;;  %v6652_v25 = vshrl.u32 %v13117_v45, 16  ;;  %v6655_v16 = vshll.u32 %v13117_v45, 16  ;;  %v11430_v27 = vld [vmem:[#allocation6 + $0xb64] sm:$0xf]  ;;  %v10558_v4 = vld [vmem:[#allocation6 + $0xb68] sm:$0xf0]  ;;  %v6482_v11 = vpack.c.b16 %v6479_v56, %v6478_v15 }
 0x58b   :  { %6573 = vmatpush.bf16.msra.mxu0 %v10379_v43  ;;  %v6643_v22 = vrot.slane %v6641_v36, 7  ;;  %v10598_v8 = vld [vmem:[#allocation6 + $0xbb0] sm:$0xf]  ;;  %v13127_v3 = vor.u32 %v6647_v31, %v6646_v60  ;;  %v10561_v48 = vor.u32 %v11430_v27, %v10558_v4  ;;  %v11441_v43 = vld [vmem:[#allocation6 + $0xbb4] sm:$0xf0] }
 0x58c   :  { %6592 = vmatpush.bf16.msra.mxu1 %v10383_v58  ;;  %v6654_v34 = vrot.slane %v6652_v25, 6  ;;  %v6657_v37 = vrot.slane %v6655_v16, 7  ;;  %v11440_v5 = vld [vmem:[#allocation6 + $0xbb4] sm:$0xf]  ;;  %v10600_v38 = vld [vmem:[#allocation6 + $0xbb8] sm:$0xf0]  ;;  %v10599_v41 = vor.u32 %v11441_v43, %v10598_v8 }
 0x58d   :  { %6209 = vmatmul.bf16.gmra.mxu0 %v6113_v10  ;;  %6228 = vmatmul.bf16.gmra.mxu1 %v6113_v10  ;;  %v6640_v10 = vrot.slane %v6638_v47, 6  ;;  %v11429_v54 = vld [vmem:[#allocation6 + $0xb54] sm:$0xf0]  ;;  %v11428_v35 = vld [vmem:[#allocation6 + $0xb54] sm:$0xf]  ;;  %v6650_v44 = vrot.slane %v13127_v3, 4  ;;  %v10603_v58 = vor.u32 %v11440_v5, %v10600_v38 }
 0x58e   :  { %7125 = vmatpush.bf16.msrb.mxu2 %v10615_v6  ;;  %7144 = vmatpush.bf16.msrb.mxu3 %v10619_v39  ;;  %v10548_v6 = vld [vmem:[#allocation6 + $0xb50] sm:$0xf]  ;;  %v10590_v63 = vld [vmem:[#allocation6 + $0xba0] sm:$0xf]  ;;  %v11439_v51 = vld [vmem:[#allocation6 + $0xba4] sm:$0xf0]  ;;  %v6658_v17 = vor.u32 %v6657_v37, %v6654_v34 }
 0x58f   :  { %6936 = vmatpush.bf16.msrb.mxu0 %v10565_v29  ;;  %6773 = vmatmul.bf16.vlgmr.msra.gmra.mxu2 %v6681_v18  ;;  %v6644_v42 = vor.u32 %v6643_v22, %v6640_v10  ;;  %v10549_v28 = vor.u32 %v11429_v54, %v10548_v6  ;;  %v10550_v29 = vld [vmem:[#allocation6 + $0xb58] sm:$0xf0]  ;;  %v11438_v32 = vld [vmem:[#allocation6 + $0xba4] sm:$0xf]  ;;  %v10592_v55 = vld [vmem:[#allocation6 + $0xba8] sm:$0xf0] }
 0x590   :  { %6955 = vmatpush.bf16.msrb.mxu1 %v10569_v2  ;;  %6792 = vmatmul.bf16.vlgmr.msra.gmra.mxu3 %v6681_v18  ;;  %v10553_v49 = vor.u32 %v11428_v35, %v10550_v29  ;;  %v10540_v24 = vld [vmem:[#allocation6 + $0xb40] sm:$0xf]  ;;  %v11427_v18 = vld [vmem:[#allocation6 + $0xb44] sm:$0xf0]  ;;  %v11426_v39 = vld [vmem:[#allocation6 + $0xb44] sm:$0xf]  ;;  %v6659_v31 = vsel %vm11922_vm7, %v6650_v44, %v6658_v17  ;;  %v10595_v25 = vor.u32 %v11438_v32, %v10592_v55 }
 0x591   :  { %v10542_v2 = vld [vmem:[#allocation6 + $0xb48] sm:$0xf0]  ;;  %v6645_v57 = vrot.slane %v6644_v42, 4  ;;  %v10541_v47 = vor.u32 %v11427_v18, %v10540_v24  ;;  %v10582_v36 = vld [vmem:[#allocation6 + $0xb90] sm:$0xf]  ;;  %v6456_v10 = vrot.slane %v13013_v53, 6 }
 0x592   :  { %7126 = vmatpush.bf16.msrb.mxu2 %v10607_v30  ;;  %7145 = vmatpush.bf16.msrb.mxu3 %v10611_v26  ;;  %v10591_v30 = vor.u32 %v11439_v51, %v10590_v63  ;;  %v11437_v60 = vld [vmem:[#allocation6 + $0xb94] sm:$0xf0]  ;;  %v10545_v16 = vor.u32 %v11426_v39, %v10542_v2  ;;  %v10584_v27 = vld [vmem:[#allocation6 + $0xb98] sm:$0xf0]  ;;  %v10532_v46 = vld [vmem:[#allocation6 + $0xb30] sm:$0xf] }
 0x593   :  { %6937 = vmatpush.bf16.msrb.mxu0 %v10557_v7  ;;  %v11436_v7 = vld [vmem:[#allocation6 + $0xb94] sm:$0xf]  ;;  %v11425_v26 = vld [vmem:[#allocation6 + $0xb34] sm:$0xf0]  ;;  %v10534_v4 = vld [vmem:[#allocation6 + $0xb38] sm:$0xf0]  ;;  %v6649_v8 = vsel %vm11922_vm7, %v6645_v57, %v13127_v3  ;;  %v10583_v43 = vor.u32 %v11437_v60, %v10582_v36 }
 0x594   :  { %6956 = vmatpush.bf16.msrb.mxu1 %v10561_v48  ;;  %v11424_v22 = vld [vmem:[#allocation6 + $0xb34] sm:$0xf]  ;;  %v6459_v34 = vrot.slane %v13061_v21, 6  ;;  %v10574_v37 = vld [vmem:[#allocation6 + $0xb80] sm:$0xf]  ;;  %v6680_v48 = vunpack.c.l.b16 %v6659_v31  ;;  %v10533_v5 = vor.u32 %v11425_v26, %v10532_v46  ;;  %v10587_v54 = vor.u32 %v11436_v7, %v10584_v27 }
 0x595   :  { %v11435_v62 = vld [vmem:[#allocation6 + $0xb84] sm:$0xf0]  ;;  %v11434_v38 = vld [vmem:[#allocation6 + $0xb84] sm:$0xf]  ;;  %v10576_v6 = vld [vmem:[#allocation6 + $0xb88] sm:$0xf0]  ;;  %v10537_v42 = vor.u32 %v11424_v22, %v10534_v4  ;;  %v6679_v29 = vunpack.c.l.b16 %v6649_v8 }
 0x596   :  { %7127 = vmatpush.bf16.msrb.mxu2 %v10599_v41  ;;  %7146 = vmatpush.bf16.msrb.mxu3 %v10603_v58  ;;  %v10524_v41 = vld [vmem:[#allocation6 + $0xb20] sm:$0xf]  ;;  %v6458_v3 = vrot.slane %v6456_v10, 4  ;;  %v11422_v56 = vld [vmem:[#allocation6 + $0xb24] sm:$0xf]  ;;  %v10575_v51 = vor.u32 %v11435_v62, %v10574_v37  ;;  %v10375_v58 = vrot.slane %v13115_v50, 10 }
 0x597   :  { %6938 = vmatpush.bf16.msrb.mxu0 %v10549_v28  ;;  %v11423_v28 = vld [vmem:[#allocation6 + $0xb24] sm:$0xf0]  ;;  %v6982_v35 = vld [vmem:[#allocation2 + $0x8] sm:$0xf]  ;;  %v10526_v21 = vld [vmem:[#allocation6 + $0xb28] sm:$0xf0]  ;;  %v6682_v63 = vpack.c.b16 %v6680_v48, %v6679_v29 }
 0x598   :  { %6957 = vmatpush.bf16.msrb.mxu1 %v10553_v49  ;;  %v6994_v44 = vshrl.u32 %v6982_v35, 16  ;;  %v10525_v17 = vor.u32 %v11423_v28, %v10524_v41  ;;  %v10579_v49 = vor.u32 %v11434_v38, %v10576_v6  ;;  %v10529_v32 = vor.u32 %v11422_v56, %v10526_v21  ;;  %v10516_v24 = vld [vmem:[#allocation6 + $0xb10] sm:$0xf]  ;;  %v11421_v15 = vld [vmem:[#allocation6 + $0xb14] sm:$0xf0] }
 0x599   :  { %v6460_v18 = vsel %vm12123_vm3, %v6458_v3, %v6459_v34  ;;  %v6811_v39 = vld [vmem:[#allocation2] sm:$0x8]  ;;  %v11420_v2 = vld [vmem:[#allocation6 + $0xb14] sm:$0xf]  ;;  %v10518_v57 = vld [vmem:[#allocation6 + $0xb18] sm:$0xf0]  ;;  %v6457_v50 = vsel %vm12123_vm3, %v10375_v58, %v6456_v10 }
 0x59a   :  { %7128 = vmatpush.bf16.msrb.mxu2 %v10591_v30  ;;  %7147 = vmatpush.bf16.msrb.mxu3 %v10595_v25  ;;  %v6996_v55 = vrot.slane %v6994_v44, 7  ;;  %v6997_v30 = vshll.u32 %v6982_v35, 16  ;;  %v6481_v36 = vunpack.c.l.b16 %v6460_v18  ;;  %v6985_v60 = vshrl.u32 %v6811_v39, 16  ;;  %v10508_v25 = vld [vmem:[#allocation6 + $0xb00] sm:$0xf] }
 0x59b   :  { %6939 = vmatpush.bf16.msrb.mxu0 %v10541_v47  ;;  %v10517_v47 = vor.u32 %v11421_v15, %v10516_v24  ;;  %v10521_v31 = vor.u32 %v11420_v2, %v10518_v57  ;;  %v11418_v27 = vld [vmem:[#allocation6 + $0xb04] sm:$0xf]  ;;  %v10510_v46 = vld [vmem:[#allocation6 + $0xb08] sm:$0xf0]  ;;  %v6480_v26 = vunpack.c.l.b16 %v6457_v50  ;;  %v11556_v48 = vld [vmem:[#allocation2 + $0x4] sm:$0xf] }
 0x59c   :  { %6958 = vmatpush.bf16.msrb.mxu1 %v10545_v16  ;;  %v6999_v7 = vor.u32 %v6997_v30, %v6996_v55  ;;  %v11419_v16 = vld [vmem:[#allocation6 + $0xb04] sm:$0xf0]  ;;  %v10570_v8 = vrot.slane %v6985_v60, 11  ;;  %v10513_v37 = vor.u32 %v11418_v27, %v10510_v46  ;;  %v10504_v35 = vrot.slane %v6811_v39, 11  ;;  %v6812_v3 = vld [vmem:[#allocation2 + $0xc] sm:$0x8] }
 0x59d   :  { %6574 = vmatmul.bf16.vlgmr.msra.gmra.mxu0 %v6482_v11  ;;  %6593 = vmatmul.bf16.vlgmr.msra.gmra.mxu1 %v6482_v11  ;;  %v6989_v11 = vrot.slane %v12997_v12, 7  ;;  %v10509_v4 = vor.u32 %v11419_v16, %v10508_v25  ;;  %v6483_v10 = vpack.c.b16 %v6481_v36, %v6480_v26  ;;  %v7006_v56 = vrot.slane %v13020_v61, 7 }
 0x59e   :  { %7129 = vmatpush.bf16.msrb.mxu2 %v10583_v43  ;;  %7148 = vmatpush.bf16.msrb.mxu3 %v10587_v54  ;;  %v6819_v43 = vrot.slane %v11556_v48, 7  ;;  %v6826_v15 = vrot.slane %v13013_v53, 7  ;;  %v6829_v57 = vrot.slane %v13117_v45, 7 }
 0x59f   :  { %6940 = vmatpush.bf16.msrb.mxu0 %v10533_v5  ;;  %6778 = vmatmul.bf16.gmra.mxu2 %v6682_v63  ;;  %v6990_v12 = vor.u32 %v6989_v11, %v12994_v14  ;;  %v6992_v22 = vrot.slane %v6989_v11, 4  ;;  %v6983_v5 = vld [vmem:[#allocation2 + $0x14] sm:$0xf] }
 0x5a0   :  { %6959 = vmatpush.bf16.msrb.mxu1 %v10537_v42  ;;  %6797 = vmatmul.bf16.gmra.mxu3 %v6682_v63  ;;  %v7011_v14 = vshrl.u32 %v6983_v5, 16  ;;  %v6821_v54 = vrot.slane %v6819_v43, 4  ;;  %v6822_v42 = vrot.slane %v13090_v1, 7  ;;  %v7014_v21 = vshll.u32 %v6983_v5, 16 }
 0x5a1   :  { %v7000_v34 = vsel %vm12177_vm8, %v6992_v22, %v6999_v7  ;;  %v6991_v62 = vsel %vm12177_vm8, %v10570_v8, %v6990_v12  ;;  %v6820_v44 = vsel %vm12189_vm12, %v10504_v35, %v6819_v43  ;;  %v7007_v1 = vor.u32 %v7006_v56, %v13017_v33 }
 0x5a2   :  { %7130 = vmatpush.bf16.msrb.mxu2 %v10575_v51  ;;  %7149 = vmatpush.bf16.msrb.mxu3 %v10579_v49  ;;  %v7036_v38 = vunpack.c.l.b16 %v7000_v34  ;;  %v7035_v6 = vunpack.c.l.b16 %v6991_v62  ;;  %v7013_v28 = vrot.slane %v7011_v14, 7  ;;  %v6823_v29 = vsel %vm12189_vm12, %v6821_v54, %v6822_v42 }
 0x5a3   :  { %6941 = vmatpush.bf16.msrb.mxu0 %v10525_v17  ;;  %v6849_v63 = vunpack.c.l.b16 %v6823_v29  ;;  %v7002_v51 = vshrl.u32 %v6812_v3, 16  ;;  %v6848_v58 = vunpack.c.l.b16 %v6820_v44  ;;  %v7009_v49 = vrot.slane %v7006_v56, 4 }
 0x5a4   :  { %6960 = vmatpush.bf16.msrb.mxu1 %v10529_v32  ;;  %v7039_v41 = vpack.c.b16 %v7036_v38, %v7035_v6  ;;  %v7016_v17 = vor.u32 %v7014_v21, %v7013_v28  ;;  %v6828_v2 = vrot.slane %v6826_v15, 4  ;;  %v10505_v33 = vrot.slane %v6812_v3, 11 }
 0x5a5   :  { %v6852_v32 = vpack.c.b16 %v6849_v63, %v6848_v58  ;;  %v10571_v55 = vrot.slane %v7002_v51, 11 }
 0x5a6   :  { %v7017_v24 = vsel %vm12177_vm8, %v7009_v49, %v7016_v17  ;;  %v6830_v30 = vsel %vm12189_vm12, %v6828_v2, %v6829_v57  ;;  %v6827_v53 = vsel %vm12189_vm12, %v10505_v33, %v6826_v15 }
 0x5a7   :  { %6942 = vmatpush.bf16.msrb.mxu0 %v10517_v47  ;;  %v7008_v61 = vsel %vm12177_vm8, %v10571_v55, %v7007_v1  ;;  %v7038_v18 = vunpack.c.l.b16 %v7017_v24  ;;  %v6851_v50 = vunpack.c.l.b16 %v6830_v30  ;;  %v6850_v47 = vunpack.c.l.b16 %v6827_v53 }
 0x5a8   :  { %6961 = vmatpush.bf16.msrb.mxu1 %v10521_v31  ;;  %v7037_v39 = vunpack.c.l.b16 %v7008_v61 }
 0x5a9   :  { %v6853_v36 = vpack.c.b16 %v6851_v50, %v6850_v47 }
 0x5aa   :  { %v7040_v11 = vpack.c.b16 %v7038_v18, %v7037_v39 }
 0x5ab   :  { %6943 = vmatpush.bf16.msrb.mxu0 %v10509_v4 }
 0x5ac   :  { %6962 = vmatpush.bf16.msrb.mxu1 %v10513_v37 }
 0x5ad   :  { %6579 = vmatmul.bf16.gmra.mxu0 %v6483_v10  ;;  %6598 = vmatmul.bf16.gmra.mxu1 %v6483_v10 }
 0x5af   :  { %7131 = vmatmul.bf16.vlgmr.msrb.gmra.mxu2 %v7039_v41 }
 0x5b0   :  { %7150 = vmatmul.bf16.vlgmr.msrb.gmra.mxu3 %v7039_v41 }
 0x5bd   :  { %6944 = vmatmul.bf16.vlgmr.msrb.gmra.mxu0 %v6852_v32  ;;  %6963 = vmatmul.bf16.vlgmr.msrb.gmra.mxu1 %v6852_v32 }
 0x5bf   :  { %7136 = vmatmul.bf16.gmra.mxu2 %v7040_v11 }
 0x5c0   :  { %7155 = vmatmul.bf16.gmra.mxu3 %v7040_v11 }
 0x5cd   :  { %6949 = vmatmul.bf16.gmra.mxu0 %v6853_v36  ;;  %6968 = vmatmul.bf16.gmra.mxu1 %v6853_v36 }
 0x5d2   :  { %v6040_v59 = vpop.f32.mrf.mxu2  ;;  %v6059_v60 = vpop.f32.mrf.mxu3 }
 0x5da   :  { %v5910_v7 = vpop.f32.mrf.mxu0  ;;  %v5929_v31 = vpop.f32.mrf.mxu1 }
 0x5db   :  { %v6041_v45 = vadd.f32 %v6040_v59, %v5910_v7  ;;  %v6060_v25 = vadd.f32 %v6059_v60, %v5929_v31  ;;  %v13171_v16 = vpop.f32.mrf.mxu2  ;;  %v6061_v27 = vpop.f32.mrf.mxu3 }
 0x5e2   :  { %v5912_v46 = vpop.f32.mrf.mxu0  ;;  %v5931_v26 = vpop.f32.mrf.mxu1 }
 0x5e3   :  { %v6062_v12 = vadd.f32 %v6061_v27, %v5931_v26  ;;  %v6045_v22 = vpop.f32.mrf.mxu2  ;;  %v6064_v13 = vpop.f32.mrf.mxu3 }
 0x5ea   :  { %v5915_v4 = vpop.f32.mrf.mxu0  ;;  %v5934_v10 = vpop.f32.mrf.mxu1 }
 0x5eb   :  { %v13173_v8 = vadd.f32 %v6045_v22, %v5915_v4  ;;  %v6065_v34 = vadd.f32 %v6064_v13, %v5934_v10  ;;  %v6047_v37 = vpop.f32.mrf.mxu2  ;;  %v6066_v48 = vpop.f32.mrf.mxu3 }
 0x5f2   :  { %v5917_v43 = vpop.f32.mrf.mxu0  ;;  %v5936_v5 = vpop.f32.mrf.mxu1 }
 0x5f3   :  { %v13175_v62 = vadd.f32 %v6047_v37, %v5917_v43  ;;  %v6067_v38 = vadd.f32 %v6066_v48, %v5936_v5  ;;  %v6404_v14 = vpop.f32.mrf.mxu2  ;;  %v6423_v6 = vpop.f32.mrf.mxu3  ;;  %v6043_v37 = vadd.f32 %v13171_v16, %v5912_v46 }
 0x5fa   :  { %v6205_v54 = vpop.f32.mrf.mxu0  ;;  %v6224_v42 = vpop.f32.mrf.mxu1 }
 0x5fb   :  { %v6235_v41 = vadd.f32 %v6224_v42, %v6060_v25  ;;  %v6406_v35 = vpop.f32.mrf.mxu2  ;;  %v6425_v29 = vpop.f32.mrf.mxu3  ;;  %v6234_v26 = vadd.f32 %v6205_v54, %v6041_v45  ;;  %v11464_v45 = vld [vmem:[#allocation9 + $0x2f0] sm:$0xff] }
 0x5fd   :  { %v6434_v28 = vadd.f32 %v6423_v6, %v6235_v41  ;;  %v6433_v10 = vadd.f32 %v6404_v14, %v6234_v26  ;;  %v11481_v6 = vld [vmem:[#allocation9 + $0x378] sm:$0xff] }
 0x5fe   :  { %7746 = vmatpush.bf16.msra.mxu3 %v11481_v6  ;;  %v11478_v6 = vld [vmem:[#allocation9 + $0x360] sm:$0xff] }
 0x602   :  { %v6207_v3 = vpop.f32.mrf.mxu0  ;;  %v6226_v56 = vpop.f32.mrf.mxu1 }
 0x603   :  { %v6237_v21 = vadd.f32 %v6226_v56, %v6062_v12  ;;  %v13177_v63 = vpop.f32.mrf.mxu2  ;;  %v6428_v51 = vpop.f32.mrf.mxu3  ;;  %v6236_v43 = vadd.f32 %v6207_v3, %v6043_v37  ;;  %v11457_v3 = vld [vmem:[#allocation9 + $0x2b8] sm:$0xff] }
 0x604   :  { %7490 = vmatpush.bf16.msra.mxu1 %v11457_v3  ;;  %v11557_v3 = vld [vmem:[#allocation2] sm:$0xe] }
 0x605   :  { %v6436_v44 = vadd.f32 %v6425_v29, %v6237_v21  ;;  %v6435_v29 = vadd.f32 %v6406_v35, %v6236_v43  ;;  %v11455_v43 = vld [vmem:[#allocation9 + $0x2a8] sm:$0xff] }
 0x60a   :  { %v6210_v17 = vpop.f32.mrf.mxu0  ;;  %v6229_v58 = vpop.f32.mrf.mxu1 }
 0x60b   :  { %v6239_v1 = vadd.f32 %v6229_v58, %v6065_v34  ;;  %v13179_v32 = vpop.f32.mrf.mxu2  ;;  %v6430_v55 = vpop.f32.mrf.mxu3  ;;  %v11473_v58 = vld [vmem:[#allocation9 + $0x338] sm:$0xff]  ;;  %v6238_v35 = vadd.f32 %v6210_v17, %v13173_v8 }
 0x60c   :  { %7630 = vmatpush.bf16.msra.mxu2 %v11473_v58 }
 0x60d   :  { %v6438_v49 = vadd.f32 %v6428_v51, %v6239_v1  ;;  %v11480_v1 = vld [vmem:[#allocation9 + $0x370] sm:$0xff] }
 0x60e   :  { %7747 = vmatpush.bf16.msra.mxu3 %v11480_v1 }
 0x612   :  { %v13181_v24 = vpop.f32.mrf.mxu0  ;;  %v6231_v15 = vpop.f32.mrf.mxu1 }
 0x613   :  { %v6241_v61 = vadd.f32 %v6231_v15, %v6067_v38  ;;  %v6774_v39 = vpop.f32.mrf.mxu2  ;;  %v6793_v2 = vpop.f32.mrf.mxu3  ;;  %v11465_v38 = vld [vmem:[#allocation9 + $0x2f8] sm:$0xff] }
 0x614   :  { %7415 = vmatpush.bf16.msra.mxu0 %v11465_v38  ;;  %v11471_v38 = vld [vmem:[#allocation9 + $0x328] sm:$0xff] }
 0x615   :  { %v6440_v18 = vadd.f32 %v6430_v55, %v6241_v61  ;;  %v11463_v61 = vld [vmem:[#allocation9 + $0x2e8] sm:$0xff] }
 0x618   :  { %7416 = vmatpush.bf16.msra.mxu0 %v11464_v45  ;;  %v11454_v45 = vld [vmem:[#allocation9 + $0x2a0] sm:$0xff] }
 0x61a   :  { %v6575_v57 = vpop.f32.mrf.mxu0  ;;  %v6594_v11 = vpop.f32.mrf.mxu1 }
 0x61b   :  { %v6605_v33 = vadd.f32 %v6594_v11, %v6434_v28  ;;  %v6776_v30 = vpop.f32.mrf.mxu2  ;;  %v6795_v53 = vpop.f32.mrf.mxu3  ;;  %v6604_v48 = vadd.f32 %v6575_v57, %v6433_v10  ;;  %v7170_v28 = vld [vmem:[#allocation8 + $0x4] sm:$0x3] }
 0x61c   :  { %v13194_v14 = vperm.slane %v7170_v28, 0  ;;  %v13196_v16 = vperm.slane %v7170_v28, 1  ;;  %7417 = vmatpush.bf16.msra.mxu0 %v11463_v61  ;;  %v11461_v28 = vld [vmem:[#allocation9 + $0x2d8] sm:$0xff] }
 0x61d   :  { %v6804_v27 = vadd.f32 %v6793_v2, %v6605_v33  ;;  %v6803_v54 = vadd.f32 %v6774_v39, %v6604_v48  ;;  %v11472_v39 = vld [vmem:[#allocation9 + $0x330] sm:$0xff]  ;;  %v11479_v33 = vld [vmem:[#allocation9 + $0x368] sm:$0xff]  ;;  %v11469_v61 = vld [vmem:[#allocation9 + $0x318] sm:$0xff] }
 0x61e   :  { %7631 = vmatpush.bf16.msra.mxu2 %v11472_v39  ;;  %7748 = vmatpush.bf16.msra.mxu3 %v11479_v33 }
 0x622   :  { %v6577_v50 = vpop.f32.mrf.mxu0  ;;  %v6596_v47 = vpop.f32.mrf.mxu1  ;;  %7632 = vmatpush.bf16.msra.mxu2 %v11471_v38  ;;  %7749 = vmatpush.bf16.msra.mxu3 %v11478_v6 }
 0x623   :  { %v6607_v36 = vadd.f32 %v6596_v47, %v6436_v44  ;;  %v13183_v59 = vpop.f32.mrf.mxu2  ;;  %v6798_v60 = vpop.f32.mrf.mxu3 }
 0x625   :  { %v6806_v5 = vadd.f32 %v6795_v53, %v6607_v36  ;;  %v11462_v53 = vld [vmem:[#allocation9 + $0x2e0] sm:$0xff] }
 0x626   :  { %7418 = vmatpush.bf16.msra.mxu0 %v11462_v53 }
 0x62a   :  { %v13185_v7 = vpop.f32.mrf.mxu0  ;;  %v6599_v31 = vpop.f32.mrf.mxu1  ;;  %7419 = vmatpush.bf16.msra.mxu0 %v11461_v28 }
 0x62b   :  { %v6609_v25 = vadd.f32 %v6599_v31, %v6438_v49  ;;  %v13187_v12 = vpop.f32.mrf.mxu2  ;;  %v13189_v22 = vpop.f32.mrf.mxu3  ;;  %v6606_v49 = vadd.f32 %v6577_v50, %v6435_v29 }
 0x62d   :  { %v13198_v46 = vadd.f32 %v6798_v60, %v6609_v25  ;;  %v6805_v36 = vadd.f32 %v6776_v30, %v6606_v49  ;;  %v6437_v60 = vadd.f32 %v13177_v63, %v6238_v35  ;;  %v6240_v30 = vadd.f32 %v13181_v24, %v13175_v62 }
 0x62f   :  { %v6608_v26 = vadd.f32 %v13185_v7, %v6437_v60  ;;  %v11468_v60 = vld [vmem:[#allocation9 + $0x310] sm:$0xff] }
 0x632   :  { %v13191_v13 = vpop.f32.mrf.mxu0  ;;  %v6601_v4 = vpop.f32.mrf.mxu1 }
 0x633   :  { %v6611_v34 = vadd.f32 %v6601_v4, %v6440_v18  ;;  %v7132_v42 = vpop.f32.mrf.mxu2  ;;  %v7151_v41 = vpop.f32.mrf.mxu3  ;;  %v11456_v18 = vld [vmem:[#allocation9 + $0x2b0] sm:$0xff] }
 0x634   :  { %7491 = vmatpush.bf16.msra.mxu1 %v11456_v18 }
 0x635   :  { %v13210_v63 = vadd.f32 %v13189_v22, %v6611_v34  ;;  %v6807_v22 = vadd.f32 %v13183_v59, %v6608_v26  ;;  %v11477_v34 = vld [vmem:[#allocation9 + $0x358] sm:$0xff] }
 0x636   :  { %v11453_v59 = vld [vmem:[#allocation9 + $0x298] sm:$0xff]  ;;  %7750 = vmatpush.bf16.msra.mxu3 %v11477_v34 }
 0x638   :  { %7492 = vmatpush.bf16.msra.mxu1 %v11455_v43 }
 0x63a   :  { %v6945_v56 = vpop.f32.mrf.mxu0  ;;  %v6964_v21 = vpop.f32.mrf.mxu1 }
 0x63b   :  { %v6974_v44 = vadd.f32 %v6945_v56, %v6803_v54  ;;  %v6975_v51 = vadd.f32 %v6964_v21, %v6804_v27  ;;  %v7134_v11 = vpop.f32.mrf.mxu2  ;;  %v7153_v47 = vpop.f32.mrf.mxu3  ;;  %v11470_v54 = vld [vmem:[#allocation9 + $0x320] sm:$0xff]  ;;  %v11460_v56 = vld [vmem:[#allocation9 + $0x2d0] sm:$0xff] }
 0x63c   :  { %7493 = vmatpush.bf16.msra.mxu1 %v11454_v45  ;;  %7633 = vmatpush.bf16.msra.mxu2 %v11470_v54 }
 0x63d   :  { %v7161_v55 = vadd.f32 %v7132_v42, %v6974_v44  ;;  %v7162_v15 = vadd.f32 %v7151_v41, %v6975_v51  ;;  %v6439_v51 = vadd.f32 %v13179_v32, %v6240_v30  ;;  %7420 = vmatpush.bf16.msra.mxu0 %v11460_v56  ;;  %v11476_v32 = vld [vmem:[#allocation9 + $0x350] sm:$0xff]  ;;  %v7239_v30 = vld [vmem:[#allocation2 + $0x8] sm:$0x3] }
 0x63e   :  { %7751 = vmatpush.bf16.msra.mxu3 %v11476_v32 }
 0x63f   :  { %v7176_v2 = vadd.f32 %v13194_v14, %v7161_v55  ;;  %v13203_v57 = vadd.f32 %v13196_v16, %v7162_v15  ;;  %v6610_v35 = vadd.f32 %v13191_v13, %v6439_v51 }
 0x640   :  { %7494 = vmatpush.bf16.msra.mxu1 %v11453_v59  ;;  %7634 = vmatpush.bf16.msra.mxu2 %v11469_v61  ;;  %v11466_v59 = vld [vmem:[#allocation9 + $0x300] sm:$0xff] }
 0x641   :  { %v7184_v50 = vmax.f32 %v7176_v2, 0.0 }
 0x642   :  { %v6947_v8 = vpop.f32.mrf.mxu0  ;;  %v6966_v17 = vpop.f32.mrf.mxu1 }
 0x643   :  { %v7188_v31 = vpack.c.bf16 %v7184_v50, %v7184_v50  ;;  %v6976_v25 = vadd.f32 %v6947_v8, %v6805_v36  ;;  %v6977_v27 = vadd.f32 %v6966_v17, %v6806_v5  ;;  %v7137_v24 = vpop.f32.mrf.mxu2  ;;  %v7156_v49 = vpop.f32.mrf.mxu3  ;;  %v11452_v36 = vld [vmem:[#allocation9 + $0x290] sm:$0xff] }
 0x644   :  { %7495 = vmatpush.bf16.msra.mxu1 %v11452_v36  ;;  %7635 = vmatpush.bf16.msra.mxu2 %v11468_v60 }
 0x645   :  { %v7193_v4 = vshrl.u32 %v7188_v31, 16  ;;  %v7196_v10 = vshll.u32 %v7188_v31, 16  ;;  %v7163_v37 = vadd.f32 %v7134_v11, %v6976_v25  ;;  %v7164_v48 = vadd.f32 %v7153_v47, %v6977_v27  ;;  %v11459_v11 = vld [vmem:[#allocation9 + $0x2c8] sm:$0xff]  ;;  %v11458_v27 = vld [vmem:[#allocation9 + $0x2c0] sm:$0xff] }
 0x646   :  { %v6809_v31 = vadd.f32 %v13187_v12, %v6610_v35  ;;  %7421 = vmatpush.bf16.msra.mxu0 %v11459_v11  ;;  %v11475_v25 = vld [vmem:[#allocation9 + $0x348] sm:$0xff]  ;;  %v7242_v11 = vld [vmem:[#allocation2 + $0xc] sm:$0xe] }
 0x647   :  { %v7195_v42 = vrot.slane %v7193_v4, 6  ;;  %v7198_v41 = vrot.slane %v7196_v10, 7  ;;  %v7178_v5 = vadd.f32 %v13194_v14, %v7163_v37  ;;  %v13214_v7 = vadd.f32 %v13196_v16, %v7164_v48  ;;  %v11489_v10 = vld [vmem:[#allocation9 + $0x3b8] sm:$0xff]  ;;  %7752 = vmatpush.bf16.msra.mxu3 %v11475_v25 }
 0x649   :  { %v7199_v29 = vor.u32 %v7198_v41, %v7195_v42  ;;  %v7185_v62 = vmax.f32 %v7178_v5, 0.0  ;;  %v11451_v41 = vld [vmem:[#allocation9 + $0x288] sm:$0xff] }
 0x64a   :  { %v6950_v21 = vpop.f32.mrf.mxu0  ;;  %v6969_v44 = vpop.f32.mrf.mxu1  ;;  %v11467_v5 = vld [vmem:[#allocation9 + $0x308] sm:$0xff]  ;;  %7422 = vmatpush.bf16.msra.mxu0 %v11458_v27  ;;  %7496 = vmatpush.bf16.msra.mxu1 %v11451_v41 }
 0x64b   :  { %v7236_v58 = vsel %vm11912_vm5, %v7199_v29, %v11557_v3  ;;  %v7189_v1 = vpack.c.bf16 %v7185_v62, %v7185_v62  ;;  %v6978_v55 = vadd.f32 %v6950_v21, %v6807_v22  ;;  %v6979_v15 = vadd.f32 %v6969_v44, %v13198_v46  ;;  %v7139_v42 = vpop.f32.mrf.mxu2  ;;  %v7158_v62 = vpop.f32.mrf.mxu3  ;;  %v11474_v22 = vld [vmem:[#allocation9 + $0x340] sm:$0xff]  ;;  %v11488_v44 = vld [vmem:[#allocation9 + $0x3b0] sm:$0xff]  ;;  %7636 = vmatpush.bf16.msra.mxu2 %v11467_v5 }
 0x64c   :  { %7237 = vst [vmem:[#allocation2] sm:$0xe] %v7236_v58  ;;  %v7200_v13 = vrot.slane %v7199_v29, 4  ;;  %7753 = vmatpush.bf16.msra.mxu3 %v11474_v22 }
 0x64d   :  { %v7202_v18 = vshrl.u32 %v7189_v1, 16  ;;  %v7205_v39 = vshll.u32 %v7189_v1, 16  ;;  %v7165_v2 = vadd.f32 %v7137_v24, %v6978_v55  ;;  %v7166_v33 = vadd.f32 %v7156_v49, %v6979_v15  ;;  %v11450_v15 = vld [vmem:[#allocation9 + $0x280] sm:$0xff] }
 0x64e   :  { %7890 = vmatpush.bf16.msrb.mxu0 %v11489_v10  ;;  %7497 = vmatpush.bf16.msra.mxu1 %v11450_v15 }
 0x64f   :  { %v7204_v53 = vrot.slane %v7202_v18, 6  ;;  %v7207_v50 = vrot.slane %v7205_v39, 7  ;;  %v7180_v47 = vadd.f32 %v13194_v14, %v7165_v2  ;;  %v13224_v46 = vadd.f32 %v13196_v16, %v7166_v33  ;;  %v11487_v33 = vld [vmem:[#allocation9 + $0x3a8] sm:$0xff]  ;;  %7637 = vmatpush.bf16.msra.mxu2 %v11466_v59 }
 0x651   :  { %v7208_v8 = vor.u32 %v7207_v50, %v7204_v53  ;;  %v7186_v17 = vmax.f32 %v7180_v47, 0.0 }
 0x652   :  { %v6952_v26 = vpop.f32.mrf.mxu0  ;;  %v6971_v4 = vpop.f32.mrf.mxu1  ;;  %7891 = vmatpush.bf16.msrb.mxu0 %v11488_v44  ;;  %v11485_v44 = vld [vmem:[#allocation9 + $0x398] sm:$0xff] }
 0x653   :  { %v7209_v37 = vsel %vm11922_vm7, %v7200_v13, %v7208_v8  ;;  %v7210_v48 = vrot.slane %v7208_v8, 4  ;;  %v7190_v43 = vpack.c.bf16 %v7186_v17, %v7186_v17  ;;  %v6980_v38 = vadd.f32 %v6952_v26, %v6809_v31  ;;  %v13229_v6 = vld [vmem:[#allocation2] sm:$0xe] }
 0x654   :  { %7238 = vst [vmem:[#allocation2 + $0x4] sm:$0xf] %v7209_v37  ;;  %v6981_v12 = vadd.f32 %v6971_v4, %v13210_v63  ;;  %v7249_v28 = vld [vmem:[#allocation2] sm:$0xf]  ;;  %v7512_v21 = vshrl.u32 %v13229_v6, 16  ;;  %v7515_v1 = vshll.u32 %v13229_v6, 16 }
 0x655   :  { %v7240_v45 = vsel %vm11908_vm4, %v7210_v48, %v7239_v30  ;;  %v7212_v54 = vshrl.u32 %v7190_v43, 16  ;;  %v7215_v29 = vshll.u32 %v7190_v43, 16  ;;  %v7167_v24 = vadd.f32 %v7139_v42, %v6980_v38  ;;  %v13240_v55 = vld [vmem:[#allocation2] sm:$0xc]  ;;  %v11486_v43 = vld [vmem:[#allocation9 + $0x3a0] sm:$0xff] }
 0x656   :  { %7241 = vst [vmem:[#allocation2 + $0x8] sm:$0x3] %v7240_v45  ;;  %v7168_v34 = vadd.f32 %v7158_v62, %v6981_v12  ;;  %v7256_v56 = vshrl.u32 %v7249_v28, 16  ;;  %v7259_v63 = vshll.u32 %v7249_v28, 16  ;;  %v7514_v2 = vrot.slane %v7512_v21, 5  ;;  %7892 = vmatpush.bf16.msrb.mxu0 %v11487_v33 }
 0x657   :  { %v7214_v51 = vrot.slane %v7212_v54, 6  ;;  %v7217_v3 = vrot.slane %v7215_v29, 7  ;;  %v7182_v58 = vadd.f32 %v13194_v14, %v7167_v24  ;;  %v7517_v32 = vrot.slane %v7515_v1, 6 }
 0x658   :  { %v13238_v49 = vadd.f32 %v13196_v16, %v7168_v34  ;;  %v7258_v61 = vrot.slane %v7256_v56, 4  ;;  %v7261_v35 = vrot.slane %v7259_v63, 5  ;;  %v10636_v47 = vrot.slane %v13229_v6, 9 }
 0x659   :  { %v7218_v18 = vor.u32 %v7217_v3, %v7214_v51  ;;  %v7187_v39 = vmax.f32 %v7182_v58, 0.0  ;;  %v10734_v36 = vrot.slane %v13240_v55, 10  ;;  %v7518_v4 = vor.u32 %v7517_v32, %v7514_v2  ;;  %v7246_v58 = vld [vmem:[#allocation2 + $0x14] sm:$0x3] }
 0x65a   :  { %v7262_v14 = vor.u32 %v7261_v35, %v7258_v61  ;;  %7893 = vmatpush.bf16.msrb.mxu0 %v11486_v43 }
 0x65b   :  { %v7243_v16 = vsel %vm11912_vm5, %v7218_v18, %v7242_v11  ;;  %v7191_v53 = vpack.c.bf16 %v7187_v39, %v7187_v39  ;;  %v7250_v50 = vld [vmem:[#allocation2 + $0x4] sm:$0xf]  ;;  %v7219_v60 = vrot.slane %v7218_v18, 4  ;;  %v7519_v18 = vrot.slane %v7518_v4, 4 }
 0x65c   :  { %7244 = vst [vmem:[#allocation2 + $0xc] sm:$0xe] %v7243_v16  ;;  %v7330_v13 = vrot.slane %v7250_v50, 5  ;;  %v7661_v8 = vrot.slane %v7250_v50, 6  ;;  %v13246_v17 = vshll.u32 %v7250_v50, 16  ;;  %v7263_v30 = vrot.slane %v7262_v14, 4 }
 0x65d   :  { %v7221_v31 = vshrl.u32 %v7191_v53, 16  ;;  %v7224_v25 = vshll.u32 %v7191_v53, 16  ;;  %v7251_v27 = vld [vmem:[#allocation2 + $0x8] sm:$0x1]  ;;  %v13255_v24 = vshrl.u32 %v7250_v50, 16 }
 0x65e   :  { %v7509_v26 = vld [vmem:[#allocation2 + $0x8] sm:$0x3]  ;;  %v7331_v10 = vsel %vm12044_vm1, %v10636_v47, %v7330_v13  ;;  %v7332_v37 = vrot.slane %v7330_v13, 4  ;;  %v7333_v48 = vrot.slane %v7251_v27, 5  ;;  %v7662_v12 = vsel %vm12123_vm3, %v10734_v36, %v7661_v8  ;;  %7894 = vmatpush.bf16.msrb.mxu0 %v11485_v44 }
 0x65f   :  { %v7223_v38 = vrot.slane %v7221_v31, 6  ;;  %v7226_v42 = vrot.slane %v7224_v25, 7  ;;  %v7663_v41 = vrot.slane %v7661_v8, 4  ;;  %v7359_v28 = vunpack.c.l.b16 %v7331_v10 }
 0x660   :  { %v7334_v5 = vsel %vm12044_vm1, %v7332_v37, %v7333_v48  ;;  %v7664_v45 = vrot.slane %v7509_v26, 6  ;;  %v7267_v54 = vrot.slane %v13246_v17, 5  ;;  %v7275_v22 = vshll.u32 %v7251_v27, 16 }
 0x661   :  { %v7227_v29 = vor.u32 %v7226_v42, %v7223_v38  ;;  %v7360_v62 = vunpack.c.l.b16 %v7334_v5  ;;  %v7690_v56 = vunpack.c.l.b16 %v7662_v12  ;;  %v7521_v21 = vrot.slane %v13246_v17, 6  ;;  %v11483_v5 = vld [vmem:[#allocation9 + $0x388] sm:$0xff] }
 0x662   :  { %v7665_v34 = vsel %vm12123_vm3, %v7663_v41, %v7664_v45  ;;  %v7268_v63 = vsel %vm11957_vm10, %v7263_v30, %v7267_v54  ;;  %v7271_v61 = vrot.slane %v13255_v24, 4  ;;  %v7277_v35 = vrot.slane %v7275_v22, 5 }
 0x663   :  { %v7228_v51 = vsel %vm11922_vm7, %v7219_v60, %v7227_v29  ;;  %v7229_v3 = vrot.slane %v7227_v29, 4  ;;  %v7363_v1 = vpack.c.b16 %v7360_v62, %v7359_v28  ;;  %v7691_v15 = vunpack.c.l.b16 %v7665_v34  ;;  %v13264_v59 = vld [vmem:[#allocation2 + $0xc] sm:$0xe]  ;;  %v11484_v60 = vld [vmem:[#allocation9 + $0x390] sm:$0xff] }
 0x664   :  { %7245 = vst [vmem:[#allocation2 + $0x10] sm:$0xf] %v7228_v51  ;;  %v7520_v39 = vrot.slane %v13255_v24, 5  ;;  %v7526_v11 = vshrl.u32 %v7509_v26, 16  ;;  %v7529_v14 = vshll.u32 %v7509_v26, 16  ;;  %v7272_v16 = vor.u32 %v7271_v61, %v7267_v54  ;;  %7895 = vmatpush.bf16.msrb.mxu0 %v11484_v60 }
 0x665   :  { %v7247_v2 = vsel %vm11908_vm4, %v7229_v3, %v7246_v58  ;;  %7423 = vmatmul.bf16.vlgmr.msra.gmra.mxu0 %v7363_v1  ;;  %v7694_v32 = vpack.c.b16 %v7691_v15, %v7690_v56  ;;  %v7252_v33 = vld [vmem:[#allocation2 + $0xc] sm:$0xf]  ;;  %v7434_v53 = vunpack.c.l.b16 %v7268_v63  ;;  %v10637_v47 = vrot.slane %v13264_v59, 9 }
 0x666   :  { %7248 = vst [vmem:[#allocation2 + $0x14] sm:$0x3] %v7247_v2  ;;  %v7522_v50 = vor.u32 %v7521_v21, %v7520_v39  ;;  %v13271_v36 = vld [vmem:[#allocation2 + $0xc] sm:$0xc]  ;;  %v7528_v13 = vrot.slane %v7526_v11, 5  ;;  %v7531_v8 = vrot.slane %v7529_v14, 6 }
 0x667   :  { %7754 = vmatmul.bf16.vlgmr.msra.gmra.mxu3 %v7694_v32  ;;  %v7280_v31 = vshrl.u32 %v7252_v33, 16  ;;  %v7283_v25 = vshll.u32 %v7252_v33, 16  ;;  %v7273_v27 = vrot.slane %v7272_v16, 4  ;;  %v7535_v10 = vshrl.u32 %v13264_v59, 16 }
 0x668   :  { %v7523_v26 = vsel %vm12022_vm15, %v7519_v18, %v7522_v50  ;;  %v7524_v4 = vrot.slane %v7522_v50, 4  ;;  %v7532_v37 = vor.u32 %v7531_v8, %v7528_v13  ;;  %v10735_v48 = vrot.slane %v13271_v36, 10  ;;  %7896 = vmatpush.bf16.msrb.mxu0 %v11483_v5 }
 0x669   :  { %v7282_v30 = vrot.slane %v7280_v31, 4  ;;  %v7285_v43 = vrot.slane %v7283_v25, 5  ;;  %v7278_v38 = vsel %vm11957_vm10, %v7273_v27, %v7277_v35  ;;  %v7574_v42 = vunpack.c.l.b16 %v7523_v26  ;;  %v11482_v35 = vld [vmem:[#allocation9 + $0x380] sm:$0xff] }
 0x66a   :  { %v7537_v12 = vrot.slane %v7535_v10, 5  ;;  %v7538_v41 = vshll.u32 %v13264_v59, 16  ;;  %v7435_v28 = vunpack.c.l.b16 %v7278_v38  ;;  %v7533_v45 = vsel %vm12022_vm15, %v7524_v4, %v7532_v37 }
 0x66b   :  { %v7253_v54 = vld [vmem:[#allocation2 + $0x10] sm:$0xf]  ;;  %v7286_v29 = vor.u32 %v7285_v43, %v7282_v30  ;;  %v7772_v62 = vshrl.u32 %v13240_v55, 16  ;;  %v7575_v22 = vunpack.c.l.b16 %v7533_v45  ;;  %v7775_v58 = vshll.u32 %v13240_v55, 16 }
 0x66c   :  { %v7337_v34 = vrot.slane %v7253_v54, 5  ;;  %v7668_v56 = vrot.slane %v7253_v54, 6  ;;  %v13283_v63 = vshll.u32 %v7253_v54, 16  ;;  %v7438_v21 = vpack.c.b16 %v7435_v28, %v7434_v53  ;;  %7897 = vmatpush.bf16.msrb.mxu0 %v11482_v35 }
 0x66d   :  { %v7254_v44 = vld [vmem:[#allocation2 + $0x14] sm:$0x1]  ;;  %v13285_v3 = vshrl.u32 %v7253_v54, 16  ;;  %v7578_v1 = vpack.c.b16 %v7575_v22, %v7574_v42  ;;  %v7287_v32 = vrot.slane %v7286_v29, 4  ;;  %v7769_v42 = vld [vmem:[#allocation2 + $0x8] sm:$0x7] }
 0x66e   :  { %v7510_v51 = vld [vmem:[#allocation2 + $0x14] sm:$0x3]  ;;  %v7338_v15 = vsel %vm12044_vm1, %v10637_v47, %v7337_v34  ;;  %v7339_v59 = vrot.slane %v7337_v34, 4  ;;  %v7340_v61 = vrot.slane %v7254_v44, 5  ;;  %7498 = vmatmul.bf16.vlgmr.msra.gmra.mxu1 %v7438_v21  ;;  %v7669_v18 = vsel %vm12123_vm3, %v10735_v48, %v7668_v56 }
 0x66f   :  { %v7670_v39 = vrot.slane %v7668_v56, 4  ;;  %v7671_v2 = vrot.slane %v7510_v51, 6  ;;  %7638 = vmatmul.bf16.vlgmr.msra.gmra.mxu2 %v7578_v1  ;;  %v7361_v55 = vunpack.c.l.b16 %v7338_v15  ;;  %v7291_v14 = vrot.slane %v13283_v63, 5 }
 0x670   :  { %v7341_v11 = vsel %vm12044_vm1, %v7339_v59, %v7340_v61  ;;  %v7295_v33 = vrot.slane %v13285_v3, 4  ;;  %v7299_v50 = vshll.u32 %v7254_v44, 16  ;;  %v7540_v47 = vrot.slane %v7538_v41, 6 }
 0x671   :  { %v7362_v16 = vunpack.c.l.b16 %v7341_v11  ;;  %v7672_v53 = vsel %vm12123_vm3, %v7670_v39, %v7671_v2  ;;  %v7692_v60 = vunpack.c.l.b16 %v7669_v18  ;;  %v7543_v31 = vrot.slane %v13285_v3, 5 }
 0x672   :  { %v7693_v13 = vunpack.c.l.b16 %v7672_v53  ;;  %v7296_v8 = vor.u32 %v7295_v33, %v7291_v14  ;;  %v7292_v27 = vsel %vm11957_vm10, %v7287_v32, %v7291_v14  ;;  %v7301_v26 = vrot.slane %v7299_v50, 5  ;;  %v7770_v32 = vld [vmem:[#allocation2 + $0x14] sm:$0x7] }
 0x673   :  { %v7364_v25 = vpack.c.b16 %v7362_v16, %v7361_v55  ;;  %v7541_v4 = vor.u32 %v7540_v47, %v7537_v12  ;;  %v7544_v48 = vrot.slane %v13283_v63, 6  ;;  %v7549_v30 = vshrl.u32 %v7510_v51, 16 }
 0x674   :  { %v7695_v10 = vpack.c.b16 %v7693_v13, %v7692_v60  ;;  %v7297_v37 = vrot.slane %v7296_v8, 4  ;;  %v7552_v38 = vshll.u32 %v7510_v51, 16  ;;  %v7774_v41 = vrot.slane %v7772_v62, 6 }
 0x675   :  { %7428 = vmatmul.bf16.gmra.mxu0 %v7364_v25  ;;  %v7542_v43 = vrot.slane %v7541_v4, 4  ;;  %v7777_v5 = vrot.slane %v7775_v58, 7  ;;  %v7545_v45 = vor.u32 %v7544_v48, %v7543_v31  ;;  %v7551_v54 = vrot.slane %v7549_v30, 5 }
 0x676   :  { %v7302_v28 = vsel %vm11957_vm10, %v7297_v37, %v7301_v26  ;;  %v7780_v29 = vrot.slane %v13255_v24, 6  ;;  %v7554_v22 = vrot.slane %v7552_v38, 6  ;;  %v7781_v56 = vrot.slane %v13246_v17, 7 }
 0x677   :  { %7759 = vmatmul.bf16.gmra.mxu3 %v7695_v10  ;;  %v7437_v12 = vunpack.c.l.b16 %v7302_v28  ;;  %v7778_v34 = vor.u32 %v7777_v5, %v7774_v41  ;;  %v7546_v21 = vsel %vm12022_vm15, %v7542_v43, %v7545_v45  ;;  %v7547_v44 = vrot.slane %v7545_v45, 4 }
 0x678   :  { %v7786_v51 = vshrl.u32 %v7769_v42, 16  ;;  %v7789_v62 = vshll.u32 %v7769_v42, 16  ;;  %v7436_v58 = vunpack.c.l.b16 %v7292_v27  ;;  %v7555_v1 = vor.u32 %v7554_v22, %v7551_v54 }
 0x679   :  { %v7782_v0 = vor.u32 %v7781_v56, %v7780_v29  ;;  %v7576_v35 = vunpack.c.l.b16 %v7546_v21  ;;  %v7779_v39 = vrot.slane %v7778_v34, 4  ;;  %v7795_v16 = vshrl.u32 %v13271_v36, 16  ;;  %v11497_v56 = vld [vmem:[#allocation12 + $0x1b8] sm:$0xff] }
 0x67a   :  { %v7788_v15 = vrot.slane %v7786_v51, 6  ;;  %v7791_v59 = vrot.slane %v7789_v62, 7  ;;  %v7439_v61 = vpack.c.b16 %v7437_v12, %v7436_v58  ;;  %v7556_v24 = vsel %vm12022_vm15, %v7547_v44, %v7555_v1  ;;  %v11513_v21 = vld [vmem:[#allocation12 + $0x238] sm:$0xff]  ;;  %8236 = vmatpush.bf16.msrb.mxu2 %v11497_v56  ;;  %v11496_v58 = vld [vmem:[#allocation12 + $0x1b0] sm:$0xff] }
 0x67b   :  { %v7577_v18 = vunpack.c.l.b16 %v7556_v24  ;;  %v7784_v2 = vrot.slane %v7782_v0, 4  ;;  %v7783_v55 = vsel %vm11922_vm7, %v7779_v39, %v7782_v0  ;;  %v7798_v53 = vshll.u32 %v13271_v36, 16  ;;  %v11505_v51 = vld [vmem:[#allocation12 + $0x1f8] sm:$0xff]  ;;  %8348 = vmatpush.bf16.msrb.mxu3 %v11513_v21  ;;  %v11512_v1 = vld [vmem:[#allocation12 + $0x230] sm:$0xff] }
 0x67c   :  { %v7792_v17 = vor.u32 %v7791_v59, %v7788_v15  ;;  %v7803_v50 = vrot.slane %v13285_v3, 6  ;;  %v7804_v47 = vrot.slane %v13283_v63, 7  ;;  %v7809_v60 = vshrl.u32 %v7770_v32, 16  ;;  %8161 = vmatpush.bf16.msrb.mxu1 %v11505_v51  ;;  %v13324_v15 = vld [vmem:[#allocation11 + $0x2] ss:$0 sm:$0xff]  ;;  %v11504_v24 = vld [vmem:[#allocation12 + $0x1f0] sm:$0xff] }
 0x67d   :  { %v7579_v11 = vpack.c.b16 %v7577_v18, %v7576_v35  ;;  %v7812_v13 = vshll.u32 %v7770_v32, 16  ;;  %v7834_v8 = vunpack.c.l.b16 %v7783_v55  ;;  %v7797_v25 = vrot.slane %v7795_v16, 6  ;;  %v11511_v35 = vld [vmem:[#allocation12 + $0x228] sm:$0xff] }
 0x67e   :  { %v7793_v14 = vsel %vm11922_vm7, %v7784_v2, %v7792_v17  ;;  %7503 = vmatmul.bf16.gmra.mxu1 %v7439_v61  ;;  %v7800_v27 = vrot.slane %v7798_v53, 7  ;;  %v7805_v26 = vor.u32 %v7804_v47, %v7803_v50  ;;  %v7811_v4 = vrot.slane %v7809_v60, 6  ;;  %8237 = vmatpush.bf16.msrb.mxu2 %v11496_v58  ;;  %v11495_v61 = vld [vmem:[#allocation12 + $0x1a8] sm:$0xff] }
 0x67f   :  { %v7835_v33 = vunpack.c.l.b16 %v7793_v14  ;;  %7643 = vmatmul.bf16.gmra.mxu2 %v7579_v11  ;;  %v7814_v10 = vrot.slane %v7812_v13, 7  ;;  %8349 = vmatpush.bf16.msrb.mxu3 %v11512_v1  ;;  %v11503_v17 = vld [vmem:[#allocation12 + $0x1e8] sm:$0xff]  ;;  %v11494_v14 = vld [vmem:[#allocation12 + $0x1a0] sm:$0xff] }
 0x680   :  { %v7801_v37 = vor.u32 %v7800_v27, %v7797_v25  ;;  %v7807_v48 = vrot.slane %v7805_v26, 4  ;;  %8162 = vmatpush.bf16.msrb.mxu1 %v11504_v24  ;;  %v11493_v27 = vld [vmem:[#allocation12 + $0x198] sm:$0xff] }
 0x681   :  { %v7838_v31 = vpack.c.b16 %v7835_v33, %v7834_v8  ;;  %v7815_v30 = vor.u32 %v7814_v10, %v7811_v4  ;;  %v11510_v33 = vld [vmem:[#allocation12 + $0x220] sm:$0xff]  ;;  %v11509_v4 = vld [vmem:[#allocation12 + $0x218] sm:$0xff] }
 0x682   :  { %v7802_v43 = vrot.slane %v7801_v37, 4  ;;  %8238 = vmatpush.bf16.msrb.mxu2 %v11495_v61  ;;  %v11499_v61 = vld [vmem:[#allocation12 + $0x1c8] sm:$0xff] }
 0x683   :  { %v7816_v36 = vsel %vm11922_vm7, %v7807_v48, %v7815_v30  ;;  %8350 = vmatpush.bf16.msrb.mxu3 %v11511_v35 }
 0x684   :  { %v7806_v63 = vsel %vm11922_vm7, %v7802_v43, %v7805_v26  ;;  %v7837_v3 = vunpack.c.l.b16 %v7816_v36  ;;  %8163 = vmatpush.bf16.msrb.mxu1 %v11503_v17  ;;  %v11502_v26 = vld [vmem:[#allocation12 + $0x1e0] sm:$0xff]  ;;  %v11492_v36 = vld [vmem:[#allocation12 + $0x190] sm:$0xff] }
 0x685   :  { %7898 = vmatmul.bf16.vlgmr.msrb.gmra.mxu0 %v7838_v31  ;;  %v7836_v38 = vunpack.c.l.b16 %v7806_v63  ;;  %v11501_v63 = vld [vmem:[#allocation12 + $0x1d8] sm:$0xff] }
 0x686   :  { %8239 = vmatpush.bf16.msrb.mxu2 %v11494_v14 }
 0x687   :  { %v7839_v42 = vpack.c.b16 %v7837_v3, %v7836_v38  ;;  %8351 = vmatpush.bf16.msrb.mxu3 %v11510_v33 }
 0x688   :  { %8164 = vmatpush.bf16.msrb.mxu1 %v11502_v26 }
 0x68a   :  { %8240 = vmatpush.bf16.msrb.mxu2 %v11493_v27 }
 0x68b   :  { %8352 = vmatpush.bf16.msrb.mxu3 %v11509_v4 }
 0x68c   :  { %8165 = vmatpush.bf16.msrb.mxu1 %v11501_v63 }
 0x68e   :  { %8241 = vmatpush.bf16.msrb.mxu2 %v11492_v36 }
 0x695   :  { %7903 = vmatmul.bf16.gmra.mxu0 %v7839_v42  ;;  %v11508_v42 = vld [vmem:[#allocation12 + $0x210] sm:$0xff] }
 0x696   :  { %8353 = vmatpush.bf16.msrb.mxu3 %v11508_v42 }
 0x6e2   :  { %v7424_v41 = vpop.f32.mrf.mxu0 }
 0x6ea   :  { %v7426_v5 = vpop.f32.mrf.mxu0  ;;  %v7755_v29 = vpop.f32.mrf.mxu3 }
 0x6eb   :  { %v7499_v28 = vpop.f32.mrf.mxu1 }
 0x6ec   :  { %v7500_v22 = vadd.f32 %v7499_v28, %v7424_v41 }
 0x6f2   :  { %v7429_v45 = vpop.f32.mrf.mxu0  ;;  %v7639_v54 = vpop.f32.mrf.mxu2 }
 0x6f3   :  { %v7501_v34 = vpop.f32.mrf.mxu1  ;;  %v7649_v44 = vadd.f32 %v7639_v54, %v7500_v22  ;;  %v7757_v2 = vpop.f32.mrf.mxu3  ;;  %v11491_v22 = vld [vmem:[#allocation12 + $0x188] sm:$0xff] }
 0x6f4   :  { %v7502_v18 = vadd.f32 %v7501_v34, %v7426_v5  ;;  %v11500_v34 = vld [vmem:[#allocation12 + $0x1d0] sm:$0xff]  ;;  %8242 = vmatpush.bf16.msrb.mxu2 %v11491_v22 }
 0x6f5   :  { %v7765_v0 = vadd.f32 %v7755_v29, %v7649_v44  ;;  %8166 = vmatpush.bf16.msrb.mxu1 %v11500_v34 }
 0x6f9   :  { %8167 = vmatpush.bf16.msrb.mxu1 %v11499_v61 }
 0x6fa   :  { %v13322_v12 = vpop.f32.mrf.mxu0  ;;  %v7641_v62 = vpop.f32.mrf.mxu2 }
 0x6fb   :  { %v7650_v32 = vadd.f32 %v7641_v62, %v7502_v18  ;;  %v7504_v55 = vpop.f32.mrf.mxu1  ;;  %v7760_v43 = vpop.f32.mrf.mxu3  ;;  %v11507_v62 = vld [vmem:[#allocation12 + $0x208] sm:$0xff] }
 0x6fc   :  { %v7505_v13 = vadd.f32 %v7504_v55, %v7429_v45  ;;  %8354 = vmatpush.bf16.msrb.mxu3 %v11507_v62 }
 0x6fd   :  { %v7766_v47 = vadd.f32 %v7757_v2, %v7650_v32  ;;  %v7977_v32 = vld [vmem:[#allocation2 + $0x8] sm:$0x3] }
 0x702   :  { %v7899_v59 = vpop.f32.mrf.mxu0  ;;  %v7644_v53 = vpop.f32.mrf.mxu2 }
 0x703   :  { %v7909_v39 = vadd.f32 %v7899_v59, %v7765_v0  ;;  %v7651_v10 = vadd.f32 %v7644_v53, %v7505_v13  ;;  %v7506_v41 = vpop.f32.mrf.mxu1  ;;  %v11490_v59 = vld [vmem:[#allocation12 + $0x180] sm:$0xff] }
 0x704   :  { %v7507_v56 = vadd.f32 %v7506_v41, %v13322_v12  ;;  %v7762_v12 = vpop.f32.mrf.mxu3  ;;  %8243 = vmatpush.bf16.msrb.mxu2 %v11490_v59 }
 0x705   :  { %v7918_v11 = vadd.f32 %v13324_v15, %v7909_v39  ;;  %v7767_v45 = vadd.f32 %v7760_v43, %v7651_v10  ;;  %v11506_v39 = vld [vmem:[#allocation12 + $0x200] sm:$0xff] }
 0x706   :  { %8355 = vmatpush.bf16.msrb.mxu3 %v11506_v39 }
 0x707   :  { %v7922_v16 = vmax.f32 %v7918_v11, 0.0 }
 0x709   :  { %v7926_v50 = vpack.c.bf16 %v7922_v16, %v7922_v16  ;;  %v11498_v16 = vld [vmem:[#allocation12 + $0x1c0] sm:$0xff] }
 0x70a   :  { %v7901_v60 = vpop.f32.mrf.mxu0  ;;  %v7646_v54 = vpop.f32.mrf.mxu2  ;;  %8168 = vmatpush.bf16.msrb.mxu1 %v11498_v16 }
 0x70b   :  { %v7931_v8 = vshrl.u32 %v7926_v50, 16  ;;  %v7934_v31 = vshll.u32 %v7926_v50, 16  ;;  %v7910_v25 = vadd.f32 %v7901_v60, %v7766_v47  ;;  %v7652_v58 = vadd.f32 %v7646_v54, %v7507_v56 }
 0x70d   :  { %v7933_v37 = vrot.slane %v7931_v8, 6  ;;  %v7936_v48 = vrot.slane %v7934_v31, 7  ;;  %v7919_v30 = vadd.f32 %v13324_v15, %v7910_v25  ;;  %v7768_v55 = vadd.f32 %v7762_v12, %v7652_v58 }
 0x70f   :  { %v7937_v3 = vor.u32 %v7936_v48, %v7933_v37  ;;  %v7923_v38 = vmax.f32 %v7919_v30, 0.0  ;;  %v7980_v30 = vld [vmem:[#allocation2 + $0xc] sm:$0xe] }
 0x711   :  { %v7974_v5 = vsel %vm11912_vm5, %v7937_v3, %v13229_v6  ;;  %v7927_v28 = vpack.c.bf16 %v7923_v38, %v7923_v38  ;;  %v7938_v24 = vrot.slane %v7937_v3, 4 }
 0x712   :  { %7975 = vst [vmem:[#allocation2] sm:$0xe] %v7974_v5  ;;  %v7904_v29 = vpop.f32.mrf.mxu0 }
 0x713   :  { %v7940_v21 = vshrl.u32 %v7927_v28, 16  ;;  %v7943_v44 = vshll.u32 %v7927_v28, 16  ;;  %v7911_v51 = vadd.f32 %v7904_v29, %v7767_v45 }
 0x715   :  { %v7942_v1 = vrot.slane %v7940_v21, 6  ;;  %v7945_v0 = vrot.slane %v7943_v44, 7  ;;  %v7920_v6 = vadd.f32 %v13324_v15, %v7911_v51 }
 0x717   :  { %v7946_v35 = vor.u32 %v7945_v0, %v7942_v1  ;;  %v7924_v18 = vmax.f32 %v7920_v6, 0.0 }
 0x719   :  { %v7947_v2 = vsel %vm11922_vm7, %v7938_v24, %v7946_v35  ;;  %v7948_v17 = vrot.slane %v7946_v35, 4  ;;  %v7928_v11 = vpack.c.bf16 %v7924_v18, %v7924_v18  ;;  %v7987_v14 = vld [vmem:[#allocation2] sm:$0xe] }
 0x71a   :  { %7976 = vst [vmem:[#allocation2 + $0x4] sm:$0xf] %v7947_v2  ;;  %v7906_v33 = vpop.f32.mrf.mxu0  ;;  %v8033_v53 = vshrl.u32 %v7987_v14, 16  ;;  %v8036_v50 = vshll.u32 %v7987_v14, 16  ;;  %v8255_v26 = vld [vmem:[#allocation2] sm:$0xc] }
 0x71b   :  { %v7978_v47 = vsel %vm11908_vm4, %v7948_v17, %v7977_v32  ;;  %v7950_v60 = vshrl.u32 %v7928_v11, 16  ;;  %v7953_v13 = vshll.u32 %v7928_v11, 16  ;;  %v7912_v8 = vadd.f32 %v7906_v33, %v7768_v55  ;;  %v7984_v55 = vld [vmem:[#allocation2 + $0x14] sm:$0x3] }
 0x71c   :  { %7979 = vst [vmem:[#allocation2 + $0x8] sm:$0x3] %v7978_v47  ;;  %v8035_v37 = vrot.slane %v8033_v53, 5  ;;  %v8038_v48 = vrot.slane %v8036_v50, 6  ;;  %v10800_v3 = vrot.slane %v7987_v14, 9  ;;  %v10866_v38 = vrot.slane %v8255_v26, 10 }
 0x71d   :  { %v7952_v31 = vrot.slane %v7950_v60, 6  ;;  %v7955_v25 = vrot.slane %v7953_v13, 7  ;;  %v7921_v27 = vadd.f32 %v13324_v15, %v7912_v8 }
 0x71e   :  { %v8039_v22 = vor.u32 %v8038_v48, %v8035_v37 }
 0x71f   :  { %v7956_v4 = vor.u32 %v7955_v25, %v7952_v31  ;;  %v7925_v10 = vmax.f32 %v7921_v27, 0.0 }
 0x720   :  { %v8040_v2 = vrot.slane %v8039_v22, 4 }
 0x721   :  { %v7981_v43 = vsel %vm11912_vm5, %v7956_v4, %v7980_v30  ;;  %v7929_v36 = vpack.c.bf16 %v7925_v10, %v7925_v10  ;;  %v7988_v63 = vld [vmem:[#allocation2 + $0x4] sm:$0xf]  ;;  %v7957_v34 = vrot.slane %v7956_v4, 4  ;;  %vm8437_vm5 = vcmask 1041409  }
 0x722   :  { %7982 = vst [vmem:[#allocation2 + $0xc] sm:$0xe] %v7981_v43  ;;  %v8001_v42 = vrot.slane %v7988_v63, 5  ;;  %v8263_v41 = vrot.slane %v7988_v63, 6  ;;  %v8042_v5 = vshrl.u32 %v7988_v63, 16  ;;  %v8045_v28 = vshll.u32 %v7988_v63, 16 }
 0x723   :  { %v7959_v15 = vshrl.u32 %v7929_v36, 16  ;;  %v7962_v45 = vshll.u32 %v7929_v36, 16  ;;  %v7989_v54 = vld [vmem:[#allocation2 + $0x8] sm:$0x1] }
 0x724   :  { %v8030_v29 = vld [vmem:[#allocation2 + $0x8] sm:$0x3]  ;;  %v8002_v56 = vsel %vm12044_vm1, %v10800_v3, %v8001_v42  ;;  %v8003_v23 = vrot.slane %v8001_v42, 4  ;;  %v8004_v21 = vrot.slane %v7989_v54, 5  ;;  %v8264_v62 = vsel %vm12123_vm3, %v10866_v38, %v8263_v41 }
 0x725   :  { %v7961_v44 = vrot.slane %v7959_v15, 6  ;;  %v7964_v51 = vrot.slane %v7962_v45, 7  ;;  %v8265_v58 = vrot.slane %v8263_v41, 4  ;;  %v8180_v0 = vunpack.c.l.b16 %v8002_v56 }
 0x726   :  { %v8005_v1 = vsel %vm12044_vm1, %v8003_v23, %v8004_v21  ;;  %v8266_v6 = vrot.slane %v8030_v29, 6  ;;  %v8044_v59 = vrot.slane %v8042_v5, 5  ;;  %v8047_v35 = vrot.slane %v8045_v28, 6 }
 0x727   :  { %v7965_v61 = vor.u32 %v7964_v51, %v7961_v44  ;;  %v8181_v24 = vunpack.c.l.b16 %v8005_v1  ;;  %v8052_v18 = vshrl.u32 %v8030_v29, 16  ;;  %v8292_v12 = vunpack.c.l.b16 %v8264_v62 }
 0x728   :  { %v8267_v39 = vsel %vm12123_vm3, %v8265_v58, %v8266_v6  ;;  %v8055_v17 = vshll.u32 %v8030_v29, 16  ;;  %v8048_v16 = vor.u32 %v8047_v35, %v8044_v59 }
 0x729   :  { %v7966_v32 = vsel %vm11922_vm7, %v7957_v34, %v7965_v61  ;;  %v7967_v11 = vrot.slane %v7965_v61, 4  ;;  %v8184_v14 = vpack.c.b16 %v8181_v24, %v8180_v0  ;;  %v8293_v33 = vunpack.c.l.b16 %v8267_v39  ;;  %v7990_v47 = vld [vmem:[#allocation2 + $0xc] sm:$0xe] }
 0x72a   :  { %7983 = vst [vmem:[#allocation2 + $0x10] sm:$0xf] %v7966_v32  ;;  %v8054_v53 = vrot.slane %v8052_v18, 5  ;;  %v8057_v50 = vrot.slane %v8055_v17, 6  ;;  %v8049_v8 = vsel %vm12022_vm15, %v8040_v2, %v8048_v16  ;;  %v8050_v52 = vrot.slane %v8048_v16, 4 }
 0x72b   :  { %v7985_v60 = vsel %vm11908_vm4, %v7967_v11, %v7984_v55  ;;  %8244 = vmatmul.bf16.vlgmr.msrb.gmra.mxu2 %v8184_v14  ;;  %v8296_v13 = vpack.c.b16 %v8293_v33, %v8292_v12  ;;  %v8061_v25 = vshrl.u32 %v7990_v47, 16  ;;  %v8064_v27 = vshll.u32 %v7990_v47, 16  ;;  %v8256_v37 = vld [vmem:[#allocation2 + $0xc] sm:$0xc] }
 0x72c   :  { %7986 = vst [vmem:[#allocation2 + $0x14] sm:$0x3] %v7985_v60  ;;  %v8058_v31 = vor.u32 %v8057_v50, %v8054_v53  ;;  %v8105_v4 = vunpack.c.l.b16 %v8049_v8  ;;  %v10801_v36 = vrot.slane %v7990_v47, 9  ;;  %v10867_v5 = vrot.slane %v8256_v37, 10  ;;  %v11546_v47 = vld [vmem:[#allocation14 + $0x2] ss:$0 sm:$0xff] }
 0x72d   :  { %8356 = vmatmul.bf16.vlgmr.msrb.gmra.mxu3 %v8296_v13  ;;  %v8063_v30 = vrot.slane %v8061_v25, 5  ;;  %v8066_v43 = vrot.slane %v8064_v27, 6 }
 0x72e   :  { %v8059_v26 = vsel %vm12022_vm15, %v8050_v52, %v8058_v31 }
 0x72f   :  { %v8106_v10 = vunpack.c.l.b16 %v8059_v26  ;;  %v8067_v56 = vor.u32 %v8066_v43, %v8063_v30  ;;  %v11827_v30 = vmov 16.0  }
 0x730   :  { %11548 = vrcp.f32 %v11827_v30 }
 0x731   :  { %v8109_v48 = vpack.c.b16 %v8106_v10, %v8105_v4  ;;  %v7991_v20 = vld [vmem:[#allocation2 + $0x10] sm:$0xf]  ;;  %v8068_v18 = vrot.slane %v8067_v56, 4 }
 0x732   :  { %v8008_v63 = vrot.slane %v7991_v20, 5  ;;  %v8270_v3 = vrot.slane %v7991_v20, 6  ;;  %v8070_v38 = vshrl.u32 %v7991_v20, 16  ;;  %v8073_v28 = vshll.u32 %v7991_v20, 16 }
 0x733   :  { %8169 = vmatmul.bf16.vlgmr.msrb.gmra.mxu1 %v8109_v48  ;;  %v7992_v42 = vld [vmem:[#allocation2 + $0x14] sm:$0x1] }
 0x734   :  { %v8031_v41 = vld [vmem:[#allocation2 + $0x14] sm:$0x3]  ;;  %v8009_v15 = vsel %vm12044_vm1, %v10801_v36, %v8008_v63  ;;  %v8010_v45 = vrot.slane %v8008_v63, 4  ;;  %v8011_v54 = vrot.slane %v7992_v42, 5  ;;  %v8271_v29 = vsel %vm12123_vm3, %v10867_v5, %v8270_v3  ;;  %v11520_v5 = vld [vmem:[#allocation15 + $0x30] sm:$0xff] }
 0x735   :  { %v8272_v22 = vrot.slane %v8270_v3, 4  ;;  %v8273_v34 = vrot.slane %v8031_v41, 6  ;;  %v8072_v21 = vrot.slane %v8070_v38, 5  ;;  %v8075_v44 = vrot.slane %v8073_v28, 6  ;;  %v11521_v38 = vld [vmem:[#allocation15 + $0x38] sm:$0xff] }
 0x736   :  { %v8012_v23 = vsel %vm12044_vm1, %v8010_v45, %v8011_v54  ;;  %v8080_v51 = vshrl.u32 %v8031_v41, 16  ;;  %v8182_v62 = vunpack.c.l.b16 %v8009_v15  ;;  %v8083_v0 = vshll.u32 %v8031_v41, 16  ;;  %v11549_v41 = vpop.eup %11548  ;;  %8489 = vmatpush.bf16.msra.mxu0 %v11521_v38 }
 0x737   :  { %v8183_v58 = vunpack.c.l.b16 %v8012_v23  ;;  %v8274_v1 = vsel %vm12123_vm3, %v8272_v22, %v8273_v34  ;;  %v8294_v6 = vunpack.c.l.b16 %v8271_v29  ;;  %v8076_v61 = vor.u32 %v8075_v44, %v8072_v21  ;;  %v11519_v22 = vld [vmem:[#allocation15 + $0x28] sm:$0xff] }
 0x738   :  { %v8295_v59 = vunpack.c.l.b16 %v8274_v1  ;;  %v8082_v24 = vrot.slane %v8080_v51, 5  ;;  %v8085_v39 = vrot.slane %v8083_v0, 6  ;;  %v11518_v51 = vld [vmem:[#allocation15 + $0x20] sm:$0xff]  ;;  %vm8407_vm4 = vweird.f32 %v11549_v41 }
 0x739   :  { %v8185_v35 = vpack.c.b16 %v8183_v58, %v8182_v62  ;;  %v8078_v2 = vrot.slane %v8076_v61, 4  ;;  %v8077_v9 = vsel %vm12022_vm15, %v8068_v18, %v8076_v61 }
 0x73a   :  { %v8297_v12 = vpack.c.b16 %v8295_v59, %v8294_v6  ;;  %v8086_v17 = vor.u32 %v8085_v39, %v8082_v24  ;;  %v8107_v32 = vunpack.c.l.b16 %v8077_v9  ;;  %8490 = vmatpush.bf16.msra.mxu0 %v11520_v5  ;;  %v11517_v59 = vld [vmem:[#allocation15 + $0x18] sm:$0xff]  ;;  %v11515_v9 = vld [vmem:[#allocation15 + $0x8] sm:$0xff] }
 0x73b   :  { %8249 = vmatmul.bf16.gmra.mxu2 %v8185_v35 }
 0x73c   :  { %v8087_v19 = vsel %vm12022_vm15, %v8078_v2, %v8086_v17 }
 0x73d   :  { %8361 = vmatmul.bf16.gmra.mxu3 %v8297_v12  ;;  %v8108_v11 = vunpack.c.l.b16 %v8087_v19 }
 0x73e   :  { %8491 = vmatpush.bf16.msra.mxu0 %v11519_v22 }
 0x73f   :  { %v8110_v55 = vpack.c.b16 %v8108_v11, %v8107_v32  ;;  %v11514_v11 = vld [vmem:[#allocation15] sm:$0xff] }
 0x742   :  { %8492 = vmatpush.bf16.msra.mxu0 %v11518_v51 }
 0x743   :  { %8174 = vmatmul.bf16.gmra.mxu1 %v8110_v55 }
 0x746   :  { %8493 = vmatpush.bf16.msra.mxu0 %v11517_v59 }
 0x7ae   :  { %v8245_v14 = vpop.f32.mrf.mxu2 }
 0x7b0   :  { %v8170_v33 = vpop.f32.mrf.mxu1  ;;  %v8357_v16 = vpop.f32.mrf.mxu3 }
 0x7b1   :  { %v8246_v53 = vadd.f32 %v8245_v14, %v8170_v33 }
 0x7b3   :  { %v8367_v50 = vadd.f32 %v8357_v16, %v8246_v53 }
 0x7b5   :  { %v8376_v52 = vadd.f32 %v11546_v47, %v8367_v50 }
 0x7b6   :  { %v8247_v60 = vpop.f32.mrf.mxu2 }
 0x7b7   :  { %v8380_v27 = vadd.f32 %v8376_v52, %v13203_v57 }
 0x7b8   :  { %v8172_v13 = vpop.f32.mrf.mxu1  ;;  %v8359_v8 = vpop.f32.mrf.mxu3 }
 0x7b9   :  { %v8248_v31 = vadd.f32 %v8247_v60, %v8172_v13  ;;  %v8384_v48 = vmax.f32 %v8380_v27, 0.0  ;;  %v11547_v60 = vld [vmem:[#allocation17] ss:$0 sm:$0xff] }
 0x7bb   :  { %v8368_v25 = vadd.f32 %v8359_v8, %v8248_v31 }
 0x7bd   :  { %v8377_v40 = vadd.f32 %v11546_v47, %v8368_v25 }
 0x7be   :  { %v8250_v26 = vpop.f32.mrf.mxu2 }
 0x7bf   :  { %v8381_v4 = vadd.f32 %v8377_v40, %v13214_v7  ;;  %v8403_v7 = vmul.f32 16.0, %v11549_v41 }
 0x7c0   :  { %v8175_v10 = vpop.f32.mrf.mxu1  ;;  %v8362_v37 = vpop.f32.mrf.mxu3 }
 0x7c1   :  { %v8385_v20 = vmax.f32 %v8381_v4, 0.0  ;;  %v8251_v43 = vadd.f32 %v8250_v26, %v8175_v10  ;;  %v8404_v21 = vsub.f32 1.0, %v8403_v7 }
 0x7c3   :  { %v8388_v36 = vadd.f32 %v8385_v20, %v8384_v48  ;;  %v8369_v3 = vadd.f32 %v8362_v37, %v8251_v43  ;;  %v8405_v0 = vmul.f32 %v11549_v41, %v8404_v21 }
 0x7c5   :  { %v8389_v63 = vrot.slane %v8388_v36, 4  ;;  %v8378_v15 = vadd.f32 %v11546_v47, %v8369_v3  ;;  %v8406_v35 = vadd.f32 %v11549_v41, %v8405_v0 }
 0x7c6   :  { %v8252_v42 = vpop.f32.mrf.mxu2 }
 0x7c7   :  { %v8390_v28 = vadd.f32 %v8389_v63, %v8388_v36  ;;  %v8382_v56 = vadd.f32 %v8378_v15, %v13224_v46  ;;  %v11516_v46 = vld [vmem:[#allocation15 + $0x10] sm:$0xff]  ;;  %v8408_v2 = vsel %vm8407_vm4, %v11549_v41, %v8406_v35 }
 0x7c8   :  { %v8177_v57 = vpop.f32.mrf.mxu1  ;;  %v8364_v54 = vpop.f32.mrf.mxu3  ;;  %8494 = vmatpush.bf16.msra.mxu0 %v11516_v46 }
 0x7c9   :  { %v8253_v45 = vadd.f32 %v8252_v42, %v8177_v57  ;;  %v8391_v34 = vrot.slane %v8390_v28, 2  ;;  %v8386_v58 = vmax.f32 %v8382_v56, 0.0 }
 0x7cb   :  { %v8370_v29 = vadd.f32 %v8364_v54, %v8253_v45  ;;  %v8392_v62 = vadd.f32 %v8391_v34, %v8390_v28 }
 0x7cc   :  { %8495 = vmatpush.bf16.msra.mxu0 %v11515_v9 }
 0x7cd   :  { %v8379_v23 = vadd.f32 %v11546_v47, %v8370_v29  ;;  %v8393_v61 = vrot.slane %v8392_v62, 1 }
 0x7cf   :  { %v8383_v44 = vadd.f32 %v8379_v23, %v13238_v49  ;;  %v8394_v39 = vadd.f32 %v8393_v61, %v8392_v62 }
 0x7d0   :  { %8496 = vmatpush.bf16.msra.mxu0 %v11514_v11 }
 0x7d1   :  { %v8387_v1 = vmax.f32 %v8383_v44, 0.0  ;;  %v8409_v17 = vmul.f32 %v8408_v2, %v8394_v39 }
 0x7d3   :  { %v8395_v6 = vadd.f32 %v8387_v1, %v8386_v58  ;;  %v8411_v55 = vpack.c.bf16 %v8409_v17, %v8409_v17 }
 0x7d5   :  { %v8396_v24 = vrot.slane %v8395_v6, 4  ;;  %v8435_v16 = vunpack.c.l.b16 %v8411_v55 }
 0x7d7   :  { %v8397_v18 = vadd.f32 %v8396_v24, %v8395_v6 }
 0x7d9   :  { %v8398_v12 = vrot.slane %v8397_v18, 2 }
 0x7db   :  { %v8399_v49 = vadd.f32 %v8398_v12, %v8397_v18 }
 0x7dd   :  { %v8400_v19 = vrot.slane %v8399_v49, 1 }
 0x7df   :  { %v8401_v32 = vadd.f32 %v8400_v19, %v8399_v49 }
 0x7e1   :  { %v8410_v14 = vmul.f32 %v8408_v2, %v8401_v32 }
 0x7e3   :  { %v8412_v33 = vpack.c.bf16 %v8410_v14, %v8410_v14 }
 0x7e5   :  { %v8436_v53 = vunpack.c.l.b16 %v8412_v33 }
 0x7e7   :  { %v8438_v50 = vsel %vm8437_vm5, %v8436_v53, %v8435_v16 }
 0x7e8   :  { %v8439_v47 = vpack.c.b16 %v8438_v50, %v8438_v50 }
 0x7ea   :  { %8497 = vmatmul.bf16.vlgmr.msra.gmra.mxu0 %v8439_v47 }
 0x867   :  { %v8498_v13 = vpop.f32.mrf.mxu0 }
 0x868   :  { %v8499_v8 = vadd.f32 %v11547_v60, %v8498_v13 }
 0x86a   :  { %8502 = vst [vmem:[#allocation18] sm:$0x3] %v8499_v8 }
 0x86b   :  { %8513 = dma.vmem_to_hbm [thread:$0]  %s8509_s8, 32, %s8511_s12, [#allocation5]  }
 0x86f   :  { %v8500_v52 = vpop.f32.mrf.mxu0 }
 0x870   :  { %11808 = dma.done.wait [#allocation5], 32  }
 0x871   :  { %11809 = vsyncadd [#allocation5], 4294967264 }
 0x872   :  { %8518 = vsyncpa [#allocation4], 1 }
 0x873   :  { %8519 = vsyncpa [#allocation7], 1 }
 0x874   :  { %8520 = vsyncpa [#allocation10], 1 }
 0x875   :  { %8521 = vsyncpa [#allocation13], 1 }
 0x876   :  { %8522 = vsyncpa [#allocation16], 1 }
 0x877   :  { %8523 = vsyncpa [#allocation5], 1 }

</bundles_post_ra>
